<compile_context>
chip_gen: v7x
topology: tpu7x:2x2x1
jax: 0.10.0
libtpu: 0.0.40
codegen_flags: <defaults>
</compile_context>

<pallas_src>
import jax
import jax.numpy as jnp
from jax.experimental import pallas as pl
from jax.experimental.pallas import tpu as pltpu

VMEM = pltpu.MemorySpace.VMEM

HEADS = 8
OUT_CH = 16
HID = HEADS * OUT_CH      # 128
N_LAYERS = 4
BN_EPS = 1e-5


# ----------------------------------------------------------------------------
# Single fused kernel: the entire forward pass, everything resident in VMEM.
# Ref order: x, mask3, expander, pool_mat, global_feats, embed_w, embed_b,
#            [wlr, blr, att_sel, scale, shift] x 4 layers,
#            fc1_w_node, fc1_w_glob, fc1_b, fc2_w, fc2_b, fc3_w, fc3_b, out.
# ----------------------------------------------------------------------------
def fused_forward_kernel(*refs):
    (x_ref, mask_ref, exp_ref, pool_ref, gf_ref, ew_ref, eb_ref) = refs[:7]
    layer_refs = refs[7:7 + 5 * N_LAYERS]
    (f1n_ref, f1g_ref, f1b_ref, f2w_ref, f2b_ref, f3w_ref, f3b_ref) = \
        refs[7 + 5 * N_LAYERS:-1]
    o_ref = refs[-1]

    n = x_ref.shape[0]
    mask = mask_ref[...]        # [n, n, H] adjacency incl. self-loops, {0,1}
    expander = exp_ref[...]     # [H, HID]  expander[h, h'*C+c] = (h == h')

    # node_embed: Linear(2, 64) + ReLU   (Dropout(0.15) = identity in eval)
    h = jnp.dot(x_ref[...], ew_ref[...],
                preferred_element_type=jnp.float32) + eb_ref[...]
    h = jnp.maximum(h, 0.0)

    for l in range(N_LAYERS):
        wlr_ref, blr_ref, att_ref, scale_ref, shift_ref = layer_refs[5 * l:5 * l + 5]

        # Fused lin_l | lin_r : [n, in] @ [in, 2*HID]  (one wide MXU matmul).
        xlr = jnp.dot(h, wlr_ref[...],
                      preferred_element_type=jnp.float32) + blr_ref[...]
        xl = xlr[:, :HID]       # lin_l(x): source / message features
        xr = xlr[:, HID:]       # lin_r(x): target features

        # Lane-dense pairwise tensor: row (i*n + j) holds xr[i] + xl[j].
        xr_rep = jnp.broadcast_to(xr[:, None, :], (n, n, HID)).reshape(n * n, HID)
        xl_rep = jnp.broadcast_to(xl[None, :, :], (n, n, HID)).reshape(n * n, HID)
        s = xr_rep + xl_rep
        s = jnp.where(s > 0.0, s, 0.2 * s)                  # LeakyReLU(0.2)

        # Per-head attention logits on the MXU: [n*n, HID] @ [HID, H].
        e = jnp.dot(s, att_ref[...], preferred_element_type=jnp.float32)
        e3 = e.reshape(n, n, HEADS)                         # [tgt, src, head]

        # Masked softmax over sources.  Max over all sources is a valid
        # (shift-invariant) stabiliser; mask applied exactly once after exp.
        m = jnp.max(e3, axis=1, keepdims=True)              # [n, 1, H]
        p = jnp.exp(e3 - m) * mask                          # zero non-edges
        denom = jnp.maximum(jnp.sum(p, axis=1, keepdims=True), 1e-16)
        alpha = (p / denom).reshape(n * n, HEADS)           # [n*n, H]

        # Expand per-head alpha to per-channel (block-diagonal) on the MXU,
        # weight the lin_l messages, reduce over sources -> lane-dense [n,128].
        alpha_w = jnp.dot(alpha, expander,
                          preferred_element_type=jnp.float32)   # [n*n, HID]
        msgs = alpha_w * xl_rep                                  # [n*n, HID]
        agg = jnp.sum(msgs.reshape(n, n, HID), axis=1)           # [n,   HID]

        # Epilogue: GAT bias + eval BatchNorm folded into scale/shift,
        # residual for layers 2..4 only (static flag), ReLU.
        y = agg * scale_ref[...] + shift_ref[...]
        if l > 0:
            y = y + h
        h = jnp.maximum(y, 0.0)

    # Dropout(0.25) = identity in eval; global_mean_pool as a pooling matmul.
    pooled = jnp.dot(pool_ref[...], h, preferred_element_type=jnp.float32)

    # fc head.  concat([pooled, global_feats]) @ W1 is computed as two partial
    # matmuls to stay lane-aligned (no in-kernel concatenate needed).
    z = (jnp.dot(pooled, f1n_ref[...], preferred_element_type=jnp.float32)
         + jnp.dot(gf_ref[...], f1g_ref[...], preferred_element_type=jnp.float32)
         + f1b_ref[...])
    z = jnp.maximum(z, 0.0)                                  # Dropout(0.3) = id
    z = jnp.dot(z, f2w_ref[...], preferred_element_type=jnp.float32) + f2b_ref[...]
    z = jnp.maximum(z, 0.0)
    z = jnp.dot(z, f3w_ref[...], preferred_element_type=jnp.float32) + f3b_ref[...]
    o_ref[...] = z


# ----------------------------------------------------------------------------
# Host-side wrapper: folds parameters (lin_l|lin_r concat, BN scale/shift with
# GAT bias, per-head selector matrices) and launches ONE pallas_call.
# ----------------------------------------------------------------------------
def forward(params, x, adj, pool_mat, global_feats):
    n = x.shape[0]
    g = pool_mat.shape[0]

    mask3 = jnp.broadcast_to(adj.astype(jnp.float32)[:, :, None], (n, n, HEADS))
    expander = jnp.repeat(jnp.eye(HEADS, dtype=jnp.float32), OUT_CH, axis=1)
    eye_h = jnp.eye(HEADS, dtype=jnp.float32)

    inputs = [x.astype(jnp.float32), mask3, expander,
              pool_mat.astype(jnp.float32), global_feats.astype(jnp.float32),
              params["embed_w"], params["embed_b"].reshape(1, -1)]
    for p in params["gat"]:
        wlr = jnp.concatenate([p["wl"], p["wr"]], axis=1)        # [in, 2*HID]
        blr = jnp.concatenate([p["bl"], p["br"]]).reshape(1, -1)
        # att_sel[h*C + c, h'] = att[h, c] if h == h' else 0
        att_sel = (p["att"][:, :, None] * eye_h[:, None, :]).reshape(HID, HEADS)
        scale = p["bn_gamma"] / jnp.sqrt(p["bn_var"] + BN_EPS)
        shift = (p["bias"] - p["bn_mean"]) * scale + p["bn_beta"]
        inputs += [wlr, blr, att_sel, scale.reshape(1, -1), shift.reshape(1, -1)]
    inputs += [params["fc1_w"][:HID], params["fc1_w"][HID:],
               params["fc1_b"].reshape(1, -1),
               params["fc2_w"], params["fc2_b"].reshape(1, -1),
               params["fc3_w"], params["fc3_b"].reshape(1, -1)]

    return pl.pallas_call(
        fused_forward_kernel,
        out_shape=jax.ShapeDtypeStruct((g, 1), jnp.float32),
        in_specs=[pl.BlockSpec(memory_space=VMEM)] * len(inputs),
        out_specs=pl.BlockSpec(memory_space=VMEM),
    )(*inputs)


# ----------------------------------------------------------------------------
# Parameters (deterministic init; shapes follow the PyTorch module __init__).
# ----------------------------------------------------------------------------
def _glorot(key, shape):
    fan_in, fan_out = shape[0], shape[-1]
    lim = jnp.sqrt(6.0 / (fan_in + fan_out))
    return jax.random.uniform(key, shape, jnp.float32, -lim, lim)


def init_params(key, global_feat_dim):
    keys = jax.random.split(key, 32)
    ki = iter(keys)
    params = {
        "embed_w": _glorot(next(ki), (2, 64)),
        "embed_b": jnp.zeros((64,), jnp.float32),
        "gat": [],
        "fc1_w": _glorot(next(ki), (HID + global_feat_dim, 128)),
        "fc1_b": jnp.zeros((128,), jnp.float32),
        "fc2_w": _glorot(next(ki), (128, 64)),
        "fc2_b": jnp.zeros((64,), jnp.float32),
        "fc3_w": _glorot(next(ki), (64, 1)),
        "fc3_b": jnp.zeros((1,), jnp.float32),
    }
    in_dims = [64, HID, HID, HID]
    for l in range(N_LAYERS):
        params["gat"].append({
            "wl": _glorot(next(ki), (in_dims[l], HID)),
            "bl": jnp.zeros((HID,), jnp.float32),
            "wr": _glorot(next(ki), (in_dims[l], HID)),
            "br": jnp.zeros((HID,), jnp.float32),
            "att": _glorot(next(ki), (HEADS, OUT_CH)),
            "bias": jnp.zeros((HID,), jnp.float32),
            "bn_gamma": jnp.ones((HID,), jnp.float32),
            "bn_beta": jnp.zeros((HID,), jnp.float32),
            "bn_mean": jnp.zeros((HID,), jnp.float32),
            "bn_var": jnp.ones((HID,), jnp.float32),
        })
    return params


# ----------------------------------------------------------------------------
# Plain-JAX reference (mirrors the PyTorch module in eval mode) for checking.
# ----------------------------------------------------------------------------
def reference_forward(params, x, adj, pool_mat, global_feats):
    h = jax.nn.relu(x @ params["embed_w"] + params["embed_b"])
    for l, p in enumerate(params["gat"]):
        xl = (h @ p["wl"] + p["bl"]).reshape(-1, HEADS, OUT_CH)
        xr = (h @ p["wr"] + p["br"]).reshape(-1, HEADS, OUT_CH)
        s = xr[:, None, :, :] + xl[None, :, :, :]          # [tgt, src, H, C]
        s = jnp.where(s > 0, s, 0.2 * s)
        e = jnp.einsum("ijhc,hc->ijh", s, p["att"])
        e = jnp.where(adj[:, :, None] > 0, e, -1e30)
        alpha = jax.nn.softmax(e, axis=1) * adj[:, :, None]
        out = jnp.einsum("ijh,jhc->ihc", alpha, xl).reshape(-1, HID) + p["bias"]
        scale = p["bn_gamma"] / jnp.sqrt(p["bn_var"] + BN_EPS)
        out = (out - p["bn_mean"]) * scale + p["bn_beta"]
        h = jax.nn.relu(out if l == 0 else out + h)
    pooled = pool_mat @ h
    z = jnp.concatenate([pooled, global_feats], axis=1)
    z = jax.nn.relu(z @ params["fc1_w"] + params["fc1_b"])
    z = jax.nn.relu(z @ params["fc2_w"] + params["fc2_b"])
    return z @ params["fc3_w"] + params["fc3_b"]


# ----------------------------------------------------------------------------
# Example inputs / driver
# ----------------------------------------------------------------------------
if __name__ == "__main__":
    key = jax.random.PRNGKey(0)
    k_x, k_gf, k_p = jax.random.split(key, 3)

    num_graphs = 2
    nodes_per_graph = 8
    n_nodes = num_graphs * nodes_per_graph          # 16
    global_feat_dim = 4

    # Node features: 2 per node (nn.Linear(2, 64)).
    x = jax.random.normal(k_x, (n_nodes, 2), jnp.float32)

    # Deterministic edge_index: bidirectional ring + one chord per graph.
    edges = []
    for gidx in range(num_graphs):
        base = gidx * nodes_per_graph
        for i in range(nodes_per_graph):
            j = (i + 1) % nodes_per_graph
            edges.append((base + i, base + j))
            edges.append((base + j, base + i))
        edges.append((base + 0, base + 4))
        edges.append((base + 4, base + 0))
    edge_index = jnp.asarray(edges, dtype=jnp.int32).T          # [2, E]

    # Dense adjacency [target, source] with self-loops (GATv2Conv default).
    adj = jnp.zeros((n_nodes, n_nodes), jnp.float32)
    adj = adj.at[edge_index[1], edge_index[0]].set(1.0)
    adj = adj.at[jnp.arange(n_nodes), jnp.arange(n_nodes)].set(1.0)

    # global_mean_pool as a [num_graphs, n_nodes] averaging matrix.
    batch = jnp.concatenate([jnp.full((nodes_per_graph,), gidx, jnp.int32)
                             for gidx in range(num_graphs)])
    one_hot = jax.nn.one_hot(batch, num_graphs, dtype=jnp.float32)   # [N, G]
    counts = jnp.sum(one_hot, axis=0)                                # [G]
    pool_mat = (one_hot / counts[None, :]).T                         # [G, N]

    global_feats = jax.random.normal(k_gf, (num_graphs, global_feat_dim),
                                     jnp.float32)

    params = init_params(k_p, global_feat_dim)

    out = jax.jit(forward)(params, x, adj, pool_mat, global_feats)
    out = jax.block_until_ready(out)
    assert out.shape == (num_graphs, 1)

    # Sanity-check against the plain-JAX reference (loose tol: matmul
    # precision differs between XLA and the in-kernel MXU path).
    ref = reference_forward(params, x, adj, pool_mat, global_feats)
    err = float(jnp.max(jnp.abs(out - ref)))
    tol = 0.05 * (1.0 + float(jnp.max(jnp.abs(ref))))
    assert err < tol, f"kernel/reference mismatch: max err {err:.3e} (tol {tol:.3e})"

    print("KERNEL_OK")
</pallas_src>

<mosaic_0001>
module attributes {stable_mosaic.version = 11 : i64} {
  func.func @fused_forward_kernel(%arg0: memref<16x2xf32, #tpu.memory_space<vmem>>, %arg1: memref<16x16x8xf32, #tpu.memory_space<vmem>>, %arg2: memref<8x128xf32, #tpu.memory_space<vmem>>, %arg3: memref<2x16xf32, #tpu.memory_space<vmem>>, %arg4: memref<2x4xf32, #tpu.memory_space<vmem>>, %arg5: memref<2x64xf32, #tpu.memory_space<vmem>>, %arg6: memref<1x64xf32, #tpu.memory_space<vmem>>, %arg7: memref<64x256xf32, #tpu.memory_space<vmem>>, %arg8: memref<1x256xf32, #tpu.memory_space<vmem>>, %arg9: memref<128x8xf32, #tpu.memory_space<vmem>>, %arg10: memref<1x128xf32, #tpu.memory_space<vmem>>, %arg11: memref<1x128xf32, #tpu.memory_space<vmem>>, %arg12: memref<128x256xf32, #tpu.memory_space<vmem>>, %arg13: memref<1x256xf32, #tpu.memory_space<vmem>>, %arg14: memref<128x8xf32, #tpu.memory_space<vmem>>, %arg15: memref<1x128xf32, #tpu.memory_space<vmem>>, %arg16: memref<1x128xf32, #tpu.memory_space<vmem>>, %arg17: memref<128x256xf32, #tpu.memory_space<vmem>>, %arg18: memref<1x256xf32, #tpu.memory_space<vmem>>, %arg19: memref<128x8xf32, #tpu.memory_space<vmem>>, %arg20: memref<1x128xf32, #tpu.memory_space<vmem>>, %arg21: memref<1x128xf32, #tpu.memory_space<vmem>>, %arg22: memref<128x256xf32, #tpu.memory_space<vmem>>, %arg23: memref<1x256xf32, #tpu.memory_space<vmem>>, %arg24: memref<128x8xf32, #tpu.memory_space<vmem>>, %arg25: memref<1x128xf32, #tpu.memory_space<vmem>>, %arg26: memref<1x128xf32, #tpu.memory_space<vmem>>, %arg27: memref<128x128xf32, #tpu.memory_space<vmem>>, %arg28: memref<4x128xf32, #tpu.memory_space<vmem>>, %arg29: memref<1x128xf32, #tpu.memory_space<vmem>>, %arg30: memref<128x64xf32, #tpu.memory_space<vmem>>, %arg31: memref<1x64xf32, #tpu.memory_space<vmem>>, %arg32: memref<64x1xf32, #tpu.memory_space<vmem>>, %arg33: memref<1x1xf32, #tpu.memory_space<vmem>>, %arg34: memref<2x1xf32, #tpu.memory_space<vmem>>) attributes {dimension_semantics = [], scalar_prefetch = 0 : i64, scratch_operands = 0 : i64, tpu.core_type = #tpu.core_type<tc>} {
    %c0 = arith.constant 0 : index
    %c0_0 = arith.constant 0 : index
    %c0_1 = arith.constant 0 : index
    %0 = vector.load %arg1[%c0, %c0_0, %c0_1] : memref<16x16x8xf32, #tpu.memory_space<vmem>>, vector<16x16x8xf32>
    %c0_2 = arith.constant 0 : index
    %c0_3 = arith.constant 0 : index
    %1 = vector.load %arg2[%c0_2, %c0_3] : memref<8x128xf32, #tpu.memory_space<vmem>>, vector<8x128xf32>
    %c0_4 = arith.constant 0 : index
    %c0_5 = arith.constant 0 : index
    %2 = vector.load %arg0[%c0_4, %c0_5] : memref<16x2xf32, #tpu.memory_space<vmem>>, vector<16x2xf32>
    %c0_6 = arith.constant 0 : index
    %c0_7 = arith.constant 0 : index
    %3 = vector.load %arg5[%c0_6, %c0_7] : memref<2x64xf32, #tpu.memory_space<vmem>>, vector<2x64xf32>
    %cst = arith.constant dense<0.000000e+00> : vector<16x64xf32>
    %4 = tpu.matmul %2, %3, %cst {dimension_numbers = #tpu.dot_dimension_numbers<[1], [0], [0], [1], [0, 0, 1, 1], [], []>} : vector<16x2xf32>, vector<2x64xf32>, vector<16x64xf32> -> vector<16x64xf32>
    %c0_8 = arith.constant 0 : index
    %c0_9 = arith.constant 0 : index
    %5 = vector.load %arg6[%c0_8, %c0_9] : memref<1x64xf32, #tpu.memory_space<vmem>>, vector<1x64xf32>
    %6 = vector.broadcast %5 : vector<1x64xf32> to vector<16x64xf32>
    %7 = arith.addf %4, %6 : vector<16x64xf32>
    %cst_10 = arith.constant 0.000000e+00 : f32
    %8 = vector.broadcast %cst_10 : f32 to vector<16x64xf32>
    %9 = arith.maximumf %7, %8 : vector<16x64xf32>
    %c0_11 = arith.constant 0 : index
    %c0_12 = arith.constant 0 : index
    %10 = vector.load %arg7[%c0_11, %c0_12] : memref<64x256xf32, #tpu.memory_space<vmem>>, vector<64x256xf32>
    %cst_13 = arith.constant dense<0.000000e+00> : vector<16x256xf32>
    %11 = tpu.matmul %9, %10, %cst_13 {dimension_numbers = #tpu.dot_dimension_numbers<[1], [0], [0], [1], [0, 0, 1, 1], [], []>} : vector<16x64xf32>, vector<64x256xf32>, vector<16x256xf32> -> vector<16x256xf32>
    %c0_14 = arith.constant 0 : index
    %c0_15 = arith.constant 0 : index
    %12 = vector.load %arg8[%c0_14, %c0_15] : memref<1x256xf32, #tpu.memory_space<vmem>>, vector<1x256xf32>
    %13 = vector.broadcast %12 : vector<1x256xf32> to vector<16x256xf32>
    %14 = arith.addf %11, %13 : vector<16x256xf32>
    %15 = vector.extract_strided_slice %14 {offsets = [0, 0], sizes = [16, 128], strides = [1, 1]} : vector<16x256xf32> to vector<16x128xf32>
    %16 = vector.extract_strided_slice %14 {offsets = [0, 128], sizes = [16, 128], strides = [1, 1]} : vector<16x256xf32> to vector<16x128xf32>
    %17 = vector.shape_cast %16 : vector<16x128xf32> to vector<16x1x128xf32>
    %18 = vector.shape_cast %17 : vector<16x1x128xf32> to vector<16x1x128xf32>
    %19 = vector.broadcast %18 : vector<16x1x128xf32> to vector<16x16x128xf32>
    %20 = vector.shape_cast %19 : vector<16x16x128xf32> to vector<256x128xf32>
    %21 = vector.shape_cast %15 : vector<16x128xf32> to vector<1x16x128xf32>
    %22 = vector.shape_cast %21 : vector<1x16x128xf32> to vector<1x16x128xf32>
    %23 = vector.broadcast %22 : vector<1x16x128xf32> to vector<16x16x128xf32>
    %24 = vector.shape_cast %23 : vector<16x16x128xf32> to vector<256x128xf32>
    %25 = arith.addf %20, %24 : vector<256x128xf32>
    %cst_16 = arith.constant 0.000000e+00 : f32
    %26 = vector.broadcast %cst_16 : f32 to vector<256x128xf32>
    %27 = arith.cmpf ogt, %25, %26 : vector<256x128xf32>
    %cst_17 = arith.constant 2.000000e-01 : f32
    %28 = vector.broadcast %cst_17 : f32 to vector<256x128xf32>
    %29 = arith.mulf %28, %25 : vector<256x128xf32>
    %30 = arith.select %27, %25, %29 : vector<256x128xi1>, vector<256x128xf32>
    %c0_18 = arith.constant 0 : index
    %c0_19 = arith.constant 0 : index
    %31 = vector.load %arg9[%c0_18, %c0_19] : memref<128x8xf32, #tpu.memory_space<vmem>>, vector<128x8xf32>
    %cst_20 = arith.constant dense<0.000000e+00> : vector<256x8xf32>
    %32 = tpu.matmul %30, %31, %cst_20 {dimension_numbers = #tpu.dot_dimension_numbers<[1], [0], [0], [1], [0, 0, 1, 1], [], []>} : vector<256x128xf32>, vector<128x8xf32>, vector<256x8xf32> -> vector<256x8xf32>
    %33 = vector.shape_cast %32 : vector<256x8xf32> to vector<16x16x8xf32>
    %cst_21 = arith.constant dense<0xFF800000> : vector<16x8xf32>
    %34 = vector.multi_reduction <maximumf>, %33, %cst_21 [1] : vector<16x16x8xf32> to vector<16x8xf32>
    %35 = vector.shape_cast %34 : vector<16x8xf32> to vector<16x1x8xf32>
    %36 = vector.broadcast %35 : vector<16x1x8xf32> to vector<16x16x8xf32>
    %37 = arith.subf %33, %36 : vector<16x16x8xf32>
    %38 = math.exp %37 : vector<16x16x8xf32>
    %39 = arith.mulf %38, %0 : vector<16x16x8xf32>
    %cst_22 = arith.constant dense<0.000000e+00> : vector<16x8xf32>
    %40 = vector.multi_reduction <add>, %39, %cst_22 [1] : vector<16x16x8xf32> to vector<16x8xf32>
    %41 = vector.shape_cast %40 : vector<16x8xf32> to vector<16x1x8xf32>
    %cst_23 = arith.constant 1.000000e-16 : f32
    %42 = vector.broadcast %cst_23 : f32 to vector<16x1x8xf32>
    %43 = arith.maximumf %41, %42 : vector<16x1x8xf32>
    %44 = vector.broadcast %43 : vector<16x1x8xf32> to vector<16x16x8xf32>
    %45 = arith.divf %39, %44 : vector<16x16x8xf32>
    %46 = vector.shape_cast %45 : vector<16x16x8xf32> to vector<256x8xf32>
    %cst_24 = arith.constant dense<0.000000e+00> : vector<256x128xf32>
    %47 = tpu.matmul %46, %1, %cst_24 {dimension_numbers = #tpu.dot_dimension_numbers<[1], [0], [0], [1], [0, 0, 1, 1], [], []>} : vector<256x8xf32>, vector<8x128xf32>, vector<256x128xf32> -> vector<256x128xf32>
    %48 = arith.mulf %47, %24 : vector<256x128xf32>
    %49 = vector.shape_cast %48 : vector<256x128xf32> to vector<16x16x128xf32>
    %cst_25 = arith.constant dense<0.000000e+00> : vector<16x128xf32>
    %50 = vector.multi_reduction <add>, %49, %cst_25 [1] : vector<16x16x128xf32> to vector<16x128xf32>
    %c0_26 = arith.constant 0 : index
    %c0_27 = arith.constant 0 : index
    %51 = vector.load %arg10[%c0_26, %c0_27] : memref<1x128xf32, #tpu.memory_space<vmem>>, vector<1x128xf32>
    %52 = vector.broadcast %51 : vector<1x128xf32> to vector<16x128xf32>
    %53 = arith.mulf %50, %52 : vector<16x128xf32>
    %c0_28 = arith.constant 0 : index
    %c0_29 = arith.constant 0 : index
    %54 = vector.load %arg11[%c0_28, %c0_29] : memref<1x128xf32, #tpu.memory_space<vmem>>, vector<1x128xf32>
    %55 = vector.broadcast %54 : vector<1x128xf32> to vector<16x128xf32>
    %56 = arith.addf %53, %55 : vector<16x128xf32>
    %cst_30 = arith.constant 0.000000e+00 : f32
    %57 = vector.broadcast %cst_30 : f32 to vector<16x128xf32>
    %58 = arith.maximumf %56, %57 : vector<16x128xf32>
    %c0_31 = arith.constant 0 : index
    %c0_32 = arith.constant 0 : index
    %59 = vector.load %arg12[%c0_31, %c0_32] : memref<128x256xf32, #tpu.memory_space<vmem>>, vector<128x256xf32>
    %cst_33 = arith.constant dense<0.000000e+00> : vector<16x256xf32>
    %60 = tpu.matmul %58, %59, %cst_33 {dimension_numbers = #tpu.dot_dimension_numbers<[1], [0], [0], [1], [0, 0, 1, 1], [], []>} : vector<16x128xf32>, vector<128x256xf32>, vector<16x256xf32> -> vector<16x256xf32>
    %c0_34 = arith.constant 0 : index
    %c0_35 = arith.constant 0 : index
    %61 = vector.load %arg13[%c0_34, %c0_35] : memref<1x256xf32, #tpu.memory_space<vmem>>, vector<1x256xf32>
    %62 = vector.broadcast %61 : vector<1x256xf32> to vector<16x256xf32>
    %63 = arith.addf %60, %62 : vector<16x256xf32>
    %64 = vector.extract_strided_slice %63 {offsets = [0, 0], sizes = [16, 128], strides = [1, 1]} : vector<16x256xf32> to vector<16x128xf32>
    %65 = vector.extract_strided_slice %63 {offsets = [0, 128], sizes = [16, 128], strides = [1, 1]} : vector<16x256xf32> to vector<16x128xf32>
    %66 = vector.shape_cast %65 : vector<16x128xf32> to vector<16x1x128xf32>
    %67 = vector.shape_cast %66 : vector<16x1x128xf32> to vector<16x1x128xf32>
    %68 = vector.broadcast %67 : vector<16x1x128xf32> to vector<16x16x128xf32>
    %69 = vector.shape_cast %68 : vector<16x16x128xf32> to vector<256x128xf32>
    %70 = vector.shape_cast %64 : vector<16x128xf32> to vector<1x16x128xf32>
    %71 = vector.shape_cast %70 : vector<1x16x128xf32> to vector<1x16x128xf32>
    %72 = vector.broadcast %71 : vector<1x16x128xf32> to vector<16x16x128xf32>
    %73 = vector.shape_cast %72 : vector<16x16x128xf32> to vector<256x128xf32>
    %74 = arith.addf %69, %73 : vector<256x128xf32>
    %cst_36 = arith.constant 0.000000e+00 : f32
    %75 = vector.broadcast %cst_36 : f32 to vector<256x128xf32>
    %76 = arith.cmpf ogt, %74, %75 : vector<256x128xf32>
    %cst_37 = arith.constant 2.000000e-01 : f32
    %77 = vector.broadcast %cst_37 : f32 to vector<256x128xf32>
    %78 = arith.mulf %77, %74 : vector<256x128xf32>
    %79 = arith.select %76, %74, %78 : vector<256x128xi1>, vector<256x128xf32>
    %c0_38 = arith.constant 0 : index
    %c0_39 = arith.constant 0 : index
    %80 = vector.load %arg14[%c0_38, %c0_39] : memref<128x8xf32, #tpu.memory_space<vmem>>, vector<128x8xf32>
    %cst_40 = arith.constant dense<0.000000e+00> : vector<256x8xf32>
    %81 = tpu.matmul %79, %80, %cst_40 {dimension_numbers = #tpu.dot_dimension_numbers<[1], [0], [0], [1], [0, 0, 1, 1], [], []>} : vector<256x128xf32>, vector<128x8xf32>, vector<256x8xf32> -> vector<256x8xf32>
    %82 = vector.shape_cast %81 : vector<256x8xf32> to vector<16x16x8xf32>
    %cst_41 = arith.constant dense<0xFF800000> : vector<16x8xf32>
    %83 = vector.multi_reduction <maximumf>, %82, %cst_41 [1] : vector<16x16x8xf32> to vector<16x8xf32>
    %84 = vector.shape_cast %83 : vector<16x8xf32> to vector<16x1x8xf32>
    %85 = vector.broadcast %84 : vector<16x1x8xf32> to vector<16x16x8xf32>
    %86 = arith.subf %82, %85 : vector<16x16x8xf32>
    %87 = math.exp %86 : vector<16x16x8xf32>
    %88 = arith.mulf %87, %0 : vector<16x16x8xf32>
    %cst_42 = arith.constant dense<0.000000e+00> : vector<16x8xf32>
    %89 = vector.multi_reduction <add>, %88, %cst_42 [1] : vector<16x16x8xf32> to vector<16x8xf32>
    %90 = vector.shape_cast %89 : vector<16x8xf32> to vector<16x1x8xf32>
    %cst_43 = arith.constant 1.000000e-16 : f32
    %91 = vector.broadcast %cst_43 : f32 to vector<16x1x8xf32>
    %92 = arith.maximumf %90, %91 : vector<16x1x8xf32>
    %93 = vector.broadcast %92 : vector<16x1x8xf32> to vector<16x16x8xf32>
    %94 = arith.divf %88, %93 : vector<16x16x8xf32>
    %95 = vector.shape_cast %94 : vector<16x16x8xf32> to vector<256x8xf32>
    %cst_44 = arith.constant dense<0.000000e+00> : vector<256x128xf32>
    %96 = tpu.matmul %95, %1, %cst_44 {dimension_numbers = #tpu.dot_dimension_numbers<[1], [0], [0], [1], [0, 0, 1, 1], [], []>} : vector<256x8xf32>, vector<8x128xf32>, vector<256x128xf32> -> vector<256x128xf32>
    %97 = arith.mulf %96, %73 : vector<256x128xf32>
    %98 = vector.shape_cast %97 : vector<256x128xf32> to vector<16x16x128xf32>
    %cst_45 = arith.constant dense<0.000000e+00> : vector<16x128xf32>
    %99 = vector.multi_reduction <add>, %98, %cst_45 [1] : vector<16x16x128xf32> to vector<16x128xf32>
    %c0_46 = arith.constant 0 : index
    %c0_47 = arith.constant 0 : index
    %100 = vector.load %arg15[%c0_46, %c0_47] : memref<1x128xf32, #tpu.memory_space<vmem>>, vector<1x128xf32>
    %101 = vector.broadcast %100 : vector<1x128xf32> to vector<16x128xf32>
    %102 = arith.mulf %99, %101 : vector<16x128xf32>
    %c0_48 = arith.constant 0 : index
    %c0_49 = arith.constant 0 : index
    %103 = vector.load %arg16[%c0_48, %c0_49] : memref<1x128xf32, #tpu.memory_space<vmem>>, vector<1x128xf32>
    %104 = vector.broadcast %103 : vector<1x128xf32> to vector<16x128xf32>
    %105 = arith.addf %102, %104 : vector<16x128xf32>
    %106 = arith.addf %105, %58 : vector<16x128xf32>
    %cst_50 = arith.constant 0.000000e+00 : f32
    %107 = vector.broadcast %cst_50 : f32 to vector<16x128xf32>
    %108 = arith.maximumf %106, %107 : vector<16x128xf32>
    %c0_51 = arith.constant 0 : index
    %c0_52 = arith.constant 0 : index
    %109 = vector.load %arg17[%c0_51, %c0_52] : memref<128x256xf32, #tpu.memory_space<vmem>>, vector<128x256xf32>
    %cst_53 = arith.constant dense<0.000000e+00> : vector<16x256xf32>
    %110 = tpu.matmul %108, %109, %cst_53 {dimension_numbers = #tpu.dot_dimension_numbers<[1], [0], [0], [1], [0, 0, 1, 1], [], []>} : vector<16x128xf32>, vector<128x256xf32>, vector<16x256xf32> -> vector<16x256xf32>
    %c0_54 = arith.constant 0 : index
    %c0_55 = arith.constant 0 : index
    %111 = vector.load %arg18[%c0_54, %c0_55] : memref<1x256xf32, #tpu.memory_space<vmem>>, vector<1x256xf32>
    %112 = vector.broadcast %111 : vector<1x256xf32> to vector<16x256xf32>
    %113 = arith.addf %110, %112 : vector<16x256xf32>
    %114 = vector.extract_strided_slice %113 {offsets = [0, 0], sizes = [16, 128], strides = [1, 1]} : vector<16x256xf32> to vector<16x128xf32>
    %115 = vector.extract_strided_slice %113 {offsets = [0, 128], sizes = [16, 128], strides = [1, 1]} : vector<16x256xf32> to vector<16x128xf32>
    %116 = vector.shape_cast %115 : vector<16x128xf32> to vector<16x1x128xf32>
    %117 = vector.shape_cast %116 : vector<16x1x128xf32> to vector<16x1x128xf32>
    %118 = vector.broadcast %117 : vector<16x1x128xf32> to vector<16x16x128xf32>
    %119 = vector.shape_cast %118 : vector<16x16x128xf32> to vector<256x128xf32>
    %120 = vector.shape_cast %114 : vector<16x128xf32> to vector<1x16x128xf32>
    %121 = vector.shape_cast %120 : vector<1x16x128xf32> to vector<1x16x128xf32>
    %122 = vector.broadcast %121 : vector<1x16x128xf32> to vector<16x16x128xf32>
    %123 = vector.shape_cast %122 : vector<16x16x128xf32> to vector<256x128xf32>
    %124 = arith.addf %119, %123 : vector<256x128xf32>
    %cst_56 = arith.constant 0.000000e+00 : f32
    %125 = vector.broadcast %cst_56 : f32 to vector<256x128xf32>
    %126 = arith.cmpf ogt, %124, %125 : vector<256x128xf32>
    %cst_57 = arith.constant 2.000000e-01 : f32
    %127 = vector.broadcast %cst_57 : f32 to vector<256x128xf32>
    %128 = arith.mulf %127, %124 : vector<256x128xf32>
    %129 = arith.select %126, %124, %128 : vector<256x128xi1>, vector<256x128xf32>
    %c0_58 = arith.constant 0 : index
    %c0_59 = arith.constant 0 : index
    %130 = vector.load %arg19[%c0_58, %c0_59] : memref<128x8xf32, #tpu.memory_space<vmem>>, vector<128x8xf32>
    %cst_60 = arith.constant dense<0.000000e+00> : vector<256x8xf32>
    %131 = tpu.matmul %129, %130, %cst_60 {dimension_numbers = #tpu.dot_dimension_numbers<[1], [0], [0], [1], [0, 0, 1, 1], [], []>} : vector<256x128xf32>, vector<128x8xf32>, vector<256x8xf32> -> vector<256x8xf32>
    %132 = vector.shape_cast %131 : vector<256x8xf32> to vector<16x16x8xf32>
    %cst_61 = arith.constant dense<0xFF800000> : vector<16x8xf32>
    %133 = vector.multi_reduction <maximumf>, %132, %cst_61 [1] : vector<16x16x8xf32> to vector<16x8xf32>
    %134 = vector.shape_cast %133 : vector<16x8xf32> to vector<16x1x8xf32>
    %135 = vector.broadcast %134 : vector<16x1x8xf32> to vector<16x16x8xf32>
    %136 = arith.subf %132, %135 : vector<16x16x8xf32>
    %137 = math.exp %136 : vector<16x16x8xf32>
    %138 = arith.mulf %137, %0 : vector<16x16x8xf32>
    %cst_62 = arith.constant dense<0.000000e+00> : vector<16x8xf32>
    %139 = vector.multi_reduction <add>, %138, %cst_62 [1] : vector<16x16x8xf32> to vector<16x8xf32>
    %140 = vector.shape_cast %139 : vector<16x8xf32> to vector<16x1x8xf32>
    %cst_63 = arith.constant 1.000000e-16 : f32
    %141 = vector.broadcast %cst_63 : f32 to vector<16x1x8xf32>
    %142 = arith.maximumf %140, %141 : vector<16x1x8xf32>
    %143 = vector.broadcast %142 : vector<16x1x8xf32> to vector<16x16x8xf32>
    %144 = arith.divf %138, %143 : vector<16x16x8xf32>
    %145 = vector.shape_cast %144 : vector<16x16x8xf32> to vector<256x8xf32>
    %cst_64 = arith.constant dense<0.000000e+00> : vector<256x128xf32>
    %146 = tpu.matmul %145, %1, %cst_64 {dimension_numbers = #tpu.dot_dimension_numbers<[1], [0], [0], [1], [0, 0, 1, 1], [], []>} : vector<256x8xf32>, vector<8x128xf32>, vector<256x128xf32> -> vector<256x128xf32>
    %147 = arith.mulf %146, %123 : vector<256x128xf32>
    %148 = vector.shape_cast %147 : vector<256x128xf32> to vector<16x16x128xf32>
    %cst_65 = arith.constant dense<0.000000e+00> : vector<16x128xf32>
    %149 = vector.multi_reduction <add>, %148, %cst_65 [1] : vector<16x16x128xf32> to vector<16x128xf32>
    %c0_66 = arith.constant 0 : index
    %c0_67 = arith.constant 0 : index
    %150 = vector.load %arg20[%c0_66, %c0_67] : memref<1x128xf32, #tpu.memory_space<vmem>>, vector<1x128xf32>
    %151 = vector.broadcast %150 : vector<1x128xf32> to vector<16x128xf32>
    %152 = arith.mulf %149, %151 : vector<16x128xf32>
    %c0_68 = arith.constant 0 : index
    %c0_69 = arith.constant 0 : index
    %153 = vector.load %arg21[%c0_68, %c0_69] : memref<1x128xf32, #tpu.memory_space<vmem>>, vector<1x128xf32>
    %154 = vector.broadcast %153 : vector<1x128xf32> to vector<16x128xf32>
    %155 = arith.addf %152, %154 : vector<16x128xf32>
    %156 = arith.addf %155, %108 : vector<16x128xf32>
    %cst_70 = arith.constant 0.000000e+00 : f32
    %157 = vector.broadcast %cst_70 : f32 to vector<16x128xf32>
    %158 = arith.maximumf %156, %157 : vector<16x128xf32>
    %c0_71 = arith.constant 0 : index
    %c0_72 = arith.constant 0 : index
    %159 = vector.load %arg22[%c0_71, %c0_72] : memref<128x256xf32, #tpu.memory_space<vmem>>, vector<128x256xf32>
    %cst_73 = arith.constant dense<0.000000e+00> : vector<16x256xf32>
    %160 = tpu.matmul %158, %159, %cst_73 {dimension_numbers = #tpu.dot_dimension_numbers<[1], [0], [0], [1], [0, 0, 1, 1], [], []>} : vector<16x128xf32>, vector<128x256xf32>, vector<16x256xf32> -> vector<16x256xf32>
    %c0_74 = arith.constant 0 : index
    %c0_75 = arith.constant 0 : index
    %161 = vector.load %arg23[%c0_74, %c0_75] : memref<1x256xf32, #tpu.memory_space<vmem>>, vector<1x256xf32>
    %162 = vector.broadcast %161 : vector<1x256xf32> to vector<16x256xf32>
    %163 = arith.addf %160, %162 : vector<16x256xf32>
    %164 = vector.extract_strided_slice %163 {offsets = [0, 0], sizes = [16, 128], strides = [1, 1]} : vector<16x256xf32> to vector<16x128xf32>
    %165 = vector.extract_strided_slice %163 {offsets = [0, 128], sizes = [16, 128], strides = [1, 1]} : vector<16x256xf32> to vector<16x128xf32>
    %166 = vector.shape_cast %165 : vector<16x128xf32> to vector<16x1x128xf32>
    %167 = vector.shape_cast %166 : vector<16x1x128xf32> to vector<16x1x128xf32>
    %168 = vector.broadcast %167 : vector<16x1x128xf32> to vector<16x16x128xf32>
    %169 = vector.shape_cast %168 : vector<16x16x128xf32> to vector<256x128xf32>
    %170 = vector.shape_cast %164 : vector<16x128xf32> to vector<1x16x128xf32>
    %171 = vector.shape_cast %170 : vector<1x16x128xf32> to vector<1x16x128xf32>
    %172 = vector.broadcast %171 : vector<1x16x128xf32> to vector<16x16x128xf32>
    %173 = vector.shape_cast %172 : vector<16x16x128xf32> to vector<256x128xf32>
    %174 = arith.addf %169, %173 : vector<256x128xf32>
    %cst_76 = arith.constant 0.000000e+00 : f32
    %175 = vector.broadcast %cst_76 : f32 to vector<256x128xf32>
    %176 = arith.cmpf ogt, %174, %175 : vector<256x128xf32>
    %cst_77 = arith.constant 2.000000e-01 : f32
    %177 = vector.broadcast %cst_77 : f32 to vector<256x128xf32>
    %178 = arith.mulf %177, %174 : vector<256x128xf32>
    %179 = arith.select %176, %174, %178 : vector<256x128xi1>, vector<256x128xf32>
    %c0_78 = arith.constant 0 : index
    %c0_79 = arith.constant 0 : index
    %180 = vector.load %arg24[%c0_78, %c0_79] : memref<128x8xf32, #tpu.memory_space<vmem>>, vector<128x8xf32>
    %cst_80 = arith.constant dense<0.000000e+00> : vector<256x8xf32>
    %181 = tpu.matmul %179, %180, %cst_80 {dimension_numbers = #tpu.dot_dimension_numbers<[1], [0], [0], [1], [0, 0, 1, 1], [], []>} : vector<256x128xf32>, vector<128x8xf32>, vector<256x8xf32> -> vector<256x8xf32>
    %182 = vector.shape_cast %181 : vector<256x8xf32> to vector<16x16x8xf32>
    %cst_81 = arith.constant dense<0xFF800000> : vector<16x8xf32>
    %183 = vector.multi_reduction <maximumf>, %182, %cst_81 [1] : vector<16x16x8xf32> to vector<16x8xf32>
    %184 = vector.shape_cast %183 : vector<16x8xf32> to vector<16x1x8xf32>
    %185 = vector.broadcast %184 : vector<16x1x8xf32> to vector<16x16x8xf32>
    %186 = arith.subf %182, %185 : vector<16x16x8xf32>
    %187 = math.exp %186 : vector<16x16x8xf32>
    %188 = arith.mulf %187, %0 : vector<16x16x8xf32>
    %cst_82 = arith.constant dense<0.000000e+00> : vector<16x8xf32>
    %189 = vector.multi_reduction <add>, %188, %cst_82 [1] : vector<16x16x8xf32> to vector<16x8xf32>
    %190 = vector.shape_cast %189 : vector<16x8xf32> to vector<16x1x8xf32>
    %cst_83 = arith.constant 1.000000e-16 : f32
    %191 = vector.broadcast %cst_83 : f32 to vector<16x1x8xf32>
    %192 = arith.maximumf %190, %191 : vector<16x1x8xf32>
    %193 = vector.broadcast %192 : vector<16x1x8xf32> to vector<16x16x8xf32>
    %194 = arith.divf %188, %193 : vector<16x16x8xf32>
    %195 = vector.shape_cast %194 : vector<16x16x8xf32> to vector<256x8xf32>
    %cst_84 = arith.constant dense<0.000000e+00> : vector<256x128xf32>
    %196 = tpu.matmul %195, %1, %cst_84 {dimension_numbers = #tpu.dot_dimension_numbers<[1], [0], [0], [1], [0, 0, 1, 1], [], []>} : vector<256x8xf32>, vector<8x128xf32>, vector<256x128xf32> -> vector<256x128xf32>
    %197 = arith.mulf %196, %173 : vector<256x128xf32>
    %198 = vector.shape_cast %197 : vector<256x128xf32> to vector<16x16x128xf32>
    %cst_85 = arith.constant dense<0.000000e+00> : vector<16x128xf32>
    %199 = vector.multi_reduction <add>, %198, %cst_85 [1] : vector<16x16x128xf32> to vector<16x128xf32>
    %c0_86 = arith.constant 0 : index
    %c0_87 = arith.constant 0 : index
    %200 = vector.load %arg25[%c0_86, %c0_87] : memref<1x128xf32, #tpu.memory_space<vmem>>, vector<1x128xf32>
    %201 = vector.broadcast %200 : vector<1x128xf32> to vector<16x128xf32>
    %202 = arith.mulf %199, %201 : vector<16x128xf32>
    %c0_88 = arith.constant 0 : index
    %c0_89 = arith.constant 0 : index
    %203 = vector.load %arg26[%c0_88, %c0_89] : memref<1x128xf32, #tpu.memory_space<vmem>>, vector<1x128xf32>
    %204 = vector.broadcast %203 : vector<1x128xf32> to vector<16x128xf32>
    %205 = arith.addf %202, %204 : vector<16x128xf32>
    %206 = arith.addf %205, %158 : vector<16x128xf32>
    %cst_90 = arith.constant 0.000000e+00 : f32
    %207 = vector.broadcast %cst_90 : f32 to vector<16x128xf32>
    %208 = arith.maximumf %206, %207 : vector<16x128xf32>
    %c0_91 = arith.constant 0 : index
    %c0_92 = arith.constant 0 : index
    %209 = vector.load %arg3[%c0_91, %c0_92] : memref<2x16xf32, #tpu.memory_space<vmem>>, vector<2x16xf32>
    %cst_93 = arith.constant dense<0.000000e+00> : vector<2x128xf32>
    %210 = tpu.matmul %209, %208, %cst_93 {dimension_numbers = #tpu.dot_dimension_numbers<[1], [0], [0], [1], [0, 0, 1, 1], [], []>} : vector<2x16xf32>, vector<16x128xf32>, vector<2x128xf32> -> vector<2x128xf32>
    %c0_94 = arith.constant 0 : index
    %c0_95 = arith.constant 0 : index
    %211 = vector.load %arg27[%c0_94, %c0_95] : memref<128x128xf32, #tpu.memory_space<vmem>>, vector<128x128xf32>
    %cst_96 = arith.constant dense<0.000000e+00> : vector<2x128xf32>
    %212 = tpu.matmul %210, %211, %cst_96 {dimension_numbers = #tpu.dot_dimension_numbers<[1], [0], [0], [1], [0, 0, 1, 1], [], []>} : vector<2x128xf32>, vector<128x128xf32>, vector<2x128xf32> -> vector<2x128xf32>
    %c0_97 = arith.constant 0 : index
    %c0_98 = arith.constant 0 : index
    %213 = vector.load %arg4[%c0_97, %c0_98] : memref<2x4xf32, #tpu.memory_space<vmem>>, vector<2x4xf32>
    %c0_99 = arith.constant 0 : index
    %c0_100 = arith.constant 0 : index
    %214 = vector.load %arg28[%c0_99, %c0_100] : memref<4x128xf32, #tpu.memory_space<vmem>>, vector<4x128xf32>
    %cst_101 = arith.constant dense<0.000000e+00> : vector<2x128xf32>
    %215 = tpu.matmul %213, %214, %cst_101 {dimension_numbers = #tpu.dot_dimension_numbers<[1], [0], [0], [1], [0, 0, 1, 1], [], []>} : vector<2x4xf32>, vector<4x128xf32>, vector<2x128xf32> -> vector<2x128xf32>
    %216 = arith.addf %212, %215 : vector<2x128xf32>
    %c0_102 = arith.constant 0 : index
    %c0_103 = arith.constant 0 : index
    %217 = vector.load %arg29[%c0_102, %c0_103] : memref<1x128xf32, #tpu.memory_space<vmem>>, vector<1x128xf32>
    %218 = vector.broadcast %217 : vector<1x128xf32> to vector<2x128xf32>
    %219 = arith.addf %216, %218 : vector<2x128xf32>
    %cst_104 = arith.constant 0.000000e+00 : f32
    %220 = vector.broadcast %cst_104 : f32 to vector<2x128xf32>
    %221 = arith.maximumf %219, %220 : vector<2x128xf32>
    %c0_105 = arith.constant 0 : index
    %c0_106 = arith.constant 0 : index
    %222 = vector.load %arg30[%c0_105, %c0_106] : memref<128x64xf32, #tpu.memory_space<vmem>>, vector<128x64xf32>
    %cst_107 = arith.constant dense<0.000000e+00> : vector<2x64xf32>
    %223 = tpu.matmul %221, %222, %cst_107 {dimension_numbers = #tpu.dot_dimension_numbers<[1], [0], [0], [1], [0, 0, 1, 1], [], []>} : vector<2x128xf32>, vector<128x64xf32>, vector<2x64xf32> -> vector<2x64xf32>
    %c0_108 = arith.constant 0 : index
    %c0_109 = arith.constant 0 : index
    %224 = vector.load %arg31[%c0_108, %c0_109] : memref<1x64xf32, #tpu.memory_space<vmem>>, vector<1x64xf32>
    %225 = vector.broadcast %224 : vector<1x64xf32> to vector<2x64xf32>
    %226 = arith.addf %223, %225 : vector<2x64xf32>
    %cst_110 = arith.constant 0.000000e+00 : f32
    %227 = vector.broadcast %cst_110 : f32 to vector<2x64xf32>
    %228 = arith.maximumf %226, %227 : vector<2x64xf32>
    %c0_111 = arith.constant 0 : index
    %c0_112 = arith.constant 0 : index
    %229 = vector.load %arg32[%c0_111, %c0_112] : memref<64x1xf32, #tpu.memory_space<vmem>>, vector<64x1xf32>
    %cst_113 = arith.constant dense<0.000000e+00> : vector<2x1xf32>
    %230 = tpu.matmul %228, %229, %cst_113 {dimension_numbers = #tpu.dot_dimension_numbers<[1], [0], [0], [1], [0, 0, 1, 1], [], []>} : vector<2x64xf32>, vector<64x1xf32>, vector<2x1xf32> -> vector<2x1xf32>
    %c0_114 = arith.constant 0 : index
    %c0_115 = arith.constant 0 : index
    %231 = vector.load %arg33[%c0_114, %c0_115] : memref<1x1xf32, #tpu.memory_space<vmem>>, vector<1x1xf32>
    %232 = vector.broadcast %231 : vector<1x1xf32> to vector<2x1xf32>
    %233 = arith.addf %230, %232 : vector<2x1xf32>
    %c0_116 = arith.constant 0 : index
    %c0_117 = arith.constant 0 : index
    %234 = vector.load %arg34[%c0_116, %c0_117] : memref<2x1xf32, #tpu.memory_space<vmem>>, vector<2x1xf32>
    tpu.vector_store %arg34[%c0_116, %c0_117], %233 {strides = array<i32>} : memref<2x1xf32, #tpu.memory_space<vmem>>, vector<2x1xf32>,
    return
  }
}

</mosaic_0001>

<bundles_post_ra>
// kernel: forward.1
= control target key start
LH: loop header
LB: loop body
LE: loop exit
PB: predicated region body
PF: predicated region fallthrough
CT: control target
= control target key end

     0   :  { %s9660_s3 = smov 5   ;;  %s9661_s10 = smov 7   ;;  %vm194_vm0 = vcmask 1041408   ;;  %vm187_vm1 = vcmask 15360   ;;  %v12862_v27 = vmov 0.0   ;;  %vm303_vm2 = vcmask 523264   ;;  %s12845_s0 = inlined_call_operand.smem [shape: u32[35], index: -1, kind: input, shape index: {}] }
   0x1   :  { %s7656_s6 = sld [smem:[%s12845_s0 + %s9660_s3]]   ;;  %s9663_s14 = smov 9   ;;  %v293_v59 = vlaneseq  ;;  %v9666_v61 = vmov 1966171168  }
   0x2   :  { %s1_s9 = sld [smem:[%s12845_s0]]   ;;  %s9664_s18 = smov 6   ;;  %v391_v62 = vunpack.c.l.s4 %v9666_v61 }
   0x3   :  { %s9712_s13 = sld [smem:[%s12845_s0 + %s9661_s10]]   ;;  %s9665_s22 = smov 8   ;;  %v294_v60 = vshrl.u32 %v293_v59, 7 }
   0x4   :  { %s9734_s17 = sld [smem:[%s12845_s0 + %s9663_s14]]   ;;  %s9667_s26 = smov 2  }
   0x5   :  { %s7657_s21 = sld [smem:[%s12845_s0 + %s9664_s18]]   ;;  %v9761_v63 = vsub.s32 1, %v294_v60  ;;  %s9668_s30 = smov 1  }
   0x6   :  { %s7659_s25 = sld [smem:[%s12845_s0 + %s9665_s22]]   ;;  %s9669_s4 = smov 12  }
   0x7   :  { %v179_v0 = vld [vmem:[%s7656_s6] sm:$0x3]  ;;  %12927 = vst [vmem:[#allocation3_spill] sm:$0xff] %v9761_v63  ;;  %s9841_s29 = sld [smem:[%s12845_s0 + %s9667_s26]]   ;;  %s9670_s8 = smov 10  }
   0x8   :  { %v177_v1 = vld [vmem:[%s1_s9] sm:$0xff]  ;;  %v178_v2 = vld [vmem:[%s1_s9 + $0x8] sm:$0xff]  ;;  %8210 = vmatprep.subr.msk.mxu1 %vm194_vm0, %v179_v0  ;;  %s9878_s3 = sld [smem:[%s12845_s0 + %s9668_s30]]   ;;  %s9671_s12 = smov 11  }
   0x9   :  { %8212 = vmatprep.mubr.msk.f32.mxu1 %vm187_vm1, %v177_v1  ;;  %v276_v3 = vld [vmem:[%s9712_s13 + $0x8] sm:$0xff]  ;;  %v278_v4 = vld [vmem:[%s9712_s13 + $0x18] sm:$0xff]  ;;  %v275_v5 = vld [vmem:[%s9712_s13] sm:$0xff]  ;;  %8211 = vmatpush3.msk.msra.mxu1 %vm194_vm0, %v179_v0  ;;  %v392_v1 = vunpack.c.0.s8 %v391_v62  ;;  %s10307_s7 = sld [smem:[%s12845_s0 + %s9669_s4]]   ;;  %s9672_s16 = smov 14  }
   0xa   :  { %v8836_v6 = vpack.c.bf16 %v278_v4, %v276_v3  ;;  %v277_v7 = vld [vmem:[%s9712_s13 + $0x10] sm:$0xff]  ;;  %v280_v8 = vld [vmem:[%s9712_s13 + $0x28] sm:$0xff]  ;;  %v282_v9 = vld [vmem:[%s9712_s13 + $0x38] sm:$0xff]  ;;  %8213 = vmatmul.mubr.msk.f32.vlgmr.msra.gmra.mrb[0].mxu1 %vm187_vm1, %v178_v2  ;;  %s7661_s11 = sld [smem:[%s12845_s0 + %s9670_s8]]   ;;  %s9673_s20 = smov 13  }
   0xb   :  { %v8838_v10 = vpack.c.bf16 %v277_v7, %v275_v5  ;;  %v8840_v11 = vpack.c.bf16 %v282_v9, %v280_v8  ;;  %v279_v12 = vld [vmem:[%s9712_s13 + $0x20] sm:$0xff]  ;;  %v281_v13 = vld [vmem:[%s9712_s13 + $0x30] sm:$0xff]  ;;  %v284_v14 = vld [vmem:[%s9712_s13 + $0x48] sm:$0xff]  ;;  %374 = vmatprep.mubr.f32.mxu1 %v12862_v27  ;;  %v9764_v4 = vsub.s32 %v392_v1, %v294_v60  ;;  %v9766_v5 = vsub.s32 0, %v294_v60  ;;  %s7662_s15 = sld [smem:[%s12845_s0 + %s9671_s12]]   ;;  %s9674_s24 = smov 17  }
   0xc   :  { %8837 = vmatprep.subr.bf16.mxu1 %v8836_v6  ;;  %v286_v15 = vld [vmem:[%s9712_s13 + $0x58] sm:$0xff]  ;;  %v8842_v16 = vpack.c.bf16 %v281_v13, %v279_v12  ;;  %v283_v18 = vld [vmem:[%s9712_s13 + $0x40] sm:$0xff]  ;;  %v285_v19 = vld [vmem:[%s9712_s13 + $0x50] sm:$0xff]  ;;  %s10518_s19 = sld [smem:[%s12845_s0 + %s9672_s16]]   ;;  %s9675_s28 = smov 15  }
   0xd   :  { %8839 = vmatpush1.bf16.msra.mxu1 %v8838_v10  ;;  %v8844_v17 = vpack.c.bf16 %v286_v15, %v284_v14  ;;  %v8846_v20 = vpack.c.bf16 %v285_v19, %v283_v18  ;;  %v288_v21 = vld [vmem:[%s9712_s13 + $0x68] sm:$0xff]  ;;  %v290_v22 = vld [vmem:[%s9712_s13 + $0x78] sm:$0xff]  ;;  %v287_v24 = vld [vmem:[%s9712_s13 + $0x60] sm:$0xff]  ;;  %12928 = vst [vmem:[#allocation4_spill] sm:$0xff] %v9764_v4  ;;  %s7664_s23 = sld [smem:[%s12845_s0 + %s9673_s20]]   ;;  %s9676_s4 = smov 16  }
   0xe   :  { %8841 = vmatprep.subr.bf16.mxu1 %v8840_v11  ;;  %v8848_v23 = vpack.c.bf16 %v290_v22, %v288_v21  ;;  %v289_v25 = vld [vmem:[%s9712_s13 + $0x70] sm:$0xff]  ;;  %v695_v28 = vld [vmem:[%s9734_s17] sm:$0xff]  ;;  %v696_v29 = vld [vmem:[%s9734_s17 + $0x8] sm:$0xff]  ;;  %12929 = vst [vmem:[#allocation5_spill] sm:$0xff] %v9766_v5  ;;  %s11059_s27 = sld [smem:[%s12845_s0 + %s9674_s24]]   ;;  %s9677_s8 = smov 19  }
   0xf   :  { %v8850_v26 = vpack.c.bf16 %v289_v25, %v287_v24  ;;  %v697_v30 = vld [vmem:[%s9734_s17 + $0x10] sm:$0xff]  ;;  %v8852_v31 = vpack.c.bf16 %v696_v29, %v695_v28  ;;  %v698_v32 = vld [vmem:[%s9734_s17 + $0x18] sm:$0xff]  ;;  %v699_v34 = vld [vmem:[%s9734_s17 + $0x20] sm:$0xff]  ;;  %s7666_s2 = sld [smem:[%s12845_s0 + %s9675_s28]]   ;;  %s9678_s12 = smov 18  }
  0x10   :  { %v8856_v33 = vpack.c.bf16 %v698_v32, %v697_v30  ;;  %v700_v35 = vld [vmem:[%s9734_s17 + $0x28] sm:$0xff]  ;;  %v701_v37 = vld [vmem:[%s9734_s17 + $0x30] sm:$0xff]  ;;  %v702_v38 = vld [vmem:[%s9734_s17 + $0x38] sm:$0xff]  ;;  %s9679_s16 = smov 22   ;;  %s9687_s10 = smov 25  }
  0x11   :  { %8843 = vmatpush1.bf16.msra.mxu1 %v8842_v16  ;;  %8853 = vmatprep.subr.bf16.mxu0 %v8852_v31  ;;  %v8860_v36 = vpack.c.bf16 %v700_v35, %v699_v34  ;;  %v8864_v39 = vpack.c.bf16 %v702_v38, %v701_v37  ;;  %v7686_v40 = vld [vmem:[%s7657_s21] ss:$0 sm:$0xff]  ;;  %v704_v48 = vld [vmem:[%s9734_s17 + $0x48] sm:$0xff]  ;;  %v705_v50 = vld [vmem:[%s9734_s17 + $0x50] sm:$0xff]  ;;  %s7676_s13 = sld [smem:[%s12845_s0 + %s9687_s10]]   ;;  %s9688_s14 = smov 26  }
  0x12   :  { %8845 = vmatprep.subr.bf16.mxu1 %v8844_v17  ;;  %8855 = vmatpush3.bf16.msra.mxu0 %v8852_v31  ;;  %v703_v47 = vld [vmem:[%s9734_s17 + $0x40] sm:$0xff]  ;;  %v706_v51 = vld [vmem:[%s9734_s17 + $0x58] sm:$0xff]  ;;  %v708_v54 = vld [vmem:[%s9734_s17 + $0x68] sm:$0xff]  ;;  %s9689_s18 = smov 3   ;;  %s9690_s21 = smov 28  }
  0x13   :  { %8857 = vmatprep.subr.bf16.mxu0 %v8856_v33  ;;  %v8868_v49 = vpack.c.bf16 %v704_v48, %v703_v47  ;;  %v8872_v52 = vpack.c.bf16 %v706_v51, %v705_v50  ;;  %v707_v53 = vld [vmem:[%s9734_s17 + $0x60] sm:$0xff]  ;;  %v709_v56 = vld [vmem:[%s9734_s17 + $0x70] sm:$0xff]  ;;  %v710_v57 = vld [vmem:[%s9734_s17 + $0x78] sm:$0xff]  ;;  %s7677_s17 = sld [smem:[%s12845_s0 + %s9688_s14]]   ;;  %s9692_s30 = smov 30  }
  0x14   :  { %v8876_v55 = vpack.c.bf16 %v708_v54, %v707_v53  ;;  %v8880_v58 = vpack.c.bf16 %v710_v57, %v709_v56  ;;  %v291_v0 = vld [vmem:[%s7659_s25] sm:$0x3]  ;;  %s7654_s20 = sld [smem:[%s12845_s0 + %s9689_s18]]   ;;  %s9691_s25 = smov 4  }
  0x15   :  { %8847 = vmatpush1.bf16.msra.mxu1 %v8846_v20  ;;  %v300_v2 = vrot.slane %v291_v0, %v9761_v63  ;;  %v296_v11 = vrot.slane %v291_v0, %v9766_v5  ;;  %s7679_s24 = sld [smem:[%s12845_s0 + %s9690_s21]]   ;;  %s9693_s5 = smov 32  }
  0x16   :  { %8849 = vmatprep.subr.bf16.mxu1 %v8848_v23  ;;  %8859 = vmatpush3.bf16.msra.mxu0 %v8856_v33  ;;  %s7655_s28 = sld [smem:[%s12845_s0 + %s9691_s25]]  }
  0x17   :  { %8861 = vmatprep.subr.bf16.mxu0 %v8860_v36 }
  0x19   :  { %8851 = vmatpush1.bf16.msra.mxu1 %v8850_v26 }
  0x1a   :  { %8863 = vmatpush3.bf16.msra.mxu0 %v8860_v36 }
  0x1b   :  { %8865 = vmatprep.subr.bf16.mxu0 %v8864_v39 }
  0x1e   :  { %8867 = vmatpush3.bf16.msra.mxu0 %v8864_v39 }
  0x1f   :  { %8869 = vmatprep.subr.bf16.mxu0 %v8868_v49 }
  0x22   :  { %8871 = vmatpush3.bf16.msra.mxu0 %v8868_v49 }
  0x23   :  { %8873 = vmatprep.subr.bf16.mxu0 %v8872_v52 }
  0x26   :  { %8875 = vmatpush3.bf16.msra.mxu0 %v8872_v52 }
  0x27   :  { %8877 = vmatprep.subr.bf16.mxu0 %v8876_v55 }
  0x2a   :  { %8879 = vmatpush3.bf16.msra.mxu0 %v8876_v55 }
  0x2b   :  { %8881 = vmatprep.subr.bf16.mxu0 %v8880_v58 }
  0x2e   :  { %8883 = vmatpush3.bf16.msra.mxu0 %v8880_v58 }
  0xdd   :  { %v8214_v41 = vpop.f32.mrb[0].mxu1 }
  0xde   :  { %v264_v42 = vpop.f32.mrb[1].mxu1  ;;  %v270_v44 = vadd.f32 %v8214_v41, %v7686_v40 }
  0xdf   :  { %v265_v43 = vadd.f32 %v7686_v40, %v264_v42 }
  0xe0   :  { %v274_v46 = vmax.f32 %v270_v44, 0.0 }
  0xe1   :  { %v273_v45 = vmax.f32 %v265_v43, 0.0 }
  0xe3   :  { %7690 = vmatmul.mubr.msk.f32.vlgmr.msra.gmra.mrb[2].mxu1 %vm303_vm2, %v273_v45 }
  0xe4   :  { %380 = vmatprep.mubr.f32.mxu1 %v12862_v27 }
  0xe7   :  { %7691 = vmatmul.mubr.msk.f32.gmra.mrb[4].mxu1 %vm303_vm2, %v274_v46 }
 0x1b6   :  { %v376_v3 = vpop.f32.mrb[2].mxu1 }
 0x1b7   :  { %v378_v6 = vpop.f32.mrb[3].mxu1  ;;  %v9773_v17 = vadd.f32 %v376_v3, %v296_v11 }
 0x1b8   :  { %v379_v7 = vadd.f32 %v378_v6, %v300_v2 }
 0x1ba   :  { %v389_v8 = vcombine.high %v379_v7, %v379_v7  ;;  %v396_v9 = vrot.slane %v379_v7, %v9764_v4  ;;  %v382_v10 = vpop.f32.mrb[4].mxu1 }
 0x1bb   :  { %v384_v12 = vpop.f32.mrb[5].mxu1  ;;  %v9776_v20 = vadd.f32 %v382_v10, %v296_v11 }
 0x1bc   :  { %v404_v13 = vcombine.high %v396_v9, %v396_v9  ;;  %v412_v14 = vrot.slane %v396_v9, %v9764_v4  ;;  %v403_v15 = vrot.slane %v389_v8, %v9764_v4  ;;  %v9790_v45 = vadd.f32 %v384_v12, %v300_v2 }
 0x1be   :  { %v426_v16 = vrot.slane %v404_v13, %v9764_v4  ;;  %v434_v18 = vcombine.high %v412_v14, %v412_v14  ;;  %v490_v19 = vrot.slane %v412_v14, %v9766_v5  ;;  %v405_v23 = vcombine.high %v403_v15, %v403_v15 }
 0x1bf   :  { %v419_v26 = vrot.slane %v403_v15, %v9764_v4  ;;  %v445_v54 = vrot.slane %v9790_v45, %v9764_v4 }
 0x1c0   :  { %v494_v21 = vrot.slane %v426_v16, %v9766_v5  ;;  %v567_v22 = vadd.f32 %v490_v19, %v9773_v17  ;;  %v568_v24 = vadd.f32 %v490_v19, %v9776_v20  ;;  %v498_v29 = vrot.slane %v434_v18, %v9766_v5 }
 0x1c1   :  { %v436_v30 = vcombine.high %v426_v16, %v426_v16  ;;  %v433_v33 = vrot.slane %v405_v23, %v9764_v4  ;;  %v506_v42 = vrot.slane %v419_v26, %v9766_v5  ;;  %v435_v44 = vcombine.high %v419_v26, %v419_v26 }
 0x1c2   :  { %v569_v25 = vadd.f32 %v494_v21, %v9773_v17  ;;  %v570_v28 = vadd.f32 %v494_v21, %v9776_v20  ;;  %vm599_vm3 = vcmp.gt.f32.partialorder %v567_v22, 0.0  ;;  %v631_v31 = vmul.f32 0.2, %v567_v22 }
 0x1c3   :  { %vm600_vm4 = vcmp.gt.f32.partialorder %v568_v24, 0.0  ;;  %v632_v32 = vmul.f32 0.2, %v568_v24  ;;  %v571_v38 = vadd.f32 %v498_v29, %v9773_v17  ;;  %v572_v39 = vadd.f32 %v498_v29, %v9776_v20 }
 0x1c4   :  { %v663_v34 = vsel %vm599_vm3, %v567_v22, %v631_v31  ;;  %vm601_vm5 = vcmp.gt.f32.partialorder %v569_v25, 0.0  ;;  %v633_v35 = vmul.f32 0.2, %v569_v25  ;;  %v634_v37 = vmul.f32 0.2, %v570_v28 }
 0x1c5   :  { %8247 = vmatprep.mubr.f32.mxu0 %v663_v34  ;;  %v664_v36 = vsel %vm600_vm4, %v568_v24, %v632_v32  ;;  %vm602_vm6 = vcmp.gt.f32.partialorder %v570_v28, 0.0  ;;  %v502_v41 = vrot.slane %v436_v30, %v9766_v5  ;;  %vm603_vm7 = vcmp.gt.f32.partialorder %v571_v38, 0.0 }
 0x1c6   :  { %8248 = vmatmul.mubr.f32.vlgmr.msra.gmra.mrb[0].mxu0 %v664_v36  ;;  %v665_v40 = vsel %vm601_vm5, %v569_v25, %v633_v35  ;;  %v635_v43 = vmul.f32 0.2, %v571_v38  ;;  %v666_v47 = vsel %vm602_vm6, %v570_v28, %v634_v37  ;;  %v636_v48 = vmul.f32 0.2, %v572_v39 }
 0x1c7   :  { %8250 = vmatprep.mubr.f32.mxu0 %v665_v40  ;;  %v573_v46 = vadd.f32 %v502_v41, %v9773_v17  ;;  %v574_v49 = vadd.f32 %v502_v41, %v9776_v20  ;;  %v510_v50 = vrot.slane %v433_v33, %v9766_v5  ;;  %vm604_vm8 = vcmp.gt.f32.partialorder %v572_v39, 0.0 }
 0x1c8   :  { %v667_v51 = vsel %vm603_vm7, %v571_v38, %v635_v43  ;;  %v575_v53 = vadd.f32 %v506_v42, %v9773_v17  ;;  %v576_v55 = vadd.f32 %v506_v42, %v9776_v20  ;;  %v668_v56 = vsel %vm604_vm8, %v572_v39, %v636_v48 }
 0x1c9   :  { %v637_v52 = vmul.f32 0.2, %v573_v46  ;;  %vm605_vm9 = vcmp.gt.f32.partialorder %v573_v46, 0.0  ;;  %vm606_vm10 = vcmp.gt.f32.partialorder %v574_v49, 0.0  ;;  %v638_v57 = vmul.f32 0.2, %v574_v49 }
 0x1ca   :  { %8251 = vmatmul.mubr.f32.gmra.mrb[2].mxu0 %v666_v47  ;;  %v577_v58 = vadd.f32 %v510_v50, %v9773_v17  ;;  %v639_v60 = vmul.f32 0.2, %v575_v53  ;;  %v514_v61 = vrot.slane %v435_v44, %v9766_v5  ;;  %v437_v62 = vcombine.high %v433_v33, %v433_v33 }
 0x1cb   :  { %8253 = vmatprep.mubr.f32.mxu0 %v667_v51  ;;  %v669_v59 = vsel %vm605_vm9, %v573_v46, %v637_v52  ;;  %vm607_vm11 = vcmp.gt.f32.partialorder %v575_v53, 0.0  ;;  %v453_v0 = vcombine.high %v445_v54, %v445_v54  ;;  %v461_v1 = vrot.slane %v445_v54, %v9764_v4 }
 0x1cc   :  { %v670_v2 = vsel %vm606_vm10, %v574_v49, %v638_v57  ;;  %vm608_vm12 = vcmp.gt.f32.partialorder %v576_v55, 0.0  ;;  %v640_v3 = vmul.f32 0.2, %v576_v55  ;;  %v578_v6 = vadd.f32 %v510_v50, %v9776_v20 }
 0x1cd   :  { %v671_v7 = vsel %vm607_vm11, %v575_v53, %v639_v60  ;;  %v641_v8 = vmul.f32 0.2, %v577_v58  ;;  %v579_v9 = vadd.f32 %v514_v61, %v9773_v17  ;;  %v518_v10 = vrot.slane %v437_v62, %v9766_v5 }
 0x1ce   :  { %8254 = vmatmul.mubr.f32.gmra.mrb[4].mxu0 %v668_v56  ;;  %vm609_vm13 = vcmp.gt.f32.partialorder %v577_v58, 0.0  ;;  %v475_v11 = vrot.slane %v453_v0, %v9764_v4  ;;  %v522_v12 = vrot.slane %v461_v1, %v9766_v5  ;;  %v672_v13 = vsel %vm608_vm12, %v576_v55, %v640_v3 }
 0x1cf   :  { %8256 = vmatprep.mubr.f32.mxu0 %v669_v59  ;;  %v642_v14 = vmul.f32 0.2, %v578_v6  ;;  %v580_v15 = vadd.f32 %v514_v61, %v9776_v20  ;;  %v673_v16 = vsel %vm609_vm13, %v577_v58, %v641_v8  ;;  %vm610_vm14 = vcmp.gt.f32.partialorder %v578_v6, 0.0 }
 0x1d0   :  { %v643_v18 = vmul.f32 0.2, %v579_v9  ;;  %v581_v19 = vadd.f32 %v518_v10, %v9773_v17  ;;  %vm611_vm15 = vcmp.gt.f32.partialorder %v579_v9, 0.0  ;;  %v438_v21 = vcombine.high %v9790_v45, %v9790_v45 }
 0x1d1   :  { %v483_v22 = vcombine.high %v461_v1, %v461_v1  ;;  %v674_v23 = vsel %vm610_vm14, %v578_v6, %v642_v14  ;;  %v644_v24 = vmul.f32 0.2, %v580_v15  ;;  %v582_v25 = vadd.f32 %v518_v10, %v9776_v20 }
 0x1d2   :  { %8257 = vmatmul.mubr.f32.gmra.mrb[6].mxu0 %v670_v2  ;;  %v583_v26 = vadd.f32 %v522_v12, %v9773_v17  ;;  %v675_v28 = vsel %vm611_vm15, %v579_v9, %v643_v18  ;;  %vm612_vm0 = vcmp.gt.f32.partialorder %v580_v15, 0.0  ;;  %v645_v29 = vmul.f32 0.2, %v581_v19 }
 0x1d3   :  { %8259 = vmatprep.mubr.f32.mxu0 %v671_v7  ;;  %v526_v30 = vrot.slane %v475_v11, %v9766_v5  ;;  %vm613_vm1 = vcmp.gt.f32.partialorder %v581_v19, 0.0  ;;  %v452_v31 = vrot.slane %v438_v21, %v9764_v4  ;;  %v485_v32 = vcombine.high %v475_v11, %v475_v11 }
 0x1d4   :  { %v676_v33 = vsel %vm612_vm0, %v580_v15, %v644_v24  ;;  %v646_v34 = vmul.f32 0.2, %v582_v25  ;;  %v584_v35 = vadd.f32 %v522_v12, %v9776_v20  ;;  %v530_v36 = vrot.slane %v483_v22, %v9766_v5 }
 0x1d5   :  { %v677_v37 = vsel %vm613_vm1, %v581_v19, %v645_v29  ;;  %vm614_vm3 = vcmp.gt.f32.partialorder %v582_v25, 0.0  ;;  %v647_v38 = vmul.f32 0.2, %v583_v26  ;;  %v585_v39 = vadd.f32 %v526_v30, %v9773_v17 }
 0x1d6   :  { %8260 = vmatmul.mubr.f32.gmra.mrb[8].mxu0 %v672_v13  ;;  %vm615_vm4 = vcmp.gt.f32.partialorder %v583_v26, 0.0  ;;  %v454_v40 = vcombine.high %v452_v31, %v452_v31  ;;  %v468_v41 = vrot.slane %v452_v31, %v9764_v4  ;;  %v678_v42 = vsel %vm614_vm3, %v582_v25, %v646_v34 }
 0x1d7   :  { %8262 = vmatprep.mubr.f32.mxu0 %v673_v16  ;;  %vm616_vm5 = vcmp.gt.f32.partialorder %v584_v35, 0.0  ;;  %v648_v43 = vmul.f32 0.2, %v584_v35  ;;  %v586_v44 = vadd.f32 %v526_v30, %v9776_v20  ;;  %v679_v45 = vsel %vm615_vm4, %v583_v26, %v647_v38 }
 0x1d8   :  { %v649_v46 = vmul.f32 0.2, %v585_v39  ;;  %v587_v47 = vadd.f32 %v530_v36, %v9773_v17  ;;  %v534_v48 = vrot.slane %v485_v32, %v9766_v5  ;;  %vm617_vm6 = vcmp.gt.f32.partialorder %v585_v39, 0.0 }
 0x1d9   :  { %v482_v49 = vrot.slane %v454_v40, %v9764_v4  ;;  %v680_v50 = vsel %vm616_vm5, %v584_v35, %v648_v43  ;;  %vm618_vm7 = vcmp.gt.f32.partialorder %v586_v44, 0.0  ;;  %v650_v51 = vmul.f32 0.2, %v586_v44 }
 0x1da   :  { %8263 = vmatmul.mubr.f32.gmra.mrb[10].mxu0 %v674_v23  ;;  %v588_v52 = vadd.f32 %v530_v36, %v9776_v20  ;;  %v681_v53 = vsel %vm617_vm6, %v585_v39, %v649_v46  ;;  %v651_v54 = vmul.f32 0.2, %v587_v47  ;;  %v589_v55 = vadd.f32 %v534_v48, %v9773_v17 }
 0x1db   :  { %8265 = vmatprep.mubr.f32.mxu0 %v675_v28  ;;  %v538_v56 = vrot.slane %v468_v41, %v9766_v5  ;;  %vm619_vm8 = vcmp.gt.f32.partialorder %v587_v47, 0.0  ;;  %v484_v57 = vcombine.high %v468_v41, %v468_v41  ;;  %v682_v58 = vsel %vm618_vm7, %v586_v44, %v650_v51 }
 0x1dc   :  { %vm620_vm9 = vcmp.gt.f32.partialorder %v588_v52, 0.0  ;;  %v652_v59 = vmul.f32 0.2, %v588_v52  ;;  %v590_v60 = vadd.f32 %v534_v48, %v9776_v20  ;;  %v683_v61 = vsel %vm619_vm8, %v587_v47, %v651_v54 }
 0x1dd   :  { %v653_v62 = vmul.f32 0.2, %v589_v55  ;;  %v591_v0 = vadd.f32 %v538_v56, %v9773_v17  ;;  %v542_v1 = vrot.slane %v482_v49, %v9766_v5  ;;  %vm621_vm10 = vcmp.gt.f32.partialorder %v589_v55, 0.0 }
 0x1de   :  { %8266 = vmatmul.mubr.f32.gmra.mrb[12].mxu0 %v676_v33  ;;  %v592_v2 = vadd.f32 %v538_v56, %v9776_v20  ;;  %v684_v3 = vsel %vm620_vm9, %v588_v52, %v652_v59  ;;  %vm622_vm11 = vcmp.gt.f32.partialorder %v590_v60, 0.0  ;;  %v654_v6 = vmul.f32 0.2, %v590_v60 }
 0x1df   :  { %8268 = vmatprep.mubr.f32.mxu0 %v677_v37  ;;  %v546_v7 = vrot.slane %v484_v57, %v9766_v5  ;;  %v685_v8 = vsel %vm621_vm10, %v589_v55, %v653_v62  ;;  %v655_v9 = vmul.f32 0.2, %v591_v0  ;;  %v593_v10 = vadd.f32 %v542_v1, %v9773_v17  ;;  %v176_v37 = vld [vmem:[%s9841_s29] sm:$0xff] }
 0x1e0   :  { %v486_v11 = vcombine.high %v482_v49, %v482_v49  ;;  %vm623_vm12 = vcmp.gt.f32.partialorder %v591_v0, 0.0  ;;  %v686_v12 = vsel %vm622_vm11, %v590_v60, %v654_v6  ;;  %vm624_vm13 = vcmp.gt.f32.partialorder %v592_v2, 0.0  ;;  %8295 = vmatprep.subr.mxu1 %v176_v37 }
 0x1e1   :  { %v656_v13 = vmul.f32 0.2, %v592_v2  ;;  %v594_v14 = vadd.f32 %v542_v1, %v9776_v20  ;;  %v687_v15 = vsel %vm623_vm12, %v591_v0, %v655_v9  ;;  %v657_v16 = vmul.f32 0.2, %v593_v10  ;;  %8296 = vmatpush3.msra.mxu1 %v176_v37 }
 0x1e2   :  { %8269 = vmatmul.mubr.f32.gmra.mrb[14].mxu0 %v678_v42  ;;  %v595_v18 = vadd.f32 %v546_v7, %v9773_v17  ;;  %v550_v19 = vrot.slane %v486_v11, %v9766_v5  ;;  %vm625_vm14 = vcmp.gt.f32.partialorder %v593_v10, 0.0  ;;  %v596_v23 = vadd.f32 %v546_v7, %v9776_v20 }
 0x1e3   :  { %8271 = vmatprep.mubr.f32.mxu0 %v679_v45  ;;  %v688_v21 = vsel %vm624_vm13, %v592_v2, %v656_v13  ;;  %v658_v22 = vmul.f32 0.2, %v594_v14  ;;  %v689_v24 = vsel %vm625_vm14, %v593_v10, %v657_v16  ;;  %vm626_vm15 = vcmp.gt.f32.partialorder %v594_v14, 0.0 }
 0x1e4   :  { %v659_v25 = vmul.f32 0.2, %v595_v18  ;;  %v597_v26 = vadd.f32 %v550_v19, %v9773_v17  ;;  %vm627_vm0 = vcmp.gt.f32.partialorder %v595_v18, 0.0  ;;  %v660_v29 = vmul.f32 0.2, %v596_v23 }
 0x1e5   :  { %v690_v28 = vsel %vm626_vm15, %v594_v14, %v658_v22  ;;  %v598_v30 = vadd.f32 %v550_v19, %v9776_v20  ;;  %vm628_vm1 = vcmp.gt.f32.partialorder %v596_v23, 0.0  ;;  %vm936_vm5 = vcmask 64512  }
 0x1e6   :  { %8272 = vmatmul.mubr.f32.gmra.mrb[16].mxu0 %v680_v50  ;;  %v691_v31 = vsel %vm627_vm0, %v595_v18, %v659_v25  ;;  %v661_v32 = vmul.f32 0.2, %v597_v26  ;;  %vm629_vm3 = vcmp.gt.f32.partialorder %v597_v26, 0.0  ;;  %v692_v33 = vsel %vm628_vm1, %v596_v23, %v660_v29 }
 0x1e7   :  { %8274 = vmatprep.mubr.f32.mxu0 %v681_v53  ;;  %v662_v34 = vmul.f32 0.2, %v598_v30  ;;  %vm630_vm4 = vcmp.gt.f32.partialorder %v598_v30, 0.0  ;;  %vm2005_vm6 = vcmask 1041409   ;;  %vm2008_vm7 = vcmask 1042434  }
 0x1e8   :  { %v693_v35 = vsel %vm629_vm3, %v597_v26, %v661_v32  ;;  %vm2011_vm8 = vcmask 1043459   ;;  %vm2014_vm9 = vcmask 1044484   ;;  %vm2017_vm10 = vcmask 1045509  }
 0x1e9   :  { %v694_v36 = vsel %vm630_vm4, %v598_v30, %v662_v34  ;;  %vm2020_vm11 = vcmask 1046534   ;;  %vm2023_vm12 = vcmask 1047559  }
 0x1ea   :  { %8275 = vmatmul.mubr.f32.gmra.mrb[18].mxu0 %v682_v58 }
 0x1eb   :  { %8277 = vmatprep.mubr.f32.mxu0 %v683_v61 }
 0x1ee   :  { %8278 = vmatmul.mubr.f32.gmra.mrb[20].mxu0 %v684_v3 }
 0x1ef   :  { %8280 = vmatprep.mubr.f32.mxu0 %v685_v8 }
 0x1f2   :  { %8281 = vmatmul.mubr.f32.gmra.mrb[22].mxu0 %v686_v12 }
 0x1f3   :  { %8283 = vmatprep.mubr.f32.mxu0 %v687_v15 }
 0x1f6   :  { %8284 = vmatmul.mubr.f32.gmra.mrb[24].mxu0 %v688_v21 }
 0x1f7   :  { %8286 = vmatprep.mubr.f32.mxu0 %v689_v24 }
 0x1fa   :  { %8287 = vmatmul.mubr.f32.gmra.mrb[26].mxu0 %v690_v28 }
 0x1fb   :  { %8289 = vmatprep.mubr.f32.mxu0 %v691_v31 }
 0x1fe   :  { %8290 = vmatmul.mubr.f32.gmra.mrb[28].mxu0 %v692_v33 }
 0x1ff   :  { %8292 = vmatprep.mubr.f32.mxu0 %v693_v35 }
 0x202   :  { %8293 = vmatmul.mubr.f32.gmra.mrb[30].mxu0 %v694_v36 }
 0x299   :  { %v8249_v38 = vpop.f32.mrb[0].mxu0 }
 0x29a   :  { %v938_v39 = vsel %vm936_vm5, %v8249_v38, -inf  ;;  %v777_v40 = vpop.f32.mrb[1].mxu0 }
 0x29b   :  { %v937_v41 = vsel %vm936_vm5, %v777_v40, -inf }
 0x29c   :  { %v939_v42 = vmax.f32 %v937_v41, %v938_v39 }
 0x29d   :  { %v8252_v43 = vpop.f32.mrb[2].mxu0 }
 0x29e   :  { %v940_v44 = vrot.slane %v939_v42, 4  ;;  %v947_v45 = vsel %vm936_vm5, %v8252_v43, -inf  ;;  %v787_v46 = vpop.f32.mrb[3].mxu0 }
 0x29f   :  { %v946_v47 = vsel %vm936_vm5, %v787_v46, -inf }
 0x2a0   :  { %v941_v48 = vmax.f32 %v939_v42, %v940_v44  ;;  %v948_v49 = vmax.f32 %v946_v47, %v947_v45 }
 0x2a1   :  { %v9848_v50 = vpop.f32.mrb[4].mxu0 }
 0x2a2   :  { %v942_v51 = vrot.slane %v941_v48, 2  ;;  %v949_v52 = vrot.slane %v948_v49, 4  ;;  %v956_v53 = vsel %vm936_vm5, %v9848_v50, -inf  ;;  %v797_v54 = vpop.f32.mrb[5].mxu0 }
 0x2a3   :  { %v955_v55 = vsel %vm936_vm5, %v797_v54, -inf }
 0x2a4   :  { %v943_v56 = vmax.f32 %v941_v48, %v942_v51  ;;  %v950_v57 = vmax.f32 %v948_v49, %v949_v52  ;;  %v957_v58 = vmax.f32 %v955_v55, %v956_v53 }
 0x2a5   :  { %v9853_v59 = vpop.f32.mrb[6].mxu0 }
 0x2a6   :  { %v944_v60 = vrot.slane %v943_v56, 1  ;;  %v951_v61 = vrot.slane %v950_v57, 2  ;;  %v958_v62 = vrot.slane %v957_v58, 4  ;;  %v965_v0 = vsel %vm936_vm5, %v9853_v59, -inf  ;;  %v9857_v1 = vpop.f32.mrb[7].mxu0 }
 0x2a7   :  { %v964_v2 = vsel %vm936_vm5, %v9857_v1, -inf }
 0x2a8   :  { %v945_v3 = vmax.f32 %v943_v56, %v944_v60  ;;  %v952_v6 = vmax.f32 %v950_v57, %v951_v61  ;;  %v959_v7 = vmax.f32 %v957_v58, %v958_v62  ;;  %v966_v8 = vmax.f32 %v964_v2, %v965_v0  ;;  %v144_v2 = vld [vmem:[%s9878_s3] sm:$0xff] }
 0x2a9   :  { %v9861_v9 = vpop.f32.mrb[8].mxu0 }
 0x2aa   :  { %v1081_v10 = vsub.f32 %v777_v40, %v945_v3  ;;  %v1082_v11 = vsub.f32 %v8249_v38, %v945_v3  ;;  %v953_v12 = vrot.slane %v952_v6, 1  ;;  %v960_v13 = vrot.slane %v959_v7, 2  ;;  %v9863_v14 = vpop.f32.mrb[9].mxu0 }
 0x2ab   :  { %v967_v15 = vrot.slane %v966_v8, 4  ;;  %v974_v16 = vsel %vm936_vm5, %v9861_v9, -inf  ;;  %v973_v18 = vsel %vm936_vm5, %v9863_v14, -inf }
 0x2ac   :  { %v1113_v19 = vmul.f32 1.442695, %v1081_v10  ;;  %v954_v21 = vmax.f32 %v952_v6, %v953_v12  ;;  %v961_v22 = vmax.f32 %v959_v7, %v960_v13  ;;  %v1115_v23 = vmul.f32 1.442695, %v1082_v11 }
 0x2ad   :  { %v968_v24 = vmax.f32 %v966_v8, %v967_v15  ;;  %v975_v25 = vmax.f32 %v973_v18, %v974_v16  ;;  %v9869_v26 = vpop.f32.mrb[10].mxu0 }
 0x2ae   :  { %9177 = vpow2.f32 %v1113_v19  ;;  %v1083_v28 = vsub.f32 %v787_v46, %v954_v21  ;;  %v1084_v29 = vsub.f32 %v8252_v43, %v954_v21  ;;  %v962_v30 = vrot.slane %v961_v22, 1  ;;  %v9871_v31 = vpop.f32.mrb[11].mxu0 }
 0x2af   :  { %v969_v32 = vrot.slane %v968_v24, 2  ;;  %v976_v33 = vrot.slane %v975_v25, 4  ;;  %v983_v34 = vsel %vm936_vm5, %v9869_v26, -inf  ;;  %v982_v37 = vsel %vm936_vm5, %v9871_v31, -inf }
 0x2b0   :  { %v1117_v35 = vmul.f32 1.442695, %v1083_v28  ;;  %v963_v36 = vmax.f32 %v961_v22, %v962_v30  ;;  %9179 = vpow2.f32 %v1115_v23  ;;  %v984_v40 = vmax.f32 %v982_v37, %v983_v34 }
 0x2b1   :  { %v970_v38 = vmax.f32 %v968_v24, %v969_v32  ;;  %v977_v39 = vmax.f32 %v975_v25, %v976_v33  ;;  %v9882_v41 = vpop.f32.mrb[12].mxu0  ;;  %v1119_v42 = vmul.f32 1.442695, %v1084_v29  ;;  %v145_v25 = vld [vmem:[%s9878_s3 + $0x8] sm:$0xff] }
 0x2b2   :  { %v1085_v43 = vsub.f32 %v797_v54, %v963_v36  ;;  %v1086_v44 = vsub.f32 %v9848_v50, %v963_v36  ;;  %v992_v45 = vsel %vm936_vm5, %v9882_v41, -inf  ;;  %v9887_v46 = vpop.f32.mrb[13].mxu0  ;;  %v985_v49 = vrot.slane %v984_v40, 4 }
 0x2b3   :  { %v971_v47 = vrot.slane %v970_v38, 1  ;;  %v978_v48 = vrot.slane %v977_v39, 2  ;;  %9181 = vpow2.f32 %v1117_v35  ;;  %v991_v53 = vsel %vm936_vm5, %v9887_v46, -inf }
 0x2b4   :  { %v1121_v51 = vmul.f32 1.442695, %v1085_v43  ;;  %v1123_v52 = vmul.f32 1.442695, %v1086_v44  ;;  %v986_v54 = vmax.f32 %v984_v40, %v985_v49  ;;  %v993_v57 = vmax.f32 %v991_v53, %v992_v45 }
 0x2b5   :  { %v972_v55 = vmax.f32 %v970_v38, %v971_v47  ;;  %v979_v56 = vmax.f32 %v977_v39, %v978_v48  ;;  %v9891_v50 = vpop.f32.mrb[14].mxu0  ;;  %9183 = vpow2.f32 %v1119_v42 }
 0x2b6   :  { %v1001_v58 = vsel %vm936_vm5, %v9891_v50, -inf  ;;  %v9895_v60 = vpop.f32.mrb[15].mxu0  ;;  %9185 = vpow2.f32 %v1121_v51  ;;  %v987_v6 = vrot.slane %v986_v54, 2  ;;  %v994_v7 = vrot.slane %v993_v57, 4 }
 0x2b7   :  { %v1087_v61 = vsub.f32 %v9857_v1, %v972_v55  ;;  %v1088_v62 = vsub.f32 %v9853_v59, %v972_v55  ;;  %v980_v0 = vrot.slane %v979_v56, 1  ;;  %9187 = vpow2.f32 %v1123_v52 }
 0x2b8   :  { %v9178_v3 = vpop.eup %9177  ;;  %v1000_v8 = vsel %vm936_vm5, %v9895_v60, -inf  ;;  %v988_v16 = vmax.f32 %v986_v54, %v987_v6  ;;  %v995_v1 = vmax.f32 %v993_v57, %v994_v7 }
 0x2b9   :  { %v1125_v10 = vmul.f32 1.442695, %v1087_v61  ;;  %v1127_v11 = vmul.f32 1.442695, %v1088_v62  ;;  %v981_v12 = vmax.f32 %v979_v56, %v980_v0  ;;  %v1002_v13 = vmax.f32 %v1000_v8, %v1001_v58  ;;  %v9902_v15 = vpop.f32.mrb[16].mxu0 }
 0x2ba   :  { %v1010_v59 = vsel %vm936_vm5, %v9902_v15, -inf  ;;  %v9906_v18 = vpop.f32.mrb[17].mxu0  ;;  %v9908_v19 = vmul.f32 %v9178_v3, %v144_v2  ;;  %v9180_v21 = vpop.eup %9179  ;;  %v989_v28 = vrot.slane %v988_v16, 1  ;;  %v996_v29 = vrot.slane %v995_v1, 2 }
 0x2bb   :  { %9189 = vpow2.f32 %v1125_v10  ;;  %v1089_v22 = vsub.f32 %v9863_v14, %v981_v12  ;;  %v1090_v23 = vsub.f32 %v9861_v9, %v981_v12  ;;  %v1003_v24 = vrot.slane %v1002_v13, 4 }
 0x2bc   :  { %9191 = vpow2.f32 %v1127_v11  ;;  %v1009_v30 = vsel %vm936_vm5, %v9906_v18, -inf  ;;  %v990_v38 = vmax.f32 %v988_v16, %v989_v28  ;;  %v997_v14 = vmax.f32 %v995_v1, %v996_v29 }
 0x2bd   :  { %v1129_v32 = vmul.f32 1.442695, %v1089_v22  ;;  %v1131_v33 = vmul.f32 1.442695, %v1090_v23  ;;  %v1004_v34 = vmax.f32 %v1002_v13, %v1003_v24  ;;  %v1011_v35 = vmax.f32 %v1009_v30, %v1010_v59  ;;  %v9915_v36 = vpop.f32.mrb[18].mxu0  ;;  %v9917_v37 = vpop.eup %9181 }
 0x2be   :  { %v1019_v9 = vsel %vm936_vm5, %v9915_v36, -inf  ;;  %v9921_v39 = vpop.f32.mrb[19].mxu0  ;;  %v9923_v40 = vmul.f32 %v9180_v21, %v145_v25  ;;  %v1091_v47 = vsub.f32 %v9871_v31, %v990_v38  ;;  %v1092_v48 = vsub.f32 %v9869_v26, %v990_v38 }
 0x2bf   :  { %9193 = vpow2.f32 %v1129_v32  ;;  %v1005_v42 = vrot.slane %v1004_v34, 2  ;;  %v1012_v43 = vrot.slane %v1011_v35, 4  ;;  %v1018_v44 = vsel %vm936_vm5, %v9921_v39, -inf  ;;  %v9927_v45 = vpop.eup %9183 }
 0x2c0   :  { %9195 = vpow2.f32 %v1131_v33  ;;  %v998_v49 = vrot.slane %v997_v14, 1  ;;  %v9931_v51 = vpop.eup %9185  ;;  %v1020_v55 = vmax.f32 %v1018_v44, %v1019_v9  ;;  %v1209_v54 = vsel %vm936_vm5, %v9908_v19, 0.0 }
 0x2c1   :  { %v1006_v52 = vmax.f32 %v1004_v34, %v1005_v42  ;;  %v1013_v53 = vmax.f32 %v1011_v35, %v1012_v43  ;;  %v9933_v56 = vpop.f32.mrb[20].mxu0  ;;  %v9937_v57 = vpop.eup %9187  ;;  %v1133_v58 = vmul.f32 1.442695, %v1091_v47  ;;  %v1135_v61 = vmul.f32 1.442695, %v1092_v48 }
 0x2c2   :  { %v999_v62 = vmax.f32 %v997_v14, %v998_v49  ;;  %v1028_v31 = vsel %vm936_vm5, %v9933_v56, -inf  ;;  %v9941_v26 = vpop.f32.mrb[21].mxu0  ;;  %v1021_v3 = vrot.slane %v1020_v55, 4  ;;  %v1210_v33 = vsel %vm936_vm5, %v9923_v40, 0.0 }
 0x2c3   :  { %v1007_v0 = vrot.slane %v1006_v52, 1  ;;  %v1014_v2 = vrot.slane %v1013_v53, 2  ;;  %v1027_v6 = vsel %vm936_vm5, %v9941_v26, -inf  ;;  %9197 = vpow2.f32 %v1133_v58 }
 0x2c4   :  { %v1093_v7 = vsub.f32 %v9887_v46, %v999_v62  ;;  %v1094_v8 = vsub.f32 %v9882_v41, %v999_v62  ;;  %v1029_v10 = vmax.f32 %v1027_v6, %v1028_v31  ;;  %9199 = vpow2.f32 %v1135_v61 }
 0x2c5   :  { %v9947_v11 = vpop.eup %9189  ;;  %v1008_v12 = vmax.f32 %v1006_v52, %v1007_v0  ;;  %v1015_v13 = vmax.f32 %v1013_v53, %v1014_v2  ;;  %v1022_v16 = vmax.f32 %v1020_v55, %v1021_v3  ;;  %v9949_v1 = vpop.f32.mrb[22].mxu0  ;;  %v1211_v2 = vadd.f32 %v1210_v33, %v1209_v54 }
 0x2c6   :  { %v9951_v59 = vpop.eup %9191  ;;  %v1137_v21 = vmul.f32 1.442695, %v1093_v7  ;;  %v1139_v22 = vmul.f32 1.442695, %v1094_v8  ;;  %v1030_v23 = vrot.slane %v1029_v10, 4  ;;  %v1037_v24 = vsel %vm936_vm5, %v9949_v1, -inf }
 0x2c7   :  { %v1095_v46 = vsub.f32 %v9895_v60, %v1008_v12  ;;  %v1096_v41 = vsub.f32 %v9891_v50, %v1008_v12  ;;  %v1016_v25 = vrot.slane %v1015_v13, 1  ;;  %v1023_v28 = vrot.slane %v1022_v16, 2  ;;  %v9957_v29 = vpop.f32.mrb[23].mxu0 }
 0x2c8   :  { %9201 = vpow2.f32 %v1137_v21  ;;  %v1031_v30 = vmax.f32 %v1029_v10, %v1030_v23  ;;  %v1036_v32 = vsel %vm936_vm5, %v9957_v29, -inf }
 0x2c9   :  { %v9963_v34 = vpop.eup %9193  ;;  %9203 = vpow2.f32 %v1139_v22  ;;  %v1141_v35 = vmul.f32 1.442695, %v1095_v46  ;;  %v1143_v38 = vmul.f32 1.442695, %v1096_v41  ;;  %v1017_v60 = vmax.f32 %v1015_v13, %v1016_v25  ;;  %v9965_v14 = vpop.f32.mrb[24].mxu0 }
 0x2ca   :  { %v9967_v50 = vpop.eup %9195  ;;  %v1024_v9 = vmax.f32 %v1022_v16, %v1023_v28  ;;  %v1032_v42 = vrot.slane %v1031_v30, 2  ;;  %v1038_v43 = vmax.f32 %v1036_v32, %v1037_v24  ;;  %v1046_v44 = vsel %vm936_vm5, %v9965_v14, -inf  ;;  %v9971_v47 = vpop.f32.mrb[25].mxu0 }
 0x2cb   :  { %9205 = vpow2.f32 %v1141_v35  ;;  %v1097_v48 = vsub.f32 %v9906_v18, %v1017_v60  ;;  %v1098_v49 = vsub.f32 %v9902_v15, %v1017_v60  ;;  %v1045_v52 = vsel %vm936_vm5, %v9971_v47, -inf }
 0x2cc   :  { %9207 = vpow2.f32 %v1143_v38  ;;  %v1025_v53 = vrot.slane %v1024_v9, 1  ;;  %v1033_v55 = vmax.f32 %v1031_v30, %v1032_v42  ;;  %v1039_v58 = vrot.slane %v1038_v43, 4 }
 0x2cd   :  { %v1145_v61 = vmul.f32 1.442695, %v1097_v48  ;;  %v1147_v62 = vmul.f32 1.442695, %v1098_v49  ;;  %v1047_v31 = vmax.f32 %v1045_v52, %v1046_v44  ;;  %v9977_v0 = vpop.f32.mrb[26].mxu0  ;;  %v9979_v3 = vpop.eup %9197  ;;  %v1212_v16 = vrot.slane %v1211_v2, 4 }
 0x2ce   :  { %v1026_v6 = vmax.f32 %v1024_v9, %v1025_v53  ;;  %v1034_v7 = vrot.slane %v1033_v55, 1  ;;  %v1040_v18 = vmax.f32 %v1038_v43, %v1039_v58  ;;  %v1055_v15 = vsel %vm936_vm5, %v9977_v0, -inf  ;;  %v9983_v8 = vpop.f32.mrb[27].mxu0  ;;  %v9985_v10 = vpop.eup %9199 }
 0x2cf   :  { %9209 = vpow2.f32 %v1145_v61  ;;  %v1048_v12 = vrot.slane %v1047_v31, 4  ;;  %v1054_v13 = vsel %vm936_vm5, %v9983_v8, -inf  ;;  %v1213_v25 = vadd.f32 %v1212_v16, %v1211_v2 }
 0x2d0   :  { %9211 = vpow2.f32 %v1147_v62  ;;  %v1099_v54 = vsub.f32 %v9921_v39, %v1026_v6  ;;  %v1100_v21 = vsub.f32 %v9915_v36, %v1026_v6  ;;  %v1035_v22 = vmax.f32 %v1033_v55, %v1034_v7  ;;  %v146_v55 = vld [vmem:[%s9878_s3 + $0x10] sm:$0xff] }
 0x2d1   :  { %v1041_v23 = vrot.slane %v1040_v18, 2  ;;  %v1049_v24 = vmax.f32 %v1047_v31, %v1048_v12  ;;  %v1056_v46 = vmax.f32 %v1054_v13, %v1055_v15  ;;  %v9991_v41 = vpop.f32.mrb[28].mxu0  ;;  %v1214_v2 = vrot.slane %v1213_v25, 2  ;;  %v147_v15 = vld [vmem:[%s9878_s3 + $0x18] sm:$0xff] }
 0x2d2   :  { %v9993_v28 = vpop.eup %9201  ;;  %v1149_v30 = vmul.f32 1.442695, %v1099_v54  ;;  %v1151_v32 = vmul.f32 1.442695, %v1100_v21  ;;  %v1101_v33 = vsub.f32 %v9941_v26, %v1035_v22  ;;  %v1102_v35 = vsub.f32 %v9933_v56, %v1035_v22  ;;  %v9997_v38 = vpop.f32.mrb[29].mxu0 }
 0x2d3   :  { %v9999_v39 = vpop.eup %9203  ;;  %v1042_v36 = vmax.f32 %v1040_v18, %v1041_v23  ;;  %v1050_v60 = vrot.slane %v1049_v24, 2  ;;  %v1057_v9 = vrot.slane %v1056_v46, 4  ;;  %v1064_v42 = vsel %vm936_vm5, %v9991_v41, -inf }
 0x2d4   :  { %9213 = vpow2.f32 %v1149_v30  ;;  %v1153_v43 = vmul.f32 1.442695, %v1101_v33  ;;  %v1155_v44 = vmul.f32 1.442695, %v1102_v35  ;;  %v1063_v48 = vsel %vm936_vm5, %v9997_v38, -inf }
 0x2d5   :  { %v10005_v26 = vpop.eup %9205  ;;  %9215 = vpow2.f32 %v1151_v32  ;;  %v1043_v56 = vrot.slane %v1042_v36, 1  ;;  %v1051_v49 = vmax.f32 %v1049_v24, %v1050_v60  ;;  %v1058_v52 = vmax.f32 %v1056_v46, %v1057_v9  ;;  %v10007_v53 = vpop.f32.mrb[30].mxu0 }
 0x2d6   :  { %v10010_v58 = vpop.eup %9207  ;;  %9217 = vpow2.f32 %v1153_v43  ;;  %v1065_v61 = vmax.f32 %v1063_v48, %v1064_v42  ;;  %v1073_v62 = vsel %vm936_vm5, %v10007_v53, -inf  ;;  %v10014_v31 = vpop.f32.mrb[31].mxu0  ;;  %v1215_v16 = vadd.f32 %v1214_v2, %v1213_v25 }
 0x2d7   :  { %9219 = vpow2.f32 %v1155_v44  ;;  %v1044_v6 = vmax.f32 %v1042_v36, %v1043_v56  ;;  %v1052_v7 = vrot.slane %v1051_v49, 1  ;;  %v1059_v18 = vrot.slane %v1058_v52, 2  ;;  %v148_v44 = vld [vmem:[%s9878_s3 + $0x20] sm:$0xff] }
 0x2d8   :  { %v1066_v12 = vrot.slane %v1065_v61, 4  ;;  %v1072_v13 = vsel %vm936_vm5, %v10014_v31, -inf  ;;  %v10020_v54 = vmul.f32 %v9917_v37, %v146_v55  ;;  %v1216_v35 = vrot.slane %v1215_v16, 1 }
 0x2d9   :  { %v10022_v21 = vpop.eup %9209  ;;  %v1103_v22 = vsub.f32 %v9957_v29, %v1044_v6  ;;  %v1104_v23 = vsub.f32 %v9949_v1, %v1044_v6  ;;  %v1053_v24 = vmax.f32 %v1051_v49, %v1052_v7  ;;  %v1060_v46 = vmax.f32 %v1058_v52, %v1059_v18 }
 0x2da   :  { %v10026_v30 = vpop.eup %9211  ;;  %v1067_v32 = vmax.f32 %v1065_v61, %v1066_v12  ;;  %v1074_v33 = vmax.f32 %v1072_v13, %v1073_v62  ;;  %v10029_v36 = vmul.f32 %v9927_v45, %v147_v15  ;;  %v1217_v43 = vadd.f32 %v1216_v35, %v1215_v16  ;;  %v149_v61 = vld [vmem:[%s9878_s3 + $0x28] sm:$0xff]  ;;  %v150_v13 = vld [vmem:[%s9878_s3 + $0x30] sm:$0xff] }
 0x2db   :  { %v1157_v25 = vmul.f32 1.442695, %v1103_v22  ;;  %v1159_v37 = vmul.f32 1.442695, %v1104_v23  ;;  %v1105_v60 = vsub.f32 %v9971_v47, %v1053_v24  ;;  %v1106_v29 = vsub.f32 %v9965_v14, %v1053_v24 }
 0x2dc   :  { %v1061_v9 = vrot.slane %v1060_v46, 1  ;;  %v1068_v1 = vrot.slane %v1067_v32, 2  ;;  %v1075_v42 = vrot.slane %v1074_v33, 4  ;;  %v1218_v49 = vsel %vm936_vm5, %v10020_v54, 0.0 }
 0x2dd   :  { %9221 = vpow2.f32 %v1157_v25  ;;  %v1161_v48 = vmul.f32 1.442695, %v1105_v60  ;;  %v1163_v56 = vmul.f32 1.442695, %v1106_v29  ;;  %v1353_v62 = vmax.f32 %v1217_v43, 1e-16 }
 0x2de   :  { %v10036_v45 = vpop.eup %9213  ;;  %9223 = vpow2.f32 %v1159_v37  ;;  %v1062_v52 = vmax.f32 %v1060_v46, %v1061_v9  ;;  %v1069_v47 = vmax.f32 %v1067_v32, %v1068_v1  ;;  %v1076_v55 = vmax.f32 %v1074_v33, %v1075_v42  ;;  %v151_v33 = vld [vmem:[%s9878_s3 + $0x38] sm:$0xff]  ;;  %v152_v9 = vld [vmem:[%s9878_s3 + $0x40] sm:$0xff] }
 0x2df   :  { %v10039_v14 = vpop.eup %9215  ;;  %9225 = vpow2.f32 %v1161_v48  ;;  %v1219_v2 = vsel %vm936_vm5, %v10029_v36, 0.0  ;;  %v10044_v6 = vmul.f32 %v9931_v51, %v148_v44  ;;  %v10054_v24 = vmul.f32 %v9937_v57, %v149_v61  ;;  %v153_v44 = vld [vmem:[%s9878_s3 + $0x48] sm:$0xff] }
 0x2e0   :  { %v10046_v7 = vpop.eup %9217  ;;  %9227 = vpow2.f32 %v1163_v56  ;;  %v1107_v18 = vsub.f32 %v9983_v8, %v1062_v52  ;;  %v1108_v15 = vsub.f32 %v9977_v0, %v1062_v52  ;;  %v1070_v12 = vrot.slane %v1069_v47, 1 }
 0x2e1   :  { %v10051_v16 = vpop.eup %9219  ;;  %v1077_v22 = vrot.slane %v1076_v55, 2  ;;  %9229 = vrcp.f32 %v1353_v62  ;;  %v1220_v23 = vadd.f32 %v1219_v2, %v1218_v49  ;;  %v1227_v8 = vsel %vm936_vm5, %v10044_v6, 0.0 }
 0x2e2   :  { %v1165_v51 = vmul.f32 1.442695, %v1107_v18  ;;  %v1167_v46 = vmul.f32 1.442695, %v1108_v15  ;;  %v1071_v32 = vmax.f32 %v1069_v47, %v1070_v12  ;;  %v1228_v25 = vsel %vm936_vm5, %v10054_v24, 0.0 }
 0x2e3   :  { %v1078_v0 = vmax.f32 %v1076_v55, %v1077_v22  ;;  %v1221_v35 = vrot.slane %v1220_v23, 4  ;;  %v10062_v37 = vmul.f32 %v9947_v11, %v150_v13  ;;  %v1229_v29 = vadd.f32 %v1228_v25, %v1227_v8 }
 0x2e4   :  { %9231 = vpow2.f32 %v1165_v51  ;;  %v1109_v57 = vsub.f32 %v9997_v38, %v1071_v32  ;;  %v1110_v60 = vsub.f32 %v9991_v41, %v1071_v32  ;;  %v10068_v43 = vmul.f32 %v9951_v59, %v151_v33 }
 0x2e5   :  { %9233 = vpow2.f32 %v1167_v46  ;;  %v1079_v1 = vrot.slane %v1078_v0, 1  ;;  %v1222_v42 = vadd.f32 %v1221_v35, %v1220_v23  ;;  %v1230_v49 = vrot.slane %v1229_v29, 4  ;;  %v154_v46 = vld [vmem:[%s9878_s3 + $0x50] sm:$0xff] }
 0x2e6   :  { %v1169_v48 = vmul.f32 1.442695, %v1109_v57  ;;  %v1171_v56 = vmul.f32 1.442695, %v1110_v60  ;;  %v1236_v11 = vsel %vm936_vm5, %v10062_v37, 0.0  ;;  %v1237_v41 = vsel %vm936_vm5, %v10068_v43, 0.0 }
 0x2e7   :  { %v10073_v52 = vpop.eup %9221  ;;  %v1080_v38 = vmax.f32 %v1078_v0, %v1079_v1  ;;  %v1223_v47 = vrot.slane %v1222_v42, 2  ;;  %v10078_v55 = vmul.f32 %v9963_v34, %v152_v9  ;;  %v1231_v61 = vadd.f32 %v1230_v49, %v1229_v29  ;;  %v156_v29 = vld [vmem:[%s9878_s3 + $0x60] sm:$0xff] }
 0x2e8   :  { %v10080_v59 = vpop.eup %9223  ;;  %9235 = vpow2.f32 %v1169_v48  ;;  %v1238_v62 = vadd.f32 %v1237_v41, %v1236_v11  ;;  %v10083_v2 = vmul.f32 %v9967_v50, %v153_v44  ;;  %v157_v44 = vld [vmem:[%s9878_s3 + $0x68] sm:$0xff]  ;;  %v158_v41 = vld [vmem:[%s9878_s3 + $0x70] sm:$0xff] }
 0x2e9   :  { %v10085_v18 = vpop.eup %9225  ;;  %9237 = vpow2.f32 %v1171_v56  ;;  %v1111_v15 = vsub.f32 %v10014_v31, %v1080_v38  ;;  %v1112_v12 = vsub.f32 %v10007_v53, %v1080_v38  ;;  %v1224_v13 = vadd.f32 %v1223_v47, %v1222_v42  ;;  %v155_v53 = vld [vmem:[%s9878_s3 + $0x58] sm:$0xff] }
 0x2ea   :  { %v10089_v34 = vpop.eup %9227  ;;  %v1232_v22 = vrot.slane %v1231_v61, 2  ;;  %v1239_v23 = vrot.slane %v1238_v62, 4  ;;  %v1245_v51 = vsel %vm936_vm5, %v10078_v55, 0.0  ;;  %v1246_v50 = vsel %vm936_vm5, %v10083_v2, 0.0 }
 0x2eb   :  { %v9230_v32 = vpop.eup %9229  ;;  %v1173_v8 = vmul.f32 1.442695, %v1111_v15  ;;  %v1175_v33 = vmul.f32 1.442695, %v1112_v12  ;;  %v1225_v31 = vrot.slane %v1224_v13, 1  ;;  %v1247_v0 = vadd.f32 %v1246_v50, %v1245_v51  ;;  %v159_v12 = vld [vmem:[%s9878_s3 + $0x78] sm:$0xff] }
 0x2ec   :  { %v1370_v35 = vmul.f32 %v9230_v32, %v9908_v19  ;;  %v1371_v25 = vmul.f32 %v9230_v32, %v9923_v40  ;;  %v1233_v57 = vadd.f32 %v1232_v22, %v1231_v61  ;;  %v1240_v60 = vadd.f32 %v1239_v23, %v1238_v62  ;;  %v160_v51 = vld [vmem:[%s9878_s3 + $0x80] sm:$0xff] }
 0x2ed   :  { %9239 = vpow2.f32 %v1173_v8  ;;  %v1226_v9 = vadd.f32 %v1225_v31, %v1224_v13  ;;  %v1248_v1 = vrot.slane %v1247_v0, 4  ;;  %v10101_v42 = vmul.f32 %v9979_v3, %v154_v46 }
 0x2ee   :  { %v10104_v48 = vpop.eup %9231  ;;  %9241 = vpow2.f32 %v1175_v33  ;;  %8297 = vmatprep.mubr.msk.f32.mxu1 %vm936_vm5, %v1370_v35  ;;  %v1234_v19 = vrot.slane %v1233_v57, 1  ;;  %v1241_v56 = vrot.slane %v1240_v60, 2  ;;  %v10108_v40 = vmul.f32 %v9985_v10, %v155_v53  ;;  %v161_v35 = vld [vmem:[%s9878_s3 + $0x88] sm:$0xff] }
 0x2ef   :  { %v10110_v49 = vpop.eup %9233  ;;  %8298 = vmatmul.mubr.msk.f32.vlgmr.msra.gmra.mrb[6].mxu1 %vm936_vm5, %v1371_v25  ;;  %v1354_v11 = vmax.f32 %v1226_v9, 1e-16  ;;  %v1249_v3 = vadd.f32 %v1248_v1, %v1247_v0  ;;  %v1254_v38 = vsel %vm936_vm5, %v10101_v42, 0.0  ;;  %v10116_v47 = vmul.f32 %v9993_v28, %v156_v29 }
 0x2f0   :  { %v1235_v61 = vadd.f32 %v1234_v19, %v1233_v57  ;;  %v1242_v62 = vadd.f32 %v1241_v56, %v1240_v60  ;;  %v1255_v10 = vsel %vm936_vm5, %v10108_v40, 0.0  ;;  %v10122_v15 = vmul.f32 %v9999_v39, %v157_v44  ;;  %v163_v19 = vld [vmem:[%s9878_s3 + $0x98] sm:$0xff] }
 0x2f1   :  { %9243 = vrcp.f32 %v1354_v11  ;;  %v1250_v13 = vrot.slane %v1249_v3, 2  ;;  %v1256_v22 = vadd.f32 %v1255_v10, %v1254_v38  ;;  %v1263_v23 = vsel %vm936_vm5, %v10116_v47, 0.0  ;;  %v164_v10 = vld [vmem:[%s9878_s3 + $0xa0] sm:$0xff] }
 0x2f2   :  { %v10128_v28 = vpop.eup %9235  ;;  %v1355_v50 = vmax.f32 %v1235_v61, 1e-16  ;;  %v1243_v46 = vrot.slane %v1242_v62, 1  ;;  %v1264_v32 = vsel %vm936_vm5, %v10122_v15, 0.0  ;;  %v10133_v39 = vmul.f32 %v10005_v26, %v158_v41  ;;  %v162_v26 = vld [vmem:[%s9878_s3 + $0x90] sm:$0xff] }
 0x2f3   :  { %v10135_v8 = vpop.eup %9237  ;;  %v1251_v33 = vadd.f32 %v1250_v13, %v1249_v3  ;;  %v1257_v31 = vrot.slane %v1256_v22, 4  ;;  %v1265_v0 = vadd.f32 %v1264_v32, %v1263_v23  ;;  %v10138_v53 = vmul.f32 %v10010_v58, %v159_v12 }
 0x2f4   :  { %9245 = vrcp.f32 %v1355_v50  ;;  %v1244_v25 = vadd.f32 %v1243_v46, %v1242_v62  ;;  %v1272_v57 = vsel %vm936_vm5, %v10133_v39, 0.0  ;;  %v10144_v60 = vmul.f32 %v10022_v21, %v160_v51 }
 0x2f5   :  { %v1252_v29 = vrot.slane %v1251_v33, 1  ;;  %v1258_v9 = vadd.f32 %v1257_v31, %v1256_v22  ;;  %v1266_v1 = vrot.slane %v1265_v0, 4  ;;  %v1273_v44 = vsel %vm936_vm5, %v10138_v53, 0.0  ;;  %v165_v31 = vld [vmem:[%s9878_s3 + $0xa8] sm:$0xff] }
 0x2f6   :  { %v1356_v58 = vmax.f32 %v1244_v25, 1e-16  ;;  %v1274_v56 = vadd.f32 %v1273_v44, %v1272_v57  ;;  %v10151_v11 = vmul.f32 %v10026_v30, %v161_v35  ;;  %v1281_v3 = vsel %vm936_vm5, %v10144_v60, 0.0 }
 0x2f7   :  { %v10155_v38 = vpop.eup %9239  ;;  %v1253_v21 = vadd.f32 %v1252_v29, %v1251_v33  ;;  %v1259_v41 = vrot.slane %v1258_v9, 2  ;;  %v1267_v61 = vadd.f32 %v1266_v1, %v1265_v0  ;;  %v10158_v62 = vmul.f32 %v10036_v45, %v162_v26  ;;  %v166_v26 = vld [vmem:[%s9878_s3 + $0xb0] sm:$0xff] }
 0x2f8   :  { %v10161_v12 = vpop.eup %9241  ;;  %9247 = vrcp.f32 %v1356_v58  ;;  %v1275_v13 = vrot.slane %v1274_v56, 4  ;;  %v1282_v30 = vsel %vm936_vm5, %v10151_v11, 0.0  ;;  %v10166_v22 = vmul.f32 %v10039_v14, %v163_v19 }
 0x2f9   :  { %v1357_v23 = vmax.f32 %v1253_v21, 1e-16  ;;  %v1260_v51 = vadd.f32 %v1259_v41, %v1258_v9  ;;  %v1268_v50 = vrot.slane %v1267_v61, 2  ;;  %v1283_v46 = vadd.f32 %v1282_v30, %v1281_v3 }
 0x2fa   :  { %v1276_v32 = vadd.f32 %v1275_v13, %v1274_v56  ;;  %v1290_v45 = vsel %vm936_vm5, %v10158_v62, 0.0  ;;  %v1291_v33 = vsel %vm936_vm5, %v10166_v22, 0.0  ;;  %v10174_v0 = vmul.f32 %v10046_v7, %v164_v10  ;;  %v167_v10 = vld [vmem:[%s9878_s3 + $0xb8] sm:$0xff] }
 0x2fb   :  { %v9244_v35 = vpop.eup %9243  ;;  %9249 = vrcp.f32 %v1357_v23  ;;  %v1261_v25 = vrot.slane %v1260_v51, 1  ;;  %v1269_v14 = vadd.f32 %v1268_v50, %v1267_v61  ;;  %v1284_v57 = vrot.slane %v1283_v46, 4 }
 0x2fc   :  { %v1373_v29 = vmul.f32 %v9244_v35, %v10020_v54  ;;  %v1374_v9 = vmul.f32 %v9244_v35, %v10029_v36  ;;  %v1277_v1 = vrot.slane %v1276_v32, 2  ;;  %v1292_v44 = vadd.f32 %v1291_v33, %v1290_v45 }
 0x2fd   :  { %v1262_v19 = vadd.f32 %v1261_v25, %v1260_v51  ;;  %v1270_v58 = vrot.slane %v1269_v14, 1  ;;  %v1285_v56 = vadd.f32 %v1284_v57, %v1283_v46  ;;  %v10180_v3 = vmul.f32 %v10051_v16, %v165_v31  ;;  %v168_v25 = vld [vmem:[%s9878_s3 + $0xc0] sm:$0xff] }
 0x2fe   :  { %v9246_v7 = vpop.eup %9245  ;;  %8300 = vmatprep.mubr.msk.f32.mxu1 %vm936_vm5, %v1373_v29  ;;  %v1278_v21 = vadd.f32 %v1277_v1, %v1276_v32  ;;  %v1293_v41 = vrot.slane %v1292_v44, 4  ;;  %v1299_v61 = vsel %vm936_vm5, %v10174_v0, 0.0  ;;  %v10187_v54 = vmul.f32 %v10073_v52, %v166_v26 }
 0x2ff   :  { %8301 = vmatmul.mubr.msk.f32.gmra.mrb[8].mxu1 %vm936_vm5, %v1374_v9  ;;  %v1376_v36 = vmul.f32 %v9246_v7, %v10044_v6  ;;  %v1377_v13 = vmul.f32 %v9246_v7, %v10054_v24  ;;  %v1358_v16 = vmax.f32 %v1262_v19, 1e-16  ;;  %v1271_v30 = vadd.f32 %v1270_v58, %v1269_v14  ;;  %v169_v14 = vld [vmem:[%s9878_s3 + $0xc8] sm:$0xff] }
 0x300   :  { %v1279_v23 = vrot.slane %v1278_v21, 1  ;;  %v1286_v51 = vrot.slane %v1285_v56, 2  ;;  %v1294_v50 = vadd.f32 %v1293_v41, %v1292_v44  ;;  %v1300_v46 = vsel %vm936_vm5, %v10180_v3, 0.0 }
 0x301   :  { %8303 = vmatprep.mubr.msk.f32.mxu1 %vm936_vm5, %v1376_v36  ;;  %9251 = vrcp.f32 %v1358_v16  ;;  %v1359_v52 = vmax.f32 %v1271_v30, 1e-16  ;;  %v1301_v32 = vadd.f32 %v1300_v46, %v1299_v61  ;;  %v10196_v45 = vmul.f32 %v10080_v59, %v167_v10  ;;  %v172_v30 = vld [vmem:[%s9878_s3 + $0xe0] sm:$0xff] }
 0x302   :  { %v9248_v6 = vpop.eup %9247  ;;  %v1280_v24 = vadd.f32 %v1279_v23, %v1278_v21  ;;  %v1287_v33 = vadd.f32 %v1286_v51, %v1285_v56  ;;  %v1295_v31 = vrot.slane %v1294_v50, 2  ;;  %v1308_v35 = vsel %vm936_vm5, %v10187_v54, 0.0  ;;  %v171_v21 = vld [vmem:[%s9878_s3 + $0xd8] sm:$0xff] }
 0x303   :  { %8304 = vmatmul.mubr.msk.f32.gmra.mrb[10].mxu1 %vm936_vm5, %v1377_v13  ;;  %v1379_v57 = vmul.f32 %v9248_v6, %v10062_v37  ;;  %v1380_v26 = vmul.f32 %v9248_v6, %v10068_v43  ;;  %9253 = vrcp.f32 %v1359_v52  ;;  %v1302_v59 = vrot.slane %v1301_v32, 4  ;;  %v170_v43 = vld [vmem:[%s9878_s3 + $0xd0] sm:$0xff] }
 0x304   :  { %v1360_v29 = vmax.f32 %v1280_v24, 1e-16  ;;  %v1288_v9 = vrot.slane %v1287_v33, 1  ;;  %v1296_v1 = vadd.f32 %v1295_v31, %v1294_v50  ;;  %v1309_v44 = vsel %vm936_vm5, %v10196_v45, 0.0 }
 0x305   :  { %v9250_v19 = vpop.eup %9249  ;;  %8306 = vmatprep.mubr.msk.f32.mxu1 %vm936_vm5, %v1379_v57  ;;  %v1303_v58 = vadd.f32 %v1302_v59, %v1301_v32  ;;  %v1310_v56 = vadd.f32 %v1309_v44, %v1308_v35  ;;  %v10209_v7 = vmul.f32 %v10085_v18, %v168_v25  ;;  %v10212_v37 = vmul.f32 %v10089_v34, %v169_v14  ;;  %v173_v32 = vld [vmem:[%s9878_s3 + $0xe8] sm:$0xff]  ;;  %v174_v44 = vld [vmem:[%s9878_s3 + $0xf0] sm:$0xff] }
 0x306   :  { %v1382_v41 = vmul.f32 %v9250_v19, %v10078_v55  ;;  %v1383_v61 = vmul.f32 %v9250_v19, %v10083_v2  ;;  %9255 = vrcp.f32 %v1360_v29  ;;  %v1289_v10 = vadd.f32 %v1288_v9, %v1287_v33  ;;  %v175_v19 = vld [vmem:[%s9878_s3 + $0xf8] sm:$0xff] }
 0x307   :  { %8307 = vmatmul.mubr.msk.f32.gmra.mrb[12].mxu1 %vm936_vm5, %v1380_v26  ;;  %v1297_v36 = vrot.slane %v1296_v1, 1  ;;  %v1304_v13 = vrot.slane %v1303_v58, 2  ;;  %v1311_v16 = vrot.slane %v1310_v56, 4  ;;  %v1317_v18 = vsel %vm936_vm5, %v10209_v7, 0.0 }
 0x308   :  { %8309 = vmatprep.mubr.msk.f32.mxu1 %vm936_vm5, %v1382_v41  ;;  %v1361_v34 = vmax.f32 %v1289_v10, 1e-16  ;;  %v1318_v55 = vsel %vm936_vm5, %v10212_v37, 0.0  ;;  %v10226_v2 = vmul.f32 %v10104_v48, %v170_v43  ;;  %v10229_v23 = vmul.f32 %v10110_v49, %v171_v21 }
 0x309   :  { %v1298_v51 = vadd.f32 %v1297_v36, %v1296_v1  ;;  %v1305_v50 = vadd.f32 %v1304_v13, %v1303_v58  ;;  %v1312_v46 = vadd.f32 %v1311_v16, %v1310_v56  ;;  %v1319_v52 = vadd.f32 %v1318_v55, %v1317_v18 }
 0x30a   :  { %9257 = vrcp.f32 %v1361_v34  ;;  %v1326_v6 = vsel %vm936_vm5, %v10226_v2, 0.0  ;;  %v1327_v24 = vsel %vm936_vm5, %v10229_v23, 0.0  ;;  %v10237_v33 = vmul.f32 %v10128_v28, %v172_v30 }
 0x30b   :  { %v9252_v48 = vpop.eup %9251  ;;  %8310 = vmatmul.mubr.msk.f32.gmra.mrb[14].mxu1 %vm936_vm5, %v1383_v61  ;;  %v1362_v49 = vmax.f32 %v1298_v51, 1e-16  ;;  %v1306_v31 = vrot.slane %v1305_v50, 1  ;;  %v1313_v35 = vrot.slane %v1312_v46, 2  ;;  %v1320_v25 = vrot.slane %v1319_v52, 4 }
 0x30c   :  { %v1385_v14 = vmul.f32 %v9252_v48, %v10101_v42  ;;  %v1386_v57 = vmul.f32 %v9252_v48, %v10108_v40  ;;  %v1328_v26 = vadd.f32 %v1327_v24, %v1326_v6  ;;  %v10243_v59 = vmul.f32 %v10135_v8, %v173_v32 }
 0x30d   :  { %v9254_v29 = vpop.eup %9253  ;;  %9259 = vrcp.f32 %v1362_v49  ;;  %v1307_v28 = vadd.f32 %v1306_v31, %v1305_v50  ;;  %v1314_v9 = vadd.f32 %v1313_v35, %v1312_v46  ;;  %v1321_v1 = vadd.f32 %v1320_v25, %v1319_v52 }
 0x30e   :  { %8312 = vmatprep.mubr.msk.f32.mxu1 %vm936_vm5, %v1385_v14  ;;  %v1388_v58 = vmul.f32 %v9254_v29, %v10116_v47  ;;  %v1389_v56 = vmul.f32 %v9254_v29, %v10122_v15  ;;  %v1329_v42 = vrot.slane %v1328_v26, 4  ;;  %v1335_v40 = vsel %vm936_vm5, %v10237_v33, 0.0 }
 0x30f   :  { %8313 = vmatmul.mubr.msk.f32.gmra.mrb[16].mxu1 %vm936_vm5, %v1386_v57  ;;  %v1363_v8 = vmax.f32 %v1307_v28, 1e-16  ;;  %v1315_v43 = vrot.slane %v1314_v9, 1  ;;  %v1322_v21 = vrot.slane %v1321_v1, 2  ;;  %v1336_v41 = vsel %vm936_vm5, %v10243_v59, 0.0 }
 0x310   :  { %v9256_v61 = vpop.eup %9255  ;;  %8315 = vmatprep.mubr.msk.f32.mxu1 %vm936_vm5, %v1388_v58  ;;  %v1330_v10 = vadd.f32 %v1329_v42, %v1328_v26  ;;  %v1337_v36 = vadd.f32 %v1336_v41, %v1335_v40  ;;  %v10257_v47 = vmul.f32 %v10155_v38, %v174_v44  ;;  %v10260_v15 = vmul.f32 %v10161_v12, %v175_v19 }
 0x311   :  { %v1391_v13 = vmul.f32 %v9256_v61, %v10133_v39  ;;  %v1392_v16 = vmul.f32 %v9256_v61, %v10138_v53  ;;  %9261 = vrcp.f32 %v1363_v8  ;;  %v1316_v18 = vadd.f32 %v1315_v43, %v1314_v9 }
 0x312   :  { %v1323_v30 = vadd.f32 %v1322_v21, %v1321_v1  ;;  %v1331_v34 = vrot.slane %v1330_v10, 2  ;;  %v1338_v55 = vrot.slane %v1337_v36, 4  ;;  %v1344_v51 = vsel %vm936_vm5, %v10257_v47, 0.0 }
 0x313   :  { %8316 = vmatmul.mubr.msk.f32.gmra.mrb[18].mxu1 %vm936_vm5, %v1389_v56  ;;  %v1364_v50 = vmax.f32 %v1316_v18, 1e-16  ;;  %v1345_v38 = vsel %vm936_vm5, %v10260_v15, 0.0  ;;  %v1949_v18 = vld [vmem:[%s10307_s7 + $0x28] sm:$0xff] }
 0x314   :  { %v9258_v12 = vpop.eup %9257  ;;  %8318 = vmatprep.mubr.msk.f32.mxu1 %vm936_vm5, %v1391_v13  ;;  %v1324_v39 = vrot.slane %v1323_v30, 1  ;;  %v1332_v46 = vadd.f32 %v1331_v34, %v1330_v10  ;;  %v1339_v53 = vadd.f32 %v1338_v55, %v1337_v36  ;;  %v1346_v52 = vadd.f32 %v1345_v38, %v1344_v51  ;;  %v1946_v13 = vld [vmem:[%s10307_s7 + $0x10] sm:$0xff]  ;;  %v1948_v55 = vld [vmem:[%s10307_s7 + $0x20] sm:$0xff]  ;;  %v1953_v38 = vld [vmem:[%s10307_s7 + $0x48] sm:$0xff] }
 0x315   :  { %v1394_v32 = vmul.f32 %v9258_v12, %v10144_v60  ;;  %v1395_v6 = vmul.f32 %v9258_v12, %v10151_v11  ;;  %9263 = vrcp.f32 %v1364_v50  ;;  %v1950_v51 = vld [vmem:[%s10307_s7 + $0x30] sm:$0xff]  ;;  %v1955_v12 = vld [vmem:[%s10307_s7 + $0x58] sm:$0xff] }
 0x316   :  { %v1325_v24 = vadd.f32 %v1324_v39, %v1323_v30  ;;  %v1333_v48 = vrot.slane %v1332_v46, 1  ;;  %v1340_v49 = vrot.slane %v1339_v53, 2  ;;  %v1347_v31 = vrot.slane %v1346_v52, 4  ;;  %v1951_v30 = vld [vmem:[%s10307_s7 + $0x38] sm:$0xff] }
 0x317   :  { %v9260_v35 = vpop.eup %9259  ;;  %8319 = vmatmul.mubr.msk.f32.gmra.mrb[20].mxu1 %vm936_vm5, %v1392_v16  ;;  %v8888_v34 = vpack.c.bf16 %v1951_v30, %v1949_v18  ;;  %v8890_v50 = vpack.c.bf16 %v1950_v51, %v1948_v55  ;;  %v8892_v39 = vpack.c.bf16 %v1955_v12, %v1953_v38 }
 0x318   :  { %8321 = vmatprep.mubr.msk.f32.mxu1 %vm936_vm5, %v1394_v32  ;;  %v1397_v25 = vmul.f32 %v9260_v35, %v10158_v62  ;;  %v1398_v14 = vmul.f32 %v9260_v35, %v10166_v22  ;;  %v1365_v57 = vmax.f32 %v1325_v24, 1e-16  ;;  %v1334_v26 = vadd.f32 %v1333_v48, %v1332_v46  ;;  %v1952_v46 = vld [vmem:[%s10307_s7 + $0x40] sm:$0xff]  ;;  %v1957_v32 = vld [vmem:[%s10307_s7 + $0x68] sm:$0xff] }
 0x319   :  { %v1341_v29 = vadd.f32 %v1340_v49, %v1339_v53  ;;  %v1348_v60 = vadd.f32 %v1347_v31, %v1346_v52  ;;  %v1954_v53 = vld [vmem:[%s10307_s7 + $0x50] sm:$0xff]  ;;  %v1956_v48 = vld [vmem:[%s10307_s7 + $0x60] sm:$0xff]  ;;  %v1961_v35 = vld [vmem:[%s10307_s7 + $0x88] sm:$0xff] }
 0x31a   :  { %9265 = vrcp.f32 %v1365_v57  ;;  %v1366_v11 = vmax.f32 %v1334_v26, 1e-16  ;;  %v8894_v52 = vpack.c.bf16 %v1954_v53, %v1952_v46  ;;  %v1958_v49 = vld [vmem:[%s10307_s7 + $0x70] sm:$0xff]  ;;  %v1960_v57 = vld [vmem:[%s10307_s7 + $0x80] sm:$0xff] }
 0x31b   :  { %v9262_v28 = vpop.eup %9261  ;;  %8322 = vmatmul.mubr.msk.f32.gmra.mrb[22].mxu1 %vm936_vm5, %v1395_v6  ;;  %v1342_v9 = vrot.slane %v1341_v29, 1  ;;  %v1349_v1 = vrot.slane %v1348_v60, 2  ;;  %v1959_v6 = vld [vmem:[%s10307_s7 + $0x78] sm:$0xff]  ;;  %v8898_v31 = vpack.c.bf16 %v1958_v49, %v1956_v48  ;;  %v1962_v26 = vld [vmem:[%s10307_s7 + $0x90] sm:$0xff] }
 0x31c   :  { %8324 = vmatprep.mubr.msk.f32.mxu1 %vm936_vm5, %v1397_v25  ;;  %v1400_v44 = vmul.f32 %v9262_v28, %v10174_v0  ;;  %v1401_v19 = vmul.f32 %v9262_v28, %v10180_v3  ;;  %9267 = vrcp.f32 %v1366_v11  ;;  %v8896_v24 = vpack.c.bf16 %v1959_v6, %v1957_v32  ;;  %v1963_v25 = vld [vmem:[%s10307_s7 + $0x98] sm:$0xff] }
 0x31d   :  { %v1343_v62 = vadd.f32 %v1342_v9, %v1341_v29  ;;  %v1350_v22 = vadd.f32 %v1349_v1, %v1348_v60  ;;  %v8902_v29 = vpack.c.bf16 %v1962_v26, %v1960_v57  ;;  %v1965_v60 = vld [vmem:[%s10307_s7 + $0xa8] sm:$0xff]  ;;  %v1967_v11 = vld [vmem:[%s10307_s7 + $0xb8] sm:$0xff]  ;;  %v1964_v9 = vld [vmem:[%s10307_s7 + $0xa0] sm:$0xff] }
 0x31e   :  { %v8904_v28 = vpack.c.bf16 %v1967_v11, %v1965_v60  ;;  %v1966_v1 = vld [vmem:[%s10307_s7 + $0xb0] sm:$0xff] }
 0x31f   :  { %v9264_v58 = vpop.eup %9263  ;;  %8325 = vmatmul.mubr.msk.f32.gmra.mrb[24].mxu1 %vm936_vm5, %v1398_v14  ;;  %v1367_v56 = vmax.f32 %v1343_v62, 1e-16  ;;  %v1351_v42 = vrot.slane %v1350_v22, 1  ;;  %v8900_v14 = vpack.c.bf16 %v1963_v25, %v1961_v35  ;;  %v1971_v62 = vld [vmem:[%s10307_s7 + $0xd8] sm:$0xff] }
 0x320   :  { %8327 = vmatprep.mubr.msk.f32.mxu1 %vm936_vm5, %v1400_v44  ;;  %v1403_v40 = vmul.f32 %v9264_v58, %v10187_v54  ;;  %v1404_v8 = vmul.f32 %v9264_v58, %v10196_v45  ;;  %v8906_v44 = vpack.c.bf16 %v1966_v1, %v1964_v9  ;;  %v1968_v58 = vld [vmem:[%s10307_s7 + $0xc0] sm:$0xff] }
 0x321   :  { %9269 = vrcp.f32 %v1367_v56  ;;  %v1352_v43 = vadd.f32 %v1351_v42, %v1350_v22  ;;  %v1970_v56 = vld [vmem:[%s10307_s7 + $0xd0] sm:$0xff] }
 0x322   :  { %v8910_v42 = vpack.c.bf16 %v1970_v56, %v1968_v58 }
 0x323   :  { %8328 = vmatmul.mubr.msk.f32.gmra.mrb[26].mxu1 %vm936_vm5, %v1401_v19  ;;  %v1368_v0 = vmax.f32 %v1352_v43, 1e-16  ;;  %v1969_v19 = vld [vmem:[%s10307_s7 + $0xc8] sm:$0xff] }
 0x324   :  { %v9266_v3 = vpop.eup %9265  ;;  %8330 = vmatprep.mubr.msk.f32.mxu1 %vm936_vm5, %v1403_v40  ;;  %v8908_v22 = vpack.c.bf16 %v1971_v62, %v1969_v19  ;;  %v1973_v40 = vld [vmem:[%s10307_s7 + $0xe8] sm:$0xff] }
 0x325   :  { %v1406_v21 = vmul.f32 %v9266_v3, %v10209_v7  ;;  %v1407_v41 = vmul.f32 %v9266_v3, %v10212_v37  ;;  %9271 = vrcp.f32 %v1368_v0  ;;  %v1972_v0 = vld [vmem:[%s10307_s7 + $0xe0] sm:$0xff]  ;;  %v1974_v3 = vld [vmem:[%s10307_s7 + $0xf0] sm:$0xff] }
 0x326   :  { %v9268_v61 = vpop.eup %9267 }
 0x327   :  { %8331 = vmatmul.mubr.msk.f32.gmra.mrb[28].mxu1 %vm936_vm5, %v1404_v8  ;;  %v1409_v54 = vmul.f32 %v9268_v61, %v10226_v2  ;;  %v1410_v45 = vmul.f32 %v9268_v61, %v10229_v23  ;;  %v1975_v8 = vld [vmem:[%s10307_s7 + $0xf8] sm:$0xff] }
 0x328   :  { %8333 = vmatprep.mubr.msk.f32.mxu1 %vm936_vm5, %v1406_v21  ;;  %v8912_v43 = vpack.c.bf16 %v1975_v8, %v1973_v40  ;;  %v8914_v21 = vpack.c.bf16 %v1974_v3, %v1972_v0 }
 0x32b   :  { %v9270_v10 = vpop.eup %9269  ;;  %8334 = vmatmul.mubr.msk.f32.gmra.mrb[30].mxu1 %vm936_vm5, %v1407_v41  ;;  %v10342_v41 = vld [vmem:[%s9841_s29] sm:$0xff] }
 0x32c   :  { %8336 = vmatprep.mubr.msk.f32.mxu1 %vm936_vm5, %v1409_v54  ;;  %v1412_v36 = vmul.f32 %v9270_v10, %v10237_v33  ;;  %v1413_v7 = vmul.f32 %v9270_v10, %v10243_v59  ;;  %v1945_v33 = vld [vmem:[%s10307_s7 + $0x8] sm:$0xff]  ;;  %v1947_v59 = vld [vmem:[%s10307_s7 + $0x18] sm:$0xff] }
 0x32f   :  { %v9272_v37 = vpop.eup %9271  ;;  %8337 = vmatmul.mubr.msk.f32.gmra.mrb[32].mxu1 %vm936_vm5, %v1410_v45 }
 0x330   :  { %8339 = vmatprep.mubr.msk.f32.mxu1 %vm936_vm5, %v1412_v36  ;;  %v1415_v2 = vmul.f32 %v9272_v37, %v10257_v47  ;;  %v1416_v23 = vmul.f32 %v9272_v37, %v10260_v15  ;;  %v8884_v47 = vpack.c.bf16 %v1947_v59, %v1945_v33  ;;  %v1944_v15 = vld [vmem:[%s10307_s7] sm:$0xff]  ;;  %s7667_s7 = sld [smem:[%s12845_s0 + %s9676_s4]]  }
 0x331   :  { %v8886_v16 = vpack.c.bf16 %v1946_v13, %v1944_v15  ;;  %s12799_s4 = sld [smem:[%s12845_s0 + %s9692_s30]]  }
 0x332   :  { %8885 = vmatprep.subr.bf16.mxu1 %v8884_v47 }
 0x333   :  { %8340 = vmatmul.mubr.msk.f32.gmra.mrb[34].mxu1 %vm936_vm5, %v1413_v7 }
 0x334   :  { %8342 = vmatprep.mubr.msk.f32.mxu1 %vm936_vm5, %v1415_v2  ;;  %8887 = vmatpush1.bf16.msra.mxu1 %v8886_v16 }
 0x335   :  { %8889 = vmatprep.subr.bf16.mxu1 %v8888_v34 }
 0x337   :  { %8343 = vmatmul.mubr.msk.f32.gmra.mrb[36].mxu1 %vm936_vm5, %v1416_v23 }
 0x338   :  { %2105 = vmatprep.mubr.f32.mxu1 %v12862_v27  ;;  %8891 = vmatpush1.bf16.msra.mxu1 %v8890_v50 }
 0x339   :  { %8893 = vmatprep.subr.bf16.mxu1 %v8892_v39 }
 0x33c   :  { %8895 = vmatpush1.bf16.msra.mxu1 %v8894_v52 }
 0x33d   :  { %8897 = vmatprep.subr.bf16.mxu1 %v8896_v24 }
 0x340   :  { %8899 = vmatpush1.bf16.msra.mxu1 %v8898_v31 }
 0x341   :  { %8901 = vmatprep.subr.bf16.mxu1 %v8900_v14 }
 0x344   :  { %8903 = vmatpush1.bf16.msra.mxu1 %v8902_v29 }
 0x345   :  { %8905 = vmatprep.subr.bf16.mxu1 %v8904_v28 }
 0x348   :  { %8907 = vmatpush1.bf16.msra.mxu1 %v8906_v44 }
 0x349   :  { %8909 = vmatprep.subr.bf16.mxu1 %v8908_v22 }
 0x34c   :  { %8911 = vmatpush1.bf16.msra.mxu1 %v8910_v42 }
 0x34d   :  { %8913 = vmatprep.subr.bf16.mxu1 %v8912_v43 }
 0x350   :  { %8915 = vmatpush1.bf16.msra.mxu1 %v8914_v21 }
 0x351   :  { %8425 = vmatprep.subr.mxu1 %v10342_v41 }
 0x3c2   :  { %v8299_v61 = vpop.f32.mrb[6].mxu1 }
 0x3c3   :  { %v1739_v54 = vmul.f32 %v8299_v61, %v9776_v20  ;;  %v1579_v45 = vpop.f32.mrb[7].mxu1  ;;  %v10364_v61 = vld [vmem:[%s7661_s11] ss:$0 sm:$0xff]  ;;  %s11302_s11 = sld [smem:[%s12845_s0 + %s9677_s8]]   ;;  %s9694_s8 = smov 29  }
 0x3c4   :  { %v1738_v10 = vmul.f32 %v1579_v45, %v9773_v17 }
 0x3c6   :  { %v1770_v36 = vadd.f32 %v1739_v54, %v1738_v10 }
 0x3c8   :  { %v1771_v18 = vrot.slane %v1770_v36, 4 }
 0x3ca   :  { %v1772_v46 = vadd.f32 %v1771_v18, %v1770_v36  ;;  %v10370_v18 = vld [vmem:[%s7662_s15] ss:$0 sm:$0xff]  ;;  %s7669_s15 = sld [smem:[%s12845_s0 + %s9678_s12]]   ;;  %s9695_s12 = smov 33  }
 0x3cc   :  { %v1773_v25 = vrot.slane %v1772_v46, 2 }
 0x3ce   :  { %v1774_v44 = vadd.f32 %v1773_v25, %v1772_v46 }
 0x3d0   :  { %v1775_v21 = vrot.slane %v1774_v44, 1 }
 0x3d2   :  { %v8302_v7 = vpop.f32.mrb[8].mxu1 }
 0x3d3   :  { %v1741_v37 = vmul.f32 %v8302_v7, %v9776_v20  ;;  %v1589_v2 = vpop.f32.mrb[9].mxu1 }
 0x3d4   :  { %v1740_v23 = vmul.f32 %v1589_v2, %v9773_v17 }
 0x3d6   :  { %v1777_v33 = vadd.f32 %v1741_v37, %v1740_v23  ;;  %v8305_v59 = vpop.f32.mrb[10].mxu1 }
 0x3d7   :  { %v1743_v47 = vmul.f32 %v8305_v59, %v9776_v20  ;;  %v1599_v15 = vpop.f32.mrb[11].mxu1 }
 0x3d8   :  { %v1778_v13 = vrot.slane %v1777_v33, 4  ;;  %v1742_v16 = vmul.f32 %v1599_v15, %v9773_v17 }
 0x3da   :  { %v1779_v30 = vadd.f32 %v1778_v13, %v1777_v33  ;;  %v1784_v34 = vadd.f32 %v1743_v47, %v1742_v16  ;;  %v8308_v55 = vpop.f32.mrb[12].mxu1  ;;  %v1776_v16 = vadd.f32 %v1775_v21, %v1774_v44 }
 0x3db   :  { %v1745_v51 = vmul.f32 %v8308_v55, %v9776_v20  ;;  %v1609_v50 = vpop.f32.mrb[13].mxu1 }
 0x3dc   :  { %v1780_v38 = vrot.slane %v1779_v30, 2  ;;  %v1785_v12 = vrot.slane %v1784_v34, 4  ;;  %v1744_v39 = vmul.f32 %v1609_v50, %v9773_v17 }
 0x3de   :  { %v1781_v53 = vadd.f32 %v1780_v38, %v1779_v30  ;;  %v1786_v52 = vadd.f32 %v1785_v12, %v1784_v34  ;;  %v1791_v32 = vadd.f32 %v1745_v51, %v1744_v39  ;;  %v8311_v6 = vpop.f32.mrb[14].mxu1 }
 0x3df   :  { %v1747_v24 = vmul.f32 %v8311_v6, %v9776_v20  ;;  %v1619_v48 = vpop.f32.mrb[15].mxu1 }
 0x3e0   :  { %v1787_v49 = vrot.slane %v1786_v52, 2  ;;  %v1792_v31 = vrot.slane %v1791_v32, 4  ;;  %v1746_v35 = vmul.f32 %v1619_v48, %v9773_v17  ;;  %v1782_v14 = vrot.slane %v1781_v53, 1 }
 0x3e1   :  { %v1889_v48 = vmul.f32 %v10364_v61, %v1776_v16 }
 0x3e2   :  { %v1793_v57 = vadd.f32 %v1792_v31, %v1791_v32  ;;  %v1798_v26 = vadd.f32 %v1747_v24, %v1746_v35  ;;  %v8314_v29 = vpop.f32.mrb[16].mxu1  ;;  %v1788_v60 = vadd.f32 %v1787_v49, %v1786_v52  ;;  %v1783_v62 = vadd.f32 %v1782_v14, %v1781_v53 }
 0x3e3   :  { %v1749_v11 = vmul.f32 %v8314_v29, %v9776_v20  ;;  %v1629_v28 = vpop.f32.mrb[17].mxu1 }
 0x3e4   :  { %v1794_v9 = vrot.slane %v1793_v57, 2  ;;  %v1799_v1 = vrot.slane %v1798_v26, 4  ;;  %v1748_v19 = vmul.f32 %v1629_v28, %v9773_v17  ;;  %v1789_v42 = vrot.slane %v1788_v60, 1 }
 0x3e5   :  { %v1890_v10 = vmul.f32 %v10364_v61, %v1783_v62  ;;  %v10391_v62 = vadd.f32 %v10370_v18, %v1889_v48 }
 0x3e6   :  { %v1795_v22 = vadd.f32 %v1794_v9, %v1793_v57  ;;  %v1800_v58 = vadd.f32 %v1799_v1, %v1798_v26  ;;  %v8317_v56 = vpop.f32.mrb[18].mxu1  ;;  %v1805_v40 = vadd.f32 %v1749_v11, %v1748_v19  ;;  %v1790_v37 = vadd.f32 %v1789_v42, %v1788_v60 }
 0x3e7   :  { %v1751_v8 = vmul.f32 %v8317_v56, %v9776_v20  ;;  %v1639_v43 = vpop.f32.mrb[19].mxu1  ;;  %v10373_v55 = vadd.f32 %v10370_v18, %v1890_v10 }
 0x3e8   :  { %v1796_v0 = vrot.slane %v1795_v22, 1  ;;  %v1801_v3 = vrot.slane %v1800_v58, 2  ;;  %v1806_v54 = vrot.slane %v1805_v40, 4  ;;  %v1750_v45 = vmul.f32 %v1639_v43, %v9773_v17 }
 0x3e9   :  { %v1891_v12 = vmul.f32 %v10364_v61, %v1790_v37  ;;  %v12861_v25 = vmax.f32 %v10373_v55, 0.0 }
 0x3ea   :  { %v1802_v36 = vadd.f32 %v1801_v3, %v1800_v58  ;;  %v8320_v7 = vpop.f32.mrb[20].mxu1  ;;  %v1807_v2 = vadd.f32 %v1806_v54, %v1805_v40  ;;  %v1812_v23 = vadd.f32 %v1751_v8, %v1750_v45  ;;  %v1797_v47 = vadd.f32 %v1796_v0, %v1795_v22 }
 0x3eb   :  { %v1753_v33 = vmul.f32 %v8320_v7, %v9776_v20  ;;  %v1649_v59 = vpop.f32.mrb[21].mxu1  ;;  %v10383_v29 = vadd.f32 %v10370_v18, %v1891_v12  ;;  %v2004_v42 = vrot.slane %v12861_v25, 7 }
 0x3ec   :  { %v1803_v15 = vrot.slane %v1802_v36, 1  ;;  %v1752_v13 = vmul.f32 %v1649_v59, %v9773_v17  ;;  %v1808_v30 = vrot.slane %v1807_v2, 2  ;;  %v1813_v34 = vrot.slane %v1812_v23, 4 }
 0x3ed   :  { %v1892_v32 = vmul.f32 %v10364_v61, %v1797_v47  ;;  %v12859_v0 = vmax.f32 %v10383_v29, 0.0 }
 0x3ee   :  { %v1804_v51 = vadd.f32 %v1803_v15, %v1802_v36  ;;  %v1819_v50 = vadd.f32 %v1753_v33, %v1752_v13  ;;  %v8323_v38 = vpop.f32.mrb[22].mxu1  ;;  %v1809_v39 = vadd.f32 %v1808_v30, %v1807_v2  ;;  %v1814_v46 = vadd.f32 %v1813_v34, %v1812_v23 }
 0x3ef   :  { %v1755_v53 = vmul.f32 %v8323_v38, %v9776_v20  ;;  %v1659_v52 = vpop.f32.mrb[23].mxu1  ;;  %v10387_v1 = vadd.f32 %v10370_v18, %v1892_v32  ;;  %v12860_v2 = vmax.f32 %v10391_v62, 0.0  ;;  %v2007_v34 = vrot.slane %v12859_v0, 6 }
 0x3f0   :  { %v1820_v6 = vrot.slane %v1819_v50, 4  ;;  %v1754_v24 = vmul.f32 %v1659_v52, %v9773_v17  ;;  %v1893_v49 = vmul.f32 %v10364_v61, %v1804_v51  ;;  %v1810_v31 = vrot.slane %v1809_v39, 1 }
 0x3f1   :  { %v1815_v35 = vrot.slane %v1814_v46, 2  ;;  %v12858_v10 = vmax.f32 %v10387_v1, 0.0 }
 0x3f2   :  { %v1821_v14 = vadd.f32 %v1820_v6, %v1819_v50  ;;  %v1826_v57 = vadd.f32 %v1755_v53, %v1754_v24  ;;  %v8326_v26 = vpop.f32.mrb[24].mxu1  ;;  %v1811_v60 = vadd.f32 %v1810_v31, %v1809_v39  ;;  %v10394_v22 = vadd.f32 %v10370_v18, %v1893_v49 }
 0x3f3   :  { %v1816_v11 = vadd.f32 %v1815_v35, %v1814_v46  ;;  %v1757_v28 = vmul.f32 %v8326_v26, %v9776_v20  ;;  %v1669_v9 = vpop.f32.mrb[25].mxu1  ;;  %v2010_v12 = vrot.slane %v12858_v10, 5  ;;  %v2006_v53 = vsel %vm2005_vm6, %v2004_v42, %v12860_v2 }
 0x3f4   :  { %v1822_v44 = vrot.slane %v1821_v14, 2  ;;  %v1756_v19 = vmul.f32 %v1669_v9, %v9773_v17  ;;  %v1894_v58 = vmul.f32 %v10364_v61, %v1811_v60  ;;  %v12857_v23 = vmax.f32 %v10394_v22, 0.0 }
 0x3f5   :  { %v1817_v56 = vrot.slane %v1816_v11, 1  ;;  %v1827_v59 = vrot.slane %v1826_v57, 4 }
 0x3f6   :  { %v1823_v40 = vadd.f32 %v1822_v44, %v1821_v14  ;;  %v1833_v8 = vadd.f32 %v1757_v28, %v1756_v19  ;;  %v8329_v43 = vpop.f32.mrb[26].mxu1  ;;  %v10401_v3 = vadd.f32 %v10370_v18, %v1894_v58  ;;  %v2013_v52 = vrot.slane %v12857_v23, 4 }
 0x3f7   :  { %v1818_v21 = vadd.f32 %v1817_v56, %v1816_v11  ;;  %v1759_v54 = vmul.f32 %v8329_v43, %v9776_v20  ;;  %v1679_v45 = vpop.f32.mrb[27].mxu1  ;;  %v1828_v6 = vadd.f32 %v1827_v59, %v1826_v57  ;;  %v2009_v28 = vsel %vm2008_vm7, %v2007_v34, %v2006_v53 }
 0x3f8   :  { %v1824_v36 = vrot.slane %v1823_v40, 1  ;;  %v1834_v7 = vrot.slane %v1833_v8, 4  ;;  %v1758_v37 = vmul.f32 %v1679_v45, %v9773_v17  ;;  %v12856_v47 = vmax.f32 %v10401_v3, 0.0 }
 0x3f9   :  { %v1895_v33 = vmul.f32 %v10364_v61, %v1818_v21  ;;  %v2012_v44 = vsel %vm2011_vm8, %v2010_v12, %v2009_v28 }
 0x3fa   :  { %v1825_v15 = vadd.f32 %v1824_v36, %v1823_v40  ;;  %v1835_v13 = vadd.f32 %v1834_v7, %v1833_v8  ;;  %v1840_v16 = vadd.f32 %v1759_v54, %v1758_v37  ;;  %v8332_v30 = vpop.f32.mrb[28].mxu1  ;;  %v2016_v14 = vrot.slane %v12856_v47, 3 }
 0x3fb   :  { %v10413_v51 = vadd.f32 %v10370_v18, %v1895_v33  ;;  %v1761_v50 = vmul.f32 %v8332_v30, %v9776_v20  ;;  %v1689_v38 = vpop.f32.mrb[29].mxu1  ;;  %v2015_v42 = vsel %vm2014_vm9, %v2013_v52, %v2012_v44  ;;  %v1829_v40 = vrot.slane %v1828_v6, 2 }
 0x3fc   :  { %v1896_v39 = vmul.f32 %v10364_v61, %v1825_v15  ;;  %v1841_v46 = vrot.slane %v1840_v16, 4  ;;  %v1760_v24 = vmul.f32 %v1689_v38, %v9773_v17  ;;  %v1836_v49 = vrot.slane %v1835_v13, 2 }
 0x3fd   :  { %v12855_v32 = vmax.f32 %v10413_v51, 0.0  ;;  %v2018_v54 = vsel %vm2017_vm10, %v2016_v14, %v2015_v42  ;;  %v1830_v34 = vadd.f32 %v1829_v40, %v1828_v6 }
 0x3fe   :  { %v10427_v48 = vadd.f32 %v10370_v18, %v1896_v39  ;;  %v1842_v31 = vadd.f32 %v1841_v46, %v1840_v16  ;;  %v8335_v35 = vpop.f32.mrb[30].mxu1  ;;  %v1847_v26 = vadd.f32 %v1761_v50, %v1760_v24  ;;  %v1837_v8 = vadd.f32 %v1836_v49, %v1835_v13 }
 0x3ff   :  { %v1763_v60 = vmul.f32 %v8335_v35, %v9776_v20  ;;  %v1699_v11 = vpop.f32.mrb[31].mxu1  ;;  %v2019_v19 = vrot.slane %v12855_v32, 2  ;;  %v1831_v28 = vrot.slane %v1830_v34, 1 }
 0x400   :  { %v1843_v9 = vrot.slane %v1842_v31, 2  ;;  %v1762_v57 = vmul.f32 %v1699_v11, %v9773_v17  ;;  %v1848_v58 = vrot.slane %v1847_v26, 4  ;;  %v12854_v56 = vmax.f32 %v10427_v48, 0.0 }
 0x401   :  { %v2021_v15 = vsel %vm2020_vm11, %v2019_v19, %v2018_v54  ;;  %v1838_v50 = vrot.slane %v1837_v8, 1 }
 0x402   :  { %v1854_v43 = vadd.f32 %v1763_v60, %v1762_v57  ;;  %v8338_v21 = vpop.f32.mrb[32].mxu1  ;;  %v1844_v45 = vadd.f32 %v1843_v9, %v1842_v31  ;;  %v1849_v36 = vadd.f32 %v1848_v58, %v1847_v26  ;;  %v2022_v33 = vrot.slane %v12854_v56, 1 }
 0x403   :  { %v1765_v7 = vmul.f32 %v8338_v21, %v9776_v20  ;;  %v1709_v37 = vpop.f32.mrb[33].mxu1  ;;  %v1839_v6 = vadd.f32 %v1838_v50, %v1837_v8 }
 0x404   :  { %v1855_v59 = vrot.slane %v1854_v43, 4  ;;  %v1850_v16 = vrot.slane %v1849_v36, 2  ;;  %v1764_v30 = vmul.f32 %v1709_v37, %v9773_v17  ;;  %v2024_v13 = vsel %vm2023_vm12, %v2022_v33, %v2021_v15 }
 0x405   :  { %2106 = vmatmul.mubr.f32.vlgmr.msra.gmra.mrb[38].mxu1 %v2024_v13  ;;  %v1845_v39 = vrot.slane %v1844_v45, 1  ;;  %v1898_v21 = vmul.f32 %v10364_v61, %v1839_v6  ;;  %v1832_v33 = vadd.f32 %v1831_v28, %v1830_v34 }
 0x406   :  { %v1856_v38 = vadd.f32 %v1855_v59, %v1854_v43  ;;  %v8341_v12 = vpop.f32.mrb[34].mxu1  ;;  %v1851_v46 = vadd.f32 %v1850_v16, %v1849_v36  ;;  %v1861_v53 = vadd.f32 %v1765_v7, %v1764_v30  ;;  %2111 = vmatprep.mubr.f32.mxu1 %v12862_v27  ;;  %8426 = vmatpush3.msra.mxu1 %v10342_v41 }
 0x407   :  { %v1767_v52 = vmul.f32 %v8341_v12, %v9776_v20  ;;  %v1719_v24 = vpop.f32.mrb[35].mxu1  ;;  %v1846_v9 = vadd.f32 %v1845_v39, %v1844_v45  ;;  %v10457_v30 = vadd.f32 %v10370_v18, %v1898_v21  ;;  %v1897_v12 = vmul.f32 %v10364_v61, %v1832_v33 }
 0x408   :  { %v1857_v49 = vrot.slane %v1856_v38, 2  ;;  %v1766_v31 = vmul.f32 %v1719_v24, %v9773_v17  ;;  %v1852_v35 = vrot.slane %v1851_v46, 1  ;;  %v1862_v14 = vrot.slane %v1861_v53, 4 }
 0x409   :  { %v1899_v7 = vmul.f32 %v10364_v61, %v1846_v9  ;;  %v12853_v24 = vmax.f32 %v10457_v30, 0.0  ;;  %v10476_v6 = vadd.f32 %v10370_v18, %v1897_v12  ;;  %v2429_v12 = vld [vmem:[%s10518_s19 + $0x18] sm:$0xff] }
 0x40a   :  { %v1858_v26 = vadd.f32 %v1857_v49, %v1856_v38  ;;  %v1868_v60 = vadd.f32 %v1767_v52, %v1766_v31  ;;  %v8344_v11 = vpop.f32.mrb[36].mxu1  ;;  %v1863_v57 = vadd.f32 %v1862_v14, %v1861_v53  ;;  %v1853_v58 = vadd.f32 %v1852_v35, %v1851_v46 }
 0x40b   :  { %v1769_v44 = vmul.f32 %v8344_v11, %v9776_v20  ;;  %v1729_v19 = vpop.f32.mrb[37].mxu1  ;;  %v10460_v50 = vadd.f32 %v10370_v18, %v1899_v7  ;;  %12934 = vst [vmem:[#allocation10_spill] sm:$0xff] %v10476_v6  ;;  %v2025_v9 = vrot.slane %v12853_v24, 7 }
 0x40c   :  { %v1859_v42 = vrot.slane %v1858_v26, 1  ;;  %v1869_v40 = vrot.slane %v1868_v60, 4  ;;  %v1768_v41 = vmul.f32 %v1729_v19, %v9773_v17  ;;  %v1864_v43 = vrot.slane %v1863_v57, 2 }
 0x40d   :  { %v1900_v45 = vmul.f32 %v10364_v61, %v1853_v58  ;;  %12930 = vst [vmem:[#allocation6_spill] sm:$0xff] %v10460_v50  ;;  %v12852_v35 = vmax.f32 %v10460_v50, 0.0 }
 0x40e   :  { %v1860_v54 = vadd.f32 %v1859_v42, %v1858_v26  ;;  %v1870_v36 = vadd.f32 %v1869_v40, %v1868_v60  ;;  %v1875_v8 = vadd.f32 %v1769_v44, %v1768_v41  ;;  %v1865_v37 = vadd.f32 %v1864_v43, %v1863_v57 }
 0x40f   :  { %v10464_v34 = vadd.f32 %v10370_v18, %v1900_v45  ;;  %v2027_v58 = vrot.slane %v12852_v35, 6  ;;  %v12848_v42 = vmax.f32 %v10476_v6, 0.0 }
 0x410   :  { %v1871_v59 = vrot.slane %v1870_v36, 2  ;;  %v1876_v20 = vrot.slane %v1875_v8, 4  ;;  %v1901_v15 = vmul.f32 %v10364_v61, %v1860_v54  ;;  %v1866_v16 = vrot.slane %v1865_v37, 1 }
 0x411   :  { %12931 = vst [vmem:[#allocation7_spill] sm:$0xff] %v10464_v34  ;;  %v12851_v26 = vmax.f32 %v10464_v34, 0.0 }
 0x412   :  { %v1872_v17 = vadd.f32 %v1871_v59, %v1870_v36  ;;  %v1877_v13 = vadd.f32 %v1876_v20, %v1875_v8  ;;  %v1867_v38 = vadd.f32 %v1866_v16, %v1865_v37  ;;  %v10467_v53 = vadd.f32 %v10370_v18, %v1901_v15  ;;  %v2426_v16 = vld [vmem:[%s10518_s19] sm:$0xff] }
 0x413   :  { %v2029_v40 = vrot.slane %v12851_v26, 5  ;;  %v2026_v36 = vsel %vm2005_vm6, %v2025_v9, %v12848_v42 }
 0x414   :  { %v1873_v39 = vrot.slane %v1872_v17, 1  ;;  %v1878_v46 = vrot.slane %v1877_v13, 2  ;;  %12932 = vst [vmem:[#allocation8_spill] sm:$0xff] %v10467_v53  ;;  %v1902_v52 = vmul.f32 %v10364_v61, %v1867_v38  ;;  %v12850_v28 = vmax.f32 %v10467_v53, 0.0  ;;  %v2428_v38 = vld [vmem:[%s10518_s19 + $0x10] sm:$0xff] }
 0x415   :  { %v2028_v7 = vsel %vm2008_vm7, %v2027_v58, %v2026_v36  ;;  %v2438_v36 = vld [vmem:[%s10518_s19 + $0x60] sm:$0xff] }
 0x416   :  { %v1874_v49 = vadd.f32 %v1873_v39, %v1872_v17  ;;  %v1879_v31 = vadd.f32 %v1878_v46, %v1877_v13  ;;  %v10473_v14 = vadd.f32 %v10370_v18, %v1902_v52  ;;  %v2031_v21 = vrot.slane %v12850_v28, 4  ;;  %v2427_v17 = vld [vmem:[%s10518_s19 + $0x8] sm:$0xff]  ;;  %v2430_v46 = vld [vmem:[%s10518_s19 + $0x20] sm:$0xff] }
 0x417   :  { %v2030_v33 = vsel %vm2011_vm8, %v2029_v40, %v2028_v7  ;;  %v8916_v13 = vpack.c.bf16 %v2427_v17, %v2426_v16  ;;  %v8920_v39 = vpack.c.bf16 %v2429_v12, %v2428_v38  ;;  %v2431_v52 = vld [vmem:[%s10518_s19 + $0x28] sm:$0xff]  ;;  %v2436_v40 = vld [vmem:[%s10518_s19 + $0x50] sm:$0xff] }
 0x418   :  { %12933 = vst [vmem:[#allocation9_spill] sm:$0xff] %v10473_v14  ;;  %v1903_v60 = vmul.f32 %v10364_v61, %v1874_v49  ;;  %v1880_v11 = vrot.slane %v1879_v31, 1  ;;  %v12849_v19 = vmax.f32 %v10473_v14, 0.0  ;;  %v2032_v45 = vsel %vm2014_vm9, %v2031_v21, %v2030_v33  ;;  %v2441_v33 = vld [vmem:[%s10518_s19 + $0x78] sm:$0xff] }
 0x419   :  { %8917 = vmatprep.subr.bf16.mxu0 %v8916_v13  ;;  %v8924_v49 = vpack.c.bf16 %v2431_v52, %v2430_v46  ;;  %v9565_v14 = vld [vmem:[%s9878_s3 + $0x18] sm:$0xff] }
 0x41a   :  { %v1881_v57 = vadd.f32 %v1880_v11, %v1879_v31  ;;  %v10484_v44 = vadd.f32 %v10370_v18, %v1903_v60  ;;  %v2033_v8 = vrot.slane %v12849_v19, 3  ;;  %8919 = vmatpush3.bf16.msra.mxu0 %v8916_v13  ;;  %v2432_v31 = vld [vmem:[%s10518_s19 + $0x30] sm:$0xff]  ;;  %v2433_v60 = vld [vmem:[%s10518_s19 + $0x38] sm:$0xff]  ;;  %v2434_v11 = vld [vmem:[%s10518_s19 + $0x40] sm:$0xff] }
 0x41b   :  { %8921 = vmatprep.subr.bf16.mxu0 %v8920_v39  ;;  %v8928_v9 = vpack.c.bf16 %v2433_v60, %v2432_v31 }
 0x41c   :  { %12935 = vst [vmem:[#allocation11_spill] sm:$0xff] %v10484_v44  ;;  %v1904_v41 = vmul.f32 %v10364_v61, %v1881_v57  ;;  %v12847_v43 = vmax.f32 %v10484_v44, 0.0  ;;  %v2435_v57 = vld [vmem:[%s10518_s19 + $0x48] sm:$0xff] }
 0x41d   :  { %v8932_v58 = vpack.c.bf16 %v2435_v57, %v2434_v11 }
 0x41e   :  { %v10497_v54 = vadd.f32 %v10370_v18, %v1904_v41  ;;  %v2035_v61 = vrot.slane %v12847_v43, 2  ;;  %v2034_v18 = vsel %vm2017_vm10, %v2033_v8, %v2032_v45  ;;  %8923 = vmatpush3.bf16.msra.mxu0 %v8920_v39  ;;  %v2437_v41 = vld [vmem:[%s10518_s19 + $0x58] sm:$0xff]  ;;  %v2439_v8 = vld [vmem:[%s10518_s19 + $0x68] sm:$0xff] }
 0x41f   :  { %8925 = vmatprep.subr.bf16.mxu0 %v8924_v49  ;;  %v8936_v21 = vpack.c.bf16 %v2437_v41, %v2436_v40  ;;  %v8940_v7 = vpack.c.bf16 %v2439_v8, %v2438_v36 }
 0x420   :  { %12936 = vst [vmem:[#allocation12_spill] sm:$0xff] %v10497_v54  ;;  %v12846_v37 = vmax.f32 %v10497_v54, 0.0  ;;  %v2036_v20 = vsel %vm2020_vm11, %v2035_v61, %v2034_v18  ;;  %v2440_v61 = vld [vmem:[%s10518_s19 + $0x70] sm:$0xff]  ;;  %v1976_v18 = vld [vmem:[%s7664_s23] sm:$0x3]  ;;  %s11843_s19 = sld [smem:[%s12845_s0 + %s9679_s16]]   ;;  %s9681_s23 = smov 21  }
 0x421   :  { %v8944_v45 = vpack.c.bf16 %v2441_v33, %v2440_v61  ;;  %v1981_v13 = vrot.slane %v1976_v18, %v9766_v5  ;;  %s7672_s26 = sld [smem:[%s12845_s0 + %s9681_s23]]   ;;  %s9696_s16 = smov 31  }
 0x422   :  { %v2037_v59 = vrot.slane %v12846_v37, 1  ;;  %8927 = vmatpush3.bf16.msra.mxu0 %v8924_v49 }
 0x423   :  { %8929 = vmatprep.subr.bf16.mxu0 %v8928_v9 }
 0x424   :  { %v2038_v15 = vsel %vm2023_vm12, %v2037_v59, %v2036_v20  ;;  %v1985_v59 = vrot.slane %v1976_v18, %v9761_v63 }
 0x425   :  { %2112 = vmatmul.mubr.f32.gmra.mrb[40].mxu1 %v2038_v15 }
 0x426   :  { %8931 = vmatpush3.bf16.msra.mxu0 %v8928_v9 }
 0x427   :  { %8933 = vmatprep.subr.bf16.mxu0 %v8932_v58 }
 0x42a   :  { %8935 = vmatpush3.bf16.msra.mxu0 %v8932_v58 }
 0x42b   :  { %8937 = vmatprep.subr.bf16.mxu0 %v8936_v21 }
 0x42e   :  { %8939 = vmatpush3.bf16.msra.mxu0 %v8936_v21 }
 0x42f   :  { %8941 = vmatprep.subr.bf16.mxu0 %v8940_v7 }
 0x432   :  { %8943 = vmatpush3.bf16.msra.mxu0 %v8940_v7 }
 0x433   :  { %8945 = vmatprep.subr.bf16.mxu0 %v8944_v45 }
 0x436   :  { %8947 = vmatpush3.bf16.msra.mxu0 %v8944_v45 }
 0x4d8   :  { %v2107_v20 = vpop.f32.mrb[38].mxu1 }
 0x4d9   :  { %v2109_v15 = vpop.f32.mrb[39].mxu1  ;;  %v10543_v12 = vadd.f32 %v2107_v20, %v1981_v13 }
 0x4da   :  { %v2110_v16 = vadd.f32 %v2109_v15, %v1985_v59 }
 0x4dc   :  { %v2127_v17 = vrot.slane %v2110_v16, %v9764_v4  ;;  %v2120_v11 = vcombine.high %v2110_v16, %v2110_v16 }
 0x4de   :  { %v2143_v38 = vrot.slane %v2127_v17, %v9764_v4  ;;  %v2135_v31 = vcombine.high %v2127_v17, %v2127_v17  ;;  %v2134_v58 = vrot.slane %v2120_v11, %v9764_v4 }
 0x4e0   :  { %v2221_v39 = vrot.slane %v2143_v38, %v9766_v5  ;;  %v2157_v60 = vrot.slane %v2135_v31, %v9764_v4  ;;  %v2165_v9 = vcombine.high %v2143_v38, %v2143_v38  ;;  %v2136_v61 = vcombine.high %v2134_v58, %v2134_v58 }
 0x4e1   :  { %v2150_v33 = vrot.slane %v2134_v58, %v9764_v4 }
 0x4e2   :  { %v2298_v46 = vadd.f32 %v2221_v39, %v10543_v12  ;;  %v2225_v57 = vrot.slane %v2157_v60, %v9766_v5  ;;  %v2167_v40 = vcombine.high %v2157_v60, %v2157_v60  ;;  %v2229_v36 = vrot.slane %v2165_v9, %v9766_v5 }
 0x4e3   :  { %v2164_v38 = vrot.slane %v2136_v61, %v9764_v4  ;;  %v2166_v11 = vcombine.high %v2150_v33, %v2150_v33 }
 0x4e4   :  { %vm2330_vm13 = vcmp.gt.f32.partialorder %v2298_v46, 0.0  ;;  %v2362_v52 = vmul.f32 0.2, %v2298_v46  ;;  %v2300_v21 = vadd.f32 %v2225_v57, %v10543_v12  ;;  %v2302_v15 = vadd.f32 %v2229_v36, %v10543_v12 }
 0x4e5   :  { %v2233_v16 = vrot.slane %v2167_v40, %v9766_v5  ;;  %v2241_v9 = vrot.slane %v2164_v38, %v9766_v5 }
 0x4e6   :  { %v2394_v49 = vsel %vm2330_vm13, %v2298_v46, %v2362_v52  ;;  %v2364_v20 = vmul.f32 0.2, %v2300_v21  ;;  %vm2332_vm15 = vcmp.gt.f32.partialorder %v2300_v21, 0.0  ;;  %v2366_v31 = vmul.f32 0.2, %v2302_v15 }
 0x4e7   :  { %8377 = vmatprep.mubr.f32.mxu0 %v2394_v49  ;;  %v2237_v49 = vrot.slane %v2150_v33, %v9766_v5  ;;  %v2304_v60 = vadd.f32 %v2233_v16, %v10543_v12  ;;  %vm2334_vm1 = vcmp.gt.f32.partialorder %v2302_v15, 0.0 }
 0x4e8   :  { %v2398_v61 = vsel %vm2334_vm1, %v2302_v15, %v2366_v31 }
 0x4e9   :  { %vm2336_vm4 = vcmp.gt.f32.partialorder %v2304_v60, 0.0 }
 0x4f8   :  { %v2113_v41 = vpop.f32.mrb[40].mxu1 }
 0x4f9   :  { %v10552_v8 = vadd.f32 %v2113_v41, %v1981_v13  ;;  %v2115_v7 = vpop.f32.mrb[41].mxu1  ;;  %v2306_v41 = vadd.f32 %v2237_v49, %v10543_v12 }
 0x4fb   :  { %v2299_v45 = vadd.f32 %v2221_v39, %v10552_v8  ;;  %v2301_v18 = vadd.f32 %v2225_v57, %v10552_v8  ;;  %v2303_v52 = vadd.f32 %v2229_v36, %v10552_v8  ;;  %v2396_v39 = vsel %vm2332_vm15, %v2300_v21, %v2364_v20 }
 0x4fc   :  { %v2305_v40 = vadd.f32 %v2233_v16, %v10552_v8  ;;  %v2116_v36 = vadd.f32 %v2115_v7, %v1985_v59  ;;  %v2368_v21 = vmul.f32 0.2, %v2304_v60  ;;  %v2168_v20 = vcombine.high %v2164_v38, %v2164_v38 }
 0x4fd   :  { %vm2331_vm14 = vcmp.gt.f32.partialorder %v2299_v45, 0.0  ;;  %v2363_v17 = vmul.f32 0.2, %v2299_v45  ;;  %v2365_v46 = vmul.f32 0.2, %v2301_v18  ;;  %vm2333_vm0 = vcmp.gt.f32.partialorder %v2301_v18, 0.0 }
 0x4fe   :  { %v2367_v58 = vmul.f32 0.2, %v2303_v52  ;;  %vm2335_vm3 = vcmp.gt.f32.partialorder %v2303_v52, 0.0  ;;  %v2369_v33 = vmul.f32 0.2, %v2305_v40  ;;  %v2176_v16 = vrot.slane %v2116_v36, %v9764_v4 }
 0x4ff   :  { %v2395_v13 = vsel %vm2331_vm14, %v2299_v45, %v2363_v17  ;;  %v2397_v57 = vsel %vm2333_vm0, %v2301_v18, %v2365_v46  ;;  %v2245_v45 = vrot.slane %v2166_v11, %v9766_v5  ;;  %v2308_v18 = vadd.f32 %v2241_v9, %v10543_v12 }
 0x500   :  { %8378 = vmatmul.mubr.f32.vlgmr.msra.gmra.mrb[32].mxu0 %v2395_v13  ;;  %v2399_v17 = vsel %vm2335_vm3, %v2303_v52, %v2367_v58  ;;  %v2307_v13 = vadd.f32 %v2237_v49, %v10552_v8  ;;  %v2400_v46 = vsel %vm2336_vm4, %v2304_v60, %v2368_v21  ;;  %vm2337_vm13 = vcmp.gt.f32.partialorder %v2305_v40, 0.0 }
 0x501   :  { %8380 = vmatprep.mubr.f32.mxu0 %v2396_v39  ;;  %v2370_v59 = vmul.f32 0.2, %v2306_v41  ;;  %vm2338_vm14 = vcmp.gt.f32.partialorder %v2306_v41, 0.0  ;;  %v2310_v7 = vadd.f32 %v2245_v45, %v10543_v12  ;;  %v2249_v15 = vrot.slane %v2168_v20, %v9766_v5 }
 0x502   :  { %v2401_v39 = vsel %vm2337_vm13, %v2305_v40, %v2369_v33  ;;  %v2371_v38 = vmul.f32 0.2, %v2307_v13  ;;  %v2372_v52 = vmul.f32 0.2, %v2308_v18  ;;  %v2309_v31 = vadd.f32 %v2241_v9, %v10552_v8 }
 0x503   :  { %v2184_v49 = vcombine.high %v2176_v16, %v2176_v16  ;;  %v2192_v11 = vrot.slane %v2176_v16, %v9764_v4  ;;  %vm2339_vm15 = vcmp.gt.f32.partialorder %v2307_v13, 0.0  ;;  %vm2340_vm0 = vcmp.gt.f32.partialorder %v2308_v18, 0.0 }
 0x504   :  { %8381 = vmatmul.mubr.f32.gmra.mrb[34].mxu0 %v2397_v57  ;;  %v2402_v57 = vsel %vm2338_vm14, %v2306_v41, %v2370_v59  ;;  %v2374_v60 = vmul.f32 0.2, %v2310_v7  ;;  %v2312_v58 = vadd.f32 %v2249_v15, %v10543_v12  ;;  %v2373_v21 = vmul.f32 0.2, %v2309_v31 }
 0x505   :  { %8383 = vmatprep.mubr.f32.mxu0 %v2398_v61  ;;  %v2403_v61 = vsel %vm2339_vm15, %v2307_v13, %v2371_v38  ;;  %vm2342_vm1 = vcmp.gt.f32.partialorder %v2310_v7, 0.0  ;;  %v2311_v40 = vadd.f32 %v2245_v45, %v10552_v8  ;;  %v2206_v20 = vrot.slane %v2184_v49, %v9764_v4 }
 0x506   :  { %v2253_v9 = vrot.slane %v2192_v11, %v9766_v5  ;;  %vm2341_vm3 = vcmp.gt.f32.partialorder %v2309_v31, 0.0  ;;  %v2169_v41 = vcombine.high %v2116_v36, %v2116_v36  ;;  %v2406_v33 = vsel %vm2342_vm1, %v2310_v7, %v2374_v60 }
 0x507   :  { %v2376_v16 = vmul.f32 0.2, %v2312_v58  ;;  %v2375_v59 = vmul.f32 0.2, %v2311_v40  ;;  %vm2344_vm4 = vcmp.gt.f32.partialorder %v2312_v58, 0.0  ;;  %v2313_v13 = vadd.f32 %v2249_v15, %v10552_v8 }
 0x508   :  { %8384 = vmatmul.mubr.f32.gmra.mrb[36].mxu0 %v2399_v17  ;;  %v2404_v17 = vsel %vm2340_vm0, %v2308_v18, %v2372_v52  ;;  %vm2343_vm13 = vcmp.gt.f32.partialorder %v2311_v40, 0.0  ;;  %v2314_v45 = vadd.f32 %v2253_v9, %v10543_v12  ;;  %v2257_v38 = vrot.slane %v2206_v20, %v9766_v5 }
 0x509   :  { %8386 = vmatprep.mubr.f32.mxu0 %v2400_v46  ;;  %v2405_v46 = vsel %vm2341_vm3, %v2309_v31, %v2373_v21  ;;  %v2183_v18 = vrot.slane %v2169_v41, %v9764_v4  ;;  %v2408_v52 = vsel %vm2344_vm4, %v2312_v58, %v2376_v16  ;;  %v2216_v49 = vcombine.high %v2206_v20, %v2206_v20 }
 0x50a   :  { %v2407_v36 = vsel %vm2343_vm13, %v2311_v40, %v2375_v59  ;;  %v2377_v7 = vmul.f32 0.2, %v2313_v13  ;;  %v2315_v31 = vadd.f32 %v2253_v9, %v10552_v8  ;;  %vm2345_vm14 = vcmp.gt.f32.partialorder %v2313_v13, 0.0 }
 0x50b   :  { %v2316_v15 = vadd.f32 %v2257_v38, %v10543_v12  ;;  %vm2346_vm15 = vcmp.gt.f32.partialorder %v2314_v45, 0.0  ;;  %v2185_v60 = vcombine.high %v2183_v18, %v2183_v18  ;;  %v2317_v58 = vadd.f32 %v2257_v38, %v10552_v8 }
 0x50c   :  { %8387 = vmatmul.mubr.f32.gmra.mrb[38].mxu0 %v2401_v39  ;;  %v2214_v39 = vcombine.high %v2192_v11, %v2192_v11  ;;  %v2409_v21 = vsel %vm2345_vm14, %v2313_v13, %v2377_v7  ;;  %v2265_v40 = vrot.slane %v2216_v49, %v9766_v5  ;;  %vm2347_vm0 = vcmp.gt.f32.partialorder %v2315_v31, 0.0 }
 0x50d   :  { %8389 = vmatprep.mubr.f32.mxu0 %v2402_v57  ;;  %v2378_v57 = vmul.f32 0.2, %v2314_v45  ;;  %v2380_v9 = vmul.f32 0.2, %v2316_v15  ;;  %vm2348_vm1 = vcmp.gt.f32.partialorder %v2316_v15, 0.0  ;;  %vm2349_vm3 = vcmp.gt.f32.partialorder %v2317_v58, 0.0 }
 0x50e   :  { %v2261_v11 = vrot.slane %v2214_v39, %v9766_v5  ;;  %v2320_v13 = vadd.f32 %v2265_v40, %v10543_v12 }
 0x50f   :  { %v2410_v20 = vsel %vm2346_vm15, %v2314_v45, %v2378_v57  ;;  %v2412_v39 = vsel %vm2348_vm1, %v2316_v15, %v2380_v9 }
 0x510   :  { %8390 = vmatmul.mubr.f32.gmra.mrb[40].mxu0 %v2403_v61  ;;  %v2199_v61 = vrot.slane %v2183_v18, %v9764_v4  ;;  %v2318_v41 = vadd.f32 %v2261_v11, %v10543_v12  ;;  %v2319_v59 = vadd.f32 %v2261_v11, %v10552_v8  ;;  %v2384_v7 = vmul.f32 0.2, %v2320_v13 }
 0x511   :  { %8392 = vmatprep.mubr.f32.mxu0 %v2404_v17  ;;  %v2379_v17 = vmul.f32 0.2, %v2315_v31  ;;  %vm2352_vm14 = vcmp.gt.f32.partialorder %v2320_v13, 0.0 }
 0x512   :  { %v2382_v38 = vmul.f32 0.2, %v2318_v41  ;;  %v2269_v45 = vrot.slane %v2199_v61, %v9766_v5  ;;  %vm2350_vm4 = vcmp.gt.f32.partialorder %v2318_v41, 0.0  ;;  %v2215_v18 = vcombine.high %v2199_v61, %v2199_v61 }
 0x513   :  { %v2411_v16 = vsel %vm2347_vm0, %v2315_v31, %v2379_v17  ;;  %vm2351_vm13 = vcmp.gt.f32.partialorder %v2319_v59, 0.0 }
 0x514   :  { %8393 = vmatmul.mubr.f32.gmra.mrb[42].mxu0 %v2405_v46  ;;  %v2381_v46 = vmul.f32 0.2, %v2317_v58  ;;  %v2414_v31 = vsel %vm2350_vm4, %v2318_v41, %v2382_v38  ;;  %v2322_v57 = vadd.f32 %v2269_v45, %v10543_v12  ;;  %v2323_v61 = vadd.f32 %v2269_v45, %v10552_v8 }
 0x515   :  { %8395 = vmatprep.mubr.f32.mxu0 %v2406_v33  ;;  %v2213_v33 = vrot.slane %v2185_v60, %v9764_v4  ;;  %v2416_v60 = vsel %vm2352_vm14, %v2320_v13, %v2384_v7 }
 0x516   :  { %v2413_v49 = vsel %vm2349_vm3, %v2317_v58, %v2381_v46  ;;  %v2386_v17 = vmul.f32 0.2, %v2322_v57  ;;  %vm2354_vm0 = vcmp.gt.f32.partialorder %v2322_v57, 0.0  ;;  %vm2355_vm1 = vcmp.gt.f32.partialorder %v2323_v61, 0.0 }
 0x517   :  { %v2273_v15 = vrot.slane %v2213_v33, %v9766_v5  ;;  %v2387_v41 = vmul.f32 0.2, %v2323_v61 }
 0x518   :  { %8396 = vmatmul.mubr.f32.gmra.mrb[44].mxu0 %v2407_v36  ;;  %v2383_v36 = vmul.f32 0.2, %v2319_v59  ;;  %v2418_v46 = vsel %vm2354_vm0, %v2322_v57, %v2386_v17 }
 0x519   :  { %8398 = vmatprep.mubr.f32.mxu0 %v2408_v52  ;;  %v2321_v52 = vadd.f32 %v2265_v40, %v10552_v8  ;;  %v2324_v58 = vadd.f32 %v2273_v15, %v10543_v12  ;;  %v2277_v40 = vrot.slane %v2215_v18, %v9766_v5  ;;  %v2419_v38 = vsel %vm2355_vm1, %v2323_v61, %v2387_v41 }
 0x51a   :  { %v2415_v11 = vsel %vm2351_vm13, %v2319_v59, %v2383_v36 }
 0x51b   :  { %vm2353_vm15 = vcmp.gt.f32.partialorder %v2321_v52, 0.0  ;;  %v2388_v59 = vmul.f32 0.2, %v2324_v58  ;;  %v2326_v13 = vadd.f32 %v2277_v40, %v10543_v12  ;;  %vm2356_vm3 = vcmp.gt.f32.partialorder %v2324_v58, 0.0 }
 0x51c   :  { %8399 = vmatmul.mubr.f32.gmra.mrb[46].mxu0 %v2409_v21  ;;  %v2385_v21 = vmul.f32 0.2, %v2321_v52 }
 0x51d   :  { %8401 = vmatprep.mubr.f32.mxu0 %v2410_v20  ;;  %v2217_v20 = vcombine.high %v2213_v33, %v2213_v33  ;;  %v2327_v33 = vadd.f32 %v2277_v40, %v10552_v8  ;;  %v2420_v18 = vsel %vm2356_vm3, %v2324_v58, %v2388_v59  ;;  %vm2358_vm13 = vcmp.gt.f32.partialorder %v2326_v13, 0.0 }
 0x51e   :  { %v2417_v9 = vsel %vm2353_vm15, %v2321_v52, %v2385_v21  ;;  %v2390_v52 = vmul.f32 0.2, %v2326_v13 }
 0x51f   :  { %v2391_v7 = vmul.f32 0.2, %v2327_v33  ;;  %vm2359_vm14 = vcmp.gt.f32.partialorder %v2327_v33, 0.0 }
 0x520   :  { %8402 = vmatmul.mubr.f32.gmra.mrb[48].mxu0 %v2411_v16  ;;  %v2325_v16 = vadd.f32 %v2273_v15, %v10552_v8  ;;  %v2422_v57 = vsel %vm2358_vm13, %v2326_v13, %v2390_v52 }
 0x521   :  { %8404 = vmatprep.mubr.f32.mxu0 %v2412_v39  ;;  %v2281_v39 = vrot.slane %v2217_v20, %v9766_v5 }
 0x522   :  { %v2389_v45 = vmul.f32 0.2, %v2325_v16  ;;  %vm2357_vm4 = vcmp.gt.f32.partialorder %v2325_v16, 0.0 }
 0x524   :  { %8405 = vmatmul.mubr.f32.gmra.mrb[50].mxu0 %v2413_v49  ;;  %v2328_v49 = vadd.f32 %v2281_v39, %v10543_v12  ;;  %v2421_v36 = vsel %vm2357_vm4, %v2325_v16, %v2389_v45 }
 0x525   :  { %8407 = vmatprep.mubr.f32.mxu0 %v2414_v31  ;;  %v2329_v31 = vadd.f32 %v2281_v39, %v10552_v8 }
 0x526   :  { %v2392_v15 = vmul.f32 0.2, %v2328_v49  ;;  %vm2360_vm15 = vcmp.gt.f32.partialorder %v2328_v49, 0.0 }
 0x527   :  { %vm2361_vm0 = vcmp.gt.f32.partialorder %v2329_v31, 0.0 }
 0x528   :  { %8408 = vmatmul.mubr.f32.gmra.mrb[52].mxu0 %v2415_v11  ;;  %v2423_v11 = vsel %vm2359_vm14, %v2327_v33, %v2391_v7  ;;  %v2424_v21 = vsel %vm2360_vm15, %v2328_v49, %v2392_v15 }
 0x529   :  { %8410 = vmatprep.mubr.f32.mxu0 %v2416_v60  ;;  %v2393_v60 = vmul.f32 0.2, %v2329_v31 }
 0x52b   :  { %v2425_v61 = vsel %vm2361_vm0, %v2329_v31, %v2393_v60 }
 0x52c   :  { %8411 = vmatmul.mubr.f32.gmra.mrb[54].mxu0 %v2417_v9 }
 0x52d   :  { %8413 = vmatprep.mubr.f32.mxu0 %v2418_v46 }
 0x530   :  { %8414 = vmatmul.mubr.f32.gmra.mrb[56].mxu0 %v2419_v38 }
 0x531   :  { %8416 = vmatprep.mubr.f32.mxu0 %v2420_v18 }
 0x534   :  { %8417 = vmatmul.mubr.f32.gmra.mrb[58].mxu0 %v2421_v36 }
 0x535   :  { %8419 = vmatprep.mubr.f32.mxu0 %v2422_v57 }
 0x538   :  { %8420 = vmatmul.mubr.f32.gmra.mrb[60].mxu0 %v2423_v11 }
 0x539   :  { %8422 = vmatprep.mubr.f32.mxu0 %v2424_v21 }
 0x53c   :  { %8423 = vmatmul.mubr.f32.gmra.mrb[62].mxu0 %v2425_v61 }
 0x5d3   :  { %v8379_v17 = vpop.f32.mrb[32].mxu0 }
 0x5d4   :  { %v2668_v58 = vsel %vm936_vm5, %v8379_v17, -inf  ;;  %v2508_v40 = vpop.f32.mrb[33].mxu0 }
 0x5d5   :  { %v2667_v20 = vsel %vm936_vm5, %v2508_v40, -inf }
 0x5d6   :  { %v2669_v9 = vmax.f32 %v2667_v20, %v2668_v58 }
 0x5d7   :  { %v8382_v41 = vpop.f32.mrb[34].mxu0 }
 0x5d8   :  { %v2670_v16 = vrot.slane %v2669_v9, 4  ;;  %v2677_v46 = vsel %vm936_vm5, %v8382_v41, -inf  ;;  %v2518_v59 = vpop.f32.mrb[35].mxu0 }
 0x5d9   :  { %v2676_v13 = vsel %vm936_vm5, %v2518_v59, -inf }
 0x5da   :  { %v2671_v39 = vmax.f32 %v2669_v9, %v2670_v16  ;;  %v2678_v38 = vmax.f32 %v2676_v13, %v2677_v46 }
 0x5db   :  { %v8385_v45 = vpop.f32.mrb[36].mxu0 }
 0x5dc   :  { %v2672_v33 = vrot.slane %v2671_v39, 2  ;;  %v2679_v18 = vrot.slane %v2678_v38, 4  ;;  %v2686_v52 = vsel %vm936_vm5, %v8385_v45, -inf  ;;  %v2528_v49 = vpop.f32.mrb[37].mxu0 }
 0x5dd   :  { %v2685_v36 = vsel %vm936_vm5, %v2528_v49, -inf }
 0x5de   :  { %v2673_v7 = vmax.f32 %v2671_v39, %v2672_v33  ;;  %v2680_v31 = vmax.f32 %v2678_v38, %v2679_v18  ;;  %v2687_v57 = vmax.f32 %v2685_v36, %v2686_v52 }
 0x5df   :  { %v10611_v15 = vpop.f32.mrb[38].mxu0 }
 0x5e0   :  { %v2674_v11 = vrot.slane %v2673_v7, 1  ;;  %v2681_v60 = vrot.slane %v2680_v31, 2  ;;  %v2688_v21 = vrot.slane %v2687_v57, 4  ;;  %v2695_v61 = vsel %vm936_vm5, %v10611_v15, -inf  ;;  %v10615_v58 = vpop.f32.mrb[39].mxu0 }
 0x5e1   :  { %v2694_v20 = vsel %vm936_vm5, %v10615_v58, -inf }
 0x5e2   :  { %v2675_v9 = vmax.f32 %v2673_v7, %v2674_v11  ;;  %v2682_v16 = vmax.f32 %v2680_v31, %v2681_v60  ;;  %v2689_v46 = vmax.f32 %v2687_v57, %v2688_v21  ;;  %v2696_v13 = vmax.f32 %v2694_v20, %v2695_v61 }
 0x5e3   :  { %v10619_v39 = vpop.f32.mrb[40].mxu0 }
 0x5e4   :  { %v2811_v38 = vsub.f32 %v2508_v40, %v2675_v9  ;;  %v2812_v33 = vsub.f32 %v8379_v17, %v2675_v9  ;;  %v2683_v18 = vrot.slane %v2682_v16, 1  ;;  %v2690_v52 = vrot.slane %v2689_v46, 2  ;;  %v10621_v36 = vpop.f32.mrb[41].mxu0 }
 0x5e5   :  { %v2697_v37 = vrot.slane %v2696_v13, 4  ;;  %v2704_v43 = vsel %vm936_vm5, %v10619_v39, -inf  ;;  %v2703_v42 = vsel %vm936_vm5, %v10621_v36, -inf }
 0x5e6   :  { %v2843_v19 = vmul.f32 1.442695, %v2811_v38  ;;  %v2684_v7 = vmax.f32 %v2682_v16, %v2683_v18  ;;  %v2691_v31 = vmax.f32 %v2689_v46, %v2690_v52  ;;  %v2845_v57 = vmul.f32 1.442695, %v2812_v33 }
 0x5e7   :  { %v2698_v11 = vmax.f32 %v2696_v13, %v2697_v37  ;;  %v2705_v60 = vmax.f32 %v2703_v42, %v2704_v43  ;;  %v10627_v21 = vpop.f32.mrb[42].mxu0 }
 0x5e8   :  { %9273 = vpow2.f32 %v2843_v19  ;;  %v2813_v17 = vsub.f32 %v2518_v59, %v2684_v7  ;;  %v2814_v40 = vsub.f32 %v8382_v41, %v2684_v7  ;;  %v2692_v61 = vrot.slane %v2691_v31, 1  ;;  %v10629_v20 = vpop.f32.mrb[43].mxu0 }
 0x5e9   :  { %v2699_v9 = vrot.slane %v2698_v11, 2  ;;  %v2706_v28 = vrot.slane %v2705_v60, 4  ;;  %v2713_v26 = vsel %vm936_vm5, %v10627_v21, -inf  ;;  %v2712_v16 = vsel %vm936_vm5, %v10629_v20, -inf }
 0x5ea   :  { %v2847_v35 = vmul.f32 1.442695, %v2813_v17  ;;  %v2693_v38 = vmax.f32 %v2691_v31, %v2692_v61  ;;  %9275 = vpow2.f32 %v2845_v57  ;;  %v2714_v37 = vmax.f32 %v2712_v16, %v2713_v26 }
 0x5eb   :  { %v2700_v42 = vmax.f32 %v2698_v11, %v2699_v9  ;;  %v2707_v43 = vmax.f32 %v2705_v60, %v2706_v28  ;;  %v10635_v19 = vpop.f32.mrb[44].mxu0  ;;  %v2849_v41 = vmul.f32 1.442695, %v2814_v40 }
 0x5ec   :  { %v2815_v59 = vsub.f32 %v2528_v49, %v2693_v38  ;;  %v2816_v46 = vsub.f32 %v8385_v45, %v2693_v38  ;;  %v2722_v13 = vsel %vm936_vm5, %v10635_v19, -inf  ;;  %v10639_v33 = vpop.f32.mrb[45].mxu0  ;;  %v2715_v7 = vrot.slane %v2714_v37, 4 }
 0x5ed   :  { %v2701_v18 = vrot.slane %v2700_v42, 1  ;;  %v2708_v52 = vrot.slane %v2707_v43, 2  ;;  %9277 = vpow2.f32 %v2847_v35  ;;  %v2721_v28 = vsel %vm936_vm5, %v10639_v33, -inf }
 0x5ee   :  { %v2851_v31 = vmul.f32 1.442695, %v2815_v59  ;;  %v2853_v17 = vmul.f32 1.442695, %v2816_v46  ;;  %v2716_v11 = vmax.f32 %v2714_v37, %v2715_v7  ;;  %v2723_v60 = vmax.f32 %v2721_v28, %v2722_v13  ;;  %v9562_v7 = vld [vmem:[%s9878_s3] sm:$0xff] }
 0x5ef   :  { %v2702_v26 = vmax.f32 %v2700_v42, %v2701_v18  ;;  %v2709_v57 = vmax.f32 %v2707_v43, %v2708_v52  ;;  %v10643_v49 = vpop.f32.mrb[46].mxu0  ;;  %9279 = vpow2.f32 %v2849_v41 }
 0x5f0   :  { %v2731_v45 = vsel %vm936_vm5, %v10643_v49, -inf  ;;  %v10647_v40 = vpop.f32.mrb[47].mxu0  ;;  %9281 = vpow2.f32 %v2851_v31  ;;  %v2717_v16 = vrot.slane %v2716_v11, 2  ;;  %v2724_v42 = vrot.slane %v2723_v60, 4 }
 0x5f1   :  { %v2817_v35 = vsub.f32 %v10615_v58, %v2702_v26  ;;  %v2818_v61 = vsub.f32 %v10611_v15, %v2702_v26  ;;  %v2710_v9 = vrot.slane %v2709_v57, 1  ;;  %9283 = vpow2.f32 %v2853_v17 }
 0x5f2   :  { %v9274_v38 = vpop.eup %9273  ;;  %v2730_v43 = vsel %vm936_vm5, %v10647_v40, -inf  ;;  %v2718_v18 = vmax.f32 %v2716_v11, %v2717_v16  ;;  %v2725_v52 = vmax.f32 %v2723_v60, %v2724_v42 }
 0x5f3   :  { %v2855_v37 = vmul.f32 1.442695, %v2817_v35  ;;  %v2857_v41 = vmul.f32 1.442695, %v2818_v61  ;;  %v2711_v59 = vmax.f32 %v2709_v57, %v2710_v9  ;;  %v2732_v46 = vmax.f32 %v2730_v43, %v2731_v45  ;;  %v10653_v13 = vpop.f32.mrb[48].mxu0 }
 0x5f4   :  { %v2740_v15 = vsel %vm936_vm5, %v10653_v13, -inf  ;;  %v10657_v58 = vpop.f32.mrb[49].mxu0  ;;  %v10660_v31 = vmul.f32 %v9562_v7, %v9274_v38  ;;  %v9276_v17 = vpop.eup %9275  ;;  %v2719_v45 = vrot.slane %v2718_v18, 1  ;;  %v2726_v11 = vrot.slane %v2725_v52, 2 }
 0x5f5   :  { %9285 = vpow2.f32 %v2855_v37  ;;  %v2819_v28 = vsub.f32 %v10621_v36, %v2711_v59  ;;  %v2820_v26 = vsub.f32 %v10619_v39, %v2711_v59  ;;  %v2733_v57 = vrot.slane %v2732_v46, 4 }
 0x5f6   :  { %9287 = vpow2.f32 %v2857_v41  ;;  %v2739_v60 = vsel %vm936_vm5, %v10657_v58, -inf  ;;  %v2720_v43 = vmax.f32 %v2718_v18, %v2719_v45  ;;  %v2727_v36 = vmax.f32 %v2725_v52, %v2726_v11  ;;  %v9563_v41 = vld [vmem:[%s9878_s3 + $0x8] sm:$0xff] }
 0x5f7   :  { %v2859_v35 = vmul.f32 1.442695, %v2819_v28  ;;  %v2861_v61 = vmul.f32 1.442695, %v2820_v26  ;;  %v2734_v9 = vmax.f32 %v2732_v46, %v2733_v57  ;;  %v2741_v16 = vmax.f32 %v2739_v60, %v2740_v15  ;;  %v10666_v38 = vpop.f32.mrb[50].mxu0  ;;  %v10668_v42 = vpop.eup %9277 }
 0x5f8   :  { %v2749_v39 = vsel %vm936_vm5, %v10666_v38, -inf  ;;  %v10672_v37 = vpop.f32.mrb[51].mxu0  ;;  %v10675_v59 = vmul.f32 %v9563_v41, %v9276_v17  ;;  %v2821_v18 = vsub.f32 %v10629_v20, %v2720_v43  ;;  %v2822_v52 = vsub.f32 %v10627_v21, %v2720_v43 }
 0x5f9   :  { %9289 = vpow2.f32 %v2859_v35  ;;  %v2735_v7 = vrot.slane %v2734_v9, 2  ;;  %v2742_v28 = vrot.slane %v2741_v16, 4  ;;  %v2748_v46 = vsel %vm936_vm5, %v10672_v37, -inf  ;;  %v10679_v15 = vpop.eup %9279 }
 0x5fa   :  { %9291 = vpow2.f32 %v2861_v61  ;;  %v2728_v26 = vrot.slane %v2727_v36, 1  ;;  %v10683_v57 = vpop.eup %9281  ;;  %v2750_v17 = vmax.f32 %v2748_v46, %v2749_v39  ;;  %v2939_v35 = vsel %vm936_vm5, %v10660_v31, 0.0 }
 0x5fb   :  { %v2736_v45 = vmax.f32 %v2734_v9, %v2735_v7  ;;  %v2743_v11 = vmax.f32 %v2741_v16, %v2742_v28  ;;  %v10685_v60 = vpop.f32.mrb[52].mxu0  ;;  %v10689_v41 = vpop.eup %9283  ;;  %v2863_v24 = vmul.f32 1.442695, %v2821_v18  ;;  %v2865_v56 = vmul.f32 1.442695, %v2822_v52 }
 0x5fc   :  { %v2729_v61 = vmax.f32 %v2727_v36, %v2728_v26  ;;  %v2758_v20 = vsel %vm936_vm5, %v10685_v60, -inf  ;;  %v10693_v21 = vpop.f32.mrb[53].mxu0  ;;  %v2751_v9 = vrot.slane %v2750_v17, 4 }
 0x5fd   :  { %v2737_v43 = vrot.slane %v2736_v45, 1  ;;  %v2744_v32 = vrot.slane %v2743_v11, 2  ;;  %v2757_v16 = vsel %vm936_vm5, %v10693_v21, -inf  ;;  %9293 = vpow2.f32 %v2863_v24 }
 0x5fe   :  { %v2823_v39 = vsub.f32 %v10639_v33, %v2729_v61  ;;  %v2824_v7 = vsub.f32 %v10635_v19, %v2729_v61  ;;  %v2759_v28 = vmax.f32 %v2757_v16, %v2758_v20  ;;  %9295 = vpow2.f32 %v2865_v56 }
 0x5ff   :  { %v10699_v46 = vpop.eup %9285  ;;  %v2738_v36 = vmax.f32 %v2736_v45, %v2737_v43  ;;  %v2745_v18 = vmax.f32 %v2743_v11, %v2744_v32  ;;  %v2752_v52 = vmax.f32 %v2750_v17, %v2751_v9  ;;  %v10701_v26 = vpop.f32.mrb[54].mxu0  ;;  %v2940_v11 = vsel %vm936_vm5, %v10675_v59, 0.0 }
 0x600   :  { %v10703_v47 = vpop.eup %9287  ;;  %v2867_v23 = vmul.f32 1.442695, %v2823_v39  ;;  %v2869_v10 = vmul.f32 1.442695, %v2824_v7  ;;  %v2760_v0 = vrot.slane %v2759_v28, 4  ;;  %v2767_v24 = vsel %vm936_vm5, %v10701_v26, -inf }
 0x601   :  { %v2825_v33 = vsub.f32 %v10647_v40, %v2738_v36  ;;  %v2826_v19 = vsub.f32 %v10643_v49, %v2738_v36  ;;  %v2746_v61 = vrot.slane %v2745_v18, 1  ;;  %v2753_v20 = vrot.slane %v2752_v52, 2  ;;  %v10709_v56 = vpop.f32.mrb[55].mxu0 }
 0x602   :  { %9297 = vpow2.f32 %v2867_v23  ;;  %v2761_v32 = vmax.f32 %v2759_v28, %v2760_v0  ;;  %v2766_v45 = vsel %vm936_vm5, %v10709_v56, -inf  ;;  %v2941_v2 = vadd.f32 %v2940_v11, %v2939_v35 }
 0x603   :  { %v10715_v17 = vpop.eup %9289  ;;  %9299 = vpow2.f32 %v2869_v10  ;;  %v2871_v43 = vmul.f32 1.442695, %v2825_v33  ;;  %v2873_v9 = vmul.f32 1.442695, %v2826_v19  ;;  %v2747_v40 = vmax.f32 %v2745_v18, %v2746_v61  ;;  %v10717_v16 = vpop.f32.mrb[56].mxu0 }
 0x604   :  { %v10719_v49 = vpop.eup %9291  ;;  %v2754_v39 = vmax.f32 %v2752_v52, %v2753_v20  ;;  %v2762_v7 = vrot.slane %v2761_v32, 2  ;;  %v2768_v23 = vmax.f32 %v2766_v45, %v2767_v24  ;;  %v2776_v0 = vsel %vm936_vm5, %v10717_v16, -inf  ;;  %v10723_v28 = vpop.f32.mrb[57].mxu0 }
 0x605   :  { %9301 = vpow2.f32 %v2871_v43  ;;  %v2827_v36 = vsub.f32 %v10657_v58, %v2747_v40  ;;  %v2828_v10 = vsub.f32 %v10653_v13, %v2747_v40  ;;  %v2775_v18 = vsel %vm936_vm5, %v10723_v28, -inf }
 0x606   :  { %9303 = vpow2.f32 %v2873_v9  ;;  %v2755_v33 = vrot.slane %v2754_v39, 1  ;;  %v2763_v19 = vmax.f32 %v2761_v32, %v2762_v7  ;;  %v2769_v61 = vrot.slane %v2768_v23, 4 }
 0x607   :  { %v2875_v52 = vmul.f32 1.442695, %v2827_v36  ;;  %v2877_v20 = vmul.f32 1.442695, %v2828_v10  ;;  %v2777_v24 = vmax.f32 %v2775_v18, %v2776_v0  ;;  %v10729_v45 = vpop.f32.mrb[58].mxu0  ;;  %v10731_v25 = vpop.eup %9293  ;;  %v2942_v0 = vrot.slane %v2941_v2, 4 }
 0x608   :  { %v2756_v43 = vmax.f32 %v2754_v39, %v2755_v33  ;;  %v2764_v27 = vrot.slane %v2763_v19, 1  ;;  %v2770_v58 = vmax.f32 %v2768_v23, %v2769_v61  ;;  %v2785_v13 = vsel %vm936_vm5, %v10729_v45, -inf  ;;  %v10735_v40 = vpop.f32.mrb[59].mxu0  ;;  %v10737_v9 = vpop.eup %9295 }
 0x609   :  { %9305 = vpow2.f32 %v2875_v52  ;;  %v2778_v32 = vrot.slane %v2777_v24, 4  ;;  %v2784_v7 = vsel %vm936_vm5, %v10735_v40, -inf  ;;  %v2943_v33 = vadd.f32 %v2942_v0, %v2941_v2 }
 0x60a   :  { %9307 = vpow2.f32 %v2877_v20  ;;  %v2829_v35 = vsub.f32 %v10672_v37, %v2756_v43  ;;  %v2830_v11 = vsub.f32 %v10666_v38, %v2756_v43  ;;  %v2765_v39 = vmax.f32 %v2763_v19, %v2764_v27 }
 0x60b   :  { %v2771_v23 = vrot.slane %v2770_v58, 2  ;;  %v2779_v36 = vmax.f32 %v2777_v24, %v2778_v32  ;;  %v2786_v10 = vmax.f32 %v2784_v7, %v2785_v13  ;;  %v10743_v18 = vpop.f32.mrb[60].mxu0 }
 0x60c   :  { %v10745_v61 = vpop.eup %9297  ;;  %v2879_v52 = vmul.f32 1.442695, %v2829_v35  ;;  %v2881_v5 = vmul.f32 1.442695, %v2830_v11  ;;  %v2831_v4 = vsub.f32 %v10693_v21, %v2765_v39  ;;  %v2832_v63 = vsub.f32 %v10685_v60, %v2765_v39  ;;  %v10749_v20 = vpop.f32.mrb[61].mxu0 }
 0x60d   :  { %v10751_v37 = vpop.eup %9299  ;;  %v2772_v38 = vmax.f32 %v2770_v58, %v2771_v23  ;;  %v2780_v27 = vrot.slane %v2779_v36, 2  ;;  %v2787_v19 = vrot.slane %v2786_v10, 4  ;;  %v2794_v24 = vsel %vm936_vm5, %v10743_v18, -inf }
 0x60e   :  { %9309 = vpow2.f32 %v2879_v52  ;;  %v2883_v2 = vmul.f32 1.442695, %v2831_v4  ;;  %v2885_v43 = vmul.f32 1.442695, %v2832_v63  ;;  %v2793_v13 = vsel %vm936_vm5, %v10749_v20, -inf }
 0x60f   :  { %v10757_v32 = vpop.eup %9301  ;;  %9311 = vpow2.f32 %v2881_v5  ;;  %v2773_v60 = vrot.slane %v2772_v38, 1  ;;  %v2781_v21 = vmax.f32 %v2779_v36, %v2780_v27  ;;  %v2788_v7 = vmax.f32 %v2786_v10, %v2787_v19  ;;  %v10759_v0 = vpop.f32.mrb[62].mxu0  ;;  %v9564_v27 = vld [vmem:[%s9878_s3 + $0x10] sm:$0xff] }
 0x610   :  { %v10761_v58 = vpop.eup %9303  ;;  %9313 = vpow2.f32 %v2883_v2  ;;  %v2795_v35 = vmax.f32 %v2793_v13, %v2794_v24  ;;  %v2803_v4 = vsel %vm936_vm5, %v10759_v0, -inf  ;;  %v10765_v63 = vpop.f32.mrb[63].mxu0  ;;  %v2944_v11 = vrot.slane %v2943_v33, 2 }
 0x611   :  { %9315 = vpow2.f32 %v2885_v43  ;;  %v2774_v39 = vmax.f32 %v2772_v38, %v2773_v60  ;;  %v2782_v23 = vrot.slane %v2781_v21, 1  ;;  %v2789_v5 = vrot.slane %v2788_v7, 2 }
 0x612   :  { %v2796_v36 = vrot.slane %v2795_v35, 4  ;;  %v2802_v10 = vsel %vm936_vm5, %v10765_v63, -inf  ;;  %v2945_v52 = vadd.f32 %v2944_v11, %v2943_v33  ;;  %v10771_v19 = vmul.f32 %v9564_v27, %v10668_v42 }
 0x613   :  { %v10773_v24 = vpop.eup %9305  ;;  %v2833_v2 = vsub.f32 %v10709_v56, %v2774_v39  ;;  %v2834_v13 = vsub.f32 %v10701_v26, %v2774_v39  ;;  %v2783_v43 = vmax.f32 %v2781_v21, %v2782_v23  ;;  %v2790_v38 = vmax.f32 %v2788_v7, %v2789_v5  ;;  %v9566_v5 = vld [vmem:[%s9878_s3 + $0x20] sm:$0xff] }
 0x614   :  { %v10777_v60 = vpop.eup %9307  ;;  %v2797_v54 = vmax.f32 %v2795_v35, %v2796_v36  ;;  %v2804_v44 = vmax.f32 %v2802_v10, %v2803_v4  ;;  %v2946_v6 = vrot.slane %v2945_v52, 1  ;;  %v10781_v33 = vmul.f32 %v9565_v14, %v10679_v15 }
 0x615   :  { %v2887_v11 = vmul.f32 1.442695, %v2833_v2  ;;  %v2889_v42 = vmul.f32 1.442695, %v2834_v13  ;;  %v2835_v27 = vsub.f32 %v10723_v28, %v2783_v43  ;;  %v2836_v53 = vsub.f32 %v10717_v16, %v2783_v43  ;;  %v9567_v13 = vld [vmem:[%s9878_s3 + $0x28] sm:$0xff] }
 0x616   :  { %v2791_v56 = vrot.slane %v2790_v38, 1  ;;  %v2798_v34 = vrot.slane %v2797_v54, 2  ;;  %v2805_v26 = vrot.slane %v2804_v44, 4  ;;  %v2947_v21 = vadd.f32 %v2946_v6, %v2945_v52 }
 0x617   :  { %9317 = vpow2.f32 %v2887_v11  ;;  %v2891_v7 = vmul.f32 1.442695, %v2835_v27  ;;  %v2893_v35 = vmul.f32 1.442695, %v2836_v53  ;;  %v2948_v4 = vsel %vm936_vm5, %v10771_v19, 0.0 }
 0x618   :  { %v10787_v39 = vpop.eup %9309  ;;  %9319 = vpow2.f32 %v2889_v42  ;;  %v2792_v14 = vmax.f32 %v2790_v38, %v2791_v56  ;;  %v2799_v15 = vmax.f32 %v2797_v54, %v2798_v34  ;;  %v2806_v23 = vmax.f32 %v2804_v44, %v2805_v26  ;;  %v9568_v56 = vld [vmem:[%s9878_s3 + $0x30] sm:$0xff] }
 0x619   :  { %v10789_v28 = vpop.eup %9311  ;;  %9321 = vpow2.f32 %v2891_v7  ;;  %v3083_v16 = vmax.f32 %v2947_v21, 1e-16  ;;  %v2949_v6 = vsel %vm936_vm5, %v10781_v33, 0.0  ;;  %v10795_v53 = vmul.f32 %v9566_v5, %v10683_v57 }
 0x61a   :  { %v10797_v36 = vpop.eup %9313  ;;  %9323 = vpow2.f32 %v2893_v35  ;;  %v2837_v10 = vsub.f32 %v10735_v40, %v2792_v14  ;;  %v2838_v34 = vsub.f32 %v10729_v45, %v2792_v14  ;;  %v2800_v44 = vrot.slane %v2799_v15, 1  ;;  %v9569_v14 = vld [vmem:[%s9878_s3 + $0x38] sm:$0xff] }
 0x61b   :  { %v10801_v54 = vpop.eup %9315  ;;  %v2807_v52 = vrot.slane %v2806_v23, 2  ;;  %9325 = vrcp.f32 %v3083_v16  ;;  %v2950_v2 = vadd.f32 %v2949_v6, %v2948_v4  ;;  %v10805_v43 = vmul.f32 %v9567_v13, %v10689_v41  ;;  %v9571_v13 = vld [vmem:[%s9878_s3 + $0x48] sm:$0xff] }
 0x61c   :  { %v2895_v57 = vmul.f32 1.442695, %v2837_v10  ;;  %v2897_v38 = vmul.f32 1.442695, %v2838_v34  ;;  %v2801_v11 = vmax.f32 %v2799_v15, %v2800_v44  ;;  %v2957_v40 = vsel %vm936_vm5, %v10795_v53, 0.0  ;;  %v9570_v34 = vld [vmem:[%s9878_s3 + $0x40] sm:$0xff] }
 0x61d   :  { %v2808_v42 = vmax.f32 %v2806_v23, %v2807_v52  ;;  %v2951_v27 = vrot.slane %v2950_v2, 4  ;;  %v2958_v45 = vsel %vm936_vm5, %v10805_v43, 0.0  ;;  %v10813_v26 = vmul.f32 %v9568_v56, %v10699_v46 }
 0x61e   :  { %9327 = vpow2.f32 %v2895_v57  ;;  %v2839_v41 = vsub.f32 %v10749_v20, %v2801_v11  ;;  %v2840_v21 = vsub.f32 %v10743_v18, %v2801_v11  ;;  %v2959_v7 = vadd.f32 %v2958_v45, %v2957_v40 }
 0x61f   :  { %9329 = vpow2.f32 %v2897_v38  ;;  %v2809_v35 = vrot.slane %v2808_v42, 1  ;;  %v2952_v4 = vadd.f32 %v2951_v27, %v2950_v2  ;;  %v10819_v15 = vmul.f32 %v9569_v14, %v10703_v47 }
 0x620   :  { %v2899_v23 = vmul.f32 1.442695, %v2839_v41  ;;  %v2901_v16 = vmul.f32 1.442695, %v2840_v21  ;;  %v2960_v6 = vrot.slane %v2959_v7, 4  ;;  %v2966_v46 = vsel %vm936_vm5, %v10813_v26, 0.0 }
 0x621   :  { %v10823_v5 = vpop.eup %9317  ;;  %v2810_v20 = vmax.f32 %v2808_v42, %v2809_v35  ;;  %v2953_v10 = vrot.slane %v2952_v4, 2  ;;  %v2967_v18 = vsel %vm936_vm5, %v10819_v15, 0.0  ;;  %v10829_v44 = vmul.f32 %v9570_v34, %v10715_v17  ;;  %v9573_v34 = vld [vmem:[%s9878_s3 + $0x58] sm:$0xff] }
 0x622   :  { %v10831_v52 = vpop.eup %9319  ;;  %9331 = vpow2.f32 %v2899_v23  ;;  %v2961_v47 = vadd.f32 %v2960_v6, %v2959_v7  ;;  %v2968_v2 = vadd.f32 %v2967_v18, %v2966_v46  ;;  %v10835_v57 = vmul.f32 %v9571_v13, %v10719_v49  ;;  %v9572_v46 = vld [vmem:[%s9878_s3 + $0x50] sm:$0xff] }
 0x623   :  { %v10837_v38 = vpop.eup %9321  ;;  %9333 = vpow2.f32 %v2901_v16  ;;  %v2841_v11 = vsub.f32 %v10765_v63, %v2810_v20  ;;  %v2842_v40 = vsub.f32 %v10759_v0, %v2810_v20  ;;  %v2954_v42 = vadd.f32 %v2953_v10, %v2952_v4 }
 0x624   :  { %v10841_v27 = vpop.eup %9323  ;;  %v2962_v17 = vrot.slane %v2961_v47, 2  ;;  %v2969_v45 = vrot.slane %v2968_v2, 4  ;;  %v2975_v56 = vsel %vm936_vm5, %v10829_v44, 0.0  ;;  %v2976_v49 = vsel %vm936_vm5, %v10835_v57, 0.0 }
 0x625   :  { %v9326_v41 = vpop.eup %9325  ;;  %v2903_v21 = vmul.f32 1.442695, %v2841_v11  ;;  %v2905_v7 = vmul.f32 1.442695, %v2842_v40  ;;  %v2955_v35 = vrot.slane %v2954_v42, 1  ;;  %v2977_v63 = vadd.f32 %v2976_v49, %v2975_v56  ;;  %v9574_v11 = vld [vmem:[%s9878_s3 + $0x60] sm:$0xff] }
 0x626   :  { %v3100_v0 = vmul.f32 %v9326_v41, %v10660_v31  ;;  %v3101_v4 = vmul.f32 %v9326_v41, %v10675_v59  ;;  %v2963_v14 = vadd.f32 %v2962_v17, %v2961_v47  ;;  %v2970_v23 = vadd.f32 %v2969_v45, %v2968_v2  ;;  %v9575_v45 = vld [vmem:[%s9878_s3 + $0x68] sm:$0xff] }
 0x627   :  { %9335 = vpow2.f32 %v2903_v21  ;;  %v2956_v16 = vadd.f32 %v2955_v35, %v2954_v42  ;;  %v2978_v6 = vrot.slane %v2977_v63, 4  ;;  %v10851_v20 = vmul.f32 %v9572_v46, %v10731_v25 }
 0x628   :  { %v10853_v10 = vpop.eup %9327  ;;  %9337 = vpow2.f32 %v2905_v7  ;;  %8427 = vmatprep.mubr.msk.f32.mxu1 %vm936_vm5, %v3100_v0  ;;  %v2964_v18 = vrot.slane %v2963_v14, 1  ;;  %v2971_v31 = vrot.slane %v2970_v23, 2  ;;  %v10858_v59 = vmul.f32 %v9573_v34, %v10737_v9  ;;  %v9576_v0 = vld [vmem:[%s9878_s3 + $0x70] sm:$0xff]  ;;  %v9578_v34 = vld [vmem:[%s9878_s3 + $0x80] sm:$0xff] }
 0x629   :  { %v10860_v47 = vpop.eup %9329  ;;  %8428 = vmatmul.mubr.msk.f32.vlgmr.msra.gmra.mrb[42].mxu1 %vm936_vm5, %v3101_v4  ;;  %v3084_v2 = vmax.f32 %v2956_v16, 1e-16  ;;  %v2979_v13 = vadd.f32 %v2978_v6, %v2977_v63  ;;  %v2984_v25 = vsel %vm936_vm5, %v10851_v20, 0.0  ;;  %v10867_v40 = vmul.f32 %v9574_v11, %v10745_v61  ;;  %v9577_v6 = vld [vmem:[%s9878_s3 + $0x78] sm:$0xff] }
 0x62a   :  { %v2965_v42 = vadd.f32 %v2964_v18, %v2963_v14  ;;  %v2972_v17 = vadd.f32 %v2971_v31, %v2970_v23  ;;  %v2985_v9 = vsel %vm936_vm5, %v10858_v59, 0.0  ;;  %v10873_v56 = vmul.f32 %v9575_v45, %v10751_v37 }
 0x62b   :  { %9339 = vrcp.f32 %v3084_v2  ;;  %v2980_v49 = vrot.slane %v2979_v13, 2  ;;  %v2986_v41 = vadd.f32 %v2985_v9, %v2984_v25  ;;  %v2993_v21 = vsel %vm936_vm5, %v10867_v40, 0.0  ;;  %v9579_v9 = vld [vmem:[%s9878_s3 + $0x88] sm:$0xff] }
 0x62c   :  { %v10877_v7 = vpop.eup %9331  ;;  %v3085_v61 = vmax.f32 %v2965_v42, 1e-16  ;;  %v2973_v35 = vrot.slane %v2972_v17, 1  ;;  %v2994_v63 = vsel %vm936_vm5, %v10873_v56, 0.0  ;;  %v10883_v4 = vmul.f32 %v9576_v0, %v10757_v32 }
 0x62d   :  { %v10885_v37 = vpop.eup %9333  ;;  %v2981_v14 = vadd.f32 %v2980_v49, %v2979_v13  ;;  %v2987_v23 = vrot.slane %v2986_v41, 4  ;;  %v2995_v16 = vadd.f32 %v2994_v63, %v2993_v21  ;;  %v10889_v46 = vmul.f32 %v9577_v6, %v10761_v58 }
 0x62e   :  { %9341 = vrcp.f32 %v3085_v61  ;;  %v2974_v18 = vadd.f32 %v2973_v35, %v2972_v17  ;;  %v3002_v31 = vsel %vm936_vm5, %v10883_v4, 0.0  ;;  %v10895_v32 = vmul.f32 %v9578_v34, %v10773_v24 }
 0x62f   :  { %v2982_v2 = vrot.slane %v2981_v14, 1  ;;  %v2988_v25 = vadd.f32 %v2987_v23, %v2986_v41  ;;  %v2996_v13 = vrot.slane %v2995_v16, 4  ;;  %v3003_v11 = vsel %vm936_vm5, %v10889_v46, 0.0  ;;  %v9580_v41 = vld [vmem:[%s9878_s3 + $0x90] sm:$0xff]  ;;  %v9581_v23 = vld [vmem:[%s9878_s3 + $0x98] sm:$0xff] }
 0x630   :  { %v3086_v42 = vmax.f32 %v2974_v18, 1e-16  ;;  %v3004_v58 = vadd.f32 %v3003_v11, %v3002_v31  ;;  %v10901_v17 = vmul.f32 %v9579_v9, %v10777_v60  ;;  %v3011_v45 = vsel %vm936_vm5, %v10895_v32, 0.0 }
 0x631   :  { %v10905_v49 = vpop.eup %9335  ;;  %v2983_v24 = vadd.f32 %v2982_v2, %v2981_v14  ;;  %v2989_v21 = vrot.slane %v2988_v25, 2  ;;  %v2997_v61 = vadd.f32 %v2996_v13, %v2995_v16  ;;  %v10909_v35 = vmul.f32 %v9580_v41, %v10787_v39  ;;  %v9582_v13 = vld [vmem:[%s9878_s3 + $0xa0] sm:$0xff] }
 0x632   :  { %v10911_v63 = vpop.eup %9337  ;;  %9343 = vrcp.f32 %v3086_v42  ;;  %v3005_v0 = vrot.slane %v3004_v58, 4  ;;  %v3012_v60 = vsel %vm936_vm5, %v10901_v17, 0.0  ;;  %v10917_v6 = vmul.f32 %v9581_v23, %v10789_v28  ;;  %v9583_v23 = vld [vmem:[%s9878_s3 + $0xa8] sm:$0xff] }
 0x633   :  { %v3087_v18 = vmax.f32 %v2983_v24, 1e-16  ;;  %v2990_v14 = vadd.f32 %v2989_v21, %v2988_v25  ;;  %v2998_v31 = vrot.slane %v2997_v61, 2  ;;  %v3013_v16 = vadd.f32 %v3012_v60, %v3011_v45 }
 0x634   :  { %v3006_v34 = vadd.f32 %v3005_v0, %v3004_v58  ;;  %v3020_v39 = vsel %vm936_vm5, %v10909_v35, 0.0  ;;  %v3021_v2 = vsel %vm936_vm5, %v10917_v6, 0.0  ;;  %v10925_v11 = vmul.f32 %v9582_v13, %v10797_v36 }
 0x635   :  { %v9340_v42 = vpop.eup %9339  ;;  %9345 = vrcp.f32 %v3087_v18  ;;  %v2991_v28 = vrot.slane %v2990_v14, 1  ;;  %v2999_v9 = vadd.f32 %v2998_v31, %v2997_v61  ;;  %v3014_v25 = vrot.slane %v3013_v16, 4 }
 0x636   :  { %v3103_v45 = vmul.f32 %v9340_v42, %v10771_v19  ;;  %v3104_v58 = vmul.f32 %v9340_v42, %v10781_v33  ;;  %v3007_v24 = vrot.slane %v3006_v34, 2  ;;  %v3022_v21 = vadd.f32 %v3021_v2, %v3020_v39  ;;  %v9584_v19 = vld [vmem:[%s9878_s3 + $0xb0] sm:$0xff] }
 0x637   :  { %v2992_v41 = vadd.f32 %v2991_v28, %v2990_v14  ;;  %v3000_v0 = vrot.slane %v2999_v9, 1  ;;  %v3015_v60 = vadd.f32 %v3014_v25, %v3013_v16  ;;  %v10931_v50 = vmul.f32 %v9583_v23, %v10801_v54  ;;  %v9585_v25 = vld [vmem:[%s9878_s3 + $0xb8] sm:$0xff] }
 0x638   :  { %v9342_v36 = vpop.eup %9341  ;;  %8430 = vmatprep.mubr.msk.f32.mxu1 %vm936_vm5, %v3103_v45  ;;  %v3008_v18 = vadd.f32 %v3007_v24, %v3006_v34  ;;  %v3023_v61 = vrot.slane %v3022_v21, 4  ;;  %v3029_v31 = vsel %vm936_vm5, %v10925_v11, 0.0  ;;  %v10938_v33 = vmul.f32 %v9584_v19, %v10823_v5  ;;  %v9586_v19 = vld [vmem:[%s9878_s3 + $0xc0] sm:$0xff] }
 0x639   :  { %8431 = vmatmul.mubr.msk.f32.gmra.mrb[44].mxu1 %vm936_vm5, %v3104_v58  ;;  %v3106_v14 = vmul.f32 %v9342_v36, %v10795_v53  ;;  %v3107_v54 = vmul.f32 %v9342_v36, %v10805_v43  ;;  %v3088_v16 = vmax.f32 %v2992_v41, 1e-16  ;;  %v3001_v39 = vadd.f32 %v3000_v0, %v2999_v9 }
 0x63a   :  { %v3009_v2 = vrot.slane %v3008_v18, 1  ;;  %v3016_v13 = vrot.slane %v3015_v60, 2  ;;  %v3024_v34 = vadd.f32 %v3023_v61, %v3022_v21  ;;  %v3030_v42 = vsel %vm936_vm5, %v10931_v50, 0.0 }
 0x63b   :  { %8433 = vmatprep.mubr.msk.f32.mxu1 %vm936_vm5, %v3106_v14  ;;  %9347 = vrcp.f32 %v3088_v16  ;;  %v3089_v28 = vmax.f32 %v3001_v39, 1e-16  ;;  %v3031_v5 = vadd.f32 %v3030_v42, %v3029_v31  ;;  %v10948_v45 = vmul.f32 %v9585_v25, %v10831_v52 }
 0x63c   :  { %v9344_v53 = vpop.eup %9343  ;;  %v3010_v58 = vadd.f32 %v3009_v2, %v3008_v18  ;;  %v3017_v43 = vadd.f32 %v3016_v13, %v3015_v60  ;;  %v3025_v9 = vrot.slane %v3024_v34, 2  ;;  %v3038_v24 = vsel %vm936_vm5, %v10938_v33, 0.0 }
 0x63d   :  { %8434 = vmatmul.mubr.msk.f32.gmra.mrb[46].mxu1 %vm936_vm5, %v3107_v54  ;;  %v3109_v21 = vmul.f32 %v9344_v53, %v10813_v26  ;;  %v3110_v41 = vmul.f32 %v9344_v53, %v10819_v15  ;;  %9349 = vrcp.f32 %v3089_v28  ;;  %v3032_v0 = vrot.slane %v3031_v5, 4  ;;  %v9587_v26 = vld [vmem:[%s9878_s3 + $0xc8] sm:$0xff]  ;;  %v9589_v28 = vld [vmem:[%s9878_s3 + $0xd8] sm:$0xff] }
 0x63e   :  { %v3090_v23 = vmax.f32 %v3010_v58, 1e-16  ;;  %v3018_v52 = vrot.slane %v3017_v43, 1  ;;  %v3026_v36 = vadd.f32 %v3025_v9, %v3024_v34  ;;  %v3039_v60 = vsel %vm936_vm5, %v10948_v45, 0.0 }
 0x63f   :  { %v9346_v18 = vpop.eup %9345  ;;  %8436 = vmatprep.mubr.msk.f32.mxu1 %vm936_vm5, %v3109_v21  ;;  %v3033_v61 = vadd.f32 %v3032_v0, %v3031_v5  ;;  %v3040_v31 = vadd.f32 %v3039_v60, %v3038_v24  ;;  %v10960_v14 = vmul.f32 %v9586_v19, %v10837_v38  ;;  %v10964_v15 = vmul.f32 %v9587_v26, %v10841_v27  ;;  %v9590_v21 = vld [vmem:[%s9878_s3 + $0xe0] sm:$0xff] }
 0x640   :  { %v3112_v54 = vmul.f32 %v9346_v18, %v10829_v44  ;;  %v3113_v16 = vmul.f32 %v9346_v18, %v10835_v57  ;;  %9351 = vrcp.f32 %v3090_v23  ;;  %v3019_v39 = vadd.f32 %v3018_v52, %v3017_v43  ;;  %v9588_v44 = vld [vmem:[%s9878_s3 + $0xd0] sm:$0xff] }
 0x641   :  { %8437 = vmatmul.mubr.msk.f32.gmra.mrb[48].mxu1 %vm936_vm5, %v3110_v41  ;;  %v3027_v2 = vrot.slane %v3026_v36, 1  ;;  %v3034_v13 = vrot.slane %v3033_v61, 2  ;;  %v3041_v34 = vrot.slane %v3040_v31, 4  ;;  %v3047_v38 = vsel %vm936_vm5, %v10960_v14, 0.0 }
 0x642   :  { %8439 = vmatprep.mubr.msk.f32.mxu1 %vm936_vm5, %v3112_v54  ;;  %v3091_v42 = vmax.f32 %v3019_v39, 1e-16  ;;  %v3048_v27 = vsel %vm936_vm5, %v10964_v15, 0.0  ;;  %v10976_v57 = vmul.f32 %v9588_v44, %v10853_v10  ;;  %v10980_v5 = vmul.f32 %v9589_v28, %v10860_v47  ;;  %v9593_v44 = vld [vmem:[%s9878_s3 + $0xf8] sm:$0xff] }
 0x643   :  { %v3028_v25 = vadd.f32 %v3027_v2, %v3026_v36  ;;  %v3035_v53 = vadd.f32 %v3034_v13, %v3033_v61  ;;  %v3042_v58 = vadd.f32 %v3041_v34, %v3040_v31  ;;  %v3049_v43 = vadd.f32 %v3048_v27, %v3047_v38  ;;  %v9591_v61 = vld [vmem:[%s9878_s3 + $0xe8] sm:$0xff] }
 0x644   :  { %9353 = vrcp.f32 %v3091_v42  ;;  %v3056_v9 = vsel %vm936_vm5, %v10976_v57, 0.0  ;;  %v3057_v24 = vsel %vm936_vm5, %v10980_v5, 0.0  ;;  %v10988_v10 = vmul.f32 %v9590_v21, %v10877_v7 }
 0x645   :  { %v9348_v41 = vpop.eup %9347  ;;  %8440 = vmatmul.mubr.msk.f32.gmra.mrb[50].mxu1 %vm936_vm5, %v3113_v16  ;;  %v3092_v47 = vmax.f32 %v3028_v25, 1e-16  ;;  %v3036_v0 = vrot.slane %v3035_v53, 1  ;;  %v3043_v23 = vrot.slane %v3042_v58, 2  ;;  %v3050_v52 = vrot.slane %v3049_v43, 4 }
 0x646   :  { %v3115_v36 = vmul.f32 %v9348_v41, %v10851_v20  ;;  %v3116_v60 = vmul.f32 %v9348_v41, %v10858_v59  ;;  %v3058_v18 = vadd.f32 %v3057_v24, %v3056_v9  ;;  %v10995_v31 = vmul.f32 %v9591_v61, %v10885_v37 }
 0x647   :  { %v9350_v19 = vpop.eup %9349  ;;  %9355 = vrcp.f32 %v3092_v47  ;;  %v3037_v7 = vadd.f32 %v3036_v0, %v3035_v53  ;;  %v3044_v26 = vadd.f32 %v3043_v23, %v3042_v58  ;;  %v3051_v54 = vadd.f32 %v3050_v52, %v3049_v43 }
 0x648   :  { %8442 = vmatprep.mubr.msk.f32.mxu1 %vm936_vm5, %v3115_v36  ;;  %v3118_v16 = vmul.f32 %v9350_v19, %v10867_v40  ;;  %v3119_v20 = vmul.f32 %v9350_v19, %v10873_v56  ;;  %v3059_v39 = vrot.slane %v3058_v18, 4  ;;  %v3065_v59 = vsel %vm936_vm5, %v10988_v10, 0.0  ;;  %v9592_v40 = vld [vmem:[%s9878_s3 + $0xf0] sm:$0xff] }
 0x649   :  { %8443 = vmatmul.mubr.msk.f32.gmra.mrb[52].mxu1 %vm936_vm5, %v3116_v60  ;;  %v3093_v37 = vmax.f32 %v3037_v7, 1e-16  ;;  %v3045_v2 = vrot.slane %v3044_v26, 1  ;;  %v3052_v13 = vrot.slane %v3051_v54, 2  ;;  %v3066_v34 = vsel %vm936_vm5, %v10995_v31, 0.0 }
 0x64a   :  { %v9352_v38 = vpop.eup %9351  ;;  %8445 = vmatprep.mubr.msk.f32.mxu1 %vm936_vm5, %v3118_v16  ;;  %v3060_v42 = vadd.f32 %v3059_v39, %v3058_v18  ;;  %v3067_v27 = vadd.f32 %v3066_v34, %v3065_v59  ;;  %v11008_v56 = vmul.f32 %v9592_v40, %v10905_v49  ;;  %v11012_v28 = vmul.f32 %v9593_v44, %v10911_v63 }
 0x64b   :  { %v3121_v25 = vmul.f32 %v9352_v38, %v10883_v4  ;;  %v3122_v53 = vmul.f32 %v9352_v38, %v10889_v46  ;;  %9357 = vrcp.f32 %v3093_v37  ;;  %v3046_v58 = vadd.f32 %v3045_v2, %v3044_v26 }
 0x64c   :  { %v3053_v43 = vadd.f32 %v3052_v13, %v3051_v54  ;;  %v3061_v9 = vrot.slane %v3060_v42, 2  ;;  %v3068_v24 = vrot.slane %v3067_v27, 4  ;;  %v3074_v21 = vsel %vm936_vm5, %v11008_v56, 0.0 }
 0x64d   :  { %8446 = vmatmul.mubr.msk.f32.gmra.mrb[54].mxu1 %vm936_vm5, %v3119_v20  ;;  %v3094_v49 = vmax.f32 %v3046_v58, 1e-16  ;;  %v3075_v41 = vsel %vm936_vm5, %v11012_v28, 0.0 }
 0x64e   :  { %v9354_v63 = vpop.eup %9353  ;;  %8448 = vmatprep.mubr.msk.f32.mxu1 %vm936_vm5, %v3121_v25  ;;  %v3054_v4 = vrot.slane %v3053_v43, 1  ;;  %v3062_v47 = vadd.f32 %v3061_v9, %v3060_v42  ;;  %v3069_v46 = vadd.f32 %v3068_v24, %v3067_v27  ;;  %v3076_v0 = vadd.f32 %v3075_v41, %v3074_v21  ;;  %v3692_v21 = vld [vmem:[%s11059_s27 + $0x10] sm:$0xff]  ;;  %v3695_v41 = vld [vmem:[%s11059_s27 + $0x28] sm:$0xff] }
 0x64f   :  { %v3124_v23 = vmul.f32 %v9354_v63, %v10895_v32  ;;  %v3125_v52 = vmul.f32 %v9354_v63, %v10901_v17  ;;  %9359 = vrcp.f32 %v3094_v49  ;;  %v12937_v24 = vmov 0.0   ;;  %v3697_v63 = vld [vmem:[%s11059_s27 + $0x38] sm:$0xff] }
 0x650   :  { %v3055_v36 = vadd.f32 %v3054_v4, %v3053_v43  ;;  %v3063_v60 = vrot.slane %v3062_v47, 1  ;;  %v3070_v18 = vrot.slane %v3069_v46, 2  ;;  %v3077_v61 = vrot.slane %v3076_v0, 4 }
 0x651   :  { %v9356_v19 = vpop.eup %9355  ;;  %8449 = vmatmul.mubr.msk.f32.gmra.mrb[56].mxu1 %vm936_vm5, %v3122_v53  ;;  %v8952_v4 = vpack.c.bf16 %v3697_v63, %v3695_v41 }
 0x652   :  { %8451 = vmatprep.mubr.msk.f32.mxu1 %vm936_vm5, %v3124_v23  ;;  %v3127_v7 = vmul.f32 %v9356_v19, %v10909_v35  ;;  %v3128_v26 = vmul.f32 %v9356_v19, %v10917_v6  ;;  %v3095_v54 = vmax.f32 %v3055_v36, 1e-16  ;;  %v3064_v16 = vadd.f32 %v3063_v60, %v3062_v47  ;;  %v3694_v47 = vld [vmem:[%s11059_s27 + $0x20] sm:$0xff]  ;;  %v3699_v23 = vld [vmem:[%s11059_s27 + $0x48] sm:$0xff] }
 0x653   :  { %v3071_v20 = vadd.f32 %v3070_v18, %v3069_v46  ;;  %v3078_v32 = vadd.f32 %v3077_v61, %v3076_v0  ;;  %v3696_v46 = vld [vmem:[%s11059_s27 + $0x30] sm:$0xff]  ;;  %v3698_v60 = vld [vmem:[%s11059_s27 + $0x40] sm:$0xff]  ;;  %v3703_v19 = vld [vmem:[%s11059_s27 + $0x68] sm:$0xff] }
 0x654   :  { %9361 = vrcp.f32 %v3095_v54  ;;  %v3096_v17 = vmax.f32 %v3064_v16, 1e-16  ;;  %v8954_v0 = vpack.c.bf16 %v3696_v46, %v3694_v47  ;;  %v3700_v18 = vld [vmem:[%s11059_s27 + $0x50] sm:$0xff]  ;;  %v3702_v54 = vld [vmem:[%s11059_s27 + $0x60] sm:$0xff] }
 0x655   :  { %v9358_v39 = vpop.eup %9357  ;;  %8452 = vmatmul.mubr.msk.f32.gmra.mrb[58].mxu1 %vm936_vm5, %v3125_v52  ;;  %v3072_v59 = vrot.slane %v3071_v20, 1  ;;  %v3079_v37 = vrot.slane %v3078_v32, 2  ;;  %v3701_v52 = vld [vmem:[%s11059_s27 + $0x58] sm:$0xff]  ;;  %v8958_v61 = vpack.c.bf16 %v3700_v18, %v3698_v60  ;;  %v3704_v16 = vld [vmem:[%s11059_s27 + $0x70] sm:$0xff] }
 0x656   :  { %8454 = vmatprep.mubr.msk.f32.mxu1 %vm936_vm5, %v3127_v7  ;;  %v3130_v2 = vmul.f32 %v9358_v39, %v10925_v11  ;;  %v3131_v13 = vmul.f32 %v9358_v39, %v10931_v50  ;;  %9363 = vrcp.f32 %v3096_v17  ;;  %v8956_v36 = vpack.c.bf16 %v3701_v52, %v3699_v23  ;;  %v3705_v7 = vld [vmem:[%s11059_s27 + $0x78] sm:$0xff] }
 0x657   :  { %v3073_v35 = vadd.f32 %v3072_v59, %v3071_v20  ;;  %v3080_v6 = vadd.f32 %v3079_v37, %v3078_v32  ;;  %v8962_v20 = vpack.c.bf16 %v3704_v16, %v3702_v54  ;;  %v3707_v32 = vld [vmem:[%s11059_s27 + $0x88] sm:$0xff]  ;;  %v3709_v17 = vld [vmem:[%s11059_s27 + $0x98] sm:$0xff]  ;;  %v3706_v59 = vld [vmem:[%s11059_s27 + $0x80] sm:$0xff] }
 0x658   :  { %v8964_v39 = vpack.c.bf16 %v3709_v17, %v3707_v32  ;;  %v3708_v37 = vld [vmem:[%s11059_s27 + $0x90] sm:$0xff] }
 0x659   :  { %v9360_v34 = vpop.eup %9359  ;;  %8455 = vmatmul.mubr.msk.f32.gmra.mrb[60].mxu1 %vm936_vm5, %v3128_v26  ;;  %v3097_v38 = vmax.f32 %v3073_v35, 1e-16  ;;  %v3081_v42 = vrot.slane %v3080_v6, 1  ;;  %v8960_v26 = vpack.c.bf16 %v3705_v7, %v3703_v19  ;;  %v3713_v35 = vld [vmem:[%s11059_s27 + $0xb8] sm:$0xff] }
 0x65a   :  { %8457 = vmatprep.mubr.msk.f32.mxu1 %vm936_vm5, %v3130_v2  ;;  %v3133_v27 = vmul.f32 %v9360_v34, %v10938_v33  ;;  %v3134_v40 = vmul.f32 %v9360_v34, %v10948_v45  ;;  %v8966_v2 = vpack.c.bf16 %v3708_v37, %v3706_v59  ;;  %v3710_v34 = vld [vmem:[%s11059_s27 + $0xa0] sm:$0xff] }
 0x65b   :  { %9365 = vrcp.f32 %v3097_v38  ;;  %v3082_v44 = vadd.f32 %v3081_v42, %v3080_v6  ;;  %v3712_v38 = vld [vmem:[%s11059_s27 + $0xb0] sm:$0xff] }
 0x65c   :  { %v8970_v42 = vpack.c.bf16 %v3712_v38, %v3710_v34 }
 0x65d   :  { %8458 = vmatmul.mubr.msk.f32.gmra.mrb[62].mxu1 %vm936_vm5, %v3131_v13  ;;  %v3098_v11 = vmax.f32 %v3082_v44, 1e-16  ;;  %v3711_v13 = vld [vmem:[%s11059_s27 + $0xa8] sm:$0xff] }
 0x65e   :  { %v9362_v50 = vpop.eup %9361  ;;  %8460 = vmatprep.mubr.msk.f32.mxu1 %vm936_vm5, %v3133_v27  ;;  %v8968_v6 = vpack.c.bf16 %v3713_v35, %v3711_v13  ;;  %v3715_v27 = vld [vmem:[%s11059_s27 + $0xc8] sm:$0xff] }
 0x65f   :  { %v3136_v25 = vmul.f32 %v9362_v50, %v10960_v14  ;;  %v3137_v53 = vmul.f32 %v9362_v50, %v10964_v15  ;;  %9367 = vrcp.f32 %v3098_v11  ;;  %v3714_v11 = vld [vmem:[%s11059_s27 + $0xc0] sm:$0xff]  ;;  %v3716_v50 = vld [vmem:[%s11059_s27 + $0xd0] sm:$0xff] }
 0x660   :  { %v9364_v58 = vpop.eup %9363 }
 0x661   :  { %8461 = vmatmul.mubr.msk.f32.gmra.mrb[64].mxu1 %vm936_vm5, %v3134_v40  ;;  %v3139_v33 = vmul.f32 %v9364_v58, %v10976_v57  ;;  %v3140_v45 = vmul.f32 %v9364_v58, %v10980_v5  ;;  %v3717_v40 = vld [vmem:[%s11059_s27 + $0xd8] sm:$0xff] }
 0x662   :  { %8463 = vmatprep.mubr.msk.f32.mxu1 %vm936_vm5, %v3136_v25  ;;  %v8972_v44 = vpack.c.bf16 %v3717_v40, %v3715_v27  ;;  %v8974_v25 = vpack.c.bf16 %v3716_v50, %v3714_v11  ;;  %v3721_v58 = vld [vmem:[%s11059_s27 + $0xf8] sm:$0xff] }
 0x665   :  { %v9366_v43 = vpop.eup %9365  ;;  %8464 = vmatmul.mubr.msk.f32.gmra.mrb[66].mxu1 %vm936_vm5, %v3137_v53  ;;  %v3719_v53 = vld [vmem:[%s11059_s27 + $0xe8] sm:$0xff] }
 0x666   :  { %8466 = vmatprep.mubr.msk.f32.mxu1 %vm936_vm5, %v3139_v33  ;;  %v3142_v9 = vmul.f32 %v9366_v43, %v10988_v10  ;;  %v3143_v14 = vmul.f32 %v9366_v43, %v10995_v31  ;;  %v3691_v10 = vld [vmem:[%s11059_s27 + $0x8] sm:$0xff]  ;;  %v3693_v31 = vld [vmem:[%s11059_s27 + $0x18] sm:$0xff]  ;;  %v8976_v33 = vpack.c.bf16 %v3721_v58, %v3719_v53  ;;  %v3720_v43 = vld [vmem:[%s11059_s27 + $0xf0] sm:$0xff] }
 0x669   :  { %v9368_v15 = vpop.eup %9367  ;;  %8467 = vmatmul.mubr.msk.f32.gmra.mrb[68].mxu1 %vm936_vm5, %v3140_v45  ;;  %v3718_v45 = vld [vmem:[%s11059_s27 + $0xe0] sm:$0xff] }
 0x66a   :  { %8469 = vmatprep.mubr.msk.f32.mxu1 %vm936_vm5, %v3142_v9  ;;  %v3145_v57 = vmul.f32 %v9368_v15, %v11008_v56  ;;  %v3146_v5 = vmul.f32 %v9368_v15, %v11012_v28  ;;  %v8948_v56 = vpack.c.bf16 %v3693_v31, %v3691_v10  ;;  %v3690_v28 = vld [vmem:[%s11059_s27] sm:$0xff]  ;;  %v8978_v9 = vpack.c.bf16 %v3720_v43, %v3718_v45  ;;  %s9682_s27 = smov 24  }
 0x66b   :  { %v8950_v49 = vpack.c.bf16 %v3692_v21, %v3690_v28  ;;  %s12086_s1 = sld [smem:[%s12845_s0 + %s9682_s27]]  }
 0x66c   :  { %8949 = vmatprep.subr.bf16.mxu1 %v8948_v56 }
 0x66d   :  { %8470 = vmatmul.mubr.msk.f32.gmra.mrb[70].mxu1 %vm936_vm5, %v3143_v14  ;;  %v11094_v14 = vld [vmem:[%s9841_s29] sm:$0xff] }
 0x66e   :  { %8472 = vmatprep.mubr.msk.f32.mxu1 %vm936_vm5, %v3145_v57  ;;  %8951 = vmatpush1.bf16.msra.mxu1 %v8950_v49 }
 0x66f   :  { %8953 = vmatprep.subr.bf16.mxu1 %v8952_v4 }
 0x671   :  { %8473 = vmatmul.mubr.msk.f32.gmra.mrb[72].mxu1 %vm936_vm5, %v3146_v5 }
 0x672   :  { %3844 = vmatprep.mubr.f32.mxu1 %v12937_v24  ;;  %8955 = vmatpush1.bf16.msra.mxu1 %v8954_v0 }
 0x673   :  { %8957 = vmatprep.subr.bf16.mxu1 %v8956_v36 }
 0x676   :  { %8959 = vmatpush1.bf16.msra.mxu1 %v8958_v61 }
 0x677   :  { %8961 = vmatprep.subr.bf16.mxu1 %v8960_v26 }
 0x67a   :  { %8963 = vmatpush1.bf16.msra.mxu1 %v8962_v20 }
 0x67b   :  { %8965 = vmatprep.subr.bf16.mxu1 %v8964_v39 }
 0x67e   :  { %8967 = vmatpush1.bf16.msra.mxu1 %v8966_v2 }
 0x67f   :  { %8969 = vmatprep.subr.bf16.mxu1 %v8968_v6 }
 0x682   :  { %8971 = vmatpush1.bf16.msra.mxu1 %v8970_v42 }
 0x683   :  { %8973 = vmatprep.subr.bf16.mxu1 %v8972_v44 }
 0x686   :  { %8975 = vmatpush1.bf16.msra.mxu1 %v8974_v25 }
 0x687   :  { %8977 = vmatprep.subr.bf16.mxu1 %v8976_v33 }
 0x68a   :  { %8979 = vmatpush1.bf16.msra.mxu1 %v8978_v9 }
 0x68b   :  { %8555 = vmatprep.subr.mxu1 %v11094_v14 }
 0x6fc   :  { %v8429_v15 = vpop.f32.mrb[42].mxu1 }
 0x6fd   :  { %v3469_v57 = vmul.f32 %v8429_v15, %v10552_v8  ;;  %v3309_v5 = vpop.f32.mrb[43].mxu1 }
 0x6fe   :  { %v3468_v10 = vmul.f32 %v3309_v5, %v10543_v12 }
 0x700   :  { %v3500_v31 = vadd.f32 %v3469_v57, %v3468_v10 }
 0x702   :  { %v3501_v49 = vrot.slane %v3500_v31, 4 }
 0x704   :  { %v3502_v0 = vadd.f32 %v3501_v49, %v3500_v31  ;;  %v11116_v49 = vld [vmem:[%s7666_s2] ss:$0 sm:$0xff]  ;;  %s9683_s2 = smov 23  }
 0x705   :  { %s7674_s6 = sld [smem:[%s12845_s0 + %s9683_s2]]  }
 0x706   :  { %v3503_v7 = vrot.slane %v3502_v0, 2 }
 0x708   :  { %v3504_v2 = vadd.f32 %v3503_v7, %v3502_v0  ;;  %v11123_v7 = vld [vmem:[%s7667_s7] ss:$0 sm:$0xff]  ;;  %s7683_s7 = sld [smem:[%s12845_s0 + %s9693_s5]]  }
 0x70a   :  { %v3505_v50 = vrot.slane %v3504_v2, 1 }
 0x70c   :  { %v8432_v56 = vpop.f32.mrb[44].mxu1  ;;  %v3506_v31 = vadd.f32 %v3505_v50, %v3504_v2  ;;  %v12938_v50 = vmax.f32 %v10373_v55, 0.0 }
 0x70d   :  { %v3471_v28 = vmul.f32 %v8432_v56, %v10552_v8  ;;  %v3319_v21 = vpop.f32.mrb[45].mxu1 }
 0x70e   :  { %v3470_v41 = vmul.f32 %v3319_v21, %v10543_v12 }
 0x710   :  { %v3507_v63 = vadd.f32 %v3471_v28, %v3470_v41  ;;  %v8435_v4 = vpop.f32.mrb[46].mxu1 }
 0x711   :  { %v3473_v47 = vmul.f32 %v8435_v4, %v10552_v8  ;;  %v3329_v46 = vpop.f32.mrb[47].mxu1 }
 0x712   :  { %v3508_v23 = vrot.slane %v3507_v63, 4  ;;  %v3472_v52 = vmul.f32 %v3329_v46, %v10543_v12 }
 0x714   :  { %v3509_v36 = vadd.f32 %v3508_v23, %v3507_v63  ;;  %v3514_v60 = vadd.f32 %v3473_v47, %v3472_v52  ;;  %v8438_v18 = vpop.f32.mrb[48].mxu1 }
 0x715   :  { %v3475_v61 = vmul.f32 %v8438_v18, %v10552_v8  ;;  %v3339_v19 = vpop.f32.mrb[49].mxu1  ;;  %v3619_v18 = vmul.f32 %v11116_v49, %v3506_v31  ;;  %v12940_v31 = vmax.f32 %v10383_v29, 0.0 }
 0x716   :  { %v3510_v26 = vrot.slane %v3509_v36, 2  ;;  %v3515_v54 = vrot.slane %v3514_v60, 4  ;;  %v3474_v16 = vmul.f32 %v3339_v19, %v10543_v12 }
 0x718   :  { %v3511_v20 = vadd.f32 %v3510_v26, %v3509_v36  ;;  %v3516_v32 = vadd.f32 %v3515_v54, %v3514_v60  ;;  %v3521_v17 = vadd.f32 %v3475_v61, %v3474_v16  ;;  %v8441_v39 = vpop.f32.mrb[50].mxu1 }
 0x719   :  { %v3477_v59 = vmul.f32 %v8441_v39, %v10552_v8  ;;  %v3349_v37 = vpop.f32.mrb[51].mxu1 }
 0x71a   :  { %v3517_v13 = vrot.slane %v3516_v32, 2  ;;  %v3522_v35 = vrot.slane %v3521_v17, 4  ;;  %v3476_v6 = vmul.f32 %v3349_v37, %v10543_v12  ;;  %v3512_v34 = vrot.slane %v3511_v20, 1 }
 0x71c   :  { %v3518_v38 = vadd.f32 %v3517_v13, %v3516_v32  ;;  %v3523_v42 = vadd.f32 %v3522_v35, %v3521_v17  ;;  %v3528_v27 = vadd.f32 %v3477_v59, %v3476_v6  ;;  %v8444_v40 = vpop.f32.mrb[52].mxu1  ;;  %v3513_v45 = vadd.f32 %v3512_v34, %v3511_v20 }
 0x71d   :  { %v3479_v44 = vmul.f32 %v8444_v40, %v10552_v8  ;;  %v3359_v11 = vpop.f32.mrb[53].mxu1  ;;  %v3642_v6 = vadd.f32 %v11123_v7, %v3619_v18 }
 0x71e   :  { %v3519_v25 = vrot.slane %v3518_v38, 1  ;;  %v3524_v53 = vrot.slane %v3523_v42, 2  ;;  %v3529_v58 = vrot.slane %v3528_v27, 4  ;;  %v3478_v33 = vmul.f32 %v3359_v11, %v10543_v12 }
 0x71f   :  { %v3620_v4 = vmul.f32 %v11116_v49, %v3513_v45 }
 0x720   :  { %v3525_v43 = vadd.f32 %v3524_v53, %v3523_v42  ;;  %v3530_v9 = vadd.f32 %v3529_v58, %v3528_v27  ;;  %v8447_v15 = vpop.f32.mrb[54].mxu1  ;;  %v3535_v57 = vadd.f32 %v3479_v44, %v3478_v33  ;;  %v3520_v56 = vadd.f32 %v3519_v25, %v3518_v38 }
 0x721   :  { %v3481_v5 = vmul.f32 %v8447_v15, %v10552_v8  ;;  %v3369_v10 = vpop.f32.mrb[55].mxu1  ;;  %v3643_v32 = vadd.f32 %v11123_v7, %v3620_v4 }
 0x722   :  { %v3526_v28 = vrot.slane %v3525_v43, 1  ;;  %v3531_v21 = vrot.slane %v3530_v9, 2  ;;  %v3536_v41 = vrot.slane %v3535_v57, 4  ;;  %v3480_v63 = vmul.f32 %v3369_v10, %v10543_v12 }
 0x723   :  { %v3621_v61 = vmul.f32 %v11116_v49, %v3520_v56  ;;  %v11136_v25 = vadd.f32 %v3643_v32, %v12938_v50 }
 0x724   :  { %v3527_v47 = vadd.f32 %v3526_v28, %v3525_v43  ;;  %v3532_v46 = vadd.f32 %v3531_v21, %v3530_v9  ;;  %v8450_v0 = vpop.f32.mrb[56].mxu1  ;;  %v3537_v23 = vadd.f32 %v3536_v41, %v3535_v57  ;;  %v3542_v52 = vadd.f32 %v3481_v5, %v3480_v63 }
 0x725   :  { %v3483_v36 = vmul.f32 %v8450_v0, %v10552_v8  ;;  %v3379_v60 = vpop.f32.mrb[57].mxu1  ;;  %v3644_v34 = vadd.f32 %v11123_v7, %v3621_v61  ;;  %v12939_v5 = vmax.f32 %v10391_v62, 0.0  ;;  %v12941_v28 = vmax.f32 %v10387_v1, 0.0 }
 0x726   :  { %v3533_v19 = vrot.slane %v3532_v46, 1  ;;  %v3622_v26 = vmul.f32 %v11116_v49, %v3527_v47  ;;  %v3538_v54 = vrot.slane %v3537_v23, 2  ;;  %v3543_v16 = vrot.slane %v3542_v52, 4 }
 0x727   :  { %v3482_v20 = vmul.f32 %v3379_v60, %v10543_v12  ;;  %v11142_v10 = vadd.f32 %v3642_v6, %v12939_v5  ;;  %v11146_v56 = vadd.f32 %v3644_v34, %v12940_v31  ;;  %v12892_v47 = vmax.f32 %v11136_v25, 0.0 }
 0x728   :  { %v3534_v17 = vadd.f32 %v3533_v19, %v3532_v46  ;;  %v8453_v39 = vpop.f32.mrb[58].mxu1  ;;  %v3539_v59 = vadd.f32 %v3538_v54, %v3537_v23  ;;  %v3544_v37 = vadd.f32 %v3543_v16, %v3542_v52  ;;  %v3645_v27 = vadd.f32 %v11123_v7, %v3622_v26 }
 0x729   :  { %v3549_v2 = vadd.f32 %v3483_v36, %v3482_v20  ;;  %v3485_v13 = vmul.f32 %v8453_v39, %v10552_v8  ;;  %v3389_v35 = vpop.f32.mrb[59].mxu1  ;;  %v12942_v62 = vmax.f32 %v10394_v22, 0.0  ;;  %v12891_v18 = vmax.f32 %v11142_v10, 0.0 }
 0x72a   :  { %v3623_v38 = vmul.f32 %v11116_v49, %v3534_v17  ;;  %v3484_v42 = vmul.f32 %v3389_v35, %v10543_v12  ;;  %v3540_v40 = vrot.slane %v3539_v59, 1  ;;  %v3545_v44 = vrot.slane %v3544_v37, 2 }
 0x72b   :  { %v3550_v11 = vrot.slane %v3549_v2, 4  ;;  %v11151_v21 = vadd.f32 %v3645_v27, %v12941_v28  ;;  %v12890_v61 = vmax.f32 %v11146_v56, 0.0  ;;  %v12943_v54 = vmax.f32 %v10401_v3, 0.0 }
 0x72c   :  { %v3646_v53 = vadd.f32 %v11123_v7, %v3623_v38  ;;  %v3556_v58 = vadd.f32 %v3485_v13, %v3484_v42  ;;  %v8456_v33 = vpop.f32.mrb[60].mxu1  ;;  %v3541_v45 = vadd.f32 %v3540_v40, %v3539_v59  ;;  %v3546_v43 = vadd.f32 %v3545_v44, %v3544_v37 }
 0x72d   :  { %v3551_v9 = vadd.f32 %v3550_v11, %v3549_v2  ;;  %v3487_v15 = vmul.f32 %v8456_v33, %v10552_v8  ;;  %v3399_v57 = vpop.f32.mrb[61].mxu1  ;;  %v12889_v22 = vmax.f32 %v11151_v21, 0.0  ;;  %v3750_v17 = vrot.slane %v12892_v47, 7 }
 0x72e   :  { %v3486_v55 = vmul.f32 %v3399_v57, %v10543_v12  ;;  %v3624_v41 = vmul.f32 %v11116_v49, %v3541_v45  ;;  %v3547_v63 = vrot.slane %v3546_v43, 1  ;;  %v11157_v46 = vadd.f32 %v3646_v53, %v12942_v62 }
 0x72f   :  { %v3552_v4 = vrot.slane %v3551_v9, 2  ;;  %v3557_v39 = vrot.slane %v3556_v58, 4  ;;  %v3752_v38 = vrot.slane %v12890_v61, 6  ;;  %v3754_v44 = vrot.slane %v12889_v22, 5 }
 0x730   :  { %v3563_v0 = vadd.f32 %v3487_v15, %v3486_v55  ;;  %v8459_v29 = vpop.f32.mrb[62].mxu1  ;;  %v3647_v23 = vadd.f32 %v11123_v7, %v3624_v41  ;;  %v3548_v52 = vadd.f32 %v3547_v63, %v3546_v43  ;;  %v12888_v13 = vmax.f32 %v11157_v46, 0.0 }
 0x731   :  { %v3553_v36 = vadd.f32 %v3552_v4, %v3551_v9  ;;  %v3489_v1 = vmul.f32 %v8459_v29, %v10552_v8  ;;  %v3409_v60 = vpop.f32.mrb[63].mxu1  ;;  %v12944_v11 = vmax.f32 %v10413_v51, 0.0  ;;  %v3558_v45 = vadd.f32 %v3557_v39, %v3556_v58 }
 0x732   :  { %v3564_v19 = vrot.slane %v3563_v0, 4  ;;  %v3488_v26 = vmul.f32 %v3409_v60, %v10543_v12  ;;  %v11167_v16 = vadd.f32 %v3647_v23, %v12943_v54  ;;  %v3625_v20 = vmul.f32 %v11116_v49, %v3548_v52 }
 0x733   :  { %v3554_v32 = vrot.slane %v3553_v36, 1  ;;  %v3751_v57 = vsel %vm2005_vm6, %v3750_v17, %v12891_v18  ;;  %v3756_v28 = vrot.slane %v12888_v13, 4  ;;  %v12945_v29 = vmax.f32 %v10427_v48, 0.0 }
 0x734   :  { %v3565_v59 = vadd.f32 %v3564_v19, %v3563_v0  ;;  %v3570_v37 = vadd.f32 %v3489_v1, %v3488_v26  ;;  %v8462_v2 = vpop.f32.mrb[64].mxu1  ;;  %v3648_v35 = vadd.f32 %v11123_v7, %v3625_v20  ;;  %v12887_v42 = vmax.f32 %v11167_v16, 0.0 }
 0x735   :  { %v3555_v6 = vadd.f32 %v3554_v32, %v3553_v36  ;;  %v3491_v34 = vmul.f32 %v8462_v2, %v10552_v8  ;;  %v3419_v3 = vpop.f32.mrb[65].mxu1  ;;  %v3753_v58 = vsel %vm2008_vm7, %v3752_v38, %v3751_v57  ;;  %v3559_v36 = vrot.slane %v3558_v45, 2 }
 0x736   :  { %v3571_v27 = vrot.slane %v3570_v37, 4  ;;  %v3490_v40 = vmul.f32 %v3419_v3, %v10543_v12  ;;  %v11183_v50 = vadd.f32 %v3648_v35, %v12944_v11  ;;  %v3566_v33 = vrot.slane %v3565_v59, 2 }
 0x737   :  { %v3626_v53 = vmul.f32 %v11116_v49, %v3555_v6  ;;  %v3758_v4 = vrot.slane %v12887_v42, 3  ;;  %v3755_v52 = vsel %vm2011_vm8, %v3754_v44, %v3753_v58 }
 0x738   :  { %v3572_v43 = vadd.f32 %v3571_v27, %v3570_v37  ;;  %v3577_v9 = vadd.f32 %v3491_v34, %v3490_v40  ;;  %v8465_v15 = vpop.f32.mrb[66].mxu1  ;;  %v12886_v51 = vmax.f32 %v11183_v50, 0.0  ;;  %v3567_v62 = vadd.f32 %v3566_v33, %v3565_v59 }
 0x739   :  { %v3649_v5 = vadd.f32 %v11123_v7, %v3626_v53  ;;  %v3493_v31 = vmul.f32 %v8465_v15, %v10552_v8  ;;  %v3429_v55 = vpop.f32.mrb[67].mxu1  ;;  %v3757_v39 = vsel %vm2014_vm9, %v3756_v28, %v3755_v52  ;;  %v3560_v34 = vadd.f32 %v3559_v36, %v3558_v45 }
 0x73a   :  { %v3573_v41 = vrot.slane %v3572_v43, 2  ;;  %v3578_v63 = vrot.slane %v3577_v9, 4  ;;  %v3492_v0 = vmul.f32 %v3429_v55, %v10543_v12  ;;  %v3760_v26 = vrot.slane %v12886_v51, 2 }
 0x73b   :  { %v11200_v23 = vadd.f32 %v3649_v5, %v12945_v29  ;;  %v3759_v59 = vsel %vm2017_vm10, %v3758_v4, %v3757_v39  ;;  %v3568_v37 = vrot.slane %v3567_v62, 1  ;;  %v3561_v45 = vrot.slane %v3560_v34, 1 }
 0x73c   :  { %v3574_v1 = vadd.f32 %v3573_v41, %v3572_v43  ;;  %v3579_v60 = vadd.f32 %v3578_v63, %v3577_v9  ;;  %v8468_v19 = vpop.f32.mrb[68].mxu1  ;;  %v3584_v54 = vadd.f32 %v3493_v31, %v3492_v0  ;;  %v3761_v40 = vsel %vm2020_vm11, %v3760_v26, %v3759_v59 }
 0x73d   :  { %v3495_v20 = vmul.f32 %v8468_v19, %v10552_v8  ;;  %v3439_v32 = vpop.f32.mrb[69].mxu1  ;;  %v12885_v17 = vmax.f32 %v11200_v23, 0.0  ;;  %v3569_v57 = vadd.f32 %v3568_v37, %v3567_v62  ;;  %v3562_v26 = vadd.f32 %v3561_v45, %v3560_v34 }
 0x73e   :  { %v3580_v48 = vrot.slane %v3579_v60, 2  ;;  %v3585_v2 = vrot.slane %v3584_v54, 4  ;;  %v3494_v35 = vmul.f32 %v3439_v32, %v10543_v12  ;;  %v3575_v3 = vrot.slane %v3574_v1, 1 }
 0x73f   :  { %v3762_v6 = vrot.slane %v12885_v17, 1  ;;  %v3628_v36 = vmul.f32 %v11116_v49, %v3569_v57 }
 0x740   :  { %v3581_v38 = vadd.f32 %v3580_v48, %v3579_v60  ;;  %v8471_v27 = vpop.f32.mrb[70].mxu1  ;;  %v3586_v44 = vadd.f32 %v3585_v2, %v3584_v54  ;;  %v3591_v11 = vadd.f32 %v3495_v20, %v3494_v35  ;;  %v3576_v55 = vadd.f32 %v3575_v3, %v3574_v1 }
 0x741   :  { %v3497_v53 = vmul.f32 %v8471_v27, %v10552_v8  ;;  %v3449_v33 = vpop.f32.mrb[71].mxu1  ;;  %v3763_v43 = vsel %vm2023_vm12, %v3762_v6, %v3761_v40 }
 0x742   :  { %v3582_v9 = vrot.slane %v3581_v38, 1  ;;  %v3496_v15 = vmul.f32 %v3449_v33, %v10543_v12  ;;  %3845 = vmatmul.mubr.f32.vlgmr.msra.gmra.mrb[74].mxu1 %v3763_v43  ;;  %v3587_v5 = vrot.slane %v3586_v44, 2  ;;  %v3592_v31 = vrot.slane %v3591_v11, 4  ;;  %v12948_v43 = vld [vmem:[#allocation6_spill] sm:$0xff] }
 0x743   :  { %3850 = vmatprep.mubr.f32.mxu1 %v12937_v24  ;;  %8556 = vmatpush3.msra.mxu1 %v11094_v14  ;;  %v3629_v14 = vmul.f32 %v11116_v49, %v3576_v55 }
 0x744   :  { %v3598_v28 = vadd.f32 %v3497_v53, %v3496_v15  ;;  %v8474_v41 = vpop.f32.mrb[72].mxu1  ;;  %v3583_v63 = vadd.f32 %v3582_v9, %v3581_v38  ;;  %v3588_v58 = vadd.f32 %v3587_v5, %v3586_v44  ;;  %v3593_v4 = vadd.f32 %v3592_v31, %v3591_v11  ;;  %v12951_v31 = vld [vmem:[#allocation7_spill] sm:$0xff] }
 0x745   :  { %v3499_v0 = vmul.f32 %v8474_v41, %v10552_v8  ;;  %v3459_v29 = vpop.f32.mrb[73].mxu1  ;;  %v3651_v8 = vadd.f32 %v11123_v7, %v3628_v36  ;;  %v3652_v35 = vadd.f32 %v11123_v7, %v3629_v14  ;;  %v12946_v44 = vmax.f32 %v10457_v30, 0.0  ;;  %v12954_v30 = vld [vmem:[#allocation8_spill] sm:$0xff] }
 0x746   :  { %v3599_v52 = vrot.slane %v3598_v28, 4  ;;  %v3589_v62 = vrot.slane %v3588_v58, 1  ;;  %v3594_v60 = vrot.slane %v3593_v4, 2  ;;  %v3498_v19 = vmul.f32 %v3459_v29, %v10543_v12 }
 0x747   :  { %v3630_v1 = vmul.f32 %v11116_v49, %v3583_v63  ;;  %v3627_v12 = vmul.f32 %v11116_v49, %v3562_v26  ;;  %v11231_v11 = vadd.f32 %v3651_v8, %v12946_v44  ;;  %v12949_v9 = vmax.f32 %v12948_v43, 0.0  ;;  %v12960_v26 = vld [vmem:[#allocation10_spill] sm:$0xff] }
 0x748   :  { %v3600_v54 = vadd.f32 %v3599_v52, %v3598_v28  ;;  %v3590_v20 = vadd.f32 %v3589_v62, %v3588_v58  ;;  %v3595_v32 = vadd.f32 %v3594_v60, %v3593_v4  ;;  %v3605_v39 = vadd.f32 %v3499_v0, %v3498_v19  ;;  %v12957_v52 = vld [vmem:[#allocation9_spill] sm:$0xff] }
 0x749   :  { %v3653_v34 = vadd.f32 %v11123_v7, %v3630_v1  ;;  %12947 = vst [vmem:[#allocation13_spill] sm:$0xff] %v11231_v11  ;;  %v11236_v15 = vadd.f32 %v3652_v35, %v12949_v9  ;;  %v3650_v5 = vadd.f32 %v11123_v7, %v3627_v12  ;;  %v12952_v45 = vmax.f32 %v12951_v31, 0.0 }
 0x74a   :  { %v3601_v48 = vrot.slane %v3600_v54, 2  ;;  %v3631_v59 = vmul.f32 %v11116_v49, %v3590_v20  ;;  %v3596_v37 = vrot.slane %v3595_v32, 1  ;;  %v3606_v2 = vrot.slane %v3605_v39, 4 }
 0x74b   :  { %12950 = vst [vmem:[#allocation6_spill] sm:$0xff] %v11236_v15  ;;  %v11241_v55 = vadd.f32 %v3653_v34, %v12952_v45  ;;  %v12955_v63 = vmax.f32 %v12954_v30, 0.0  ;;  %v12884_v0 = vmax.f32 %v11231_v11, 0.0  ;;  %v12958_v36 = vmax.f32 %v12957_v52, 0.0  ;;  %v4166_v30 = vld [vmem:[%s11302_s11 + $0x8] sm:$0xff] }
 0x74c   :  { %v3602_v6 = vadd.f32 %v3601_v48, %v3600_v54  ;;  %v3597_v3 = vadd.f32 %v3596_v37, %v3595_v32  ;;  %v3607_v38 = vadd.f32 %v3606_v2, %v3605_v39  ;;  %v3654_v27 = vadd.f32 %v11123_v7, %v3631_v59  ;;  %v12963_v32 = vld [vmem:[#allocation11_spill] sm:$0xff] }
 0x74d   :  { %12953 = vst [vmem:[#allocation7_spill] sm:$0xff] %v11241_v55  ;;  %v12883_v60 = vmax.f32 %v11236_v15, 0.0  ;;  %v12961_v14 = vmax.f32 %v12960_v26, 0.0  ;;  %v12882_v1 = vmax.f32 %v11241_v55, 0.0  ;;  %v12964_v39 = vmax.f32 %v12963_v32, 0.0  ;;  %v4173_v32 = vld [vmem:[%s11302_s11 + $0x40] sm:$0xff] }
 0x74e   :  { %v3603_v40 = vrot.slane %v3602_v6, 1  ;;  %v3632_v53 = vmul.f32 %v11116_v49, %v3597_v3  ;;  %v3608_v33 = vrot.slane %v3607_v38, 2  ;;  %v11246_v58 = vadd.f32 %v3654_v27, %v12955_v63  ;;  %v12966_v27 = vld [vmem:[#allocation12_spill] sm:$0xff] }
 0x74f   :  { %v11258_v54 = vadd.f32 %v3650_v5, %v12961_v14  ;;  %v3764_v59 = vrot.slane %v12884_v0, 7  ;;  %v3766_v35 = vrot.slane %v12883_v60, 6  ;;  %v3768_v3 = vrot.slane %v12882_v1, 5  ;;  %v4171_v14 = vld [vmem:[%s11302_s11 + $0x30] sm:$0xff] }
 0x750   :  { %v3604_v57 = vadd.f32 %v3603_v40, %v3602_v6  ;;  %v3655_v28 = vadd.f32 %v11123_v7, %v3632_v53  ;;  %v3609_v41 = vadd.f32 %v3608_v33, %v3607_v38  ;;  %12956 = vst [vmem:[#allocation8_spill] sm:$0xff] %v11246_v58  ;;  %v12881_v8 = vmax.f32 %v11246_v58, 0.0  ;;  %v9598_v58 = vld [vmem:[%s9878_s3 + $0x18] sm:$0xff] }
 0x751   :  { %12962 = vst [vmem:[#allocation10_spill] sm:$0xff] %v11258_v54  ;;  %v12879_v12 = vmax.f32 %v11258_v54, 0.0  ;;  %v12967_v40 = vmax.f32 %v12966_v27, 0.0  ;;  %v4178_v27 = vld [vmem:[%s11302_s11 + $0x68] sm:$0xff] }
 0x752   :  { %v3633_v4 = vmul.f32 %v11116_v49, %v3604_v57  ;;  %v3610_v29 = vrot.slane %v3609_v41, 1  ;;  %v11252_v62 = vadd.f32 %v3655_v28, %v12958_v36  ;;  %v3770_v38 = vrot.slane %v12881_v8, 4  ;;  %v4169_v36 = vld [vmem:[%s11302_s11 + $0x20] sm:$0xff] }
 0x753   :  { %v3765_v44 = vsel %vm2005_vm6, %v3764_v59, %v12879_v12  ;;  %v4174_v59 = vld [vmem:[%s11302_s11 + $0x48] sm:$0xff] }
 0x754   :  { %12959 = vst [vmem:[#allocation9_spill] sm:$0xff] %v11252_v62  ;;  %v3656_v19 = vadd.f32 %v11123_v7, %v3633_v4  ;;  %v3611_v20 = vadd.f32 %v3610_v29, %v3609_v41  ;;  %v12880_v2 = vmax.f32 %v11252_v62, 0.0  ;;  %v3767_v33 = vsel %vm2008_vm7, %v3766_v35, %v3765_v44  ;;  %v4165_v41 = vld [vmem:[%s11302_s11] sm:$0xff]  ;;  %v4167_v4 = vld [vmem:[%s11302_s11 + $0x10] sm:$0xff]  ;;  %v4168_v29 = vld [vmem:[%s11302_s11 + $0x18] sm:$0xff] }
 0x755   :  { %v3769_v9 = vsel %vm2011_vm8, %v3768_v3, %v3767_v33  ;;  %v8980_v63 = vpack.c.bf16 %v4166_v30, %v4165_v41  ;;  %v8984_v52 = vpack.c.bf16 %v4168_v29, %v4167_v4  ;;  %v4175_v35 = vld [vmem:[%s11302_s11 + $0x50] sm:$0xff] }
 0x756   :  { %v11263_v48 = vadd.f32 %v3656_v19, %v12964_v39  ;;  %v3634_v37 = vmul.f32 %v11116_v49, %v3611_v20  ;;  %v3772_v53 = vrot.slane %v12880_v2, 3  ;;  %v3771_v57 = vsel %vm2014_vm9, %v3770_v38, %v3769_v9  ;;  %v4170_v19 = vld [vmem:[%s11302_s11 + $0x28] sm:$0xff]  ;;  %v4172_v20 = vld [vmem:[%s11302_s11 + $0x38] sm:$0xff]  ;;  %v4177_v38 = vld [vmem:[%s11302_s11 + $0x60] sm:$0xff] }
 0x757   :  { %8981 = vmatprep.subr.bf16.mxu0 %v8980_v63  ;;  %v8988_v26 = vpack.c.bf16 %v4170_v19, %v4169_v36  ;;  %v8992_v39 = vpack.c.bf16 %v4172_v20, %v4171_v14  ;;  %v4179_v44 = vld [vmem:[%s11302_s11 + $0x70] sm:$0xff]  ;;  %v12969_v9 = vld [vmem:[#allocation3_spill] sm:$0xff] }
 0x758   :  { %12965 = vst [vmem:[#allocation11_spill] sm:$0xff] %v11263_v48  ;;  %v12878_v6 = vmax.f32 %v11263_v48, 0.0  ;;  %v3657_v34 = vadd.f32 %v11123_v7, %v3634_v37  ;;  %v3773_v5 = vsel %vm2017_vm10, %v3772_v53, %v3771_v57  ;;  %8983 = vmatpush3.bf16.msra.mxu0 %v8980_v63  ;;  %v8996_v37 = vpack.c.bf16 %v4174_v59, %v4173_v32  ;;  %v4180_v53 = vld [vmem:[%s11302_s11 + $0x78] sm:$0xff] }
 0x759   :  { %8985 = vmatprep.subr.bf16.mxu0 %v8984_v52  ;;  %v9008_v33 = vpack.c.bf16 %v4180_v53, %v4179_v44  ;;  %v12971_v30 = vld [vmem:[#allocation5_spill] sm:$0xff] }
 0x75a   :  { %v11281_v49 = vadd.f32 %v3657_v34, %v12967_v40  ;;  %v3774_v7 = vrot.slane %v12878_v6, 2  ;;  %v4176_v34 = vld [vmem:[%s11302_s11 + $0x58] sm:$0xff]  ;;  %v9004_v40 = vpack.c.bf16 %v4178_v27, %v4177_v38  ;;  %s7680_s11 = sld [smem:[%s12845_s0 + %s9694_s8]]  }
 0x75b   :  { %v9000_v3 = vpack.c.bf16 %v4176_v34, %v4175_v35 }
 0x75c   :  { %12968 = vst [vmem:[#allocation12_spill] sm:$0xff] %v11281_v49  ;;  %v12877_v43 = vmax.f32 %v11281_v49, 0.0  ;;  %v3775_v45 = vsel %vm2020_vm11, %v3774_v7, %v3773_v5  ;;  %8987 = vmatpush3.bf16.msra.mxu0 %v8984_v52  ;;  %v3722_v7 = vld [vmem:[%s7669_s15] sm:$0x3]  ;;  %s7684_s15 = sld [smem:[%s12845_s0 + %s9695_s12]]  }
 0x75d   :  { %8989 = vmatprep.subr.bf16.mxu0 %v8988_v26  ;;  %v3731_v57 = vrot.slane %v3722_v7, %v12969_v9  ;;  %v3727_v63 = vrot.slane %v3722_v7, %v12971_v30 }
 0x75e   :  { %v3776_v31 = vrot.slane %v12877_v43, 1 }
 0x760   :  { %v3777_v28 = vsel %vm2023_vm12, %v3776_v31, %v3775_v45  ;;  %8991 = vmatpush3.bf16.msra.mxu0 %v8988_v26 }
 0x761   :  { %3851 = vmatmul.mubr.f32.gmra.mrb[76].mxu1 %v3777_v28  ;;  %8993 = vmatprep.subr.bf16.mxu0 %v8992_v39  ;;  %v12970_v28 = vld [vmem:[#allocation4_spill] sm:$0xff] }
 0x764   :  { %8995 = vmatpush3.bf16.msra.mxu0 %v8992_v39 }
 0x765   :  { %8997 = vmatprep.subr.bf16.mxu0 %v8996_v37 }
 0x768   :  { %8999 = vmatpush3.bf16.msra.mxu0 %v8996_v37 }
 0x769   :  { %9001 = vmatprep.subr.bf16.mxu0 %v9000_v3 }
 0x76c   :  { %9003 = vmatpush3.bf16.msra.mxu0 %v9000_v3 }
 0x76d   :  { %9005 = vmatprep.subr.bf16.mxu0 %v9004_v40 }
 0x770   :  { %9007 = vmatpush3.bf16.msra.mxu0 %v9004_v40 }
 0x771   :  { %9009 = vmatprep.subr.bf16.mxu0 %v9008_v33 }
 0x774   :  { %9011 = vmatpush3.bf16.msra.mxu0 %v9008_v33 }
 0x815   :  { %v3846_v5 = vpop.f32.mrb[74].mxu1 }
 0x816   :  { %v3848_v31 = vpop.f32.mrb[75].mxu1  ;;  %v11327_v29 = vadd.f32 %v3846_v5, %v3727_v63 }
 0x817   :  { %v3849_v45 = vadd.f32 %v3848_v31, %v3731_v57 }
 0x819   :  { %v3866_v41 = vrot.slane %v3849_v45, %v12970_v28  ;;  %v3859_v32 = vcombine.high %v3849_v45, %v3849_v45 }
 0x81b   :  { %v3882_v4 = vrot.slane %v3866_v41, %v12970_v28  ;;  %v3874_v14 = vcombine.high %v3866_v41, %v3866_v41  ;;  %v3873_v37 = vrot.slane %v3859_v32, %v12970_v28 }
 0x81d   :  { %v3960_v52 = vrot.slane %v3882_v4, %v12971_v30  ;;  %v3896_v20 = vrot.slane %v3874_v14, %v12970_v28  ;;  %v3904_v39 = vcombine.high %v3882_v4, %v3882_v4  ;;  %v3875_v44 = vcombine.high %v3873_v37, %v3873_v37 }
 0x81e   :  { %v3889_v53 = vrot.slane %v3873_v37, %v12970_v28 }
 0x81f   :  { %v4037_v36 = vadd.f32 %v3960_v52, %v11327_v29  ;;  %v3964_v59 = vrot.slane %v3896_v20, %v12971_v30  ;;  %v3906_v35 = vcombine.high %v3896_v20, %v3896_v20  ;;  %v3968_v38 = vrot.slane %v3904_v39, %v12971_v30 }
 0x820   :  { %v3903_v4 = vrot.slane %v3875_v44, %v12970_v28  ;;  %v3905_v32 = vcombine.high %v3889_v53, %v3889_v53 }
 0x821   :  { %vm4069_vm1 = vcmp.gt.f32.partialorder %v4037_v36, 0.0  ;;  %v4101_v19 = vmul.f32 0.2, %v4037_v36  ;;  %v4039_v3 = vadd.f32 %v3964_v59, %v11327_v29  ;;  %v4041_v31 = vadd.f32 %v3968_v38, %v11327_v29 }
 0x822   :  { %v3972_v45 = vrot.slane %v3906_v35, %v12971_v30  ;;  %v3980_v39 = vrot.slane %v3903_v4, %v12971_v30 }
 0x823   :  { %v4133_v26 = vsel %vm4069_vm1, %v4037_v36, %v4101_v19  ;;  %v4103_v5 = vmul.f32 0.2, %v4039_v3  ;;  %vm4071_vm4 = vcmp.gt.f32.partialorder %v4039_v3, 0.0  ;;  %v4105_v14 = vmul.f32 0.2, %v4041_v31 }
 0x824   :  { %8507 = vmatprep.mubr.f32.mxu0 %v4133_v26  ;;  %v3976_v26 = vrot.slane %v3889_v53, %v12971_v30  ;;  %v4043_v20 = vadd.f32 %v3972_v45, %v11327_v29  ;;  %vm4073_vm14 = vcmp.gt.f32.partialorder %v4041_v31, 0.0 }
 0x825   :  { %v4137_v44 = vsel %vm4073_vm14, %v4041_v31, %v4105_v14 }
 0x826   :  { %vm4075_vm0 = vcmp.gt.f32.partialorder %v4043_v20, 0.0 }
 0x834   :  { %v3852_v34 = vpop.f32.mrb[76].mxu1 }
 0x835   :  { %v11336_v27 = vadd.f32 %v3852_v34, %v3727_v63  ;;  %v3854_v40 = vpop.f32.mrb[77].mxu1  ;;  %v4045_v34 = vadd.f32 %v3976_v26, %v11327_v29 }
 0x837   :  { %v4038_v33 = vadd.f32 %v3960_v52, %v11336_v27  ;;  %v4040_v7 = vadd.f32 %v3964_v59, %v11336_v27  ;;  %v4042_v19 = vadd.f32 %v3968_v38, %v11336_v27  ;;  %v4135_v52 = vsel %vm4071_vm4, %v4039_v3, %v4103_v5 }
 0x838   :  { %v4044_v35 = vadd.f32 %v3972_v45, %v11336_v27  ;;  %v3855_v38 = vadd.f32 %v3854_v40, %v3731_v57  ;;  %v4107_v3 = vmul.f32 0.2, %v4043_v20  ;;  %v3907_v5 = vcombine.high %v3903_v4, %v3903_v4 }
 0x839   :  { %vm4070_vm3 = vcmp.gt.f32.partialorder %v4038_v33, 0.0  ;;  %v4102_v41 = vmul.f32 0.2, %v4038_v33  ;;  %v4104_v36 = vmul.f32 0.2, %v4040_v7  ;;  %vm4072_vm13 = vcmp.gt.f32.partialorder %v4040_v7, 0.0 }
 0x83a   :  { %v4106_v37 = vmul.f32 0.2, %v4042_v19  ;;  %vm4074_vm15 = vcmp.gt.f32.partialorder %v4042_v19, 0.0  ;;  %v4108_v53 = vmul.f32 0.2, %v4044_v35  ;;  %v3915_v45 = vrot.slane %v3855_v38, %v12970_v28 }
 0x83b   :  { %v4134_v63 = vsel %vm4070_vm3, %v4038_v33, %v4102_v41  ;;  %v4136_v59 = vsel %vm4072_vm13, %v4040_v7, %v4104_v36  ;;  %v3984_v33 = vrot.slane %v3905_v32, %v12971_v30  ;;  %v4047_v7 = vadd.f32 %v3980_v39, %v11327_v29 }
 0x83c   :  { %8508 = vmatmul.mubr.f32.vlgmr.msra.gmra.mrb[64].mxu0 %v4134_v63  ;;  %v4138_v41 = vsel %vm4074_vm15, %v4042_v19, %v4106_v37  ;;  %v4046_v63 = vadd.f32 %v3976_v26, %v11336_v27  ;;  %v4139_v36 = vsel %vm4075_vm0, %v4043_v20, %v4107_v3  ;;  %vm4076_vm1 = vcmp.gt.f32.partialorder %v4044_v35, 0.0 }
 0x83d   :  { %8510 = vmatprep.mubr.f32.mxu0 %v4135_v52  ;;  %v4109_v57 = vmul.f32 0.2, %v4045_v34  ;;  %vm4077_vm3 = vcmp.gt.f32.partialorder %v4045_v34, 0.0  ;;  %v4049_v40 = vadd.f32 %v3984_v33, %v11327_v29  ;;  %v3988_v31 = vrot.slane %v3907_v5, %v12971_v30 }
 0x83e   :  { %v4140_v52 = vsel %vm4076_vm1, %v4044_v35, %v4108_v53  ;;  %v4110_v4 = vmul.f32 0.2, %v4046_v63  ;;  %v4111_v19 = vmul.f32 0.2, %v4047_v7  ;;  %v4048_v14 = vadd.f32 %v3980_v39, %v11336_v27 }
 0x83f   :  { %v3923_v26 = vcombine.high %v3915_v45, %v3915_v45  ;;  %v3931_v32 = vrot.slane %v3915_v45, %v12970_v28  ;;  %vm4078_vm4 = vcmp.gt.f32.partialorder %v4046_v63, 0.0  ;;  %vm4079_vm13 = vcmp.gt.f32.partialorder %v4047_v7, 0.0 }
 0x840   :  { %8511 = vmatmul.mubr.f32.gmra.mrb[66].mxu0 %v4136_v59  ;;  %v4141_v59 = vsel %vm4077_vm3, %v4045_v34, %v4109_v57  ;;  %v4113_v20 = vmul.f32 0.2, %v4049_v40  ;;  %v4051_v37 = vadd.f32 %v3988_v31, %v11327_v29  ;;  %v4112_v3 = vmul.f32 0.2, %v4048_v14 }
 0x841   :  { %8513 = vmatprep.mubr.f32.mxu0 %v4137_v44  ;;  %v4142_v44 = vsel %vm4078_vm4, %v4046_v63, %v4110_v4  ;;  %vm4081_vm14 = vcmp.gt.f32.partialorder %v4049_v40, 0.0  ;;  %v4050_v35 = vadd.f32 %v3984_v33, %v11336_v27  ;;  %v3945_v5 = vrot.slane %v3923_v26, %v12970_v28 }
 0x842   :  { %v3992_v39 = vrot.slane %v3931_v32, %v12971_v30  ;;  %vm4080_vm15 = vcmp.gt.f32.partialorder %v4048_v14, 0.0  ;;  %v3908_v34 = vcombine.high %v3855_v38, %v3855_v38  ;;  %v4145_v53 = vsel %vm4081_vm14, %v4049_v40, %v4113_v20 }
 0x843   :  { %v4115_v45 = vmul.f32 0.2, %v4051_v37  ;;  %v4114_v57 = vmul.f32 0.2, %v4050_v35  ;;  %vm4083_vm0 = vcmp.gt.f32.partialorder %v4051_v37, 0.0  ;;  %v4052_v63 = vadd.f32 %v3988_v31, %v11336_v27 }
 0x844   :  { %8514 = vmatmul.mubr.f32.gmra.mrb[68].mxu0 %v4138_v41  ;;  %v4143_v41 = vsel %vm4079_vm13, %v4047_v7, %v4111_v19  ;;  %vm4082_vm1 = vcmp.gt.f32.partialorder %v4050_v35, 0.0  ;;  %v4053_v33 = vadd.f32 %v3992_v39, %v11327_v29  ;;  %v3996_v4 = vrot.slane %v3945_v5, %v12971_v30 }
 0x845   :  { %8516 = vmatprep.mubr.f32.mxu0 %v4139_v36  ;;  %v4144_v36 = vsel %vm4080_vm15, %v4048_v14, %v4112_v3  ;;  %v3922_v7 = vrot.slane %v3908_v34, %v12970_v28  ;;  %v4147_v19 = vsel %vm4083_vm0, %v4051_v37, %v4115_v45  ;;  %v3955_v26 = vcombine.high %v3945_v5, %v3945_v5 }
 0x846   :  { %v4146_v38 = vsel %vm4082_vm1, %v4050_v35, %v4114_v57  ;;  %v4116_v40 = vmul.f32 0.2, %v4052_v63  ;;  %v4054_v14 = vadd.f32 %v3992_v39, %v11336_v27  ;;  %vm4084_vm3 = vcmp.gt.f32.partialorder %v4052_v63, 0.0 }
 0x847   :  { %v4055_v31 = vadd.f32 %v3996_v4, %v11327_v29  ;;  %vm4085_vm4 = vcmp.gt.f32.partialorder %v4053_v33, 0.0  ;;  %v3924_v20 = vcombine.high %v3922_v7, %v3922_v7  ;;  %v4056_v37 = vadd.f32 %v3996_v4, %v11336_v27 }
 0x848   :  { %8517 = vmatmul.mubr.f32.gmra.mrb[70].mxu0 %v4140_v52  ;;  %v3953_v52 = vcombine.high %v3931_v32, %v3931_v32  ;;  %v4148_v3 = vsel %vm4084_vm3, %v4052_v63, %v4116_v40  ;;  %v4004_v35 = vrot.slane %v3955_v26, %v12971_v30  ;;  %vm4086_vm13 = vcmp.gt.f32.partialorder %v4054_v14, 0.0 }
 0x849   :  { %8519 = vmatprep.mubr.f32.mxu0 %v4141_v59  ;;  %v4117_v59 = vmul.f32 0.2, %v4053_v33  ;;  %v4119_v39 = vmul.f32 0.2, %v4055_v31  ;;  %vm4087_vm14 = vcmp.gt.f32.partialorder %v4055_v31, 0.0  ;;  %vm4088_vm15 = vcmp.gt.f32.partialorder %v4056_v37, 0.0 }
 0x84a   :  { %v4000_v32 = vrot.slane %v3953_v52, %v12971_v30  ;;  %v4059_v63 = vadd.f32 %v4004_v35, %v11327_v29 }
 0x84b   :  { %v4149_v5 = vsel %vm4085_vm4, %v4053_v33, %v4117_v59  ;;  %v4151_v52 = vsel %vm4087_vm14, %v4055_v31, %v4119_v39 }
 0x84c   :  { %8520 = vmatmul.mubr.f32.gmra.mrb[72].mxu0 %v4142_v44  ;;  %v3938_v44 = vrot.slane %v3922_v7, %v12970_v28  ;;  %v4057_v34 = vadd.f32 %v4000_v32, %v11327_v29  ;;  %v4058_v57 = vadd.f32 %v4000_v32, %v11336_v27  ;;  %v4123_v40 = vmul.f32 0.2, %v4059_v63 }
 0x84d   :  { %8522 = vmatprep.mubr.f32.mxu0 %v4143_v41  ;;  %v4118_v41 = vmul.f32 0.2, %v4054_v14  ;;  %vm4091_vm3 = vcmp.gt.f32.partialorder %v4059_v63, 0.0 }
 0x84e   :  { %v4121_v4 = vmul.f32 0.2, %v4057_v34  ;;  %v4008_v33 = vrot.slane %v3938_v44, %v12971_v30  ;;  %vm4089_vm0 = vcmp.gt.f32.partialorder %v4057_v34, 0.0  ;;  %v3954_v7 = vcombine.high %v3938_v44, %v3938_v44 }
 0x84f   :  { %v4150_v45 = vsel %vm4086_vm13, %v4054_v14, %v4118_v41  ;;  %vm4090_vm1 = vcmp.gt.f32.partialorder %v4058_v57, 0.0 }
 0x850   :  { %8523 = vmatmul.mubr.f32.gmra.mrb[74].mxu0 %v4144_v36  ;;  %v4120_v36 = vmul.f32 0.2, %v4056_v37  ;;  %v4153_v14 = vsel %vm4089_vm0, %v4057_v34, %v4121_v4  ;;  %v4061_v59 = vadd.f32 %v4008_v33, %v11327_v29  ;;  %v4062_v44 = vadd.f32 %v4008_v33, %v11336_v27 }
 0x851   :  { %8525 = vmatprep.mubr.f32.mxu0 %v4145_v53  ;;  %v3952_v53 = vrot.slane %v3924_v20, %v12970_v28  ;;  %v4155_v20 = vsel %vm4091_vm3, %v4059_v63, %v4123_v40 }
 0x852   :  { %v4152_v26 = vsel %vm4088_vm15, %v4056_v37, %v4120_v36  ;;  %v4125_v41 = vmul.f32 0.2, %v4061_v59  ;;  %vm4093_vm13 = vcmp.gt.f32.partialorder %v4061_v59, 0.0  ;;  %vm4094_vm14 = vcmp.gt.f32.partialorder %v4062_v44, 0.0 }
 0x853   :  { %v4012_v31 = vrot.slane %v3952_v53, %v12971_v30  ;;  %v4126_v34 = vmul.f32 0.2, %v4062_v44 }
 0x854   :  { %8526 = vmatmul.mubr.f32.gmra.mrb[76].mxu0 %v4146_v38  ;;  %v4122_v38 = vmul.f32 0.2, %v4058_v57  ;;  %v4157_v36 = vsel %vm4093_vm13, %v4061_v59, %v4125_v41 }
 0x855   :  { %8528 = vmatprep.mubr.f32.mxu0 %v4147_v19  ;;  %v4060_v19 = vadd.f32 %v4004_v35, %v11336_v27  ;;  %v4063_v37 = vadd.f32 %v4012_v31, %v11327_v29  ;;  %v4016_v35 = vrot.slane %v3954_v7, %v12971_v30  ;;  %v4158_v4 = vsel %vm4094_vm14, %v4062_v44, %v4126_v34 }
 0x856   :  { %v4154_v32 = vsel %vm4090_vm1, %v4058_v57, %v4122_v38 }
 0x857   :  { %vm4092_vm4 = vcmp.gt.f32.partialorder %v4060_v19, 0.0  ;;  %v4127_v57 = vmul.f32 0.2, %v4063_v37  ;;  %v4065_v63 = vadd.f32 %v4016_v35, %v11327_v29  ;;  %vm4095_vm15 = vcmp.gt.f32.partialorder %v4063_v37, 0.0 }
 0x858   :  { %8529 = vmatmul.mubr.f32.gmra.mrb[78].mxu0 %v4148_v3  ;;  %v4124_v3 = vmul.f32 0.2, %v4060_v19 }
 0x859   :  { %8531 = vmatprep.mubr.f32.mxu0 %v4149_v5  ;;  %v3956_v5 = vcombine.high %v3952_v53, %v3952_v53  ;;  %v4066_v53 = vadd.f32 %v4016_v35, %v11336_v27  ;;  %v4159_v7 = vsel %vm4095_vm15, %v4063_v37, %v4127_v57  ;;  %vm4097_vm1 = vcmp.gt.f32.partialorder %v4065_v63, 0.0 }
 0x85a   :  { %v4156_v39 = vsel %vm4092_vm4, %v4060_v19, %v4124_v3  ;;  %v4129_v19 = vmul.f32 0.2, %v4065_v63 }
 0x85b   :  { %v4130_v40 = vmul.f32 0.2, %v4066_v53  ;;  %vm4098_vm3 = vcmp.gt.f32.partialorder %v4066_v53, 0.0 }
 0x85c   :  { %8532 = vmatmul.mubr.f32.gmra.mrb[80].mxu0 %v4150_v45  ;;  %v4064_v45 = vadd.f32 %v4012_v31, %v11336_v27  ;;  %v4161_v59 = vsel %vm4097_vm1, %v4065_v63, %v4129_v19 }
 0x85d   :  { %8534 = vmatprep.mubr.f32.mxu0 %v4151_v52  ;;  %v4020_v52 = vrot.slane %v3956_v5, %v12971_v30 }
 0x85e   :  { %v4128_v33 = vmul.f32 0.2, %v4064_v45  ;;  %vm4096_vm0 = vcmp.gt.f32.partialorder %v4064_v45, 0.0 }
 0x860   :  { %8535 = vmatmul.mubr.f32.gmra.mrb[82].mxu0 %v4152_v26  ;;  %v4067_v26 = vadd.f32 %v4020_v52, %v11327_v29  ;;  %v4160_v38 = vsel %vm4096_vm0, %v4064_v45, %v4128_v33 }
 0x861   :  { %8537 = vmatprep.mubr.f32.mxu0 %v4153_v14  ;;  %v4068_v14 = vadd.f32 %v4020_v52, %v11336_v27 }
 0x862   :  { %v4131_v31 = vmul.f32 0.2, %v4067_v26  ;;  %vm4099_vm4 = vcmp.gt.f32.partialorder %v4067_v26, 0.0 }
 0x863   :  { %vm4100_vm13 = vcmp.gt.f32.partialorder %v4068_v14, 0.0 }
 0x864   :  { %8538 = vmatmul.mubr.f32.gmra.mrb[84].mxu0 %v4154_v32  ;;  %v4162_v32 = vsel %vm4098_vm3, %v4066_v53, %v4130_v40  ;;  %v4163_v3 = vsel %vm4099_vm4, %v4067_v26, %v4131_v31 }
 0x865   :  { %8540 = vmatprep.mubr.f32.mxu0 %v4155_v20  ;;  %v4132_v20 = vmul.f32 0.2, %v4068_v14 }
 0x867   :  { %v4164_v44 = vsel %vm4100_vm13, %v4068_v14, %v4132_v20 }
 0x868   :  { %8541 = vmatmul.mubr.f32.gmra.mrb[86].mxu0 %v4156_v39 }
 0x869   :  { %8543 = vmatprep.mubr.f32.mxu0 %v4157_v36 }
 0x86c   :  { %8544 = vmatmul.mubr.f32.gmra.mrb[88].mxu0 %v4158_v4 }
 0x86d   :  { %8546 = vmatprep.mubr.f32.mxu0 %v4159_v7 }
 0x870   :  { %8547 = vmatmul.mubr.f32.gmra.mrb[90].mxu0 %v4160_v38 }
 0x871   :  { %8549 = vmatprep.mubr.f32.mxu0 %v4161_v59 }
 0x874   :  { %8550 = vmatmul.mubr.f32.gmra.mrb[92].mxu0 %v4162_v32 }
 0x875   :  { %8552 = vmatprep.mubr.f32.mxu0 %v4163_v3 }
 0x878   :  { %8553 = vmatmul.mubr.f32.gmra.mrb[94].mxu0 %v4164_v44 }
 0x879   :  { %5583 = vmatprep.mubr.f32.mxu0 %v12937_v24 }
 0x90f   :  { %v8509_v41 = vpop.f32.mrb[64].mxu0 }
 0x910   :  { %v4407_v37 = vsel %vm936_vm5, %v8509_v41, -inf  ;;  %v4247_v35 = vpop.f32.mrb[65].mxu0 }
 0x911   :  { %v4406_v5 = vsel %vm936_vm5, %v4247_v35, -inf }
 0x912   :  { %v4408_v39 = vmax.f32 %v4406_v5, %v4407_v37 }
 0x913   :  { %v8512_v34 = vpop.f32.mrb[66].mxu0 }
 0x914   :  { %v4409_v45 = vrot.slane %v4408_v39, 4  ;;  %v4416_v36 = vsel %vm936_vm5, %v8512_v34, -inf  ;;  %v4257_v57 = vpop.f32.mrb[67].mxu0 }
 0x915   :  { %v4415_v63 = vsel %vm936_vm5, %v4257_v57, -inf }
 0x916   :  { %v4410_v52 = vmax.f32 %v4408_v39, %v4409_v45  ;;  %v4417_v4 = vmax.f32 %v4415_v63, %v4416_v36 }
 0x917   :  { %v8515_v33 = vpop.f32.mrb[68].mxu0 }
 0x918   :  { %v4411_v53 = vrot.slane %v4410_v52, 2  ;;  %v4418_v7 = vrot.slane %v4417_v4, 4  ;;  %v4425_v19 = vsel %vm936_vm5, %v8515_v33, -inf  ;;  %v4267_v26 = vpop.f32.mrb[69].mxu0 }
 0x919   :  { %v4424_v38 = vsel %vm936_vm5, %v4267_v26, -inf }
 0x91a   :  { %v4412_v40 = vmax.f32 %v4410_v52, %v4411_v53  ;;  %v4419_v14 = vmax.f32 %v4417_v4, %v4418_v7  ;;  %v4426_v59 = vmax.f32 %v4424_v38, %v4425_v19 }
 0x91b   :  { %v11396_v31 = vpop.f32.mrb[70].mxu0 }
 0x91c   :  { %v4413_v32 = vrot.slane %v4412_v40, 1  ;;  %v4420_v20 = vrot.slane %v4419_v14, 2  ;;  %v4427_v3 = vrot.slane %v4426_v59, 4  ;;  %v4434_v44 = vsel %vm936_vm5, %v11396_v31, -inf  ;;  %v11400_v37 = vpop.f32.mrb[71].mxu0 }
 0x91d   :  { %v4433_v5 = vsel %vm936_vm5, %v11400_v37, -inf }
 0x91e   :  { %v4414_v39 = vmax.f32 %v4412_v40, %v4413_v32  ;;  %v4421_v45 = vmax.f32 %v4419_v14, %v4420_v20  ;;  %v4428_v36 = vmax.f32 %v4426_v59, %v4427_v3  ;;  %v4435_v63 = vmax.f32 %v4433_v5, %v4434_v44 }
 0x91f   :  { %v11404_v52 = vpop.f32.mrb[72].mxu0 }
 0x920   :  { %v4550_v4 = vsub.f32 %v4247_v35, %v4414_v39  ;;  %v4551_v53 = vsub.f32 %v8509_v41, %v4414_v39  ;;  %v4422_v7 = vrot.slane %v4421_v45, 1  ;;  %v4429_v19 = vrot.slane %v4428_v36, 2  ;;  %v11406_v38 = vpop.f32.mrb[73].mxu0 }
 0x921   :  { %v4436_v43 = vrot.slane %v4435_v63, 4  ;;  %v4443_v6 = vsel %vm936_vm5, %v11404_v52, -inf  ;;  %v4442_v12 = vsel %vm936_vm5, %v11406_v38, -inf }
 0x922   :  { %v4582_v2 = vmul.f32 1.442695, %v4550_v4  ;;  %v4423_v40 = vmax.f32 %v4421_v45, %v4422_v7  ;;  %v4430_v14 = vmax.f32 %v4428_v36, %v4429_v19  ;;  %v4584_v59 = vmul.f32 1.442695, %v4551_v53 }
 0x923   :  { %v4437_v32 = vmax.f32 %v4435_v63, %v4436_v43  ;;  %v4444_v20 = vmax.f32 %v4442_v12, %v4443_v6  ;;  %v11412_v3 = vpop.f32.mrb[74].mxu0 }
 0x924   :  { %9369 = vpow2.f32 %v4582_v2  ;;  %v4552_v41 = vsub.f32 %v4257_v57, %v4423_v40  ;;  %v4553_v35 = vsub.f32 %v8512_v34, %v4423_v40  ;;  %v4431_v44 = vrot.slane %v4430_v14, 1  ;;  %v11414_v5 = vpop.f32.mrb[75].mxu0 }
 0x925   :  { %v4438_v39 = vrot.slane %v4437_v32, 2  ;;  %v4445_v8 = vrot.slane %v4444_v20, 4  ;;  %v4452_v1 = vsel %vm936_vm5, %v11412_v3, -inf  ;;  %v4451_v45 = vsel %vm936_vm5, %v11414_v5, -inf }
 0x926   :  { %v4586_v60 = vmul.f32 1.442695, %v4552_v41  ;;  %v4432_v4 = vmax.f32 %v4430_v14, %v4431_v44  ;;  %9371 = vpow2.f32 %v4584_v59  ;;  %v4453_v43 = vmax.f32 %v4451_v45, %v4452_v1 }
 0x927   :  { %v4439_v6 = vmax.f32 %v4437_v32, %v4438_v39  ;;  %v4446_v12 = vmax.f32 %v4444_v20, %v4445_v8  ;;  %v11420_v2 = vpop.f32.mrb[76].mxu0  ;;  %v4588_v34 = vmul.f32 1.442695, %v4553_v35 }
 0x928   :  { %v4554_v57 = vsub.f32 %v4267_v26, %v4432_v4  ;;  %v4555_v36 = vsub.f32 %v8515_v33, %v4432_v4  ;;  %v4461_v63 = vsel %vm936_vm5, %v11420_v2, -inf  ;;  %v11424_v53 = vpop.f32.mrb[77].mxu0  ;;  %v4454_v40 = vrot.slane %v4453_v43, 4 }
 0x929   :  { %v4440_v7 = vrot.slane %v4439_v6, 1  ;;  %v4447_v19 = vrot.slane %v4446_v12, 2  ;;  %9373 = vpow2.f32 %v4586_v60  ;;  %v4460_v8 = vsel %vm936_vm5, %v11424_v53, -inf }
 0x92a   :  { %v4590_v14 = vmul.f32 1.442695, %v4554_v57  ;;  %v4592_v41 = vmul.f32 1.442695, %v4555_v36  ;;  %v4455_v32 = vmax.f32 %v4453_v43, %v4454_v40  ;;  %v4462_v20 = vmax.f32 %v4460_v8, %v4461_v63  ;;  %v9595_v40 = vld [vmem:[%s9878_s3] sm:$0xff] }
 0x92b   :  { %v4441_v1 = vmax.f32 %v4439_v6, %v4440_v7  ;;  %v4448_v59 = vmax.f32 %v4446_v12, %v4447_v19  ;;  %v11428_v26 = vpop.f32.mrb[78].mxu0  ;;  %9375 = vpow2.f32 %v4588_v34 }
 0x92c   :  { %v4470_v33 = vsel %vm936_vm5, %v11428_v26, -inf  ;;  %v11432_v35 = vpop.f32.mrb[79].mxu0  ;;  %9377 = vpow2.f32 %v4590_v14  ;;  %v4456_v45 = vrot.slane %v4455_v32, 2  ;;  %v4463_v6 = vrot.slane %v4462_v20, 4 }
 0x92d   :  { %v4556_v60 = vsub.f32 %v11400_v37, %v4441_v1  ;;  %v4557_v44 = vsub.f32 %v11396_v31, %v4441_v1  ;;  %v4449_v39 = vrot.slane %v4448_v59, 1  ;;  %9379 = vpow2.f32 %v4592_v41 }
 0x92e   :  { %v9370_v4 = vpop.eup %9369  ;;  %v4469_v12 = vsel %vm936_vm5, %v11432_v35, -inf  ;;  %v4457_v7 = vmax.f32 %v4455_v32, %v4456_v45  ;;  %v4464_v19 = vmax.f32 %v4462_v20, %v4463_v6 }
 0x92f   :  { %v4594_v43 = vmul.f32 1.442695, %v4556_v60  ;;  %v4596_v34 = vmul.f32 1.442695, %v4557_v44  ;;  %v4450_v57 = vmax.f32 %v4448_v59, %v4449_v39  ;;  %v4471_v36 = vmax.f32 %v4469_v12, %v4470_v33  ;;  %v11438_v63 = vpop.f32.mrb[80].mxu0 }
 0x930   :  { %v4479_v31 = vsel %vm936_vm5, %v11438_v63, -inf  ;;  %v11442_v37 = vpop.f32.mrb[81].mxu0  ;;  %v11445_v14 = vmul.f32 %v9595_v40, %v9370_v4  ;;  %v9372_v41 = vpop.eup %9371  ;;  %v4458_v33 = vrot.slane %v4457_v7, 1  ;;  %v4465_v32 = vrot.slane %v4464_v19, 2 }
 0x931   :  { %9381 = vpow2.f32 %v4594_v43  ;;  %v4558_v8 = vsub.f32 %v11406_v38, %v4450_v57  ;;  %v4559_v1 = vsub.f32 %v11404_v52, %v4450_v57  ;;  %v4472_v59 = vrot.slane %v4471_v36, 4 }
 0x932   :  { %9383 = vpow2.f32 %v4596_v34  ;;  %v4478_v20 = vsel %vm936_vm5, %v11442_v37, -inf  ;;  %v4459_v12 = vmax.f32 %v4457_v7, %v4458_v33  ;;  %v4466_v38 = vmax.f32 %v4464_v19, %v4465_v32  ;;  %v9596_v34 = vld [vmem:[%s9878_s3 + $0x8] sm:$0xff] }
 0x933   :  { %v4598_v60 = vmul.f32 1.442695, %v4558_v8  ;;  %v4600_v44 = vmul.f32 1.442695, %v4559_v1  ;;  %v4473_v39 = vmax.f32 %v4471_v36, %v4472_v59  ;;  %v4480_v45 = vmax.f32 %v4478_v20, %v4479_v31  ;;  %v11451_v4 = vpop.f32.mrb[82].mxu0  ;;  %v11453_v6 = vpop.eup %9373 }
 0x934   :  { %v4488_v52 = vsel %vm936_vm5, %v11451_v4, -inf  ;;  %v11457_v43 = vpop.f32.mrb[83].mxu0  ;;  %v11460_v57 = vmul.f32 %v9596_v34, %v9372_v41  ;;  %v4560_v7 = vsub.f32 %v11414_v5, %v4459_v12  ;;  %v4561_v19 = vsub.f32 %v11412_v3, %v4459_v12 }
 0x935   :  { %9385 = vpow2.f32 %v4598_v60  ;;  %v4474_v40 = vrot.slane %v4473_v39, 2  ;;  %v4481_v8 = vrot.slane %v4480_v45, 4  ;;  %v4487_v36 = vsel %vm936_vm5, %v11457_v43, -inf  ;;  %v11464_v31 = vpop.eup %9375 }
 0x936   :  { %9387 = vpow2.f32 %v4600_v44  ;;  %v4467_v1 = vrot.slane %v4466_v38, 1  ;;  %v11468_v59 = vpop.eup %9377  ;;  %v4489_v41 = vmax.f32 %v4487_v36, %v4488_v52  ;;  %v4678_v60 = vsel %vm936_vm5, %v11445_v14, 0.0 }
 0x937   :  { %v4475_v33 = vmax.f32 %v4473_v39, %v4474_v40  ;;  %v4482_v32 = vmax.f32 %v4480_v45, %v4481_v8  ;;  %v11470_v20 = vpop.f32.mrb[84].mxu0  ;;  %v11474_v34 = vpop.eup %9379  ;;  %v4602_v0 = vmul.f32 1.442695, %v4560_v7  ;;  %v4604_v17 = vmul.f32 1.442695, %v4561_v19 }
 0x938   :  { %v4468_v44 = vmax.f32 %v4466_v38, %v4467_v1  ;;  %v4497_v5 = vsel %vm936_vm5, %v11470_v20, -inf  ;;  %v11478_v3 = vpop.f32.mrb[85].mxu0  ;;  %v4490_v39 = vrot.slane %v4489_v41, 4 }
 0x939   :  { %v4476_v12 = vrot.slane %v4475_v33, 1  ;;  %v4483_v51 = vrot.slane %v4482_v32, 2  ;;  %v4496_v45 = vsel %vm936_vm5, %v11478_v3, -inf  ;;  %9389 = vpow2.f32 %v4602_v0 }
 0x93a   :  { %v4562_v52 = vsub.f32 %v11424_v53, %v4468_v44  ;;  %v4563_v40 = vsub.f32 %v11420_v2, %v4468_v44  ;;  %v4498_v8 = vmax.f32 %v4496_v45, %v4497_v5  ;;  %9391 = vpow2.f32 %v4604_v17 }
 0x93b   :  { %v11484_v36 = vpop.eup %9381  ;;  %v4477_v38 = vmax.f32 %v4475_v33, %v4476_v12  ;;  %v4484_v7 = vmax.f32 %v4482_v32, %v4483_v51  ;;  %v4491_v19 = vmax.f32 %v4489_v41, %v4490_v39  ;;  %v11486_v1 = vpop.f32.mrb[86].mxu0  ;;  %v4679_v32 = vsel %vm936_vm5, %v11460_v57, 0.0 }
 0x93c   :  { %v11488_v42 = vpop.eup %9383  ;;  %v4606_v13 = vmul.f32 1.442695, %v4562_v52  ;;  %v4608_v22 = vmul.f32 1.442695, %v4563_v40  ;;  %v4499_v61 = vrot.slane %v4498_v8, 4  ;;  %v4506_v0 = vsel %vm936_vm5, %v11486_v1, -inf }
 0x93d   :  { %v4564_v53 = vsub.f32 %v11432_v35, %v4477_v38  ;;  %v4565_v2 = vsub.f32 %v11428_v26, %v4477_v38  ;;  %v4485_v44 = vrot.slane %v4484_v7, 1  ;;  %v4492_v5 = vrot.slane %v4491_v19, 2  ;;  %v11494_v17 = vpop.f32.mrb[87].mxu0 }
 0x93e   :  { %9393 = vpow2.f32 %v4606_v13  ;;  %v4500_v51 = vmax.f32 %v4498_v8, %v4499_v61  ;;  %v4505_v33 = vsel %vm936_vm5, %v11494_v17, -inf  ;;  %v4680_v18 = vadd.f32 %v4679_v32, %v4678_v60 }
 0x93f   :  { %v11500_v41 = vpop.eup %9385  ;;  %9395 = vpow2.f32 %v4608_v22  ;;  %v4610_v12 = vmul.f32 1.442695, %v4564_v53  ;;  %v4612_v39 = vmul.f32 1.442695, %v4565_v2  ;;  %v4486_v35 = vmax.f32 %v4484_v7, %v4485_v44  ;;  %v11502_v45 = vpop.f32.mrb[88].mxu0 }
 0x940   :  { %v11504_v26 = vpop.eup %9387  ;;  %v4493_v52 = vmax.f32 %v4491_v19, %v4492_v5  ;;  %v4501_v40 = vrot.slane %v4500_v51, 2  ;;  %v4507_v13 = vmax.f32 %v4505_v33, %v4506_v0  ;;  %v4515_v61 = vsel %vm936_vm5, %v11502_v45, -inf  ;;  %v11508_v8 = vpop.f32.mrb[89].mxu0 }
 0x941   :  { %9397 = vpow2.f32 %v4610_v12  ;;  %v4566_v38 = vsub.f32 %v11442_v37, %v4486_v35  ;;  %v4567_v22 = vsub.f32 %v11438_v63, %v4486_v35  ;;  %v4514_v7 = vsel %vm936_vm5, %v11508_v8, -inf }
 0x942   :  { %9399 = vpow2.f32 %v4612_v39  ;;  %v4494_v53 = vrot.slane %v4493_v52, 1  ;;  %v4502_v2 = vmax.f32 %v4500_v51, %v4501_v40  ;;  %v4508_v44 = vrot.slane %v4507_v13, 4 }
 0x943   :  { %v4614_v19 = vmul.f32 1.442695, %v4566_v38  ;;  %v4616_v5 = vmul.f32 1.442695, %v4567_v22  ;;  %v4516_v0 = vmax.f32 %v4514_v7, %v4515_v61  ;;  %v11514_v33 = vpop.f32.mrb[90].mxu0  ;;  %v11516_v47 = vpop.eup %9389  ;;  %v4681_v61 = vrot.slane %v4680_v18, 4 }
 0x944   :  { %v4495_v12 = vmax.f32 %v4493_v52, %v4494_v53  ;;  %v4503_v30 = vrot.slane %v4502_v2, 1  ;;  %v4509_v37 = vmax.f32 %v4507_v13, %v4508_v44  ;;  %v4524_v63 = vsel %vm936_vm5, %v11514_v33, -inf  ;;  %v11520_v35 = vpop.f32.mrb[91].mxu0  ;;  %v11522_v39 = vpop.eup %9391 }
 0x945   :  { %9401 = vpow2.f32 %v4614_v19  ;;  %v4517_v51 = vrot.slane %v4516_v0, 4  ;;  %v4523_v40 = vsel %vm936_vm5, %v11520_v35, -inf  ;;  %v4682_v53 = vadd.f32 %v4681_v61, %v4680_v18 }
 0x946   :  { %9403 = vpow2.f32 %v4616_v5  ;;  %v4568_v60 = vsub.f32 %v11457_v43, %v4495_v12  ;;  %v4569_v32 = vsub.f32 %v11451_v4, %v4495_v12  ;;  %v4504_v52 = vmax.f32 %v4502_v2, %v4503_v30 }
 0x947   :  { %v4510_v13 = vrot.slane %v4509_v37, 2  ;;  %v4518_v38 = vmax.f32 %v4516_v0, %v4517_v51  ;;  %v4525_v22 = vmax.f32 %v4523_v40, %v4524_v63  ;;  %v11528_v7 = vpop.f32.mrb[92].mxu0 }
 0x948   :  { %v11530_v44 = vpop.eup %9393  ;;  %v4618_v19 = vmul.f32 1.442695, %v4568_v60  ;;  %v4620_v28 = vmul.f32 1.442695, %v4569_v32  ;;  %v4570_v9 = vsub.f32 %v11478_v3, %v4504_v52  ;;  %v4571_v49 = vsub.f32 %v11470_v20, %v4504_v52  ;;  %v11534_v5 = vpop.f32.mrb[93].mxu0 }
 0x949   :  { %v11536_v43 = vpop.eup %9395  ;;  %v4511_v4 = vmax.f32 %v4509_v37, %v4510_v13  ;;  %v4519_v30 = vrot.slane %v4518_v38, 2  ;;  %v4526_v2 = vrot.slane %v4525_v22, 4  ;;  %v4533_v0 = vsel %vm936_vm5, %v11528_v7, -inf }
 0x94a   :  { %9405 = vpow2.f32 %v4618_v19  ;;  %v4622_v18 = vmul.f32 1.442695, %v4570_v9  ;;  %v4624_v12 = vmul.f32 1.442695, %v4571_v49  ;;  %v4532_v63 = vsel %vm936_vm5, %v11534_v5, -inf }
 0x94b   :  { %v11542_v51 = vpop.eup %9397  ;;  %9407 = vpow2.f32 %v4620_v28  ;;  %v4512_v20 = vrot.slane %v4511_v4, 1  ;;  %v4520_v3 = vmax.f32 %v4518_v38, %v4519_v30  ;;  %v4527_v40 = vmax.f32 %v4525_v22, %v4526_v2  ;;  %v11544_v61 = vpop.f32.mrb[94].mxu0  ;;  %v9597_v30 = vld [vmem:[%s9878_s3 + $0x10] sm:$0xff] }
 0x94c   :  { %v11546_v37 = vpop.eup %9399  ;;  %9409 = vpow2.f32 %v4622_v18  ;;  %v4534_v60 = vmax.f32 %v4532_v63, %v4533_v0  ;;  %v4542_v9 = vsel %vm936_vm5, %v11544_v61, -inf  ;;  %v11550_v49 = vpop.f32.mrb[95].mxu0  ;;  %v4683_v32 = vrot.slane %v4682_v53, 2 }
 0x94d   :  { %9411 = vpow2.f32 %v4624_v12  ;;  %v4513_v52 = vmax.f32 %v4511_v4, %v4512_v20  ;;  %v4521_v13 = vrot.slane %v4520_v3, 1  ;;  %v4528_v28 = vrot.slane %v4527_v40, 2 }
 0x94e   :  { %v4535_v38 = vrot.slane %v4534_v60, 4  ;;  %v4541_v22 = vsel %vm936_vm5, %v11550_v49, -inf  ;;  %v4684_v19 = vadd.f32 %v4683_v32, %v4682_v53  ;;  %v11556_v2 = vmul.f32 %v9597_v30, %v11453_v6 }
 0x94f   :  { %v11558_v0 = vpop.eup %9401  ;;  %v4572_v18 = vsub.f32 %v11494_v17, %v4513_v52  ;;  %v4573_v63 = vsub.f32 %v11486_v1, %v4513_v52  ;;  %v4522_v12 = vmax.f32 %v4520_v3, %v4521_v13  ;;  %v4529_v4 = vmax.f32 %v4527_v40, %v4528_v28  ;;  %v9599_v28 = vld [vmem:[%s9878_s3 + $0x20] sm:$0xff] }
 0x950   :  { %v11562_v20 = vpop.eup %9403  ;;  %v4536_v48 = vmax.f32 %v4534_v60, %v4535_v38  ;;  %v4543_v54 = vmax.f32 %v4541_v22, %v4542_v9  ;;  %v4685_v62 = vrot.slane %v4684_v19, 1  ;;  %v11566_v53 = vmul.f32 %v9598_v58, %v11464_v31 }
 0x951   :  { %v4626_v32 = vmul.f32 1.442695, %v4572_v18  ;;  %v4628_v6 = vmul.f32 1.442695, %v4573_v63  ;;  %v4574_v30 = vsub.f32 %v11508_v8, %v4522_v12  ;;  %v4575_v55 = vsub.f32 %v11502_v45, %v4522_v12  ;;  %v9600_v63 = vld [vmem:[%s9878_s3 + $0x28] sm:$0xff] }
 0x952   :  { %v4530_v17 = vrot.slane %v4529_v4, 1  ;;  %v4537_v15 = vrot.slane %v4536_v48, 2  ;;  %v4544_v1 = vrot.slane %v4543_v54, 4  ;;  %v4686_v3 = vadd.f32 %v4685_v62, %v4684_v19 }
 0x953   :  { %9413 = vpow2.f32 %v4626_v32  ;;  %v4630_v40 = vmul.f32 1.442695, %v4574_v30  ;;  %v4632_v60 = vmul.f32 1.442695, %v4575_v55  ;;  %v4687_v9 = vsel %vm936_vm5, %v11556_v2, 0.0 }
 0x954   :  { %v11572_v52 = vpop.eup %9405  ;;  %9415 = vpow2.f32 %v4628_v6  ;;  %v4531_v58 = vmax.f32 %v4529_v4, %v4530_v17  ;;  %v4538_v31 = vmax.f32 %v4536_v48, %v4537_v15  ;;  %v4545_v13 = vmax.f32 %v4543_v54, %v4544_v1  ;;  %v9601_v17 = vld [vmem:[%s9878_s3 + $0x30] sm:$0xff] }
 0x955   :  { %v11574_v8 = vpop.eup %9407  ;;  %9417 = vpow2.f32 %v4630_v40  ;;  %v4822_v45 = vmax.f32 %v4686_v3, 1e-16  ;;  %v4688_v62 = vsel %vm936_vm5, %v11566_v53, 0.0  ;;  %v11580_v55 = vmul.f32 %v9599_v28, %v11468_v59 }
 0x956   :  { %v11582_v38 = vpop.eup %9409  ;;  %9419 = vpow2.f32 %v4632_v60  ;;  %v4576_v22 = vsub.f32 %v11520_v35, %v4531_v58  ;;  %v4577_v15 = vsub.f32 %v11514_v33, %v4531_v58  ;;  %v4539_v54 = vrot.slane %v4538_v31, 1  ;;  %v9602_v58 = vld [vmem:[%s9878_s3 + $0x38] sm:$0xff] }
 0x957   :  { %v11586_v48 = vpop.eup %9411  ;;  %v4546_v19 = vrot.slane %v4545_v13, 2  ;;  %9421 = vrcp.f32 %v4822_v45  ;;  %v4689_v18 = vadd.f32 %v4688_v62, %v4687_v9  ;;  %v11590_v12 = vmul.f32 %v9600_v63, %v11474_v34  ;;  %v9604_v63 = vld [vmem:[%s9878_s3 + $0x48] sm:$0xff] }
 0x958   :  { %v4634_v59 = vmul.f32 1.442695, %v4576_v22  ;;  %v4636_v4 = vmul.f32 1.442695, %v4577_v15  ;;  %v4540_v32 = vmax.f32 %v4538_v31, %v4539_v54  ;;  %v4696_v35 = vsel %vm936_vm5, %v11580_v55, 0.0  ;;  %v9603_v15 = vld [vmem:[%s9878_s3 + $0x40] sm:$0xff] }
 0x959   :  { %v4547_v6 = vmax.f32 %v4545_v13, %v4546_v19  ;;  %v4690_v30 = vrot.slane %v4689_v18, 4  ;;  %v4697_v33 = vsel %vm936_vm5, %v11590_v12, 0.0  ;;  %v11598_v1 = vmul.f32 %v9601_v17, %v11484_v36 }
 0x95a   :  { %9423 = vpow2.f32 %v4634_v59  ;;  %v4578_v34 = vsub.f32 %v11534_v5, %v4540_v32  ;;  %v4579_v3 = vsub.f32 %v11528_v7, %v4540_v32  ;;  %v4698_v40 = vadd.f32 %v4697_v33, %v4696_v35 }
 0x95b   :  { %9425 = vpow2.f32 %v4636_v4  ;;  %v4548_v60 = vrot.slane %v4547_v6, 1  ;;  %v4691_v9 = vadd.f32 %v4690_v30, %v4689_v18  ;;  %v11604_v31 = vmul.f32 %v9602_v58, %v11488_v42 }
 0x95c   :  { %v4638_v13 = vmul.f32 1.442695, %v4578_v34  ;;  %v4640_v45 = vmul.f32 1.442695, %v4579_v3  ;;  %v4699_v62 = vrot.slane %v4698_v40, 4  ;;  %v4705_v36 = vsel %vm936_vm5, %v11598_v1, 0.0 }
 0x95d   :  { %v11608_v28 = vpop.eup %9413  ;;  %v4549_v5 = vmax.f32 %v4547_v6, %v4548_v60  ;;  %v4692_v22 = vrot.slane %v4691_v9, 2  ;;  %v4706_v7 = vsel %vm936_vm5, %v11604_v31, 0.0  ;;  %v11614_v54 = vmul.f32 %v9603_v15, %v11500_v41  ;;  %v9606_v15 = vld [vmem:[%s9878_s3 + $0x58] sm:$0xff] }
 0x95e   :  { %v11616_v19 = vpop.eup %9415  ;;  %9427 = vpow2.f32 %v4638_v13  ;;  %v4700_v42 = vadd.f32 %v4699_v62, %v4698_v40  ;;  %v4707_v18 = vadd.f32 %v4706_v7, %v4705_v36  ;;  %v11620_v59 = vmul.f32 %v9604_v63, %v11504_v26  ;;  %v9605_v36 = vld [vmem:[%s9878_s3 + $0x50] sm:$0xff] }
 0x95f   :  { %v11622_v4 = vpop.eup %9417  ;;  %9429 = vpow2.f32 %v4640_v45  ;;  %v4580_v32 = vsub.f32 %v11550_v49, %v4549_v5  ;;  %v4581_v35 = vsub.f32 %v11544_v61, %v4549_v5  ;;  %v4693_v6 = vadd.f32 %v4692_v22, %v4691_v9 }
 0x960   :  { %v11626_v30 = vpop.eup %9419  ;;  %v4701_v41 = vrot.slane %v4700_v42, 2  ;;  %v4708_v33 = vrot.slane %v4707_v18, 4  ;;  %v4714_v17 = vsel %vm936_vm5, %v11614_v54, 0.0  ;;  %v4715_v26 = vsel %vm936_vm5, %v11620_v59, 0.0 }
 0x961   :  { %v9422_v34 = vpop.eup %9421  ;;  %v4642_v3 = vmul.f32 1.442695, %v4580_v32  ;;  %v4644_v40 = vmul.f32 1.442695, %v4581_v35  ;;  %v4694_v60 = vrot.slane %v4693_v6, 1  ;;  %v4716_v49 = vadd.f32 %v4715_v26, %v4714_v17  ;;  %v9607_v32 = vld [vmem:[%s9878_s3 + $0x60] sm:$0xff] }
 0x962   :  { %v4839_v61 = vmul.f32 %v9422_v34, %v11445_v14  ;;  %v4840_v9 = vmul.f32 %v9422_v34, %v11460_v57  ;;  %v4702_v58 = vadd.f32 %v4701_v41, %v4700_v42  ;;  %v4709_v13 = vadd.f32 %v4708_v33, %v4707_v18  ;;  %v9608_v33 = vld [vmem:[%s9878_s3 + $0x68] sm:$0xff] }
 0x963   :  { %9431 = vpow2.f32 %v4642_v3  ;;  %v4695_v45 = vadd.f32 %v4694_v60, %v4693_v6  ;;  %v4717_v62 = vrot.slane %v4716_v49, 4  ;;  %v11636_v5 = vmul.f32 %v9605_v36, %v11516_v47 }
 0x964   :  { %v11638_v22 = vpop.eup %9423  ;;  %9433 = vpow2.f32 %v4644_v40  ;;  %8557 = vmatprep.mubr.msk.f32.mxu1 %vm936_vm5, %v4839_v61  ;;  %v4703_v7 = vrot.slane %v4702_v58, 1  ;;  %v4710_v14 = vrot.slane %v4709_v13, 2  ;;  %v11643_v57 = vmul.f32 %v9606_v15, %v11522_v39  ;;  %v9609_v61 = vld [vmem:[%s9878_s3 + $0x70] sm:$0xff]  ;;  %v9611_v15 = vld [vmem:[%s9878_s3 + $0x80] sm:$0xff] }
 0x965   :  { %v11645_v42 = vpop.eup %9425  ;;  %8558 = vmatmul.mubr.msk.f32.vlgmr.msra.gmra.mrb[78].mxu1 %vm936_vm5, %v4840_v9  ;;  %v4823_v18 = vmax.f32 %v4695_v45, 1e-16  ;;  %v4718_v63 = vadd.f32 %v4717_v62, %v4716_v49  ;;  %v4723_v47 = vsel %vm936_vm5, %v11636_v5, 0.0  ;;  %v11652_v35 = vmul.f32 %v9607_v32, %v11530_v44  ;;  %v9610_v62 = vld [vmem:[%s9878_s3 + $0x78] sm:$0xff] }
 0x966   :  { %v4704_v6 = vadd.f32 %v4703_v7, %v4702_v58  ;;  %v4711_v41 = vadd.f32 %v4710_v14, %v4709_v13  ;;  %v4724_v39 = vsel %vm936_vm5, %v11643_v57, 0.0  ;;  %v11658_v17 = vmul.f32 %v9608_v33, %v11536_v43 }
 0x967   :  { %9435 = vrcp.f32 %v4823_v18  ;;  %v4719_v26 = vrot.slane %v4718_v63, 2  ;;  %v4725_v34 = vadd.f32 %v4724_v39, %v4723_v47  ;;  %v4732_v3 = vsel %vm936_vm5, %v11652_v35, 0.0  ;;  %v9612_v39 = vld [vmem:[%s9878_s3 + $0x88] sm:$0xff] }
 0x968   :  { %v11662_v40 = vpop.eup %9427  ;;  %v4824_v44 = vmax.f32 %v4704_v6, 1e-16  ;;  %v4712_v60 = vrot.slane %v4711_v41, 1  ;;  %v4733_v49 = vsel %vm936_vm5, %v11658_v17, 0.0  ;;  %v11668_v9 = vmul.f32 %v9609_v61, %v11542_v51 }
 0x969   :  { %v11670_v43 = vpop.eup %9429  ;;  %v4720_v58 = vadd.f32 %v4719_v26, %v4718_v63  ;;  %v4726_v13 = vrot.slane %v4725_v34, 4  ;;  %v4734_v45 = vadd.f32 %v4733_v49, %v4732_v3  ;;  %v11674_v36 = vmul.f32 %v9610_v62, %v11546_v37 }
 0x96a   :  { %9437 = vrcp.f32 %v4824_v44  ;;  %v4713_v7 = vadd.f32 %v4712_v60, %v4711_v41  ;;  %v4741_v14 = vsel %vm936_vm5, %v11668_v9, 0.0  ;;  %v11680_v51 = vmul.f32 %v9611_v15, %v11558_v0 }
 0x96b   :  { %v4721_v18 = vrot.slane %v4720_v58, 1  ;;  %v4727_v47 = vadd.f32 %v4726_v13, %v4725_v34  ;;  %v4735_v63 = vrot.slane %v4734_v45, 4  ;;  %v4742_v32 = vsel %vm936_vm5, %v11674_v36, 0.0  ;;  %v9613_v34 = vld [vmem:[%s9878_s3 + $0x90] sm:$0xff]  ;;  %v9614_v13 = vld [vmem:[%s9878_s3 + $0x98] sm:$0xff] }
 0x96c   :  { %v4825_v6 = vmax.f32 %v4713_v7, 1e-16  ;;  %v4743_v37 = vadd.f32 %v4742_v32, %v4741_v14  ;;  %v11686_v41 = vmul.f32 %v9612_v39, %v11562_v20  ;;  %v4750_v33 = vsel %vm936_vm5, %v11680_v51, 0.0 }
 0x96d   :  { %v11690_v26 = vpop.eup %9431  ;;  %v4722_v0 = vadd.f32 %v4721_v18, %v4720_v58  ;;  %v4728_v3 = vrot.slane %v4727_v47, 2  ;;  %v4736_v44 = vadd.f32 %v4735_v63, %v4734_v45  ;;  %v11694_v60 = vmul.f32 %v9613_v34, %v11572_v52  ;;  %v9615_v63 = vld [vmem:[%s9878_s3 + $0xa0] sm:$0xff] }
 0x96e   :  { %v11696_v49 = vpop.eup %9433  ;;  %9439 = vrcp.f32 %v4825_v6  ;;  %v4744_v61 = vrot.slane %v4743_v37, 4  ;;  %v4751_v20 = vsel %vm936_vm5, %v11686_v41, 0.0  ;;  %v11702_v62 = vmul.f32 %v9614_v13, %v11574_v8  ;;  %v9616_v13 = vld [vmem:[%s9878_s3 + $0xa8] sm:$0xff] }
 0x96f   :  { %v4826_v7 = vmax.f32 %v4722_v0, 1e-16  ;;  %v4729_v58 = vadd.f32 %v4728_v3, %v4727_v47  ;;  %v4737_v14 = vrot.slane %v4736_v44, 2  ;;  %v4752_v45 = vadd.f32 %v4751_v20, %v4750_v33 }
 0x970   :  { %v4745_v15 = vadd.f32 %v4744_v61, %v4743_v37  ;;  %v4759_v52 = vsel %vm936_vm5, %v11694_v60, 0.0  ;;  %v4760_v18 = vsel %vm936_vm5, %v11702_v62, 0.0  ;;  %v11710_v32 = vmul.f32 %v9615_v63, %v11582_v38 }
 0x971   :  { %v9436_v6 = vpop.eup %9435  ;;  %9441 = vrcp.f32 %v4826_v7  ;;  %v4730_v8 = vrot.slane %v4729_v58, 1  ;;  %v4738_v39 = vadd.f32 %v4737_v14, %v4736_v44  ;;  %v4753_v47 = vrot.slane %v4752_v45, 4 }
 0x972   :  { %v4842_v33 = vmul.f32 %v9436_v6, %v11556_v2  ;;  %v4843_v37 = vmul.f32 %v9436_v6, %v11566_v53  ;;  %v4746_v0 = vrot.slane %v4745_v15, 2  ;;  %v4761_v3 = vadd.f32 %v4760_v18, %v4759_v52  ;;  %v9617_v2 = vld [vmem:[%s9878_s3 + $0xb0] sm:$0xff] }
 0x973   :  { %v4731_v34 = vadd.f32 %v4730_v8, %v4729_v58  ;;  %v4739_v61 = vrot.slane %v4738_v39, 1  ;;  %v4754_v20 = vadd.f32 %v4753_v47, %v4752_v45  ;;  %v11716_v11 = vmul.f32 %v9616_v13, %v11586_v48  ;;  %v9618_v47 = vld [vmem:[%s9878_s3 + $0xb8] sm:$0xff] }
 0x974   :  { %v9438_v38 = vpop.eup %9437  ;;  %8560 = vmatprep.mubr.msk.f32.mxu1 %vm936_vm5, %v4842_v33  ;;  %v4747_v7 = vadd.f32 %v4746_v0, %v4745_v15  ;;  %v4762_v44 = vrot.slane %v4761_v3, 4  ;;  %v4768_v14 = vsel %vm936_vm5, %v11710_v32, 0.0  ;;  %v11723_v53 = vmul.f32 %v9617_v2, %v11608_v28  ;;  %v9619_v2 = vld [vmem:[%s9878_s3 + $0xc0] sm:$0xff] }
 0x975   :  { %8561 = vmatmul.mubr.msk.f32.gmra.mrb[80].mxu1 %vm936_vm5, %v4843_v37  ;;  %v4845_v58 = vmul.f32 %v9438_v38, %v11580_v55  ;;  %v4846_v48 = vmul.f32 %v9438_v38, %v11590_v12  ;;  %v4827_v45 = vmax.f32 %v4731_v34, 1e-16  ;;  %v4740_v52 = vadd.f32 %v4739_v61, %v4738_v39 }
 0x976   :  { %v4748_v18 = vrot.slane %v4747_v7, 1  ;;  %v4755_v63 = vrot.slane %v4754_v20, 2  ;;  %v4763_v15 = vadd.f32 %v4762_v44, %v4761_v3  ;;  %v4769_v6 = vsel %vm936_vm5, %v11716_v11, 0.0 }
 0x977   :  { %8563 = vmatprep.mubr.msk.f32.mxu1 %vm936_vm5, %v4845_v58  ;;  %9443 = vrcp.f32 %v4827_v45  ;;  %v4828_v8 = vmax.f32 %v4740_v52, 1e-16  ;;  %v4770_v28 = vadd.f32 %v4769_v6, %v4768_v14  ;;  %v11733_v33 = vmul.f32 %v9618_v47, %v11616_v19 }
 0x978   :  { %v9440_v55 = vpop.eup %9439  ;;  %v4749_v37 = vadd.f32 %v4748_v18, %v4747_v7  ;;  %v4756_v12 = vadd.f32 %v4755_v63, %v4754_v20  ;;  %v4764_v39 = vrot.slane %v4763_v15, 2  ;;  %v4777_v0 = vsel %vm936_vm5, %v11723_v53, 0.0 }
 0x979   :  { %8564 = vmatmul.mubr.msk.f32.gmra.mrb[82].mxu1 %vm936_vm5, %v4846_v48  ;;  %v4848_v3 = vmul.f32 %v9440_v55, %v11598_v1  ;;  %v4849_v34 = vmul.f32 %v9440_v55, %v11604_v31  ;;  %9445 = vrcp.f32 %v4828_v8  ;;  %v4771_v61 = vrot.slane %v4770_v28, 4  ;;  %v9620_v1 = vld [vmem:[%s9878_s3 + $0xc8] sm:$0xff]  ;;  %v9622_v8 = vld [vmem:[%s9878_s3 + $0xd8] sm:$0xff] }
 0x97a   :  { %v4829_v13 = vmax.f32 %v4749_v37, 1e-16  ;;  %v4757_v19 = vrot.slane %v4756_v12, 1  ;;  %v4765_v38 = vadd.f32 %v4764_v39, %v4763_v15  ;;  %v4778_v20 = vsel %vm936_vm5, %v11733_v33, 0.0 }
 0x97b   :  { %v9442_v7 = vpop.eup %9441  ;;  %8566 = vmatprep.mubr.msk.f32.mxu1 %vm936_vm5, %v4848_v3  ;;  %v4772_v44 = vadd.f32 %v4771_v61, %v4770_v28  ;;  %v4779_v14 = vadd.f32 %v4778_v20, %v4777_v0  ;;  %v11745_v58 = vmul.f32 %v9619_v2, %v11622_v4  ;;  %v11749_v31 = vmul.f32 %v9620_v1, %v11626_v30  ;;  %v9623_v3 = vld [vmem:[%s9878_s3 + $0xe0] sm:$0xff] }
 0x97c   :  { %v4851_v48 = vmul.f32 %v9442_v7, %v11614_v54  ;;  %v4852_v45 = vmul.f32 %v9442_v7, %v11620_v59  ;;  %9447 = vrcp.f32 %v4829_v13  ;;  %v4758_v52 = vadd.f32 %v4757_v19, %v4756_v12  ;;  %v9621_v54 = vld [vmem:[%s9878_s3 + $0xd0] sm:$0xff] }
 0x97d   :  { %8567 = vmatmul.mubr.msk.f32.gmra.mrb[84].mxu1 %vm936_vm5, %v4849_v34  ;;  %v4766_v18 = vrot.slane %v4765_v38, 1  ;;  %v4773_v63 = vrot.slane %v4772_v44, 2  ;;  %v4780_v15 = vrot.slane %v4779_v14, 4  ;;  %v4786_v4 = vsel %vm936_vm5, %v11745_v58, 0.0 }
 0x97e   :  { %8569 = vmatprep.mubr.msk.f32.mxu1 %vm936_vm5, %v4851_v48  ;;  %v4830_v6 = vmax.f32 %v4758_v52, 1e-16  ;;  %v4787_v30 = vsel %vm936_vm5, %v11749_v31, 0.0  ;;  %v11761_v59 = vmul.f32 %v9621_v54, %v11638_v22  ;;  %v11765_v28 = vmul.f32 %v9622_v8, %v11645_v42  ;;  %v9626_v54 = vld [vmem:[%s9878_s3 + $0xf8] sm:$0xff] }
 0x97f   :  { %v4767_v47 = vadd.f32 %v4766_v18, %v4765_v38  ;;  %v4774_v55 = vadd.f32 %v4773_v63, %v4772_v44  ;;  %v4781_v37 = vadd.f32 %v4780_v15, %v4779_v14  ;;  %v4788_v12 = vadd.f32 %v4787_v30, %v4786_v4  ;;  %v9624_v44 = vld [vmem:[%s9878_s3 + $0xe8] sm:$0xff] }
 0x980   :  { %9449 = vrcp.f32 %v4830_v6  ;;  %v4795_v39 = vsel %vm936_vm5, %v11761_v59, 0.0  ;;  %v4796_v0 = vsel %vm936_vm5, %v11765_v28, 0.0  ;;  %v11773_v22 = vmul.f32 %v9623_v3, %v11662_v40 }
 0x981   :  { %v9444_v34 = vpop.eup %9443  ;;  %8570 = vmatmul.mubr.msk.f32.gmra.mrb[86].mxu1 %vm936_vm5, %v4852_v45  ;;  %v4831_v42 = vmax.f32 %v4767_v47, 1e-16  ;;  %v4775_v61 = vrot.slane %v4774_v55, 1  ;;  %v4782_v13 = vrot.slane %v4781_v37, 2  ;;  %v4789_v19 = vrot.slane %v4788_v12, 4 }
 0x982   :  { %v4854_v38 = vmul.f32 %v9444_v34, %v11636_v5  ;;  %v4855_v20 = vmul.f32 %v9444_v34, %v11643_v57  ;;  %v4797_v7 = vadd.f32 %v4796_v0, %v4795_v39  ;;  %v11780_v14 = vmul.f32 %v9624_v44, %v11670_v43 }
 0x983   :  { %v9446_v2 = vpop.eup %9445  ;;  %9451 = vrcp.f32 %v4831_v42  ;;  %v4776_v40 = vadd.f32 %v4775_v61, %v4774_v55  ;;  %v4783_v1 = vadd.f32 %v4782_v13, %v4781_v37  ;;  %v4790_v48 = vadd.f32 %v4789_v19, %v4788_v12 }
 0x984   :  { %8572 = vmatprep.mubr.msk.f32.mxu1 %vm936_vm5, %v4854_v38  ;;  %v4857_v45 = vmul.f32 %v9446_v2, %v11652_v35  ;;  %v4858_v5 = vmul.f32 %v9446_v2, %v11658_v17  ;;  %v4798_v52 = vrot.slane %v4797_v7, 4  ;;  %v4804_v57 = vsel %vm936_vm5, %v11773_v22, 0.0  ;;  %v9625_v35 = vld [vmem:[%s9878_s3 + $0xf0] sm:$0xff] }
 0x985   :  { %8573 = vmatmul.mubr.msk.f32.gmra.mrb[88].mxu1 %vm936_vm5, %v4855_v20  ;;  %v4832_v43 = vmax.f32 %v4776_v40, 1e-16  ;;  %v4784_v18 = vrot.slane %v4783_v1, 1  ;;  %v4791_v63 = vrot.slane %v4790_v48, 2  ;;  %v4805_v15 = vsel %vm936_vm5, %v11780_v14, 0.0 }
 0x986   :  { %v9448_v4 = vpop.eup %9447  ;;  %8575 = vmatprep.mubr.msk.f32.mxu1 %vm936_vm5, %v4857_v45  ;;  %v4799_v6 = vadd.f32 %v4798_v52, %v4797_v7  ;;  %v4806_v30 = vadd.f32 %v4805_v15, %v4804_v57  ;;  %v11793_v17 = vmul.f32 %v9625_v35, %v11690_v26  ;;  %v11797_v8 = vmul.f32 %v9626_v54, %v11696_v49 }
 0x987   :  { %v4860_v47 = vmul.f32 %v9448_v4, %v11668_v9  ;;  %v4861_v55 = vmul.f32 %v9448_v4, %v11674_v36  ;;  %9453 = vrcp.f32 %v4832_v43  ;;  %v4785_v37 = vadd.f32 %v4784_v18, %v4783_v1 }
 0x988   :  { %v4792_v12 = vadd.f32 %v4791_v63, %v4790_v48  ;;  %v4800_v39 = vrot.slane %v4799_v6, 2  ;;  %v4807_v0 = vrot.slane %v4806_v30, 4  ;;  %v4813_v3 = vsel %vm936_vm5, %v11793_v17, 0.0 }
 0x989   :  { %8576 = vmatmul.mubr.msk.f32.gmra.mrb[90].mxu1 %vm936_vm5, %v4858_v5  ;;  %v4833_v26 = vmax.f32 %v4785_v37, 1e-16  ;;  %v4814_v34 = vsel %vm936_vm5, %v11797_v8, 0.0 }
 0x98a   :  { %v9450_v49 = vpop.eup %9449  ;;  %8578 = vmatprep.mubr.msk.f32.mxu1 %vm936_vm5, %v4860_v47  ;;  %v4793_v9 = vrot.slane %v4792_v12, 1  ;;  %v4801_v42 = vadd.f32 %v4800_v39, %v4799_v6  ;;  %v4808_v36 = vadd.f32 %v4807_v0, %v4806_v30  ;;  %v4815_v61 = vadd.f32 %v4814_v34, %v4813_v3  ;;  %v5431_v0 = vld [vmem:[%s11843_s19 + $0x10] sm:$0xff]  ;;  %v5436_v34 = vld [vmem:[%s11843_s19 + $0x38] sm:$0xff] }
 0x98b   :  { %v4863_v13 = vmul.f32 %v9450_v49, %v11680_v51  ;;  %v4864_v19 = vmul.f32 %v9450_v49, %v11686_v41  ;;  %9455 = vrcp.f32 %v4833_v26  ;;  %v5434_v26 = vld [vmem:[%s11843_s19 + $0x28] sm:$0xff] }
 0x98c   :  { %v4794_v38 = vadd.f32 %v4793_v9, %v4792_v12  ;;  %v4802_v20 = vrot.slane %v4801_v42, 1  ;;  %v4809_v7 = vrot.slane %v4808_v36, 2  ;;  %v4816_v44 = vrot.slane %v4815_v61, 4  ;;  %v5433_v9 = vld [vmem:[%s11843_s19 + $0x20] sm:$0xff] }
 0x98d   :  { %v9452_v2 = vpop.eup %9451  ;;  %8579 = vmatmul.mubr.msk.f32.gmra.mrb[92].mxu1 %vm936_vm5, %v4861_v55  ;;  %v9016_v49 = vpack.c.bf16 %v5436_v34, %v5434_v26 }
 0x98e   :  { %8581 = vmatprep.mubr.msk.f32.mxu1 %vm936_vm5, %v4863_v13  ;;  %v4866_v40 = vmul.f32 %v9452_v2, %v11694_v60  ;;  %v4867_v1 = vmul.f32 %v9452_v2, %v11702_v62  ;;  %v4834_v48 = vmax.f32 %v4794_v38, 1e-16  ;;  %v4803_v45 = vadd.f32 %v4802_v20, %v4801_v42  ;;  %v5435_v42 = vld [vmem:[%s11843_s19 + $0x30] sm:$0xff]  ;;  %v5440_v13 = vld [vmem:[%s11843_s19 + $0x58] sm:$0xff]  ;;  %v5437_v38 = vld [vmem:[%s11843_s19 + $0x40] sm:$0xff] }
 0x98f   :  { %v4810_v5 = vadd.f32 %v4809_v7, %v4808_v36  ;;  %v4817_v51 = vadd.f32 %v4816_v44, %v4815_v61  ;;  %v9018_v36 = vpack.c.bf16 %v5435_v42, %v5433_v9  ;;  %v5438_v61 = vld [vmem:[%s11843_s19 + $0x48] sm:$0xff]  ;;  %v5439_v20 = vld [vmem:[%s11843_s19 + $0x50] sm:$0xff]  ;;  %v5444_v2 = vld [vmem:[%s11843_s19 + $0x78] sm:$0xff] }
 0x990   :  { %9457 = vrcp.f32 %v4834_v48  ;;  %v4835_v41 = vmax.f32 %v4803_v45, 1e-16  ;;  %v9022_v7 = vpack.c.bf16 %v5439_v20, %v5437_v38  ;;  %v5442_v44 = vld [vmem:[%s11843_s19 + $0x68] sm:$0xff]  ;;  %v5443_v48 = vld [vmem:[%s11843_s19 + $0x70] sm:$0xff] }
 0x991   :  { %v9454_v52 = vpop.eup %9453  ;;  %8582 = vmatmul.mubr.msk.f32.gmra.mrb[94].mxu1 %vm936_vm5, %v4864_v19  ;;  %v4811_v57 = vrot.slane %v4810_v5, 1  ;;  %v4818_v43 = vrot.slane %v4817_v51, 2  ;;  %v9020_v19 = vpack.c.bf16 %v5440_v13, %v5438_v61 }
 0x992   :  { %8584 = vmatprep.mubr.msk.f32.mxu1 %vm936_vm5, %v4866_v40  ;;  %v4869_v18 = vmul.f32 %v9454_v52, %v11710_v32  ;;  %v4870_v63 = vmul.f32 %v9454_v52, %v11716_v11  ;;  %9459 = vrcp.f32 %v4835_v41  ;;  %v9024_v40 = vpack.c.bf16 %v5444_v2, %v5442_v44  ;;  %v5445_v52 = vld [vmem:[%s11843_s19 + $0x80] sm:$0xff] }
 0x993   :  { %v4812_v60 = vadd.f32 %v4811_v57, %v4810_v5  ;;  %v4819_v62 = vadd.f32 %v4818_v43, %v4817_v51  ;;  %v5446_v5 = vld [vmem:[%s11843_s19 + $0x88] sm:$0xff]  ;;  %v5448_v51 = vld [vmem:[%s11843_s19 + $0x98] sm:$0xff]  ;;  %v5447_v57 = vld [vmem:[%s11843_s19 + $0x90] sm:$0xff] }
 0x994   :  { %v9028_v41 = vpack.c.bf16 %v5448_v51, %v5446_v5  ;;  %v9030_v43 = vpack.c.bf16 %v5447_v57, %v5445_v52 }
 0x995   :  { %v9456_v15 = vpop.eup %9455  ;;  %8585 = vmatmul.mubr.msk.f32.gmra.mrb[96].mxu1 %vm936_vm5, %v4867_v1  ;;  %v4836_v4 = vmax.f32 %v4812_v60, 1e-16  ;;  %v4820_v6 = vrot.slane %v4819_v62, 1  ;;  %v5441_v1 = vld [vmem:[%s11843_s19 + $0x60] sm:$0xff] }
 0x996   :  { %8587 = vmatprep.mubr.msk.f32.mxu1 %vm936_vm5, %v4869_v18  ;;  %v4872_v30 = vmul.f32 %v9456_v15, %v11723_v53  ;;  %v4873_v35 = vmul.f32 %v9456_v15, %v11733_v33  ;;  %v9026_v45 = vpack.c.bf16 %v5443_v48, %v5441_v1  ;;  %v5450_v18 = vld [vmem:[%s11843_s19 + $0xa8] sm:$0xff]  ;;  %v5451_v15 = vld [vmem:[%s11843_s19 + $0xb0] sm:$0xff] }
 0x997   :  { %9461 = vrcp.f32 %v4836_v4  ;;  %v4821_v54 = vadd.f32 %v4820_v6, %v4819_v62  ;;  %v5449_v62 = vld [vmem:[%s11843_s19 + $0xa0] sm:$0xff]  ;;  %v5454_v6 = vld [vmem:[%s11843_s19 + $0xc8] sm:$0xff] }
 0x998   :  { %v9034_v4 = vpack.c.bf16 %v5451_v15, %v5449_v62 }
 0x999   :  { %8588 = vmatmul.mubr.msk.f32.gmra.mrb[98].mxu1 %vm936_vm5, %v4870_v63  ;;  %v4837_v32 = vmax.f32 %v4821_v54, 1e-16  ;;  %v5452_v63 = vld [vmem:[%s11843_s19 + $0xb8] sm:$0xff]  ;;  %v5453_v54 = vld [vmem:[%s11843_s19 + $0xc0] sm:$0xff] }
 0x99a   :  { %v9458_v11 = vpop.eup %9457  ;;  %8590 = vmatprep.mubr.msk.f32.mxu1 %vm936_vm5, %v4872_v30  ;;  %v9032_v60 = vpack.c.bf16 %v5452_v63, %v5450_v18  ;;  %v5456_v30 = vld [vmem:[%s11843_s19 + $0xd8] sm:$0xff] }
 0x99b   :  { %v4875_v47 = vmul.f32 %v9458_v11, %v11745_v58  ;;  %v4876_v55 = vmul.f32 %v9458_v11, %v11749_v31  ;;  %9463 = vrcp.f32 %v4837_v32  ;;  %v5455_v32 = vld [vmem:[%s11843_s19 + $0xd0] sm:$0xff] }
 0x99c   :  { %v9460_v37 = vpop.eup %9459  ;;  %v9038_v11 = vpack.c.bf16 %v5455_v32, %v5453_v54 }
 0x99d   :  { %8591 = vmatmul.mubr.msk.f32.gmra.mrb[100].mxu1 %vm936_vm5, %v4873_v35  ;;  %v4878_v53 = vmul.f32 %v9460_v37, %v11761_v59  ;;  %v4879_v33 = vmul.f32 %v9460_v37, %v11765_v28  ;;  %v9036_v35 = vpack.c.bf16 %v5456_v30, %v5454_v6 }
 0x99e   :  { %8593 = vmatprep.mubr.msk.f32.mxu1 %vm936_vm5, %v4875_v47  ;;  %v5458_v47 = vld [vmem:[%s11843_s19 + $0xe8] sm:$0xff] }
 0x9a1   :  { %v9462_v12 = vpop.eup %9461  ;;  %8594 = vmatmul.mubr.msk.f32.gmra.mrb[102].mxu1 %vm936_vm5, %v4876_v55  ;;  %v5460_v55 = vld [vmem:[%s11843_s19 + $0xf8] sm:$0xff] }
 0x9a2   :  { %8596 = vmatprep.mubr.msk.f32.mxu1 %vm936_vm5, %v4878_v53  ;;  %v4881_v39 = vmul.f32 %v9462_v12, %v11773_v22  ;;  %v4882_v58 = vmul.f32 %v9462_v12, %v11780_v14  ;;  %v5430_v22 = vld [vmem:[%s11843_s19 + $0x8] sm:$0xff]  ;;  %v5432_v14 = vld [vmem:[%s11843_s19 + $0x18] sm:$0xff]  ;;  %v9040_v37 = vpack.c.bf16 %v5460_v55, %v5458_v47  ;;  %v5457_v53 = vld [vmem:[%s11843_s19 + $0xe0] sm:$0xff] }
 0x9a5   :  { %v9464_v31 = vpop.eup %9463  ;;  %8597 = vmatmul.mubr.msk.f32.gmra.mrb[104].mxu1 %vm936_vm5, %v4879_v33  ;;  %v5459_v33 = vld [vmem:[%s11843_s19 + $0xf0] sm:$0xff] }
 0x9a6   :  { %8599 = vmatprep.mubr.msk.f32.mxu1 %vm936_vm5, %v4881_v39  ;;  %v4884_v59 = vmul.f32 %v9464_v31, %v11793_v17  ;;  %v4885_v28 = vmul.f32 %v9464_v31, %v11797_v8  ;;  %v9012_v17 = vpack.c.bf16 %v5432_v14, %v5430_v22  ;;  %v5429_v8 = vld [vmem:[%s11843_s19] sm:$0xff]  ;;  %v9042_v12 = vpack.c.bf16 %v5459_v33, %v5457_v53  ;;  %s7682_s19 = sld [smem:[%s12845_s0 + %s9696_s16]]  }
 0x9a7   :  { %v9014_v3 = vpack.c.bf16 %v5431_v0, %v5429_v8  ;;  %v11878_v39 = vld [vmem:[%s9841_s29] sm:$0xff]  ;;  %s9680_s29 = smov 20  }
 0x9a8   :  { %9013 = vmatprep.subr.bf16.mxu0 %v9012_v17  ;;  %s7671_s22 = sld [smem:[%s12845_s0 + %s9680_s29]]   ;;  %s9697_s29 = smov 34  }
 0x9a9   :  { %8600 = vmatmul.mubr.msk.f32.gmra.mrb[106].mxu1 %vm936_vm5, %v4882_v58  ;;  %9015 = vmatpush1.bf16.msra.mxu0 %v9014_v3 }
 0x9aa   :  { %8602 = vmatprep.mubr.msk.f32.mxu1 %vm936_vm5, %v4884_v59  ;;  %9017 = vmatprep.subr.bf16.mxu0 %v9016_v49 }
 0x9ad   :  { %8603 = vmatmul.mubr.msk.f32.gmra.mrb[108].mxu1 %vm936_vm5, %v4885_v28  ;;  %9019 = vmatpush1.bf16.msra.mxu0 %v9018_v36 }
 0x9ae   :  { %9021 = vmatprep.subr.bf16.mxu0 %v9020_v19 }
 0x9b1   :  { %9023 = vmatpush1.bf16.msra.mxu0 %v9022_v7 }
 0x9b2   :  { %9025 = vmatprep.subr.bf16.mxu0 %v9024_v40 }
 0x9b5   :  { %9027 = vmatpush1.bf16.msra.mxu0 %v9026_v45 }
 0x9b6   :  { %9029 = vmatprep.subr.bf16.mxu0 %v9028_v41 }
 0x9b9   :  { %9031 = vmatpush1.bf16.msra.mxu0 %v9030_v43 }
 0x9ba   :  { %9033 = vmatprep.subr.bf16.mxu0 %v9032_v60 }
 0x9bd   :  { %9035 = vmatpush1.bf16.msra.mxu0 %v9034_v4 }
 0x9be   :  { %9037 = vmatprep.subr.bf16.mxu0 %v9036_v35 }
 0x9c1   :  { %9039 = vmatpush1.bf16.msra.mxu0 %v9038_v11 }
 0x9c2   :  { %9041 = vmatprep.subr.bf16.mxu0 %v9040_v37 }
 0x9c5   :  { %9043 = vmatpush1.bf16.msra.mxu0 %v9042_v12 }
 0x9c6   :  { %8685 = vmatprep.subr.mxu0 %v11878_v39 }
 0xa38   :  { %v8559_v58 = vpop.f32.mrb[78].mxu1 }
 0xa39   :  { %v5208_v31 = vmul.f32 %v8559_v58, %v11336_v27  ;;  %v5048_v59 = vpop.f32.mrb[79].mxu1 }
 0xa3a   :  { %v5207_v28 = vmul.f32 %v5048_v59, %v11327_v29 }
 0xa3c   :  { %v5239_v22 = vadd.f32 %v5208_v31, %v5207_v28 }
 0xa3e   :  { %v5240_v0 = vrot.slane %v5239_v22, 4 }
 0xa40   :  { %v5241_v42 = vadd.f32 %v5240_v0, %v5239_v22 }
 0xa42   :  { %v5242_v44 = vrot.slane %v5241_v42, 2 }
 0xa44   :  { %v5243_v57 = vadd.f32 %v5242_v44, %v5241_v42 }
 0xa46   :  { %v5244_v54 = vrot.slane %v5243_v57, 1 }
 0xa48   :  { %v8562_v14 = vpop.f32.mrb[80].mxu1  ;;  %v5245_v28 = vadd.f32 %v5244_v54, %v5243_v57 }
 0xa49   :  { %v5210_v17 = vmul.f32 %v8562_v14, %v11336_v27  ;;  %v5058_v8 = vpop.f32.mrb[81].mxu1 }
 0xa4a   :  { %v5209_v3 = vmul.f32 %v5058_v8, %v11327_v29  ;;  %v11900_v8 = vld [vmem:[%s7671_s22] ss:$0 sm:$0xff]  ;;  %s7685_s22 = sld [smem:[%s12845_s0 + %s9697_s29]]  }
 0xa4c   :  { %v5246_v26 = vadd.f32 %v5210_v17, %v5209_v3  ;;  %v8565_v34 = vpop.f32.mrb[82].mxu1 }
 0xa4d   :  { %v5212_v49 = vmul.f32 %v8565_v34, %v11336_v27  ;;  %v5068_v9 = vpop.f32.mrb[83].mxu1 }
 0xa4e   :  { %v5247_v36 = vrot.slane %v5246_v26, 4  ;;  %v5211_v61 = vmul.f32 %v5068_v9, %v11327_v29 }
 0xa50   :  { %v5248_v13 = vadd.f32 %v5247_v36, %v5246_v26  ;;  %v5253_v19 = vadd.f32 %v5212_v49, %v5211_v61  ;;  %v8568_v38 = vpop.f32.mrb[84].mxu1 }
 0xa51   :  { %v5214_v20 = vmul.f32 %v8568_v38, %v11336_v27  ;;  %v5078_v7 = vpop.f32.mrb[85].mxu1 }
 0xa52   :  { %v5249_v2 = vrot.slane %v5248_v13, 2  ;;  %v5254_v40 = vrot.slane %v5253_v19, 4  ;;  %v5213_v1 = vmul.f32 %v5078_v7, %v11327_v29  ;;  %v11907_v7 = vld [vmem:[%s7672_s26] ss:$0 sm:$0xff] }
 0xa54   :  { %v5250_v48 = vadd.f32 %v5249_v2, %v5248_v13  ;;  %v5255_v45 = vadd.f32 %v5254_v40, %v5253_v19  ;;  %v5260_v5 = vadd.f32 %v5214_v20, %v5213_v1  ;;  %v8571_v51 = vpop.f32.mrb[86].mxu1  ;;  %v5358_v19 = vmul.f32 %v11900_v8, %v5245_v28 }
 0xa55   :  { %v5216_v41 = vmul.f32 %v8571_v51, %v11336_v27  ;;  %v5088_v52 = vpop.f32.mrb[87].mxu1 }
 0xa56   :  { %v5256_v43 = vrot.slane %v5255_v45, 2  ;;  %v5261_v18 = vrot.slane %v5260_v5, 4  ;;  %v5215_v63 = vmul.f32 %v5088_v52, %v11327_v29  ;;  %v5251_v60 = vrot.slane %v5250_v48, 1 }
 0xa58   :  { %v5257_v62 = vadd.f32 %v5256_v43, %v5255_v45  ;;  %v5262_v15 = vadd.f32 %v5261_v18, %v5260_v5  ;;  %v5267_v4 = vadd.f32 %v5216_v41, %v5215_v63  ;;  %v8574_v6 = vpop.f32.mrb[88].mxu1  ;;  %v5252_v37 = vadd.f32 %v5251_v60, %v5250_v48 }
 0xa59   :  { %v5218_v30 = vmul.f32 %v8574_v6, %v11336_v27  ;;  %v5098_v35 = vpop.f32.mrb[89].mxu1  ;;  %v5381_v18 = vadd.f32 %v11907_v7, %v5358_v19 }
 0xa5a   :  { %v5258_v32 = vrot.slane %v5257_v62, 1  ;;  %v5263_v11 = vrot.slane %v5262_v15, 2  ;;  %v5268_v47 = vrot.slane %v5267_v4, 4  ;;  %v5217_v55 = vmul.f32 %v5098_v35, %v11327_v29 }
 0xa5b   :  { %v5359_v26 = vmul.f32 %v11900_v8, %v5252_v37  ;;  %v12972_v35 = vmax.f32 %v11136_v25, 0.0 }
 0xa5c   :  { %v5264_v53 = vadd.f32 %v5263_v11, %v5262_v15  ;;  %v5269_v33 = vadd.f32 %v5268_v47, %v5267_v4  ;;  %v8577_v12 = vpop.f32.mrb[90].mxu1  ;;  %v5274_v58 = vadd.f32 %v5218_v30, %v5217_v55  ;;  %v5259_v22 = vadd.f32 %v5258_v32, %v5257_v62 }
 0xa5d   :  { %v5220_v31 = vmul.f32 %v8577_v12, %v11336_v27  ;;  %v5108_v59 = vpop.f32.mrb[91].mxu1  ;;  %v5382_v48 = vadd.f32 %v11907_v7, %v5359_v26 }
 0xa5e   :  { %v5265_v14 = vrot.slane %v5264_v53, 1  ;;  %v5270_v17 = vrot.slane %v5269_v33, 2  ;;  %v5275_v0 = vrot.slane %v5274_v58, 4  ;;  %v5219_v3 = vmul.f32 %v5108_v59, %v11327_v29 }
 0xa5f   :  { %v5360_v38 = vmul.f32 %v11900_v8, %v5259_v22  ;;  %v11920_v54 = vadd.f32 %v5382_v48, %v12972_v35  ;;  %v12974_v59 = vmax.f32 %v11146_v56, 0.0  ;;  %v12975_v22 = vmax.f32 %v11151_v21, 0.0 }
 0xa60   :  { %v5266_v34 = vadd.f32 %v5265_v14, %v5264_v53  ;;  %v5271_v49 = vadd.f32 %v5270_v17, %v5269_v33  ;;  %v8580_v9 = vpop.f32.mrb[92].mxu1  ;;  %v5276_v42 = vadd.f32 %v5275_v0, %v5274_v58  ;;  %v5281_v36 = vadd.f32 %v5220_v31, %v5219_v3 }
 0xa61   :  { %v5222_v61 = vmul.f32 %v8580_v9, %v11336_v27  ;;  %v5118_v13 = vpop.f32.mrb[93].mxu1  ;;  %v5383_v63 = vadd.f32 %v11907_v7, %v5360_v38  ;;  %v12973_v58 = vmax.f32 %v11142_v10, 0.0  ;;  %v12917_v26 = vmax.f32 %v11920_v54, 0.0 }
 0xa62   :  { %v5272_v20 = vrot.slane %v5271_v49, 1  ;;  %v5361_v44 = vmul.f32 %v11900_v8, %v5266_v34  ;;  %v5277_v2 = vrot.slane %v5276_v42, 2  ;;  %v5282_v40 = vrot.slane %v5281_v36, 4 }
 0xa63   :  { %v5221_v1 = vmul.f32 %v5118_v13, %v11327_v29  ;;  %v11926_v31 = vadd.f32 %v5381_v18, %v12973_v58  ;;  %v11930_v28 = vadd.f32 %v5383_v63, %v12974_v59  ;;  %v12976_v10 = vmax.f32 %v11157_v46, 0.0 }
 0xa64   :  { %v5273_v45 = vadd.f32 %v5272_v20, %v5271_v49  ;;  %v8583_v5 = vpop.f32.mrb[94].mxu1  ;;  %v5278_v51 = vadd.f32 %v5277_v2, %v5276_v42  ;;  %v5283_v41 = vadd.f32 %v5282_v40, %v5281_v36  ;;  %v5384_v15 = vadd.f32 %v11907_v7, %v5361_v44 }
 0xa65   :  { %v5288_v52 = vadd.f32 %v5222_v61, %v5221_v1  ;;  %v5224_v57 = vmul.f32 %v8583_v5, %v11336_v27  ;;  %v5128_v43 = vpop.f32.mrb[95].mxu1  ;;  %v12918_v13 = vmax.f32 %v11926_v31, 0.0  ;;  %v12916_v19 = vmax.f32 %v11930_v28, 0.0 }
 0xa66   :  { %v5362_v60 = vmul.f32 %v11900_v8, %v5273_v45  ;;  %v5223_v62 = vmul.f32 %v5128_v43, %v11327_v29  ;;  %v5279_v4 = vrot.slane %v5278_v51, 1  ;;  %v5284_v6 = vrot.slane %v5283_v41, 2 }
 0xa67   :  { %v5289_v30 = vrot.slane %v5288_v52, 4  ;;  %v11935_v14 = vadd.f32 %v5384_v15, %v12975_v22  ;;  %v12977_v44 = vmax.f32 %v11167_v16, 0.0  ;;  %v5489_v48 = vrot.slane %v12917_v26, 7 }
 0xa68   :  { %v5385_v32 = vadd.f32 %v11907_v7, %v5362_v60  ;;  %v5295_v11 = vadd.f32 %v5224_v57, %v5223_v62  ;;  %v8586_v47 = vpop.f32.mrb[96].mxu1  ;;  %v5280_v55 = vadd.f32 %v5279_v4, %v5278_v51  ;;  %v5285_v37 = vadd.f32 %v5284_v6, %v5283_v41 }
 0xa69   :  { %v5290_v53 = vadd.f32 %v5289_v30, %v5288_v52  ;;  %v5226_v33 = vmul.f32 %v8586_v47, %v11336_v27  ;;  %v5138_v12 = vpop.f32.mrb[97].mxu1  ;;  %v12915_v46 = vmax.f32 %v11935_v14, 0.0  ;;  %v5491_v63 = vrot.slane %v12916_v19, 6 }
 0xa6a   :  { %v5225_v25 = vmul.f32 %v5138_v12, %v11327_v29  ;;  %v5363_v17 = vmul.f32 %v11900_v8, %v5280_v55  ;;  %v5286_v0 = vrot.slane %v5285_v37, 1  ;;  %v11941_v34 = vadd.f32 %v5385_v32, %v12976_v10 }
 0xa6b   :  { %v5291_v3 = vrot.slane %v5290_v53, 2  ;;  %v5296_v45 = vrot.slane %v5295_v11, 4  ;;  %v5493_v4 = vrot.slane %v12915_v46, 5  ;;  %v12978_v6 = vmax.f32 %v11183_v50, 0.0 }
 0xa6c   :  { %v5302_v49 = vadd.f32 %v5226_v33, %v5225_v25  ;;  %v8589_v56 = vpop.f32.mrb[98].mxu1  ;;  %v5386_v9 = vadd.f32 %v11907_v7, %v5363_v17  ;;  %v5287_v42 = vadd.f32 %v5286_v0, %v5285_v37  ;;  %v12914_v52 = vmax.f32 %v11941_v34, 0.0 }
 0xa6d   :  { %v5292_v36 = vadd.f32 %v5291_v3, %v5290_v53  ;;  %v5228_v21 = vmul.f32 %v8589_v56, %v11336_v27  ;;  %v5148_v61 = vpop.f32.mrb[99].mxu1  ;;  %v5297_v47 = vadd.f32 %v5296_v45, %v5295_v11  ;;  %v5490_v33 = vsel %vm2005_vm6, %v5489_v48, %v12918_v13 }
 0xa6e   :  { %v5303_v38 = vrot.slane %v5302_v49, 4  ;;  %v5227_v20 = vmul.f32 %v5148_v61, %v11327_v29  ;;  %v11951_v2 = vadd.f32 %v5386_v9, %v12977_v44  ;;  %v5364_v40 = vmul.f32 %v11900_v8, %v5287_v42 }
 0xa6f   :  { %v5293_v1 = vrot.slane %v5292_v36, 1  ;;  %v5495_v25 = vrot.slane %v12914_v52, 4  ;;  %v5492_v11 = vsel %vm2008_vm7, %v5491_v63, %v5490_v33  ;;  %v5298_v42 = vrot.slane %v5297_v47, 2 }
 0xa70   :  { %v5304_v5 = vadd.f32 %v5303_v38, %v5302_v49  ;;  %v5309_v51 = vadd.f32 %v5228_v21, %v5227_v20  ;;  %v8592_v41 = vpop.f32.mrb[100].mxu1  ;;  %v5387_v57 = vadd.f32 %v11907_v7, %v5364_v40  ;;  %v12913_v60 = vmax.f32 %v11951_v2, 0.0 }
 0xa71   :  { %v5294_v43 = vadd.f32 %v5293_v1, %v5292_v36  ;;  %v5230_v18 = vmul.f32 %v8592_v41, %v11336_v27  ;;  %v5158_v16 = vpop.f32.mrb[101].mxu1  ;;  %v12979_v49 = vmax.f32 %v11200_v23, 0.0  ;;  %v5494_v9 = vsel %vm2011_vm8, %v5493_v4, %v5492_v11 }
 0xa72   :  { %v5310_v62 = vrot.slane %v5309_v51, 4  ;;  %v5229_v15 = vmul.f32 %v5158_v16, %v11327_v29  ;;  %v11967_v30 = vadd.f32 %v5387_v57, %v12978_v6  ;;  %v5305_v32 = vrot.slane %v5304_v5, 2 }
 0xa73   :  { %v5365_v35 = vmul.f32 %v11900_v8, %v5294_v43  ;;  %v5497_v0 = vrot.slane %v12913_v60, 3  ;;  %v5496_v48 = vsel %vm2014_vm9, %v5495_v25, %v5494_v9  ;;  %v5299_v43 = vadd.f32 %v5298_v42, %v5297_v47 }
 0xa74   :  { %v5311_v55 = vadd.f32 %v5310_v62, %v5309_v51  ;;  %v5316_v37 = vadd.f32 %v5230_v18, %v5229_v15  ;;  %v8595_v53 = vpop.f32.mrb[102].mxu1  ;;  %v12912_v50 = vmax.f32 %v11967_v30, 0.0  ;;  %v5306_v3 = vadd.f32 %v5305_v32, %v5304_v5 }
 0xa75   :  { %v5388_v12 = vadd.f32 %v11907_v7, %v5365_v35  ;;  %v5232_v58 = vmul.f32 %v8595_v53, %v11336_v27  ;;  %v5168_v59 = vpop.f32.mrb[103].mxu1  ;;  %v5498_v45 = vsel %vm2017_vm10, %v5497_v0, %v5496_v48  ;;  %v5300_v47 = vrot.slane %v5299_v43, 1 }
 0xa76   :  { %v5312_v22 = vrot.slane %v5311_v55, 2  ;;  %v5317_v17 = vrot.slane %v5316_v37, 4  ;;  %v5231_v10 = vmul.f32 %v5168_v59, %v11327_v29  ;;  %v5499_v38 = vrot.slane %v12912_v50, 2 }
 0xa77   :  { %v11984_v56 = vadd.f32 %v5388_v12, %v12979_v49  ;;  %v5307_v5 = vrot.slane %v5306_v3, 1 }
 0xa78   :  { %v5313_v36 = vadd.f32 %v5312_v22, %v5311_v55  ;;  %v5318_v21 = vadd.f32 %v5317_v17, %v5316_v37  ;;  %v8598_v61 = vpop.f32.mrb[104].mxu1  ;;  %v5323_v20 = vadd.f32 %v5232_v58, %v5231_v10  ;;  %v5500_v62 = vsel %vm2020_vm11, %v5499_v38, %v5498_v45 }
 0xa79   :  { %v5234_v44 = vmul.f32 %v8598_v61, %v11336_v27  ;;  %v5178_v40 = vpop.f32.mrb[105].mxu1  ;;  %v12911_v1 = vmax.f32 %v11984_v56, 0.0  ;;  %v5308_v53 = vadd.f32 %v5307_v5, %v5306_v3  ;;  %v5301_v61 = vadd.f32 %v5300_v47, %v5299_v43 }
 0xa7a   :  { %v5319_v23 = vrot.slane %v5318_v21, 2  ;;  %v5324_v51 = vrot.slane %v5323_v20, 4  ;;  %v5233_v41 = vmul.f32 %v5178_v40, %v11327_v29  ;;  %v5314_v18 = vrot.slane %v5313_v36, 1 }
 0xa7b   :  { %v5501_v57 = vrot.slane %v12911_v1, 1  ;;  %v5367_v9 = vmul.f32 %v11900_v8, %v5308_v53 }
 0xa7c   :  { %v5320_v16 = vadd.f32 %v5319_v23, %v5318_v21  ;;  %v8601_v63 = vpop.f32.mrb[106].mxu1  ;;  %v5325_v15 = vadd.f32 %v5324_v51, %v5323_v20  ;;  %v5330_v4 = vadd.f32 %v5234_v44, %v5233_v41  ;;  %v5315_v58 = vadd.f32 %v5314_v18, %v5313_v36 }
 0xa7d   :  { %v5236_v6 = vmul.f32 %v8601_v63, %v11336_v27  ;;  %v5188_v35 = vpop.f32.mrb[107].mxu1  ;;  %v5502_v32 = vsel %vm2023_vm12, %v5501_v57, %v5500_v62  ;;  %v12980_v62 = vld [vmem:[#allocation13_spill] sm:$0xff] }
 0xa7e   :  { %v5321_v55 = vrot.slane %v5320_v16, 1  ;;  %v5235_v37 = vmul.f32 %v5188_v35, %v11327_v29  ;;  %5584 = vmatmul.mubr.f32.vlgmr.msra.gmra.mrb[96].mxu0 %v5502_v32  ;;  %v5326_v33 = vrot.slane %v5325_v15, 2  ;;  %v5331_v12 = vrot.slane %v5330_v4, 4  ;;  %v12983_v32 = vld [vmem:[#allocation6_spill] sm:$0xff] }
 0xa7f   :  { %5589 = vmatprep.mubr.f32.mxu0 %v12937_v24  ;;  %8686 = vmatpush3.msra.mxu0 %v11878_v39  ;;  %v5368_v39 = vmul.f32 %v11900_v8, %v5315_v58 }
 0xa80   :  { %v5337_v59 = vadd.f32 %v5236_v6, %v5235_v37  ;;  %v8604_v25 = vpop.f32.mrb[108].mxu1  ;;  %v5322_v22 = vadd.f32 %v5321_v55, %v5320_v16  ;;  %v5327_v17 = vadd.f32 %v5326_v33, %v5325_v15  ;;  %v5332_v11 = vadd.f32 %v5331_v12, %v5330_v4  ;;  %v12986_v12 = vld [vmem:[#allocation7_spill] sm:$0xff] }
 0xa81   :  { %v5238_v0 = vmul.f32 %v8604_v25, %v11336_v27  ;;  %v5198_v10 = vpop.f32.mrb[109].mxu1  ;;  %v5390_v27 = vadd.f32 %v11907_v7, %v5367_v9  ;;  %v5391_v51 = vadd.f32 %v11907_v7, %v5368_v39  ;;  %v12981_v15 = vmax.f32 %v12980_v62, 0.0  ;;  %v12992_v9 = vld [vmem:[#allocation9_spill] sm:$0xff]  ;;  %v12995_v39 = vld [vmem:[#allocation10_spill] sm:$0xff] }
 0xa82   :  { %v5338_v49 = vrot.slane %v5337_v59, 4  ;;  %v5328_v3 = vrot.slane %v5327_v17, 1  ;;  %v5333_v42 = vrot.slane %v5332_v11, 2  ;;  %v5237_v21 = vmul.f32 %v5198_v10, %v11327_v29 }
 0xa83   :  { %v5369_v36 = vmul.f32 %v11900_v8, %v5322_v22  ;;  %v5366_v29 = vmul.f32 %v11900_v8, %v5301_v61  ;;  %v12015_v4 = vadd.f32 %v5390_v27, %v12981_v15  ;;  %v12984_v55 = vmax.f32 %v12983_v32, 0.0  ;;  %v12989_v22 = vld [vmem:[#allocation8_spill] sm:$0xff] }
 0xa84   :  { %v5339_v38 = vadd.f32 %v5338_v49, %v5337_v59  ;;  %v5329_v20 = vadd.f32 %v5328_v3, %v5327_v17  ;;  %v5334_v44 = vadd.f32 %v5333_v42, %v5332_v11  ;;  %v5344_v40 = vadd.f32 %v5238_v0, %v5237_v21 }
 0xa85   :  { %v5392_v57 = vadd.f32 %v11907_v7, %v5369_v36  ;;  %12982 = vst [vmem:[#allocation13_spill] sm:$0xff] %v12015_v4  ;;  %v12020_v37 = vadd.f32 %v5391_v51, %v12984_v55  ;;  %v5389_v33 = vadd.f32 %v11907_v7, %v5366_v29  ;;  %v12987_v47 = vmax.f32 %v12986_v12, 0.0 }
 0xa86   :  { %v5340_v48 = vrot.slane %v5339_v38, 2  ;;  %v5370_v23 = vmul.f32 %v11900_v8, %v5329_v20  ;;  %v5335_v45 = vrot.slane %v5334_v44, 1  ;;  %v5345_v5 = vrot.slane %v5344_v40, 4 }
 0xa87   :  { %12985 = vst [vmem:[#allocation6_spill] sm:$0xff] %v12020_v37  ;;  %v12025_v58 = vadd.f32 %v5392_v57, %v12987_v47  ;;  %v12990_v17 = vmax.f32 %v12989_v22, 0.0  ;;  %v12909_v10 = vmax.f32 %v12015_v4, 0.0  ;;  %v12993_v3 = vmax.f32 %v12992_v9, 0.0  ;;  %v5905_v22 = vld [vmem:[%s12086_s1 + $0x8] sm:$0xff] }
 0xa88   :  { %v5341_v41 = vadd.f32 %v5340_v48, %v5339_v38  ;;  %v5336_v43 = vadd.f32 %v5335_v45, %v5334_v44  ;;  %v5346_v18 = vadd.f32 %v5345_v5, %v5344_v40  ;;  %v5393_v16 = vadd.f32 %v11907_v7, %v5370_v23  ;;  %v12998_v40 = vld [vmem:[#allocation11_spill] sm:$0xff] }
 0xa89   :  { %12988 = vst [vmem:[#allocation7_spill] sm:$0xff] %v12025_v58  ;;  %v12908_v21 = vmax.f32 %v12020_v37, 0.0  ;;  %v12996_v38 = vmax.f32 %v12995_v39, 0.0  ;;  %v12907_v20 = vmax.f32 %v12025_v58, 0.0  ;;  %v12999_v48 = vmax.f32 %v12998_v40, 0.0  ;;  %v5912_v40 = vld [vmem:[%s12086_s1 + $0x40] sm:$0xff] }
 0xa8a   :  { %v5342_v63 = vrot.slane %v5341_v41, 1  ;;  %v5371_v6 = vmul.f32 %v11900_v8, %v5336_v43  ;;  %v5347_v35 = vrot.slane %v5346_v18, 2  ;;  %v12030_v11 = vadd.f32 %v5393_v16, %v12990_v17  ;;  %v9631_v58 = vld [vmem:[%s9878_s3 + $0x18] sm:$0xff] }
 0xa8b   :  { %v12042_v36 = vadd.f32 %v5389_v33, %v12996_v38  ;;  %v5503_v45 = vrot.slane %v12909_v10, 7  ;;  %v5910_v38 = vld [vmem:[%s12086_s1 + $0x30] sm:$0xff] }
 0xa8c   :  { %v5343_v53 = vadd.f32 %v5342_v63, %v5341_v41  ;;  %v5394_v59 = vadd.f32 %v11907_v7, %v5371_v6  ;;  %v5348_v25 = vadd.f32 %v5347_v35, %v5346_v18  ;;  %12991 = vst [vmem:[#allocation8_spill] sm:$0xff] %v12030_v11  ;;  %v12906_v23 = vmax.f32 %v12030_v11, 0.0  ;;  %v13001_v63 = vld [vmem:[#allocation12_spill] sm:$0xff] }
 0xa8d   :  { %12997 = vst [vmem:[#allocation10_spill] sm:$0xff] %v12042_v36  ;;  %v5505_v41 = vrot.slane %v12908_v21, 6  ;;  %v12910_v57 = vmax.f32 %v12042_v36, 0.0  ;;  %v5507_v18 = vrot.slane %v12907_v20, 5  ;;  %v13002_v62 = vmax.f32 %v13001_v63, 0.0  ;;  %v5917_v63 = vld [vmem:[%s12086_s1 + $0x68] sm:$0xff] }
 0xa8e   :  { %v5372_v0 = vmul.f32 %v11900_v8, %v5343_v53  ;;  %v5349_v49 = vrot.slane %v5348_v25, 1  ;;  %v12036_v42 = vadd.f32 %v5394_v59, %v12993_v3  ;;  %v5509_v16 = vrot.slane %v12906_v23, 4  ;;  %v5908_v3 = vld [vmem:[%s12086_s1 + $0x20] sm:$0xff] }
 0xa8f   :  { %v5504_v15 = vsel %vm2005_vm6, %v5503_v45, %v12910_v57  ;;  %v5913_v45 = vld [vmem:[%s12086_s1 + $0x48] sm:$0xff] }
 0xa90   :  { %12994 = vst [vmem:[#allocation9_spill] sm:$0xff] %v12036_v42  ;;  %v5395_v61 = vadd.f32 %v11907_v7, %v5372_v0  ;;  %v5350_v44 = vadd.f32 %v5349_v49, %v5348_v25  ;;  %v12905_v51 = vmax.f32 %v12036_v42, 0.0  ;;  %v5506_v35 = vsel %vm2008_vm7, %v5505_v41, %v5504_v15  ;;  %v5904_v25 = vld [vmem:[%s12086_s1] sm:$0xff]  ;;  %v5906_v0 = vld [vmem:[%s12086_s1 + $0x10] sm:$0xff]  ;;  %v5907_v49 = vld [vmem:[%s12086_s1 + $0x18] sm:$0xff] }
 0xa91   :  { %v5508_v55 = vsel %vm2011_vm8, %v5507_v18, %v5506_v35  ;;  %v9044_v17 = vpack.c.bf16 %v5905_v22, %v5904_v25  ;;  %v9048_v9 = vpack.c.bf16 %v5907_v49, %v5906_v0  ;;  %v5914_v41 = vld [vmem:[%s12086_s1 + $0x50] sm:$0xff] }
 0xa92   :  { %v12047_v27 = vadd.f32 %v5395_v61, %v12999_v48  ;;  %v5373_v5 = vmul.f32 %v11900_v8, %v5350_v44  ;;  %v5511_v6 = vrot.slane %v12905_v51, 3  ;;  %v5510_v53 = vsel %vm2014_vm9, %v5509_v16, %v5508_v55  ;;  %v5909_v61 = vld [vmem:[%s12086_s1 + $0x28] sm:$0xff]  ;;  %v5911_v44 = vld [vmem:[%s12086_s1 + $0x38] sm:$0xff]  ;;  %v5916_v16 = vld [vmem:[%s12086_s1 + $0x60] sm:$0xff] }
 0xa93   :  { %9045 = vmatprep.subr.bf16.mxu1 %v9044_v17  ;;  %v9052_v39 = vpack.c.bf16 %v5909_v61, %v5908_v3  ;;  %v9056_v48 = vpack.c.bf16 %v5911_v44, %v5910_v38  ;;  %v5918_v15 = vld [vmem:[%s12086_s1 + $0x70] sm:$0xff]  ;;  %v13004_v55 = vld [vmem:[#allocation3_spill] sm:$0xff] }
 0xa94   :  { %13000 = vst [vmem:[#allocation11_spill] sm:$0xff] %v12047_v27  ;;  %v12904_v29 = vmax.f32 %v12047_v27, 0.0  ;;  %v5396_v43 = vadd.f32 %v11907_v7, %v5373_v5  ;;  %v5512_v33 = vsel %vm2017_vm10, %v5511_v6, %v5510_v53  ;;  %9047 = vmatpush3.bf16.msra.mxu1 %v9044_v17  ;;  %v9060_v5 = vpack.c.bf16 %v5913_v45, %v5912_v40  ;;  %v5919_v6 = vld [vmem:[%s12086_s1 + $0x78] sm:$0xff] }
 0xa95   :  { %9049 = vmatprep.subr.bf16.mxu1 %v9048_v9  ;;  %v9072_v35 = vpack.c.bf16 %v5919_v6, %v5918_v15  ;;  %v13006_v22 = vld [vmem:[#allocation5_spill] sm:$0xff] }
 0xa96   :  { %v12065_v8 = vadd.f32 %v5396_v43, %v13002_v62  ;;  %v5513_v7 = vrot.slane %v12904_v29, 2  ;;  %v5915_v43 = vld [vmem:[%s12086_s1 + $0x58] sm:$0xff]  ;;  %v9068_v62 = vpack.c.bf16 %v5917_v63, %v5916_v16 }
 0xa97   :  { %v9064_v18 = vpack.c.bf16 %v5915_v43, %v5914_v41 }
 0xa98   :  { %13003 = vst [vmem:[#allocation12_spill] sm:$0xff] %v12065_v8  ;;  %v12903_v32 = vmax.f32 %v12065_v8, 0.0  ;;  %v5514_v47 = vsel %vm2020_vm11, %v5513_v7, %v5512_v33  ;;  %9051 = vmatpush3.bf16.msra.mxu1 %v9048_v9  ;;  %v5461_v7 = vld [vmem:[%s7674_s6] sm:$0x3] }
 0xa99   :  { %9053 = vmatprep.subr.bf16.mxu1 %v9052_v39  ;;  %v5470_v53 = vrot.slane %v5461_v7, %v13004_v55  ;;  %v5466_v17 = vrot.slane %v5461_v7, %v13006_v22 }
 0xa9a   :  { %v5515_v12 = vrot.slane %v12903_v32, 1 }
 0xa9c   :  { %v5516_v59 = vsel %vm2023_vm12, %v5515_v12, %v5514_v47  ;;  %9055 = vmatpush3.bf16.msra.mxu1 %v9052_v39 }
 0xa9d   :  { %5590 = vmatmul.mubr.f32.gmra.mrb[98].mxu0 %v5516_v59  ;;  %9057 = vmatprep.subr.bf16.mxu1 %v9056_v48  ;;  %v13005_v59 = vld [vmem:[#allocation4_spill] sm:$0xff] }
 0xaa0   :  { %9059 = vmatpush3.bf16.msra.mxu1 %v9056_v48 }
 0xaa1   :  { %9061 = vmatprep.subr.bf16.mxu1 %v9060_v5 }
 0xaa4   :  { %9063 = vmatpush3.bf16.msra.mxu1 %v9060_v5 }
 0xaa5   :  { %9065 = vmatprep.subr.bf16.mxu1 %v9064_v18 }
 0xaa8   :  { %9067 = vmatpush3.bf16.msra.mxu1 %v9064_v18 }
 0xaa9   :  { %9069 = vmatprep.subr.bf16.mxu1 %v9068_v62 }
 0xaac   :  { %9071 = vmatpush3.bf16.msra.mxu1 %v9068_v62 }
 0xaad   :  { %9073 = vmatprep.subr.bf16.mxu1 %v9072_v35 }
 0xab0   :  { %9075 = vmatpush3.bf16.msra.mxu1 %v9072_v35 }
 0xb51   :  { %v5585_v33 = vpop.f32.mrb[96].mxu0 }
 0xb52   :  { %v5587_v12 = vpop.f32.mrb[97].mxu0  ;;  %v12111_v49 = vadd.f32 %v5585_v33, %v5466_v17 }
 0xb53   :  { %v5588_v47 = vadd.f32 %v5587_v12, %v5470_v53 }
 0xb55   :  { %v5605_v25 = vrot.slane %v5588_v47, %v13005_v59  ;;  %v5598_v40 = vcombine.high %v5588_v47, %v5588_v47 }
 0xb57   :  { %v5621_v0 = vrot.slane %v5605_v25, %v13005_v59  ;;  %v5613_v38 = vcombine.high %v5605_v25, %v5605_v25  ;;  %v5612_v5 = vrot.slane %v5598_v40, %v13005_v59 }
 0xb59   :  { %v5699_v9 = vrot.slane %v5621_v0, %v13006_v22  ;;  %v5635_v44 = vrot.slane %v5613_v38, %v13005_v59  ;;  %v5643_v48 = vcombine.high %v5621_v0, %v5621_v0  ;;  %v5614_v15 = vcombine.high %v5612_v5, %v5612_v5 }
 0xb5a   :  { %v5628_v6 = vrot.slane %v5612_v5, %v13005_v59 }
 0xb5b   :  { %v5776_v3 = vadd.f32 %v5699_v9, %v12111_v49  ;;  %v5703_v45 = vrot.slane %v5635_v44, %v13006_v22  ;;  %v5645_v41 = vcombine.high %v5635_v44, %v5635_v44  ;;  %v5707_v16 = vrot.slane %v5643_v48, %v13006_v22 }
 0xb5c   :  { %v5642_v25 = vrot.slane %v5614_v15, %v13005_v59  ;;  %v5644_v44 = vcombine.high %v5628_v6, %v5628_v6 }
 0xb5d   :  { %vm5808_vm14 = vcmp.gt.f32.partialorder %v5776_v3, 0.0  ;;  %v5840_v61 = vmul.f32 0.2, %v5776_v3  ;;  %v5778_v18 = vadd.f32 %v5703_v45, %v12111_v49  ;;  %v5780_v33 = vadd.f32 %v5707_v16, %v12111_v49 }
 0xb5e   :  { %v5711_v12 = vrot.slane %v5645_v41, %v13006_v22  ;;  %v5719_v40 = vrot.slane %v5642_v25, %v13006_v22  ;;  %v5723_v15 = vrot.slane %v5644_v44, %v13006_v22 }
 0xb5f   :  { %v5872_v39 = vsel %vm5808_vm14, %v5776_v3, %v5840_v61  ;;  %v5842_v55 = vmul.f32 0.2, %v5778_v18  ;;  %vm5810_vm0 = vcmp.gt.f32.partialorder %v5778_v18, 0.0  ;;  %v5715_v61 = vrot.slane %v5628_v6, %v13006_v22 }
 0xb60   :  { %8637 = vmatprep.mubr.f32.mxu1 %v5872_v39  ;;  %v5844_v39 = vmul.f32 0.2, %v5780_v33  ;;  %v5782_v38 = vadd.f32 %v5711_v12, %v12111_v49  ;;  %vm5812_vm3 = vcmp.gt.f32.partialorder %v5780_v33, 0.0 }
 0xb61   :  { %v5784_v41 = vadd.f32 %v5715_v61, %v12111_v49 }
 0xb62   :  { %vm5814_vm13 = vcmp.gt.f32.partialorder %v5782_v38, 0.0 }
 0xb70   :  { %v5591_v43 = vpop.f32.mrb[98].mxu0 }
 0xb71   :  { %v12120_v63 = vadd.f32 %v5591_v43, %v5466_v17  ;;  %v5593_v62 = vpop.f32.mrb[99].mxu0 }
 0xb72   :  { %v5594_v43 = vadd.f32 %v5593_v62, %v5470_v53  ;;  %v5848_v53 = vmul.f32 0.2, %v5784_v41  ;;  %v5788_v62 = vadd.f32 %v5723_v15, %v12111_v49 }
 0xb73   :  { %v5777_v35 = vadd.f32 %v5699_v9, %v12120_v63  ;;  %v5779_v7 = vadd.f32 %v5703_v45, %v12120_v63  ;;  %v5781_v3 = vadd.f32 %v5707_v16, %v12120_v63  ;;  %v5874_v9 = vsel %vm5810_vm0, %v5778_v18, %v5842_v55 }
 0xb74   :  { %v5783_v5 = vadd.f32 %v5711_v12, %v12120_v63  ;;  %v5876_v16 = vsel %vm5812_vm3, %v5780_v33, %v5844_v39  ;;  %v5846_v18 = vmul.f32 0.2, %v5782_v38  ;;  %v5654_v12 = vrot.slane %v5594_v43, %v13005_v59 }
 0xb75   :  { %vm5809_vm15 = vcmp.gt.f32.partialorder %v5777_v35, 0.0  ;;  %v5841_v47 = vmul.f32 0.2, %v5777_v35  ;;  %v5843_v0 = vmul.f32 0.2, %v5779_v7  ;;  %vm5811_vm1 = vcmp.gt.f32.partialorder %v5779_v7, 0.0 }
 0xb76   :  { %v5845_v45 = vmul.f32 0.2, %v5781_v3  ;;  %vm5813_vm4 = vcmp.gt.f32.partialorder %v5781_v3, 0.0  ;;  %v5847_v6 = vmul.f32 0.2, %v5783_v5  ;;  %vm5815_vm14 = vcmp.gt.f32.partialorder %v5783_v5, 0.0 }
 0xb77   :  { %v5873_v17 = vsel %vm5809_vm15, %v5777_v35, %v5841_v47  ;;  %v5875_v48 = vsel %vm5811_vm1, %v5779_v7, %v5843_v0  ;;  %v5646_v35 = vcombine.high %v5642_v25, %v5642_v25  ;;  %v5785_v47 = vadd.f32 %v5715_v61, %v12120_v63 }
 0xb78   :  { %8638 = vmatmul.mubr.f32.vlgmr.msra.gmra.mrb[110].mxu1 %v5873_v17  ;;  %v5877_v55 = vsel %vm5813_vm4, %v5781_v3, %v5845_v45  ;;  %v5786_v7 = vadd.f32 %v5719_v40, %v12111_v49  ;;  %v5878_v17 = vsel %vm5814_vm13, %v5782_v38, %v5846_v18  ;;  %vm5816_vm15 = vcmp.gt.f32.partialorder %v5784_v41, 0.0 }
 0xb79   :  { %8640 = vmatprep.mubr.f32.mxu1 %v5874_v9  ;;  %v5727_v33 = vrot.slane %v5646_v35, %v13006_v22  ;;  %v5879_v0 = vsel %vm5815_vm14, %v5783_v5, %v5847_v6  ;;  %v5849_v25 = vmul.f32 0.2, %v5785_v47  ;;  %v5787_v9 = vadd.f32 %v5719_v40, %v12120_v63 }
 0xb7a   :  { %v5850_v3 = vmul.f32 0.2, %v5786_v7  ;;  %v5662_v61 = vcombine.high %v5654_v12, %v5654_v12  ;;  %v5670_v39 = vrot.slane %v5654_v12, %v13005_v59  ;;  %v5880_v44 = vsel %vm5816_vm15, %v5784_v41, %v5848_v53 }
 0xb7b   :  { %vm5817_vm0 = vcmp.gt.f32.partialorder %v5785_v47, 0.0  ;;  %vm5818_vm1 = vcmp.gt.f32.partialorder %v5786_v7, 0.0  ;;  %v5852_v38 = vmul.f32 0.2, %v5788_v62  ;;  %vm5820_vm3 = vcmp.gt.f32.partialorder %v5788_v62, 0.0 }
 0xb7c   :  { %8641 = vmatmul.mubr.f32.gmra.mrb[112].mxu1 %v5875_v48  ;;  %v5790_v48 = vadd.f32 %v5727_v33, %v12111_v49  ;;  %v5881_v45 = vsel %vm5817_vm0, %v5785_v47, %v5849_v25  ;;  %v5789_v5 = vadd.f32 %v5723_v15, %v12120_v63  ;;  %v5684_v18 = vrot.slane %v5662_v61, %v13005_v59 }
 0xb7d   :  { %8643 = vmatprep.mubr.f32.mxu1 %v5876_v16  ;;  %v5851_v16 = vmul.f32 0.2, %v5787_v9  ;;  %v5731_v40 = vrot.slane %v5670_v39, %v13006_v22  ;;  %v5882_v35 = vsel %vm5818_vm1, %v5786_v7, %v5850_v3  ;;  %vm5819_vm4 = vcmp.gt.f32.partialorder %v5787_v9, 0.0 }
 0xb7e   :  { %v5647_v41 = vcombine.high %v5594_v43, %v5594_v43  ;;  %v5854_v6 = vmul.f32 0.2, %v5790_v48  ;;  %vm5822_vm13 = vcmp.gt.f32.partialorder %v5790_v48, 0.0  ;;  %v5791_v47 = vadd.f32 %v5727_v33, %v12120_v63 }
 0xb7f   :  { %v5883_v12 = vsel %vm5819_vm4, %v5787_v9, %v5851_v16  ;;  %v5692_v53 = vcombine.high %v5670_v39, %v5670_v39  ;;  %vm5821_vm14 = vcmp.gt.f32.partialorder %v5789_v5, 0.0  ;;  %v5792_v15 = vadd.f32 %v5731_v40, %v12111_v49 }
 0xb80   :  { %8644 = vmatmul.mubr.f32.gmra.mrb[114].mxu1 %v5877_v55  ;;  %v5884_v55 = vsel %vm5820_vm3, %v5788_v62, %v5852_v38  ;;  %v5661_v7 = vrot.slane %v5647_v41, %v13005_v59  ;;  %v5886_v25 = vsel %vm5822_vm13, %v5790_v48, %v5854_v6  ;;  %v5694_v3 = vcombine.high %v5684_v18, %v5684_v18 }
 0xb81   :  { %8646 = vmatprep.mubr.f32.mxu1 %v5878_v17  ;;  %v5853_v17 = vmul.f32 0.2, %v5789_v5  ;;  %v5855_v62 = vmul.f32 0.2, %v5791_v47  ;;  %v5793_v9 = vadd.f32 %v5731_v40, %v12120_v63  ;;  %vm5823_vm15 = vcmp.gt.f32.partialorder %v5791_v47, 0.0 }
 0xb82   :  { %v5856_v61 = vmul.f32 0.2, %v5792_v15  ;;  %v5739_v39 = vrot.slane %v5692_v53, %v13006_v22  ;;  %vm5824_vm0 = vcmp.gt.f32.partialorder %v5792_v15, 0.0  ;;  %v5677_v38 = vrot.slane %v5661_v7, %v13005_v59 }
 0xb83   :  { %v5885_v43 = vsel %vm5821_vm14, %v5789_v5, %v5853_v17  ;;  %v5857_v16 = vmul.f32 0.2, %v5793_v9  ;;  %v5743_v5 = vrot.slane %v5694_v3, %v13006_v22  ;;  %vm5825_vm1 = vcmp.gt.f32.partialorder %v5793_v9, 0.0 }
 0xb84   :  { %8647 = vmatmul.mubr.f32.gmra.mrb[116].mxu1 %v5879_v0  ;;  %v5735_v0 = vrot.slane %v5684_v18, %v13006_v22  ;;  %v5888_v18 = vsel %vm5824_vm0, %v5792_v15, %v5856_v61  ;;  %v5747_v15 = vrot.slane %v5677_v38, %v13006_v22 }
 0xb85   :  { %8649 = vmatprep.mubr.f32.mxu1 %v5880_v44  ;;  %v5663_v44 = vcombine.high %v5661_v7, %v5661_v7  ;;  %v5798_v17 = vadd.f32 %v5743_v5, %v12111_v49  ;;  %v5799_v7 = vadd.f32 %v5743_v5, %v12120_v63 }
 0xb86   :  { %v5794_v33 = vadd.f32 %v5735_v0, %v12111_v49  ;;  %v5795_v48 = vadd.f32 %v5735_v0, %v12120_v63  ;;  %v5693_v0 = vcombine.high %v5677_v38, %v5677_v38 }
 0xb87   :  { %v5691_v41 = vrot.slane %v5663_v44, %v13005_v59  ;;  %v5862_v3 = vmul.f32 0.2, %v5798_v17  ;;  %vm5831_vm0 = vcmp.gt.f32.partialorder %v5799_v7, 0.0  ;;  %v5801_v44 = vadd.f32 %v5747_v15, %v12120_v63 }
 0xb88   :  { %8650 = vmatmul.mubr.f32.gmra.mrb[118].mxu1 %v5881_v45  ;;  %v5887_v45 = vsel %vm5823_vm15, %v5791_v47, %v5855_v62  ;;  %v5858_v40 = vmul.f32 0.2, %v5794_v33  ;;  %vm5826_vm3 = vcmp.gt.f32.partialorder %v5794_v33, 0.0  ;;  %v5859_v6 = vmul.f32 0.2, %v5795_v48 }
 0xb89   :  { %8652 = vmatprep.mubr.f32.mxu1 %v5882_v35  ;;  %v5796_v35 = vadd.f32 %v5739_v39, %v12111_v49  ;;  %vm5827_vm4 = vcmp.gt.f32.partialorder %v5795_v48, 0.0  ;;  %vm5830_vm15 = vcmp.gt.f32.partialorder %v5798_v17, 0.0  ;;  %v5800_v62 = vadd.f32 %v5747_v15, %v12111_v49 }
 0xb8a   :  { %v5890_v47 = vsel %vm5826_vm3, %v5794_v33, %v5858_v40  ;;  %v5894_v33 = vsel %vm5830_vm15, %v5798_v17, %v5862_v3  ;;  %vm5833_vm3 = vcmp.gt.f32.partialorder %v5801_v44, 0.0 }
 0xb8b   :  { %v5860_v53 = vmul.f32 0.2, %v5796_v35  ;;  %vm5828_vm13 = vcmp.gt.f32.partialorder %v5796_v35, 0.0  ;;  %v5864_v38 = vmul.f32 0.2, %v5800_v62 }
 0xb8c   :  { %8653 = vmatmul.mubr.f32.gmra.mrb[120].mxu1 %v5883_v12  ;;  %v5797_v12 = vadd.f32 %v5739_v39, %v12120_v63  ;;  %v5863_v39 = vmul.f32 0.2, %v5799_v7 }
 0xb8d   :  { %8655 = vmatprep.mubr.f32.mxu1 %v5884_v55  ;;  %v5889_v55 = vsel %vm5825_vm1, %v5793_v9, %v5857_v16  ;;  %v5751_v9 = vrot.slane %v5691_v41, %v13006_v22  ;;  %v5755_v16 = vrot.slane %v5693_v0, %v13006_v22  ;;  %vm5832_vm1 = vcmp.gt.f32.partialorder %v5800_v62, 0.0 }
 0xb8e   :  { %vm5829_vm14 = vcmp.gt.f32.partialorder %v5797_v12, 0.0  ;;  %v5861_v59 = vmul.f32 0.2, %v5797_v12  ;;  %v5895_v5 = vsel %vm5831_vm0, %v5799_v7, %v5863_v39 }
 0xb8f   :  { %v5803_v40 = vadd.f32 %v5751_v9, %v12120_v63 }
 0xb90   :  { %8656 = vmatmul.mubr.f32.gmra.mrb[122].mxu1 %v5885_v43  ;;  %v5892_v43 = vsel %vm5828_vm13, %v5796_v35, %v5860_v53  ;;  %v5893_v61 = vsel %vm5829_vm14, %v5797_v12, %v5861_v59  ;;  %v5896_v35 = vsel %vm5832_vm1, %v5800_v62, %v5864_v38 }
 0xb91   :  { %8658 = vmatprep.mubr.f32.mxu1 %v5886_v25  ;;  %v5891_v25 = vsel %vm5827_vm4, %v5795_v48, %v5859_v6  ;;  %v5695_v48 = vcombine.high %v5691_v41, %v5691_v41  ;;  %v5804_v6 = vadd.f32 %v5755_v16, %v12111_v49  ;;  %v5805_v41 = vadd.f32 %v5755_v16, %v12120_v63 }
 0xb92   :  { %vm5835_vm13 = vcmp.gt.f32.partialorder %v5803_v40, 0.0 }
 0xb93   :  { %v5759_v12 = vrot.slane %v5695_v48, %v13006_v22  ;;  %v5868_v15 = vmul.f32 0.2, %v5804_v6  ;;  %vm5836_vm14 = vcmp.gt.f32.partialorder %v5804_v6, 0.0  ;;  %vm5837_vm15 = vcmp.gt.f32.partialorder %v5805_v41, 0.0 }
 0xb94   :  { %8659 = vmatmul.mubr.f32.gmra.mrb[124].mxu1 %v5887_v45  ;;  %v5802_v45 = vadd.f32 %v5751_v9, %v12111_v49 }
 0xb95   :  { %8661 = vmatprep.mubr.f32.mxu1 %v5888_v18  ;;  %v5865_v18 = vmul.f32 0.2, %v5801_v44  ;;  %v5806_v0 = vadd.f32 %v5759_v12, %v12111_v49  ;;  %v5807_v59 = vadd.f32 %v5759_v12, %v12120_v63  ;;  %v5900_v22 = vsel %vm5836_vm14, %v5804_v6, %v5868_v15 }
 0xb96   :  { %vm5834_vm4 = vcmp.gt.f32.partialorder %v5802_v45, 0.0 }
 0xb97   :  { %v5897_v17 = vsel %vm5833_vm3, %v5801_v44, %v5865_v18  ;;  %v5870_v3 = vmul.f32 0.2, %v5806_v0  ;;  %vm5838_vm0 = vcmp.gt.f32.partialorder %v5806_v0, 0.0  ;;  %v5871_v62 = vmul.f32 0.2, %v5807_v59 }
 0xb98   :  { %8662 = vmatmul.mubr.f32.gmra.mrb[126].mxu1 %v5889_v55  ;;  %v5866_v55 = vmul.f32 0.2, %v5802_v45  ;;  %vm5839_vm1 = vcmp.gt.f32.partialorder %v5807_v59, 0.0  ;;  %vm9685_vm3 = vmmov 0  }
 0xb99   :  { %8664 = vmatprep.mubr.f32.mxu1 %v5890_v47  ;;  %v5867_v47 = vmul.f32 0.2, %v5803_v40  ;;  %v5902_v9 = vsel %vm5838_vm0, %v5806_v0, %v5870_v3 }
 0xb9a   :  { %v5898_v53 = vsel %vm5834_vm4, %v5802_v45, %v5866_v55 }
 0xb9b   :  { %v5899_v7 = vsel %vm5835_vm13, %v5803_v40, %v5867_v47 }
 0xb9c   :  { %8665 = vmatmul.mubr.f32.gmra.mrb[128].mxu1 %v5891_v25  ;;  %v5869_v25 = vmul.f32 0.2, %v5805_v41 }
 0xb9d   :  { %8667 = vmatprep.mubr.f32.mxu1 %v5892_v43 }
 0xb9e   :  { %v5901_v43 = vsel %vm5837_vm15, %v5805_v41, %v5869_v25 }
 0xba0   :  { %8668 = vmatmul.mubr.f32.gmra.mrb[130].mxu1 %v5893_v61  ;;  %v5903_v61 = vsel %vm5839_vm1, %v5807_v59, %v5871_v62 }
 0xba1   :  { %8670 = vmatprep.mubr.f32.mxu1 %v5894_v33 }
 0xba4   :  { %8671 = vmatmul.mubr.f32.gmra.mrb[132].mxu1 %v5895_v5 }
 0xba5   :  { %8673 = vmatprep.mubr.f32.mxu1 %v5896_v35 }
 0xba8   :  { %8674 = vmatmul.mubr.f32.gmra.mrb[134].mxu1 %v5897_v17 }
 0xba9   :  { %8676 = vmatprep.mubr.f32.mxu1 %v5898_v53 }
 0xbac   :  { %8677 = vmatmul.mubr.f32.gmra.mrb[136].mxu1 %v5899_v7 }
 0xbad   :  { %8679 = vmatprep.mubr.f32.mxu1 %v5900_v22 }
 0xbb0   :  { %8680 = vmatmul.mubr.f32.gmra.mrb[138].mxu1 %v5901_v43 }
 0xbb1   :  { %8682 = vmatprep.mubr.f32.mxu1 %v5902_v9 }
 0xbb4   :  { %8683 = vmatmul.mubr.f32.gmra.mrb[140].mxu1 %v5903_v61 }
 0xbb5   :  { %8779 = vmatprep.mubr.msk.f32.mxu1 %vm9685_vm3, %v12937_v24 }
 0xc4b   :  { %v8639_v33 = vpop.f32.mrb[110].mxu1 }
 0xc4c   :  { %v6146_v39 = vsel %vm936_vm5, %v8639_v33, -inf  ;;  %v5986_v44 = vpop.f32.mrb[111].mxu1 }
 0xc4d   :  { %v6145_v38 = vsel %vm936_vm5, %v5986_v44, -inf }
 0xc4e   :  { %v6147_v45 = vmax.f32 %v6145_v38, %v6146_v39 }
 0xc4f   :  { %v8642_v16 = vpop.f32.mrb[112].mxu1 }
 0xc50   :  { %v6148_v48 = vrot.slane %v6147_v45, 4  ;;  %v6155_v5 = vsel %vm936_vm5, %v8642_v16, -inf  ;;  %v5996_v18 = vpop.f32.mrb[113].mxu1 }
 0xc51   :  { %v6154_v40 = vsel %vm936_vm5, %v5996_v18, -inf }
 0xc52   :  { %v6149_v35 = vmax.f32 %v6147_v45, %v6148_v48  ;;  %v6156_v55 = vmax.f32 %v6154_v40, %v6155_v5 }
 0xc53   :  { %v8645_v6 = vpop.f32.mrb[114].mxu1 }
 0xc54   :  { %v6150_v12 = vrot.slane %v6149_v35, 2  ;;  %v6157_v17 = vrot.slane %v6156_v55, 4  ;;  %v6164_v47 = vsel %vm936_vm5, %v8645_v6, -inf  ;;  %v6006_v41 = vpop.f32.mrb[115].mxu1 }
 0xc55   :  { %v6163_v53 = vsel %vm936_vm5, %v6006_v41, -inf }
 0xc56   :  { %v6151_v15 = vmax.f32 %v6149_v35, %v6150_v12  ;;  %v6158_v0 = vmax.f32 %v6156_v55, %v6157_v17  ;;  %v6165_v7 = vmax.f32 %v6163_v53, %v6164_v47 }
 0xc57   :  { %v12179_v25 = vpop.f32.mrb[116].mxu1 }
 0xc58   :  { %v6152_v59 = vrot.slane %v6151_v15, 1  ;;  %v6159_v22 = vrot.slane %v6158_v0, 2  ;;  %v6166_v3 = vrot.slane %v6165_v7, 4  ;;  %v6173_v43 = vsel %vm936_vm5, %v12179_v25, -inf  ;;  %v12183_v62 = vpop.f32.mrb[117].mxu1 }
 0xc59   :  { %v6172_v9 = vsel %vm936_vm5, %v12183_v62, -inf }
 0xc5a   :  { %v6153_v61 = vmax.f32 %v6151_v15, %v6152_v59  ;;  %v6160_v39 = vmax.f32 %v6158_v0, %v6159_v22  ;;  %v6167_v38 = vmax.f32 %v6165_v7, %v6166_v3  ;;  %v6174_v45 = vmax.f32 %v6172_v9, %v6173_v43 }
 0xc5b   :  { %v12187_v48 = vpop.f32.mrb[118].mxu1 }
 0xc5c   :  { %v6289_v5 = vsub.f32 %v5986_v44, %v6153_v61  ;;  %v6290_v40 = vsub.f32 %v8639_v33, %v6153_v61  ;;  %v6161_v35 = vrot.slane %v6160_v39, 1  ;;  %v6168_v55 = vrot.slane %v6167_v38, 2  ;;  %v12189_v12 = vpop.f32.mrb[119].mxu1 }
 0xc5d   :  { %v6175_v17 = vrot.slane %v6174_v45, 4  ;;  %v6182_v47 = vsel %vm936_vm5, %v12187_v48, -inf  ;;  %v6181_v53 = vsel %vm936_vm5, %v12189_v12, -inf }
 0xc5e   :  { %v6321_v32 = vmul.f32 1.442695, %v6289_v5  ;;  %v6162_v15 = vmax.f32 %v6160_v39, %v6161_v35  ;;  %v6169_v0 = vmax.f32 %v6167_v38, %v6168_v55  ;;  %v6323_v7 = vmul.f32 1.442695, %v6290_v40 }
 0xc5f   :  { %v6176_v59 = vmax.f32 %v6174_v45, %v6175_v17  ;;  %v6183_v22 = vmax.f32 %v6181_v53, %v6182_v47  ;;  %v12195_v3 = vpop.f32.mrb[120].mxu1 }
 0xc60   :  { %9465 = vpow2.f32 %v6321_v32  ;;  %v6291_v33 = vsub.f32 %v5996_v18, %v6162_v15  ;;  %v6292_v44 = vsub.f32 %v8642_v16, %v6162_v15  ;;  %v6170_v43 = vrot.slane %v6169_v0, 1  ;;  %v12197_v9 = vpop.f32.mrb[121].mxu1 }
 0xc61   :  { %v6177_v61 = vrot.slane %v6176_v59, 2  ;;  %v6184_v29 = vrot.slane %v6183_v22, 4  ;;  %v6191_v51 = vsel %vm936_vm5, %v12195_v3, -inf  ;;  %v6190_v39 = vsel %vm936_vm5, %v12197_v9, -inf }
 0xc62   :  { %v6325_v23 = vmul.f32 1.442695, %v6291_v33  ;;  %v6171_v5 = vmax.f32 %v6169_v0, %v6170_v43  ;;  %9467 = vpow2.f32 %v6323_v7  ;;  %v6192_v40 = vmax.f32 %v6190_v39, %v6191_v51 }
 0xc63   :  { %v6178_v38 = vmax.f32 %v6176_v59, %v6177_v61  ;;  %v6185_v45 = vmax.f32 %v6183_v22, %v6184_v29  ;;  %v12203_v32 = vpop.f32.mrb[122].mxu1  ;;  %v6327_v16 = vmul.f32 1.442695, %v6292_v44 }
 0xc64   :  { %v6293_v18 = vsub.f32 %v6006_v41, %v6171_v5  ;;  %v6294_v35 = vsub.f32 %v8645_v6, %v6171_v5  ;;  %v6200_v55 = vsel %vm936_vm5, %v12203_v32, -inf  ;;  %v12207_v17 = vpop.f32.mrb[123].mxu1  ;;  %v6193_v15 = vrot.slane %v6192_v40, 4 }
 0xc65   :  { %v6179_v47 = vrot.slane %v6178_v38, 1  ;;  %v6186_v53 = vrot.slane %v6185_v45, 2  ;;  %9469 = vpow2.f32 %v6325_v23  ;;  %v6199_v29 = vsel %vm936_vm5, %v12207_v17, -inf }
 0xc66   :  { %v6329_v0 = vmul.f32 1.442695, %v6293_v18  ;;  %v6331_v33 = vmul.f32 1.442695, %v6294_v35  ;;  %v6194_v59 = vmax.f32 %v6192_v40, %v6193_v15  ;;  %v6201_v22 = vmax.f32 %v6199_v29, %v6200_v55  ;;  %v9628_v15 = vld [vmem:[%s9878_s3] sm:$0xff] }
 0xc67   :  { %v6180_v51 = vmax.f32 %v6178_v38, %v6179_v47  ;;  %v6187_v7 = vmax.f32 %v6185_v45, %v6186_v53  ;;  %v12211_v41 = vpop.f32.mrb[124].mxu1  ;;  %9471 = vpow2.f32 %v6327_v16 }
 0xc68   :  { %v6209_v6 = vsel %vm936_vm5, %v12211_v41, -inf  ;;  %v12215_v44 = vpop.f32.mrb[125].mxu1  ;;  %9473 = vpow2.f32 %v6329_v0  ;;  %v6195_v39 = vrot.slane %v6194_v59, 2  ;;  %v6202_v38 = vrot.slane %v6201_v22, 4 }
 0xc69   :  { %v6295_v23 = vsub.f32 %v12183_v62, %v6180_v51  ;;  %v6296_v43 = vsub.f32 %v12179_v25, %v6180_v51  ;;  %v6188_v61 = vrot.slane %v6187_v7, 1  ;;  %9475 = vpow2.f32 %v6331_v33 }
 0xc6a   :  { %v9466_v5 = vpop.eup %9465  ;;  %v6208_v45 = vsel %vm936_vm5, %v12215_v44, -inf  ;;  %v6196_v47 = vmax.f32 %v6194_v59, %v6195_v39  ;;  %v6203_v53 = vmax.f32 %v6201_v22, %v6202_v38 }
 0xc6b   :  { %v6333_v40 = vmul.f32 1.442695, %v6295_v23  ;;  %v6335_v16 = vmul.f32 1.442695, %v6296_v43  ;;  %v6189_v18 = vmax.f32 %v6187_v7, %v6188_v61  ;;  %v6210_v35 = vmax.f32 %v6208_v45, %v6209_v6  ;;  %v12221_v55 = vpop.f32.mrb[126].mxu1 }
 0xc6c   :  { %v6218_v25 = vsel %vm936_vm5, %v12221_v55, -inf  ;;  %v12225_v62 = vpop.f32.mrb[127].mxu1  ;;  %v12228_v0 = vmul.f32 %v9628_v15, %v9466_v5  ;;  %v9468_v33 = vpop.eup %9467  ;;  %v6197_v6 = vrot.slane %v6196_v47, 1  ;;  %v6204_v59 = vrot.slane %v6203_v53, 2 }
 0xc6d   :  { %9477 = vpow2.f32 %v6333_v40  ;;  %v6297_v29 = vsub.f32 %v12189_v12, %v6189_v18  ;;  %v6298_v51 = vsub.f32 %v12187_v48, %v6189_v18  ;;  %v6211_v7 = vrot.slane %v6210_v35, 4 }
 0xc6e   :  { %9479 = vpow2.f32 %v6335_v16  ;;  %v6217_v22 = vsel %vm936_vm5, %v12225_v62, -inf  ;;  %v6198_v45 = vmax.f32 %v6196_v47, %v6197_v6  ;;  %v6205_v12 = vmax.f32 %v6203_v53, %v6204_v59  ;;  %v9629_v16 = vld [vmem:[%s9878_s3 + $0x8] sm:$0xff] }
 0xc6f   :  { %v6337_v23 = vmul.f32 1.442695, %v6297_v29  ;;  %v6339_v43 = vmul.f32 1.442695, %v6298_v51  ;;  %v6212_v61 = vmax.f32 %v6210_v35, %v6211_v7  ;;  %v6219_v39 = vmax.f32 %v6217_v22, %v6218_v25  ;;  %v12234_v5 = vpop.f32.mrb[128].mxu1  ;;  %v12236_v38 = vpop.eup %9469 }
 0xc70   :  { %v6227_v48 = vsel %vm936_vm5, %v12234_v5, -inf  ;;  %v12240_v40 = vpop.f32.mrb[129].mxu1  ;;  %v12243_v18 = vmul.f32 %v9629_v16, %v9468_v33  ;;  %v6299_v47 = vsub.f32 %v12197_v9, %v6198_v45  ;;  %v6300_v53 = vsub.f32 %v12195_v3, %v6198_v45 }
 0xc71   :  { %9481 = vpow2.f32 %v6337_v23  ;;  %v6213_v15 = vrot.slane %v6212_v61, 2  ;;  %v6220_v29 = vrot.slane %v6219_v39, 4  ;;  %v6226_v35 = vsel %vm936_vm5, %v12240_v40, -inf  ;;  %v12247_v25 = vpop.eup %9471 }
 0xc72   :  { %9483 = vpow2.f32 %v6339_v43  ;;  %v6206_v51 = vrot.slane %v6205_v12, 1  ;;  %v12251_v7 = vpop.eup %9473  ;;  %v6228_v33 = vmax.f32 %v6226_v35, %v6227_v48  ;;  %v6417_v23 = vsel %vm936_vm5, %v12228_v0, 0.0 }
 0xc73   :  { %v6214_v6 = vmax.f32 %v6212_v61, %v6213_v15  ;;  %v6221_v59 = vmax.f32 %v6219_v39, %v6220_v29  ;;  %v12253_v22 = vpop.f32.mrb[130].mxu1  ;;  %v12257_v16 = vpop.eup %9475  ;;  %v6341_v20 = vmul.f32 1.442695, %v6299_v47  ;;  %v6343_v21 = vmul.f32 1.442695, %v6300_v53 }
 0xc74   :  { %v6207_v43 = vmax.f32 %v6205_v12, %v6206_v51  ;;  %v6236_v9 = vsel %vm936_vm5, %v12253_v22, -inf  ;;  %v12261_v3 = vpop.f32.mrb[131].mxu1  ;;  %v6229_v61 = vrot.slane %v6228_v33, 4 }
 0xc75   :  { %v6215_v45 = vrot.slane %v6214_v6, 1  ;;  %v6222_v10 = vrot.slane %v6221_v59, 2  ;;  %v6235_v39 = vsel %vm936_vm5, %v12261_v3, -inf  ;;  %9485 = vpow2.f32 %v6341_v20 }
 0xc76   :  { %v6301_v48 = vsub.f32 %v12207_v17, %v6207_v43  ;;  %v6302_v15 = vsub.f32 %v12203_v32, %v6207_v43  ;;  %v6237_v29 = vmax.f32 %v6235_v39, %v6236_v9  ;;  %9487 = vpow2.f32 %v6343_v21 }
 0xc77   :  { %v12267_v35 = vpop.eup %9477  ;;  %v6216_v12 = vmax.f32 %v6214_v6, %v6215_v45  ;;  %v6223_v47 = vmax.f32 %v6221_v59, %v6222_v10  ;;  %v6230_v53 = vmax.f32 %v6228_v33, %v6229_v61  ;;  %v12269_v51 = vpop.f32.mrb[132].mxu1  ;;  %v6418_v59 = vsel %vm936_vm5, %v12243_v18, 0.0 }
 0xc78   :  { %v12271_v57 = vpop.eup %9479  ;;  %v6345_v1 = vmul.f32 1.442695, %v6301_v48  ;;  %v6347_v50 = vmul.f32 1.442695, %v6302_v15  ;;  %v6238_v60 = vrot.slane %v6237_v29, 4  ;;  %v6245_v20 = vsel %vm936_vm5, %v12269_v51, -inf }
 0xc79   :  { %v6303_v17 = vsub.f32 %v12215_v44, %v6216_v12  ;;  %v6304_v32 = vsub.f32 %v12211_v41, %v6216_v12  ;;  %v6224_v43 = vrot.slane %v6223_v47, 1  ;;  %v6231_v9 = vrot.slane %v6230_v53, 2  ;;  %v12277_v21 = vpop.f32.mrb[133].mxu1 }
 0xc7a   :  { %9489 = vpow2.f32 %v6345_v1  ;;  %v6239_v10 = vmax.f32 %v6237_v29, %v6238_v60  ;;  %v6244_v6 = vsel %vm936_vm5, %v12277_v21, -inf  ;;  %v6419_v52 = vadd.f32 %v6418_v59, %v6417_v23 }
 0xc7b   :  { %v12283_v33 = vpop.eup %9481  ;;  %9491 = vpow2.f32 %v6347_v50  ;;  %v6349_v45 = vmul.f32 1.442695, %v6303_v17  ;;  %v6351_v61 = vmul.f32 1.442695, %v6304_v32  ;;  %v6225_v44 = vmax.f32 %v6223_v47, %v6224_v43  ;;  %v12285_v39 = vpop.f32.mrb[134].mxu1 }
 0xc7c   :  { %v12287_v41 = vpop.eup %9483  ;;  %v6232_v48 = vmax.f32 %v6230_v53, %v6231_v9  ;;  %v6240_v15 = vrot.slane %v6239_v10, 2  ;;  %v6246_v1 = vmax.f32 %v6244_v6, %v6245_v20  ;;  %v6254_v60 = vsel %vm936_vm5, %v12285_v39, -inf  ;;  %v12291_v29 = vpop.f32.mrb[135].mxu1 }
 0xc7d   :  { %9493 = vpow2.f32 %v6349_v45  ;;  %v6305_v12 = vsub.f32 %v12225_v62, %v6225_v44  ;;  %v6306_v50 = vsub.f32 %v12221_v55, %v6225_v44  ;;  %v6253_v47 = vsel %vm936_vm5, %v12291_v29, -inf }
 0xc7e   :  { %9495 = vpow2.f32 %v6351_v61  ;;  %v6233_v17 = vrot.slane %v6232_v48, 1  ;;  %v6241_v32 = vmax.f32 %v6239_v10, %v6240_v15  ;;  %v6247_v43 = vrot.slane %v6246_v1, 4 }
 0xc7f   :  { %v6353_v53 = vmul.f32 1.442695, %v6305_v12  ;;  %v6355_v9 = vmul.f32 1.442695, %v6306_v50  ;;  %v6255_v20 = vmax.f32 %v6253_v47, %v6254_v60  ;;  %v12297_v6 = vpop.f32.mrb[136].mxu1  ;;  %v12299_v46 = vpop.eup %9485  ;;  %v6420_v60 = vrot.slane %v6419_v52, 4 }
 0xc80   :  { %v6234_v45 = vmax.f32 %v6232_v48, %v6233_v17  ;;  %v6242_v19 = vrot.slane %v6241_v32, 1  ;;  %v6248_v62 = vmax.f32 %v6246_v1, %v6247_v43  ;;  %v6263_v55 = vsel %vm936_vm5, %v12297_v6, -inf  ;;  %v12303_v44 = vpop.f32.mrb[137].mxu1  ;;  %v12305_v61 = vpop.eup %9487 }
 0xc81   :  { %9497 = vpow2.f32 %v6353_v53  ;;  %v6256_v10 = vrot.slane %v6255_v20, 4  ;;  %v6262_v15 = vsel %vm936_vm5, %v12303_v44, -inf  ;;  %v6421_v17 = vadd.f32 %v6420_v60, %v6419_v52 }
 0xc82   :  { %9499 = vpow2.f32 %v6355_v9  ;;  %v6307_v23 = vsub.f32 %v12240_v40, %v6234_v45  ;;  %v6308_v59 = vsub.f32 %v12234_v5, %v6234_v45  ;;  %v6243_v48 = vmax.f32 %v6241_v32, %v6242_v19 }
 0xc83   :  { %v6249_v1 = vrot.slane %v6248_v62, 2  ;;  %v6257_v12 = vmax.f32 %v6255_v20, %v6256_v10  ;;  %v6264_v50 = vmax.f32 %v6262_v15, %v6263_v55  ;;  %v12311_v47 = vpop.f32.mrb[138].mxu1 }
 0xc84   :  { %v12313_v43 = vpop.eup %9489  ;;  %v6357_v53 = vmul.f32 1.442695, %v6307_v23  ;;  %v6359_v26 = vmul.f32 1.442695, %v6308_v59  ;;  %v6309_v13 = vsub.f32 %v12261_v3, %v6243_v48  ;;  %v6310_v8 = vsub.f32 %v12253_v22, %v6243_v48  ;;  %v12317_v9 = vpop.f32.mrb[139].mxu1 }
 0xc85   :  { %v12319_v40 = vpop.eup %9491  ;;  %v6250_v5 = vmax.f32 %v6248_v62, %v6249_v1  ;;  %v6258_v19 = vrot.slane %v6257_v12, 2  ;;  %v6265_v32 = vrot.slane %v6264_v50, 4  ;;  %v6272_v20 = vsel %vm936_vm5, %v12311_v47, -inf }
 0xc86   :  { %9501 = vpow2.f32 %v6357_v53  ;;  %v6361_v52 = vmul.f32 1.442695, %v6309_v13  ;;  %v6363_v45 = vmul.f32 1.442695, %v6310_v8  ;;  %v6271_v55 = vsel %vm936_vm5, %v12317_v9, -inf }
 0xc87   :  { %v12325_v10 = vpop.eup %9493  ;;  %9503 = vpow2.f32 %v6359_v26  ;;  %v6251_v22 = vrot.slane %v6250_v5, 1  ;;  %v6259_v3 = vmax.f32 %v6257_v12, %v6258_v19  ;;  %v6266_v15 = vmax.f32 %v6264_v50, %v6265_v32  ;;  %v12327_v60 = vpop.f32.mrb[140].mxu1  ;;  %v9630_v19 = vld [vmem:[%s9878_s3 + $0x10] sm:$0xff] }
 0xc88   :  { %v12329_v62 = vpop.eup %9495  ;;  %9505 = vpow2.f32 %v6361_v52  ;;  %v6273_v23 = vmax.f32 %v6271_v55, %v6272_v20  ;;  %v6281_v13 = vsel %vm936_vm5, %v12327_v60, -inf  ;;  %v12333_v8 = vpop.f32.mrb[141].mxu1  ;;  %v6422_v59 = vrot.slane %v6421_v17, 2 }
 0xc89   :  { %9507 = vpow2.f32 %v6363_v45  ;;  %v6252_v48 = vmax.f32 %v6250_v5, %v6251_v22  ;;  %v6260_v1 = vrot.slane %v6259_v3, 1  ;;  %v6267_v26 = vrot.slane %v6266_v15, 2 }
 0xc8a   :  { %v6274_v12 = vrot.slane %v6273_v23, 4  ;;  %v6280_v50 = vsel %vm936_vm5, %v12333_v8, -inf  ;;  %v6423_v53 = vadd.f32 %v6422_v59, %v6421_v17  ;;  %v12339_v32 = vmul.f32 %v9630_v19, %v12236_v38 }
 0xc8b   :  { %v12341_v20 = vpop.eup %9497  ;;  %v6311_v52 = vsub.f32 %v12277_v21, %v6252_v48  ;;  %v6312_v55 = vsub.f32 %v12269_v51, %v6252_v48  ;;  %v6261_v45 = vmax.f32 %v6259_v3, %v6260_v1  ;;  %v6268_v5 = vmax.f32 %v6266_v15, %v6267_v26  ;;  %v9632_v26 = vld [vmem:[%s9878_s3 + $0x20] sm:$0xff] }
 0xc8c   :  { %v12345_v22 = vpop.eup %9499  ;;  %v6275_v27 = vmax.f32 %v6273_v23, %v6274_v12  ;;  %v6282_v42 = vmax.f32 %v6280_v50, %v6281_v13  ;;  %v6424_v11 = vrot.slane %v6423_v53, 1  ;;  %v12349_v17 = vmul.f32 %v9631_v58, %v12247_v25 }
 0xc8d   :  { %v6365_v59 = vmul.f32 1.442695, %v6311_v52  ;;  %v6367_v38 = vmul.f32 1.442695, %v6312_v55  ;;  %v6313_v19 = vsub.f32 %v12291_v29, %v6261_v45  ;;  %v6314_v37 = vsub.f32 %v12285_v39, %v6261_v45  ;;  %v9633_v55 = vld [vmem:[%s9878_s3 + $0x28] sm:$0xff] }
 0xc8e   :  { %v6269_v21 = vrot.slane %v6268_v5, 1  ;;  %v6276_v4 = vrot.slane %v6275_v27, 2  ;;  %v6283_v51 = vrot.slane %v6282_v42, 4  ;;  %v6425_v3 = vadd.f32 %v6424_v11, %v6423_v53 }
 0xc8f   :  { %9509 = vpow2.f32 %v6365_v59  ;;  %v6369_v15 = vmul.f32 1.442695, %v6313_v19  ;;  %v6371_v23 = vmul.f32 1.442695, %v6314_v37  ;;  %v6426_v13 = vsel %vm936_vm5, %v12339_v32, 0.0 }
 0xc90   :  { %v12355_v48 = vpop.eup %9501  ;;  %9511 = vpow2.f32 %v6367_v38  ;;  %v6270_v58 = vmax.f32 %v6268_v5, %v6269_v21  ;;  %v6277_v25 = vmax.f32 %v6275_v27, %v6276_v4  ;;  %v6284_v1 = vmax.f32 %v6282_v42, %v6283_v51  ;;  %v9634_v21 = vld [vmem:[%s9878_s3 + $0x30] sm:$0xff] }
 0xc91   :  { %v12357_v29 = vpop.eup %9503  ;;  %9513 = vpow2.f32 %v6369_v15  ;;  %v6561_v39 = vmax.f32 %v6425_v3, 1e-16  ;;  %v6427_v11 = vsel %vm936_vm5, %v12349_v17, 0.0  ;;  %v12363_v37 = vmul.f32 %v9632_v26, %v12251_v7 }
 0xc92   :  { %v12365_v12 = vpop.eup %9505  ;;  %9515 = vpow2.f32 %v6371_v23  ;;  %v6315_v50 = vsub.f32 %v12303_v44, %v6270_v58  ;;  %v6316_v4 = vsub.f32 %v12297_v6, %v6270_v58  ;;  %v6278_v42 = vrot.slane %v6277_v25, 1  ;;  %v9635_v58 = vld [vmem:[%s9878_s3 + $0x38] sm:$0xff] }
 0xc93   :  { %v12369_v27 = vpop.eup %9507  ;;  %v6285_v53 = vrot.slane %v6284_v1, 2  ;;  %9517 = vrcp.f32 %v6561_v39  ;;  %v6428_v52 = vadd.f32 %v6427_v11, %v6426_v13  ;;  %v12373_v45 = vmul.f32 %v9633_v55, %v12257_v16  ;;  %v9637_v55 = vld [vmem:[%s9878_s3 + $0x48] sm:$0xff] }
 0xc94   :  { %v6373_v7 = vmul.f32 1.442695, %v6315_v50  ;;  %v6375_v5 = vmul.f32 1.442695, %v6316_v4  ;;  %v6279_v59 = vmax.f32 %v6277_v25, %v6278_v42  ;;  %v6435_v44 = vsel %vm936_vm5, %v12363_v37, 0.0  ;;  %v9636_v4 = vld [vmem:[%s9878_s3 + $0x40] sm:$0xff] }
 0xc95   :  { %v6286_v38 = vmax.f32 %v6284_v1, %v6285_v53  ;;  %v6429_v19 = vrot.slane %v6428_v52, 4  ;;  %v6436_v6 = vsel %vm936_vm5, %v12373_v45, 0.0  ;;  %v12381_v51 = vmul.f32 %v9634_v21, %v12267_v35 }
 0xc96   :  { %9519 = vpow2.f32 %v6373_v7  ;;  %v6317_v16 = vsub.f32 %v12317_v9, %v6279_v59  ;;  %v6318_v3 = vsub.f32 %v12311_v47, %v6279_v59  ;;  %v6437_v15 = vadd.f32 %v6436_v6, %v6435_v44 }
 0xc97   :  { %9521 = vpow2.f32 %v6375_v5  ;;  %v6287_v23 = vrot.slane %v6286_v38, 1  ;;  %v6430_v13 = vadd.f32 %v6429_v19, %v6428_v52  ;;  %v12387_v25 = vmul.f32 %v9635_v58, %v12271_v57 }
 0xc98   :  { %v6377_v1 = vmul.f32 1.442695, %v6317_v16  ;;  %v6379_v39 = vmul.f32 1.442695, %v6318_v3  ;;  %v6438_v11 = vrot.slane %v6437_v15, 4  ;;  %v6444_v35 = vsel %vm936_vm5, %v12381_v51, 0.0 }
 0xc99   :  { %v12391_v26 = vpop.eup %9509  ;;  %v6288_v9 = vmax.f32 %v6286_v38, %v6287_v23  ;;  %v6431_v50 = vrot.slane %v6430_v13, 2  ;;  %v6445_v47 = vsel %vm936_vm5, %v12387_v25, 0.0  ;;  %v12397_v42 = vmul.f32 %v9636_v4, %v12283_v33  ;;  %v9639_v4 = vld [vmem:[%s9878_s3 + $0x58] sm:$0xff] }
 0xc9a   :  { %v12399_v53 = vpop.eup %9511  ;;  %9523 = vpow2.f32 %v6377_v1  ;;  %v6439_v57 = vadd.f32 %v6438_v11, %v6437_v15  ;;  %v6446_v52 = vadd.f32 %v6445_v47, %v6444_v35  ;;  %v12403_v7 = vmul.f32 %v9637_v55, %v12287_v41  ;;  %v9638_v35 = vld [vmem:[%s9878_s3 + $0x50] sm:$0xff] }
 0xc9b   :  { %v12405_v5 = vpop.eup %9513  ;;  %9525 = vpow2.f32 %v6379_v39  ;;  %v6319_v59 = vsub.f32 %v12333_v8, %v6288_v9  ;;  %v6320_v44 = vsub.f32 %v12327_v60, %v6288_v9  ;;  %v6432_v38 = vadd.f32 %v6431_v50, %v6430_v13 }
 0xc9c   :  { %v12409_v19 = vpop.eup %9515  ;;  %v6440_v33 = vrot.slane %v6439_v57, 2  ;;  %v6447_v6 = vrot.slane %v6446_v52, 4  ;;  %v6453_v21 = vsel %vm936_vm5, %v12397_v42, 0.0  ;;  %v6454_v41 = vsel %vm936_vm5, %v12403_v7, 0.0 }
 0xc9d   :  { %v9518_v16 = vpop.eup %9517  ;;  %v6381_v3 = vmul.f32 1.442695, %v6319_v59  ;;  %v6383_v15 = vmul.f32 1.442695, %v6320_v44  ;;  %v6433_v23 = vrot.slane %v6432_v38, 1  ;;  %v6455_v8 = vadd.f32 %v6454_v41, %v6453_v21  ;;  %v9640_v59 = vld [vmem:[%s9878_s3 + $0x60] sm:$0xff] }
 0xc9e   :  { %v6578_v60 = vmul.f32 %v9518_v16, %v12228_v0  ;;  %v6579_v13 = vmul.f32 %v9518_v16, %v12243_v18  ;;  %v6441_v58 = vadd.f32 %v6440_v33, %v6439_v57  ;;  %v6448_v1 = vadd.f32 %v6447_v6, %v6446_v52  ;;  %v9641_v6 = vld [vmem:[%s9878_s3 + $0x68] sm:$0xff] }
 0xc9f   :  { %9527 = vpow2.f32 %v6381_v3  ;;  %v6434_v39 = vadd.f32 %v6433_v23, %v6432_v38  ;;  %v6456_v11 = vrot.slane %v6455_v8, 4  ;;  %v12419_v9 = vmul.f32 %v9638_v35, %v12299_v46 }
 0xca0   :  { %v12421_v50 = vpop.eup %9519  ;;  %9529 = vpow2.f32 %v6383_v15  ;;  %8687 = vmatprep.mubr.msk.f32.mxu0 %vm936_vm5, %v6578_v60  ;;  %v6442_v47 = vrot.slane %v6441_v58, 1  ;;  %v6449_v0 = vrot.slane %v6448_v1, 2  ;;  %v12426_v18 = vmul.f32 %v9639_v4, %v12305_v61  ;;  %v9642_v60 = vld [vmem:[%s9878_s3 + $0x70] sm:$0xff]  ;;  %v9644_v4 = vld [vmem:[%s9878_s3 + $0x80] sm:$0xff] }
 0xca1   :  { %v12428_v57 = vpop.eup %9521  ;;  %8688 = vmatmul.mubr.msk.f32.vlgmr.msra.gmra.mrb[100].mxu0 %vm936_vm5, %v6579_v13  ;;  %v6562_v52 = vmax.f32 %v6434_v39, 1e-16  ;;  %v6457_v55 = vadd.f32 %v6456_v11, %v6455_v8  ;;  %v6462_v46 = vsel %vm936_vm5, %v12419_v9, 0.0  ;;  %v12435_v44 = vmul.f32 %v9640_v59, %v12313_v43  ;;  %v9643_v11 = vld [vmem:[%s9878_s3 + $0x78] sm:$0xff] }
 0xca2   :  { %v6443_v38 = vadd.f32 %v6442_v47, %v6441_v58  ;;  %v6450_v33 = vadd.f32 %v6449_v0, %v6448_v1  ;;  %v6463_v61 = vsel %vm936_vm5, %v12426_v18, 0.0  ;;  %v12441_v21 = vmul.f32 %v9641_v6, %v12319_v40 }
 0xca3   :  { %9531 = vrcp.f32 %v6562_v52  ;;  %v6458_v41 = vrot.slane %v6457_v55, 2  ;;  %v6464_v16 = vadd.f32 %v6463_v61, %v6462_v46  ;;  %v6471_v3 = vsel %vm936_vm5, %v12435_v44, 0.0  ;;  %v9645_v61 = vld [vmem:[%s9878_s3 + $0x88] sm:$0xff] }
 0xca4   :  { %v12445_v15 = vpop.eup %9523  ;;  %v6563_v43 = vmax.f32 %v6443_v38, 1e-16  ;;  %v6451_v23 = vrot.slane %v6450_v33, 1  ;;  %v6472_v8 = vsel %vm936_vm5, %v12441_v21, 0.0  ;;  %v12451_v13 = vmul.f32 %v9642_v60, %v12325_v10 }
 0xca5   :  { %v12453_v40 = vpop.eup %9525  ;;  %v6459_v58 = vadd.f32 %v6458_v41, %v6457_v55  ;;  %v6465_v1 = vrot.slane %v6464_v16, 4  ;;  %v6473_v39 = vadd.f32 %v6472_v8, %v6471_v3  ;;  %v12457_v35 = vmul.f32 %v9643_v11, %v12329_v62 }
 0xca6   :  { %9533 = vrcp.f32 %v6563_v43  ;;  %v6452_v47 = vadd.f32 %v6451_v23, %v6450_v33  ;;  %v6480_v0 = vsel %vm936_vm5, %v12451_v13, 0.0  ;;  %v12463_v10 = vmul.f32 %v9644_v4, %v12341_v20 }
 0xca7   :  { %v6460_v52 = vrot.slane %v6459_v58, 1  ;;  %v6466_v46 = vadd.f32 %v6465_v1, %v6464_v16  ;;  %v6474_v55 = vrot.slane %v6473_v39, 4  ;;  %v6481_v59 = vsel %vm936_vm5, %v12457_v35, 0.0  ;;  %v9646_v16 = vld [vmem:[%s9878_s3 + $0x90] sm:$0xff]  ;;  %v9647_v1 = vld [vmem:[%s9878_s3 + $0x98] sm:$0xff] }
 0xca8   :  { %v6564_v38 = vmax.f32 %v6452_v47, 1e-16  ;;  %v6482_v62 = vadd.f32 %v6481_v59, %v6480_v0  ;;  %v12469_v33 = vmul.f32 %v9645_v61, %v12345_v22  ;;  %v6489_v6 = vsel %vm936_vm5, %v12463_v10, 0.0 }
 0xca9   :  { %v12473_v41 = vpop.eup %9527  ;;  %v6461_v20 = vadd.f32 %v6460_v52, %v6459_v58  ;;  %v6467_v3 = vrot.slane %v6466_v46, 2  ;;  %v6475_v43 = vadd.f32 %v6474_v55, %v6473_v39  ;;  %v12477_v23 = vmul.f32 %v9646_v16, %v12355_v48  ;;  %v9648_v55 = vld [vmem:[%s9878_s3 + $0xa0] sm:$0xff] }
 0xcaa   :  { %v12479_v8 = vpop.eup %9529  ;;  %9535 = vrcp.f32 %v6564_v38  ;;  %v6483_v60 = vrot.slane %v6482_v62, 4  ;;  %v6490_v22 = vsel %vm936_vm5, %v12469_v33, 0.0  ;;  %v12485_v11 = vmul.f32 %v9647_v1, %v12357_v29  ;;  %v9649_v1 = vld [vmem:[%s9878_s3 + $0xa8] sm:$0xff] }
 0xcab   :  { %v6565_v47 = vmax.f32 %v6461_v20, 1e-16  ;;  %v6468_v58 = vadd.f32 %v6467_v3, %v6466_v46  ;;  %v6476_v0 = vrot.slane %v6475_v43, 2  ;;  %v6491_v39 = vadd.f32 %v6490_v22, %v6489_v6 }
 0xcac   :  { %v6484_v4 = vadd.f32 %v6483_v60, %v6482_v62  ;;  %v6498_v48 = vsel %vm936_vm5, %v12477_v23, 0.0  ;;  %v6499_v52 = vsel %vm936_vm5, %v12485_v11, 0.0  ;;  %v12493_v59 = vmul.f32 %v9648_v55, %v12365_v12 }
 0xcad   :  { %v9532_v38 = vpop.eup %9531  ;;  %9537 = vrcp.f32 %v6565_v47  ;;  %v6469_v29 = vrot.slane %v6468_v58, 1  ;;  %v6477_v61 = vadd.f32 %v6476_v0, %v6475_v43  ;;  %v6492_v46 = vrot.slane %v6491_v39, 4 }
 0xcae   :  { %v6581_v6 = vmul.f32 %v9532_v38, %v12339_v32  ;;  %v6582_v62 = vmul.f32 %v9532_v38, %v12349_v17  ;;  %v6485_v20 = vrot.slane %v6484_v4, 2  ;;  %v6500_v3 = vadd.f32 %v6499_v52, %v6498_v48  ;;  %v9650_v32 = vld [vmem:[%s9878_s3 + $0xb0] sm:$0xff] }
 0xcaf   :  { %v6470_v16 = vadd.f32 %v6469_v29, %v6468_v58  ;;  %v6478_v60 = vrot.slane %v6477_v61, 1  ;;  %v6493_v22 = vadd.f32 %v6492_v46, %v6491_v39  ;;  %v12499_v36 = vmul.f32 %v9649_v1, %v12369_v27  ;;  %v9651_v46 = vld [vmem:[%s9878_s3 + $0xb8] sm:$0xff] }
 0xcb0   :  { %v9534_v12 = vpop.eup %9533  ;;  %8690 = vmatprep.mubr.msk.f32.mxu0 %vm936_vm5, %v6581_v6  ;;  %v6486_v47 = vadd.f32 %v6485_v20, %v6484_v4  ;;  %v6501_v43 = vrot.slane %v6500_v3, 4  ;;  %v6507_v0 = vsel %vm936_vm5, %v12493_v59, 0.0  ;;  %v12506_v17 = vmul.f32 %v9650_v32, %v12391_v26  ;;  %v9652_v32 = vld [vmem:[%s9878_s3 + $0xc0] sm:$0xff] }
 0xcb1   :  { %8691 = vmatmul.mubr.msk.f32.gmra.mrb[102].mxu0 %vm936_vm5, %v6582_v62  ;;  %v6584_v58 = vmul.f32 %v9534_v12, %v12363_v37  ;;  %v6585_v27 = vmul.f32 %v9534_v12, %v12373_v45  ;;  %v6566_v39 = vmax.f32 %v6470_v16, 1e-16  ;;  %v6479_v48 = vadd.f32 %v6478_v60, %v6477_v61 }
 0xcb2   :  { %v6487_v52 = vrot.slane %v6486_v47, 1  ;;  %v6494_v55 = vrot.slane %v6493_v22, 2  ;;  %v6502_v4 = vadd.f32 %v6501_v43, %v6500_v3  ;;  %v6508_v38 = vsel %vm936_vm5, %v12499_v36, 0.0 }
 0xcb3   :  { %8693 = vmatprep.mubr.msk.f32.mxu0 %vm936_vm5, %v6584_v58  ;;  %9539 = vrcp.f32 %v6566_v39  ;;  %v6567_v29 = vmax.f32 %v6479_v48, 1e-16  ;;  %v6509_v26 = vadd.f32 %v6508_v38, %v6507_v0  ;;  %v12516_v6 = vmul.f32 %v9651_v46, %v12399_v53 }
 0xcb4   :  { %v9536_v37 = vpop.eup %9535  ;;  %v6488_v62 = vadd.f32 %v6487_v52, %v6486_v47  ;;  %v6495_v45 = vadd.f32 %v6494_v55, %v6493_v22  ;;  %v6503_v61 = vrot.slane %v6502_v4, 2  ;;  %v6516_v20 = vsel %vm936_vm5, %v12506_v17, 0.0 }
 0xcb5   :  { %8694 = vmatmul.mubr.msk.f32.gmra.mrb[104].mxu0 %vm936_vm5, %v6585_v27  ;;  %v6587_v3 = vmul.f32 %v9536_v37, %v12381_v51  ;;  %v6588_v16 = vmul.f32 %v9536_v37, %v12387_v25  ;;  %9541 = vrcp.f32 %v6567_v29  ;;  %v6510_v60 = vrot.slane %v6509_v26, 4  ;;  %v9653_v51 = vld [vmem:[%s9878_s3 + $0xc8] sm:$0xff]  ;;  %v9655_v29 = vld [vmem:[%s9878_s3 + $0xd8] sm:$0xff] }
 0xcb6   :  { %v6568_v1 = vmax.f32 %v6488_v62, 1e-16  ;;  %v6496_v53 = vrot.slane %v6495_v45, 1  ;;  %v6504_v12 = vadd.f32 %v6503_v61, %v6502_v4  ;;  %v6517_v22 = vsel %vm936_vm5, %v12516_v6, 0.0 }
 0xcb7   :  { %v9538_v47 = vpop.eup %9537  ;;  %8696 = vmatprep.mubr.msk.f32.mxu0 %vm936_vm5, %v6587_v3  ;;  %v6511_v43 = vadd.f32 %v6510_v60, %v6509_v26  ;;  %v6518_v0 = vadd.f32 %v6517_v22, %v6516_v20  ;;  %v12528_v58 = vmul.f32 %v9652_v32, %v12405_v5  ;;  %v12532_v25 = vmul.f32 %v9653_v51, %v12409_v19  ;;  %v9656_v3 = vld [vmem:[%s9878_s3 + $0xe0] sm:$0xff] }
 0xcb8   :  { %v6590_v27 = vmul.f32 %v9538_v47, %v12397_v42  ;;  %v6591_v39 = vmul.f32 %v9538_v47, %v12403_v7  ;;  %9543 = vrcp.f32 %v6568_v1  ;;  %v6497_v48 = vadd.f32 %v6496_v53, %v6495_v45  ;;  %v9654_v42 = vld [vmem:[%s9878_s3 + $0xd0] sm:$0xff] }
 0xcb9   :  { %8697 = vmatmul.mubr.msk.f32.gmra.mrb[106].mxu0 %vm936_vm5, %v6588_v16  ;;  %v6505_v52 = vrot.slane %v6504_v12, 1  ;;  %v6512_v55 = vrot.slane %v6511_v43, 2  ;;  %v6519_v4 = vrot.slane %v6518_v0, 4  ;;  %v6525_v5 = vsel %vm936_vm5, %v12528_v58, 0.0 }
 0xcba   :  { %8699 = vmatprep.mubr.msk.f32.mxu0 %vm936_vm5, %v6590_v27  ;;  %v6569_v38 = vmax.f32 %v6497_v48, 1e-16  ;;  %v6526_v19 = vsel %vm936_vm5, %v12532_v25, 0.0  ;;  %v12544_v7 = vmul.f32 %v9654_v42, %v12421_v50  ;;  %v12548_v26 = vmul.f32 %v9655_v29, %v12428_v57  ;;  %v9659_v42 = vld [vmem:[%s9878_s3 + $0xf8] sm:$0xff] }
 0xcbb   :  { %v6506_v46 = vadd.f32 %v6505_v52, %v6504_v12  ;;  %v6513_v37 = vadd.f32 %v6512_v55, %v6511_v43  ;;  %v6520_v62 = vadd.f32 %v6519_v4, %v6518_v0  ;;  %v6527_v45 = vadd.f32 %v6526_v19, %v6525_v5  ;;  %v9657_v43 = vld [vmem:[%s9878_s3 + $0xe8] sm:$0xff] }
 0xcbc   :  { %9545 = vrcp.f32 %v6569_v38  ;;  %v6534_v61 = vsel %vm936_vm5, %v12544_v7, 0.0  ;;  %v6535_v20 = vsel %vm936_vm5, %v12548_v26, 0.0  ;;  %v12556_v50 = vmul.f32 %v9656_v3, %v12445_v15 }
 0xcbd   :  { %v9540_v16 = vpop.eup %9539  ;;  %8700 = vmatmul.mubr.msk.f32.gmra.mrb[108].mxu0 %vm936_vm5, %v6591_v39  ;;  %v6570_v57 = vmax.f32 %v6506_v46, 1e-16  ;;  %v6514_v60 = vrot.slane %v6513_v37, 1  ;;  %v6521_v1 = vrot.slane %v6520_v62, 2  ;;  %v6528_v53 = vrot.slane %v6527_v45, 4 }
 0xcbe   :  { %v6593_v12 = vmul.f32 %v9540_v16, %v12419_v9  ;;  %v6594_v22 = vmul.f32 %v9540_v16, %v12426_v18  ;;  %v6536_v47 = vadd.f32 %v6535_v20, %v6534_v61  ;;  %v12563_v0 = vmul.f32 %v9657_v43, %v12453_v40 }
 0xcbf   :  { %v9542_v32 = vpop.eup %9541  ;;  %9547 = vrcp.f32 %v6570_v57  ;;  %v6515_v15 = vadd.f32 %v6514_v60, %v6513_v37  ;;  %v6522_v51 = vadd.f32 %v6521_v1, %v6520_v62  ;;  %v6529_v27 = vadd.f32 %v6528_v53, %v6527_v45 }
 0xcc0   :  { %8702 = vmatprep.mubr.msk.f32.mxu0 %vm936_vm5, %v6593_v12  ;;  %v6596_v39 = vmul.f32 %v9542_v32, %v12435_v44  ;;  %v6597_v9 = vmul.f32 %v9542_v32, %v12441_v21  ;;  %v6537_v48 = vrot.slane %v6536_v47, 4  ;;  %v6543_v18 = vsel %vm936_vm5, %v12556_v50, 0.0  ;;  %v9658_v44 = vld [vmem:[%s9878_s3 + $0xf0] sm:$0xff]  ;;  %s9686_s3 = smov 27  }
 0xcc1   :  { %8703 = vmatmul.mubr.msk.f32.gmra.mrb[110].mxu0 %vm936_vm5, %v6594_v22  ;;  %v6571_v40 = vmax.f32 %v6515_v15, 1e-16  ;;  %v6523_v52 = vrot.slane %v6522_v51, 1  ;;  %v6530_v55 = vrot.slane %v6529_v27, 2  ;;  %v6544_v4 = vsel %vm936_vm5, %v12563_v0, 0.0  ;;  %s12632_s9 = sld [smem:[%s12845_s0 + %s9686_s3]]  }
 0xcc2   :  { %v9544_v5 = vpop.eup %9543  ;;  %8705 = vmatprep.mubr.msk.f32.mxu0 %vm936_vm5, %v6596_v39  ;;  %v6538_v38 = vadd.f32 %v6537_v48, %v6536_v47  ;;  %v6545_v19 = vadd.f32 %v6544_v4, %v6543_v18  ;;  %v12576_v21 = vmul.f32 %v9658_v44, %v12473_v41  ;;  %v12580_v29 = vmul.f32 %v9659_v42, %v12479_v8 }
 0xcc3   :  { %v6599_v46 = vmul.f32 %v9544_v5, %v12451_v13  ;;  %v6600_v37 = vmul.f32 %v9544_v5, %v12457_v35  ;;  %9549 = vrcp.f32 %v6571_v40  ;;  %v6524_v62 = vadd.f32 %v6523_v52, %v6522_v51 }
 0xcc4   :  { %v6531_v45 = vadd.f32 %v6530_v55, %v6529_v27  ;;  %v6539_v61 = vrot.slane %v6538_v38, 2  ;;  %v6546_v20 = vrot.slane %v6545_v19, 4  ;;  %v6552_v3 = vsel %vm936_vm5, %v12576_v21, 0.0 }
 0xcc5   :  { %8706 = vmatmul.mubr.msk.f32.gmra.mrb[112].mxu0 %vm936_vm5, %v6597_v9  ;;  %v6572_v41 = vmax.f32 %v6524_v62, 1e-16  ;;  %v6553_v16 = vsel %vm936_vm5, %v12580_v29, 0.0 }
 0xcc6   :  { %v9546_v8 = vpop.eup %9545  ;;  %8708 = vmatprep.mubr.msk.f32.mxu0 %vm936_vm5, %v6599_v46  ;;  %v6532_v13 = vrot.slane %v6531_v45, 1  ;;  %v6540_v57 = vadd.f32 %v6539_v61, %v6538_v38  ;;  %v6547_v35 = vadd.f32 %v6546_v20, %v6545_v19  ;;  %v6554_v60 = vadd.f32 %v6553_v16, %v6552_v3 }
 0xcc7   :  { %v6602_v1 = vmul.f32 %v9546_v8, %v12463_v10  ;;  %v6603_v53 = vmul.f32 %v9546_v8, %v12469_v33  ;;  %9551 = vrcp.f32 %v6572_v41  ;;  %v9684_v20 = vmov 0.0|0.0   ;;  %v7292_v3 = vld [vmem:[%s12632_s9 + $0x18] sm:$0xff]  ;;  %v7293_v16 = vld [vmem:[%s12632_s9 + $0x20] sm:$0xff]  ;;  %v7294_v8 = vld [vmem:[%s12632_s9 + $0x28] sm:$0xff] }
 0xcc8   :  { %v6533_v12 = vadd.f32 %v6532_v13, %v6531_v45  ;;  %v6541_v22 = vrot.slane %v6540_v57, 1  ;;  %v6548_v47 = vrot.slane %v6547_v35, 2  ;;  %v6555_v43 = vrot.slane %v6554_v60, 4  ;;  %9076 = vmatprep.subr.bf16.mxu0 %v9684_v20  ;;  %9079 = vmatprep.subr.bf16.mxu1 %v9684_v20 }
 0xcc9   :  { %v9548_v32 = vpop.eup %9547  ;;  %8709 = vmatmul.mubr.msk.f32.gmra.mrb[114].mxu0 %vm936_vm5, %v6600_v37  ;;  %v9086_v13 = vpack.c.bf16 %v7294_v8, %v7293_v16 }
 0xcca   :  { %8711 = vmatprep.mubr.msk.f32.mxu0 %vm936_vm5, %v6602_v1  ;;  %v6605_v15 = vmul.f32 %v9548_v32, %v12477_v23  ;;  %v6606_v51 = vmul.f32 %v9548_v32, %v12485_v11  ;;  %v6573_v27 = vmax.f32 %v6533_v12, 1e-16  ;;  %v6542_v39 = vadd.f32 %v6541_v22, %v6540_v57  ;;  %v7295_v57 = vld [vmem:[%s12632_s9 + $0x30] sm:$0xff]  ;;  %v7297_v1 = vld [vmem:[%s12632_s9 + $0x40] sm:$0xff] }
 0xccb   :  { %v6549_v9 = vadd.f32 %v6548_v47, %v6547_v35  ;;  %v6556_v10 = vadd.f32 %v6555_v43, %v6554_v60  ;;  %v7296_v35 = vld [vmem:[%s12632_s9 + $0x38] sm:$0xff] }
 0xccc   :  { %9553 = vrcp.f32 %v6573_v27  ;;  %v6574_v33 = vmax.f32 %v6542_v39, 1e-16  ;;  %v9089_v60 = vpack.c.bf16 %v7296_v35, %v7295_v57  ;;  %v12676_v57 = vld [vmem:[%s7677_s17] ss:$0 sm:$0xff] }
 0xccd   :  { %v9550_v48 = vpop.eup %9549  ;;  %8712 = vmatmul.mubr.msk.f32.gmra.mrb[116].mxu0 %vm936_vm5, %v6603_v53  ;;  %v6550_v18 = vrot.slane %v6549_v9, 1  ;;  %v6557_v40 = vrot.slane %v6556_v10, 2  ;;  %v7298_v53 = vld [vmem:[%s12632_s9 + $0x48] sm:$0xff] }
 0xcce   :  { %8714 = vmatprep.mubr.msk.f32.mxu0 %vm936_vm5, %v6605_v15  ;;  %v6608_v52 = vmul.f32 %v9550_v48, %v12493_v59  ;;  %v6609_v55 = vmul.f32 %v9550_v48, %v12499_v36  ;;  %9555 = vrcp.f32 %v6574_v33  ;;  %v9092_v43 = vpack.c.bf16 %v7298_v53, %v7297_v1  ;;  %v7299_v15 = vld [vmem:[%s12632_s9 + $0x50] sm:$0xff]  ;;  %v7302_v33 = vld [vmem:[%s12632_s9 + $0x68] sm:$0xff] }
 0xccf   :  { %v6551_v23 = vadd.f32 %v6550_v18, %v6549_v9  ;;  %v6558_v11 = vadd.f32 %v6557_v40, %v6556_v10  ;;  %v7301_v10 = vld [vmem:[%s12632_s9 + $0x60] sm:$0xff]  ;;  %v7303_v40 = vld [vmem:[%s12632_s9 + $0x70] sm:$0xff] }
 0xcd0   :  { %v9098_v18 = vpack.c.bf16 %v7302_v33, %v7301_v10 }
 0xcd1   :  { %v9552_v4 = vpop.eup %9551  ;;  %8715 = vmatmul.mubr.msk.f32.gmra.mrb[118].mxu0 %vm936_vm5, %v6606_v51  ;;  %v6575_v5 = vmax.f32 %v6551_v23, 1e-16  ;;  %v6559_v38 = vrot.slane %v6558_v11, 1  ;;  %v7300_v51 = vld [vmem:[%s12632_s9 + $0x58] sm:$0xff] }
 0xcd2   :  { %8717 = vmatprep.mubr.msk.f32.mxu0 %vm936_vm5, %v6608_v52  ;;  %v6611_v19 = vmul.f32 %v9552_v4, %v12506_v17  ;;  %v6612_v44 = vmul.f32 %v9552_v4, %v12516_v6  ;;  %v9095_v39 = vpack.c.bf16 %v7300_v51, %v7299_v15  ;;  %v7304_v52 = vld [vmem:[%s12632_s9 + $0x78] sm:$0xff] }
 0xcd3   :  { %9557 = vrcp.f32 %v6575_v5  ;;  %v6560_v42 = vadd.f32 %v6559_v38, %v6558_v11  ;;  %v9101_v23 = vpack.c.bf16 %v7304_v52, %v7303_v40 }
 0xcd5   :  { %8718 = vmatmul.mubr.msk.f32.gmra.mrb[120].mxu0 %vm936_vm5, %v6609_v55  ;;  %v6576_v59 = vmax.f32 %v6560_v42, 1e-16 }
 0xcd6   :  { %v9554_v36 = vpop.eup %9553  ;;  %8720 = vmatprep.mubr.msk.f32.mxu0 %vm936_vm5, %v6611_v19 }
 0xcd7   :  { %v6614_v46 = vmul.f32 %v9554_v36, %v12528_v58  ;;  %v6615_v37 = vmul.f32 %v9554_v36, %v12532_v25  ;;  %9559 = vrcp.f32 %v6576_v59 }
 0xcd8   :  { %v9556_v62 = vpop.eup %9555 }
 0xcd9   :  { %8721 = vmatmul.mubr.msk.f32.gmra.mrb[122].mxu0 %vm936_vm5, %v6612_v44  ;;  %v6617_v17 = vmul.f32 %v9556_v62, %v12544_v7  ;;  %v6618_v6 = vmul.f32 %v9556_v62, %v12548_v26 }
 0xcda   :  { %8723 = vmatprep.mubr.msk.f32.mxu0 %vm936_vm5, %v6614_v46 }
 0xcdd   :  { %v9558_v45 = vpop.eup %9557  ;;  %8724 = vmatmul.mubr.msk.f32.gmra.mrb[124].mxu0 %vm936_vm5, %v6615_v37 }
 0xcde   :  { %8726 = vmatprep.mubr.msk.f32.mxu0 %vm936_vm5, %v6617_v17  ;;  %v6620_v61 = vmul.f32 %v9558_v45, %v12556_v50  ;;  %v6621_v58 = vmul.f32 %v9558_v45, %v12563_v0  ;;  %v7289_v50 = vld [vmem:[%s12632_s9] sm:$0xff]  ;;  %v7290_v0 = vld [vmem:[%s12632_s9 + $0x8] sm:$0xff] }
 0xce1   :  { %v9560_v25 = vpop.eup %9559  ;;  %8727 = vmatmul.mubr.msk.f32.gmra.mrb[126].mxu0 %vm936_vm5, %v6618_v6 }
 0xce2   :  { %8729 = vmatprep.mubr.msk.f32.mxu0 %vm936_vm5, %v6620_v61  ;;  %v6623_v7 = vmul.f32 %v9560_v25, %v12576_v21  ;;  %v6624_v26 = vmul.f32 %v9560_v25, %v12580_v29  ;;  %v7291_v21 = vld [vmem:[%s12632_s9 + $0x10] sm:$0xff]  ;;  %v9080_v29 = vpack.c.bf16 %v7290_v0, %v7289_v50 }
 0xce3   :  { %v9083_v41 = vpack.c.bf16 %v7292_v3, %v7291_v21 }
 0xce4   :  { %9081 = vmatpush3.bf16.msra.mxu1 %v9080_v29 }
 0xce5   :  { %8730 = vmatmul.mubr.msk.f32.gmra.mrb[128].mxu0 %vm936_vm5, %v6621_v58  ;;  %9082 = vmatprep.subr.bf16.mxu1 %v9684_v20 }
 0xce6   :  { %8732 = vmatprep.mubr.msk.f32.mxu0 %vm936_vm5, %v6623_v7  ;;  %v12671_v7 = vld [vmem:[%s7676_s13] ss:$0 sm:$0xff] }
 0xce8   :  { %9084 = vmatpush3.bf16.msra.mxu1 %v9083_v41 }
 0xce9   :  { %8733 = vmatmul.mubr.msk.f32.gmra.mrb[130].mxu0 %vm936_vm5, %v6624_v26  ;;  %9085 = vmatprep.subr.bf16.mxu1 %v9684_v20  ;;  %vm7215_vm5 = vcmask 130048  }
 0xcea   :  { %8739 = vmatprep.mubr.msk.f32.mxu0 %vm9685_vm3, %v12937_v24 }
 0xcec   :  { %9087 = vmatpush3.bf16.msra.mxu1 %v9086_v13 }
 0xced   :  { %9088 = vmatprep.subr.bf16.mxu1 %v9684_v20 }
 0xcf0   :  { %9090 = vmatpush3.bf16.msra.mxu1 %v9089_v60 }
 0xcf1   :  { %9091 = vmatprep.subr.bf16.mxu1 %v9684_v20 }
 0xcf4   :  { %9093 = vmatpush3.bf16.msra.mxu1 %v9092_v43 }
 0xcf5   :  { %9094 = vmatprep.subr.bf16.mxu1 %v9684_v20 }
 0xcf8   :  { %9096 = vmatpush3.bf16.msra.mxu1 %v9095_v39 }
 0xcf9   :  { %9097 = vmatprep.subr.bf16.mxu1 %v9684_v20 }
 0xcfc   :  { %9099 = vmatpush3.bf16.msra.mxu1 %v9098_v18 }
 0xcfd   :  { %9100 = vmatprep.subr.bf16.mxu1 %v9684_v20 }
 0xd00   :  { %9102 = vmatpush3.bf16.msra.mxu1 %v9101_v23 }
 0xd01   :  { %9127 = vmatprep.subr.bf16.mxu1 %v9684_v20 }
 0xd74   :  { %v8689_v12 = vpop.f32.mrb[100].mxu0 }
 0xd75   :  { %v6947_v22 = vmul.f32 %v8689_v12, %v12120_v63  ;;  %v6787_v47 = vpop.f32.mrb[101].mxu0 }
 0xd76   :  { %v6946_v32 = vmul.f32 %v6787_v47, %v12111_v49 }
 0xd78   :  { %v6978_v27 = vadd.f32 %v6947_v22, %v6946_v32 }
 0xd7a   :  { %v6979_v9 = vrot.slane %v6978_v27, 4 }
 0xd7c   :  { %v6980_v48 = vadd.f32 %v6979_v9, %v6978_v27 }
 0xd7e   :  { %v6981_v55 = vrot.slane %v6980_v48, 2 }
 0xd80   :  { %v6982_v4 = vadd.f32 %v6981_v55, %v6980_v48 }
 0xd82   :  { %v6983_v59 = vrot.slane %v6982_v4, 1 }
 0xd84   :  { %v8692_v11 = vpop.f32.mrb[102].mxu0  ;;  %v6984_v61 = vadd.f32 %v6983_v59, %v6982_v4 }
 0xd85   :  { %v6949_v5 = vmul.f32 %v8692_v11, %v12120_v63  ;;  %v6797_v38 = vpop.f32.mrb[103].mxu0  ;;  %v13007_v11 = vmax.f32 %v11926_v31, 0.0 }
 0xd86   :  { %v6948_v19 = vmul.f32 %v6797_v38, %v12111_v49  ;;  %v7097_v16 = vmul.f32 %v12671_v7, %v6984_v61 }
 0xd88   :  { %v6985_v44 = vadd.f32 %v6949_v5, %v6948_v19  ;;  %v8695_v42 = vpop.f32.mrb[104].mxu0  ;;  %v7120_v15 = vadd.f32 %v12676_v57, %v7097_v16 }
 0xd89   :  { %v6951_v36 = vmul.f32 %v8695_v42, %v12120_v63  ;;  %v6807_v46 = vpop.f32.mrb[105].mxu0 }
 0xd8a   :  { %v6986_v37 = vrot.slane %v6985_v44, 4  ;;  %v6950_v62 = vmul.f32 %v6807_v46, %v12111_v49  ;;  %v7136_v4 = vadd.f32 %v7120_v15, %v13007_v11 }
 0xd8c   :  { %v6987_v17 = vadd.f32 %v6986_v37, %v6985_v44  ;;  %v6992_v6 = vadd.f32 %v6951_v36, %v6950_v62  ;;  %v8698_v45 = vpop.f32.mrb[106].mxu0  ;;  %v13008_v44 = vmax.f32 %v11920_v54, 0.0 }
 0xd8d   :  { %v6953_v58 = vmul.f32 %v8698_v45, %v12120_v63  ;;  %v6817_v25 = vpop.f32.mrb[107].mxu0 }
 0xd8e   :  { %v6988_v26 = vrot.slane %v6987_v17, 2  ;;  %v6993_v50 = vrot.slane %v6992_v6, 4  ;;  %v6952_v0 = vmul.f32 %v6817_v25, %v12111_v49 }
 0xd90   :  { %v6989_v21 = vadd.f32 %v6988_v26, %v6987_v17  ;;  %v6994_v29 = vadd.f32 %v6993_v50, %v6992_v6  ;;  %v6999_v3 = vadd.f32 %v6953_v58, %v6952_v0  ;;  %v8701_v41 = vpop.f32.mrb[108].mxu0  ;;  %v7152_v58 = vmax.f32 %v7136_v4, 0.0 }
 0xd91   :  { %v6955_v8 = vmul.f32 %v8701_v41, %v12120_v63  ;;  %v6827_v13 = vpop.f32.mrb[109].mxu0 }
 0xd92   :  { %v6990_v35 = vrot.slane %v6989_v21, 1  ;;  %v6995_v60 = vrot.slane %v6994_v29, 2  ;;  %v7000_v1 = vrot.slane %v6999_v3, 4  ;;  %v6954_v53 = vmul.f32 %v6827_v13, %v12111_v49 }
 0xd94   :  { %v6991_v12 = vadd.f32 %v6990_v35, %v6989_v21  ;;  %v6996_v22 = vadd.f32 %v6995_v60, %v6994_v29  ;;  %v7001_v47 = vadd.f32 %v7000_v1, %v6999_v3  ;;  %v7006_v43 = vadd.f32 %v6955_v8, %v6954_v53  ;;  %v8704_v32 = vpop.f32.mrb[110].mxu0 }
 0xd95   :  { %v6957_v51 = vmul.f32 %v8704_v32, %v12120_v63  ;;  %v6837_v27 = vpop.f32.mrb[111].mxu0  ;;  %v13009_v21 = vmax.f32 %v11930_v28, 0.0 }
 0xd96   :  { %v7098_v39 = vmul.f32 %v12671_v7, %v6991_v12  ;;  %v6997_v9 = vrot.slane %v6996_v22, 1  ;;  %v7002_v10 = vrot.slane %v7001_v47, 2  ;;  %v7007_v33 = vrot.slane %v7006_v43, 4 }
 0xd97   :  { %v6956_v48 = vmul.f32 %v6837_v27, %v12111_v49 }
 0xd98   :  { %v7121_v18 = vadd.f32 %v12676_v57, %v7098_v39  ;;  %v6998_v40 = vadd.f32 %v6997_v9, %v6996_v22  ;;  %v7003_v52 = vadd.f32 %v7002_v10, %v7001_v47  ;;  %v7008_v55 = vadd.f32 %v7007_v33, %v7006_v43  ;;  %v8707_v23 = vpop.f32.mrb[112].mxu0 }
 0xd99   :  { %v7013_v5 = vadd.f32 %v6957_v51, %v6956_v48  ;;  %v6959_v38 = vmul.f32 %v8707_v23, %v12120_v63  ;;  %v6847_v19 = vpop.f32.mrb[113].mxu0  ;;  %v13010_v51 = vmax.f32 %v11935_v14, 0.0 }
 0xd9a   :  { %v7137_v42 = vadd.f32 %v7121_v18, %v13008_v44  ;;  %v7099_v59 = vmul.f32 %v12671_v7, %v6998_v40  ;;  %v7004_v36 = vrot.slane %v7003_v52, 1  ;;  %v7009_v46 = vrot.slane %v7008_v55, 2 }
 0xd9b   :  { %v7014_v37 = vrot.slane %v7013_v5, 4  ;;  %v6958_v62 = vmul.f32 %v6847_v19, %v12111_v49  ;;  %v13011_v44 = vmax.f32 %v11941_v34, 0.0 }
 0xd9c   :  { %v7153_v17 = vmax.f32 %v7137_v42, 0.0  ;;  %v7122_v6 = vadd.f32 %v12676_v57, %v7099_v59  ;;  %v7005_v45 = vadd.f32 %v7004_v36, %v7003_v52  ;;  %v7010_v31 = vadd.f32 %v7009_v46, %v7008_v55  ;;  %v8710_v61 = vpop.f32.mrb[114].mxu0 }
 0xd9d   :  { %v7015_v25 = vadd.f32 %v7014_v37, %v7013_v5  ;;  %v7020_v26 = vadd.f32 %v6959_v38, %v6958_v62  ;;  %v6961_v50 = vmul.f32 %v8710_v61, %v12120_v63  ;;  %v6857_v54 = vpop.f32.mrb[115].mxu0 }
 0xd9e   :  { %v7185_v0 = vrot.slane %v7153_v17, 7  ;;  %v7138_v29 = vadd.f32 %v7122_v6, %v13009_v21  ;;  %v7100_v3 = vmul.f32 %v12671_v7, %v7005_v45  ;;  %v7011_v41 = vrot.slane %v7010_v31, 1 }
 0xd9f   :  { %v7016_v16 = vrot.slane %v7015_v25, 2  ;;  %v7021_v8 = vrot.slane %v7020_v26, 4  ;;  %v6960_v13 = vmul.f32 %v6857_v54, %v12111_v49 }
 0xda0   :  { %v7186_v35 = vsel %vm2005_vm6, %v7185_v0, %v7152_v58  ;;  %v7154_v60 = vmax.f32 %v7138_v29, 0.0  ;;  %v7123_v1 = vadd.f32 %v12676_v57, %v7100_v3  ;;  %v7012_v53 = vadd.f32 %v7011_v41, %v7010_v31  ;;  %v8713_v12 = vpop.f32.mrb[116].mxu0 }
 0xda1   :  { %v7017_v22 = vadd.f32 %v7016_v16, %v7015_v25  ;;  %v7022_v47 = vadd.f32 %v7021_v8, %v7020_v26  ;;  %v7027_v43 = vadd.f32 %v6961_v50, %v6960_v13  ;;  %v6963_v28 = vmul.f32 %v8713_v12, %v12120_v63  ;;  %v6867_v32 = vpop.f32.mrb[117].mxu0 }
 0xda2   :  { %v7187_v15 = vrot.slane %v7154_v60, 6  ;;  %v7139_v27 = vadd.f32 %v7123_v1, %v13010_v51  ;;  %v7101_v39 = vmul.f32 %v12671_v7, %v7012_v53  ;;  %v6962_v9 = vmul.f32 %v6867_v32, %v12111_v49 }
 0xda3   :  { %v7018_v10 = vrot.slane %v7017_v22, 1  ;;  %v7023_v33 = vrot.slane %v7022_v47, 2  ;;  %v7028_v48 = vrot.slane %v7027_v43, 4  ;;  %v13012_v3 = vmax.f32 %v11951_v2, 0.0 }
 0xda4   :  { %v7155_v18 = vmax.f32 %v7139_v27, 0.0  ;;  %v7124_v40 = vadd.f32 %v12676_v57, %v7101_v39  ;;  %v7034_v52 = vadd.f32 %v6963_v28, %v6962_v9  ;;  %v8716_v55 = vpop.f32.mrb[118].mxu0  ;;  %v7188_v23 = vsel %vm2008_vm7, %v7187_v15, %v7186_v35 }
 0xda5   :  { %v7019_v11 = vadd.f32 %v7018_v10, %v7017_v22  ;;  %v7024_v4 = vadd.f32 %v7023_v33, %v7022_v47  ;;  %v7029_v5 = vadd.f32 %v7028_v48, %v7027_v43  ;;  %v6965_v14 = vmul.f32 %v8716_v55, %v12120_v63  ;;  %v6877_v38 = vpop.f32.mrb[119].mxu0 }
 0xda6   :  { %v7189_v19 = vrot.slane %v7155_v18, 5  ;;  %v7140_v42 = vadd.f32 %v7124_v40, %v13011_v44  ;;  %v7035_v59 = vrot.slane %v7034_v52, 4  ;;  %v6964_v36 = vmul.f32 %v6877_v38, %v12111_v49 }
 0xda7   :  { %v7102_v46 = vmul.f32 %v12671_v7, %v7019_v11  ;;  %v7025_v37 = vrot.slane %v7024_v4, 1  ;;  %v7030_v62 = vrot.slane %v7029_v5, 2  ;;  %v13013_v39 = vmax.f32 %v11967_v30, 0.0 }
 0xda8   :  { %v7156_v17 = vmax.f32 %v7140_v42, 0.0  ;;  %v7036_v6 = vadd.f32 %v7035_v59, %v7034_v52  ;;  %v7041_v45 = vadd.f32 %v6965_v14, %v6964_v36  ;;  %v8719_v31 = vpop.f32.mrb[120].mxu0  ;;  %v7190_v61 = vsel %vm2011_vm8, %v7189_v19, %v7188_v23 }
 0xda9   :  { %v7125_v58 = vadd.f32 %v12676_v57, %v7102_v46  ;;  %v7026_v25 = vadd.f32 %v7025_v37, %v7024_v4  ;;  %v7031_v26 = vadd.f32 %v7030_v62, %v7029_v5  ;;  %v6967_v34 = vmul.f32 %v8719_v31, %v12120_v63  ;;  %v6887_v50 = vpop.f32.mrb[121].mxu0 }
 0xdaa   :  { %v7191_v54 = vrot.slane %v7156_v17, 4  ;;  %v7037_v0 = vrot.slane %v7036_v6, 2  ;;  %v7042_v21 = vrot.slane %v7041_v45, 4  ;;  %v6966_v29 = vmul.f32 %v6887_v50, %v12111_v49 }
 0xdab   :  { %v7141_v41 = vadd.f32 %v7125_v58, %v13012_v3  ;;  %v7103_v16 = vmul.f32 %v12671_v7, %v7026_v25  ;;  %v7032_v8 = vrot.slane %v7031_v26, 1  ;;  %v13014_v42 = vmax.f32 %v11984_v56, 0.0 }
 0xdac   :  { %v7038_v13 = vadd.f32 %v7037_v0, %v7036_v6  ;;  %v7043_v35 = vadd.f32 %v7042_v21, %v7041_v45  ;;  %v7048_v60 = vadd.f32 %v6967_v34, %v6966_v29  ;;  %v8722_v1 = vpop.f32.mrb[122].mxu0  ;;  %v7192_v53 = vsel %vm2014_vm9, %v7191_v54, %v7190_v61  ;;  %v13015_v21 = vld [vmem:[#allocation10_spill] sm:$0xff] }
 0xdad   :  { %v7157_v12 = vmax.f32 %v7141_v41, 0.0  ;;  %v7126_v22 = vadd.f32 %v12676_v57, %v7103_v16  ;;  %v7033_v47 = vadd.f32 %v7032_v8, %v7031_v26  ;;  %v6969_v43 = vmul.f32 %v8722_v1, %v12120_v63  ;;  %v6897_v28 = vpop.f32.mrb[123].mxu0 }
 0xdae   :  { %v7039_v32 = vrot.slane %v7038_v13, 1  ;;  %v7044_v15 = vrot.slane %v7043_v35, 2  ;;  %v7049_v2 = vrot.slane %v7048_v60, 4  ;;  %v6968_v51 = vmul.f32 %v6897_v28, %v12111_v49 }
 0xdaf   :  { %v7193_v27 = vrot.slane %v7157_v12, 3  ;;  %v7142_v9 = vadd.f32 %v7126_v22, %v13013_v39  ;;  %v7104_v10 = vmul.f32 %v12671_v7, %v7033_v47  ;;  %v13016_v29 = vmax.f32 %v13015_v21, 0.0  ;;  %v13017_v22 = vld [vmem:[#allocation13_spill] sm:$0xff] }
 0xdb0   :  { %v7040_v33 = vadd.f32 %v7039_v32, %v7038_v13  ;;  %v7045_v48 = vadd.f32 %v7044_v15, %v7043_v35  ;;  %v7050_v18 = vadd.f32 %v7049_v2, %v7048_v60  ;;  %v7055_v40 = vadd.f32 %v6969_v43, %v6968_v51  ;;  %v8725_v52 = vpop.f32.mrb[124].mxu0 }
 0xdb1   :  { %v7158_v55 = vmax.f32 %v7142_v9, 0.0  ;;  %v7127_v23 = vadd.f32 %v12676_v57, %v7104_v10  ;;  %v6971_v11 = vmul.f32 %v8725_v52, %v12120_v63  ;;  %v6907_v4 = vpop.f32.mrb[125].mxu0  ;;  %v7194_v5 = vsel %vm2017_vm10, %v7193_v27, %v7192_v53 }
 0xdb2   :  { %v7105_v14 = vmul.f32 %v12671_v7, %v7040_v33  ;;  %v7046_v38 = vrot.slane %v7045_v48, 1  ;;  %v7051_v30 = vrot.slane %v7050_v18, 2  ;;  %v7056_v19 = vrot.slane %v7055_v40, 4 }
 0xdb3   :  { %v6970_v44 = vmul.f32 %v6907_v4, %v12111_v49  ;;  %v7143_v59 = vadd.f32 %v7127_v23, %v13014_v42  ;;  %v7195_v36 = vrot.slane %v7158_v55, 2  ;;  %v13018_v47 = vmax.f32 %v13017_v22, 0.0 }
 0xdb4   :  { %v7128_v46 = vadd.f32 %v12676_v57, %v7105_v14  ;;  %v7047_v37 = vadd.f32 %v7046_v38, %v7045_v48  ;;  %v7052_v62 = vadd.f32 %v7051_v30, %v7050_v18  ;;  %v7057_v17 = vadd.f32 %v7056_v19, %v7055_v40  ;;  %v8728_v6 = vpop.f32.mrb[126].mxu0 }
 0xdb5   :  { %v7062_v45 = vadd.f32 %v6971_v11, %v6970_v44  ;;  %v6973_v31 = vmul.f32 %v8728_v6, %v12120_v63  ;;  %v6917_v61 = vpop.f32.mrb[127].mxu0  ;;  %v7159_v58 = vmax.f32 %v7143_v59, 0.0  ;;  %v7196_v25 = vsel %vm2020_vm11, %v7195_v36, %v7194_v5  ;;  %v13019_v11 = vld [vmem:[#allocation6_spill] sm:$0xff]  ;;  %v13021_v6 = vld [vmem:[#allocation7_spill] sm:$0xff] }
 0xdb6   :  { %v7106_v26 = vmul.f32 %v12671_v7, %v7047_v37  ;;  %v7053_v34 = vrot.slane %v7052_v62, 1  ;;  %v7058_v50 = vrot.slane %v7057_v17, 2  ;;  %v6972_v54 = vmul.f32 %v6917_v61, %v12111_v49 }
 0xdb7   :  { %v7063_v56 = vrot.slane %v7062_v45, 4  ;;  %v7197_v0 = vrot.slane %v7159_v58, 1  ;;  %v7144_v3 = vadd.f32 %v7128_v46, %v13016_v29  ;;  %v13020_v4 = vmax.f32 %v13019_v11, 0.0 }
 0xdb8   :  { %v7129_v41 = vadd.f32 %v12676_v57, %v7106_v26  ;;  %v7054_v16 = vadd.f32 %v7053_v34, %v7052_v62  ;;  %v7059_v8 = vadd.f32 %v7058_v50, %v7057_v17  ;;  %v8731_v13 = vpop.f32.mrb[128].mxu0  ;;  %v7069_v60 = vadd.f32 %v6973_v31, %v6972_v54 }
 0xdb9   :  { %v7064_v35 = vadd.f32 %v7063_v56, %v7062_v45  ;;  %v6975_v1 = vmul.f32 %v8731_v13, %v12120_v63  ;;  %v6927_v53 = vpop.f32.mrb[129].mxu0  ;;  %v12742_v12 = vsel %vm2023_vm12, %v7197_v0, %v7196_v25  ;;  %v7160_v48 = vmax.f32 %v7144_v3, 0.0  ;;  %v13023_v3 = vld [vmem:[#allocation8_spill] sm:$0xff] }
 0xdba   :  { %v7145_v43 = vadd.f32 %v7129_v41, %v13018_v47  ;;  %v7107_v28 = vmul.f32 %v12671_v7, %v7054_v16  ;;  %v7060_v32 = vrot.slane %v7059_v8, 1  ;;  %v6974_v15 = vmul.f32 %v6927_v53, %v12111_v49 }
 0xdbb   :  { %v7065_v2 = vrot.slane %v7064_v35, 2  ;;  %v7070_v51 = vrot.slane %v7069_v60, 4  ;;  %v13022_v45 = vmax.f32 %v13021_v6, 0.0  ;;  %v13024_v41 = vmax.f32 %v13023_v3, 0.0  ;;  %v7469_v6 = vld [vmem:[%s12799_s4 + $0x28] sm:$0xff] }
 0xdbc   :  { %v7161_v27 = vmax.f32 %v7145_v43, 0.0  ;;  %v7130_v39 = vadd.f32 %v12676_v57, %v7107_v28  ;;  %v7061_v9 = vadd.f32 %v7060_v32, %v7059_v8  ;;  %v7076_v10 = vadd.f32 %v6975_v1, %v6974_v15  ;;  %v8734_v33 = vpop.f32.mrb[130].mxu0  ;;  %v13025_v28 = vld [vmem:[#allocation9_spill] sm:$0xff] }
 0xdbd   :  { %v7066_v18 = vadd.f32 %v7065_v2, %v7064_v35  ;;  %v7071_v40 = vadd.f32 %v7070_v51, %v7069_v60  ;;  %v6977_v52 = vmul.f32 %v8734_v33, %v12120_v63  ;;  %v6937_v55 = vpop.f32.mrb[131].mxu0  ;;  %v13026_v32 = vmax.f32 %v13025_v28, 0.0  ;;  %v7563_v28 = vld [vmem:[%s7683_s7 + $0x28] sm:$0xff] }
 0xdbe   :  { %v7199_v23 = vrot.slane %v7161_v27, 7  ;;  %v7146_v5 = vadd.f32 %v7130_v39, %v13020_v4  ;;  %v7108_v14 = vmul.f32 %v12671_v7, %v7061_v9  ;;  %v7077_v38 = vrot.slane %v7076_v10, 4  ;;  %v13029_v4 = vld [vmem:[#allocation12_spill] sm:$0xff] }
 0xdbf   :  { %v7067_v30 = vrot.slane %v7066_v18, 1  ;;  %v7072_v19 = vrot.slane %v7071_v40, 2  ;;  %v6976_v44 = vmul.f32 %v6937_v55, %v12111_v49 }
 0xdc0   :  { %v7200_v42 = vsel %vm2005_vm6, %v7199_v23, %v7160_v48  ;;  %v7162_v59 = vmax.f32 %v7146_v5, 0.0  ;;  %v7131_v36 = vadd.f32 %v12676_v57, %v7108_v14  ;;  %v7078_v46 = vadd.f32 %v7077_v38, %v7076_v10  ;;  %v13027_v10 = vld [vmem:[#allocation11_spill] sm:$0xff] }
 0xdc1   :  { %v7068_v37 = vadd.f32 %v7067_v30, %v7066_v18  ;;  %v7073_v63 = vadd.f32 %v7072_v19, %v7071_v40  ;;  %v7083_v62 = vadd.f32 %v6977_v52, %v6976_v44  ;;  %v13028_v33 = vmax.f32 %v13027_v10, 0.0  ;;  %v7168_v44 = vld [vmem:[%s7654_s20] sm:$0x3]  ;;  %v7564_v10 = vld [vmem:[%s7683_s7 + $0x30] sm:$0xff] }
 0xdc2   :  { %v7201_v17 = vrot.slane %v7162_v59, 6  ;;  %v7147_v31 = vadd.f32 %v7131_v36, %v13022_v45  ;;  %v7079_v61 = vrot.slane %v7078_v46, 2  ;;  %v13030_v5 = vmax.f32 %v13029_v4, 0.0  ;;  %v7464_v59 = vld [vmem:[%s12799_s4] sm:$0xff]  ;;  %v7465_v36 = vld [vmem:[%s12799_s4 + $0x8] sm:$0xff] }
 0xdc3   :  { %v7109_v58 = vmul.f32 %v12671_v7, %v7068_v37  ;;  %v7074_v25 = vrot.slane %v7073_v63, 1  ;;  %v7084_v26 = vrot.slane %v7083_v62, 4  ;;  %vm7311_vm6 = vcmask 1043456  }
 0xdc4   :  { %v7163_v34 = vmax.f32 %v7147_v31, 0.0  ;;  %v7080_v49 = vadd.f32 %v7079_v61, %v7078_v46  ;;  %v7202_v50 = vsel %vm2008_vm7, %v7201_v17, %v7200_v42  ;;  %v7306_v42 = vld [vmem:[%s7679_s24] sm:$0xf]  ;;  %vm7307_vm7 = vcmask 31744   ;;  %v7466_v46 = vld [vmem:[%s12799_s4 + $0x10] sm:$0xff]  ;;  %v7471_v61 = vld [vmem:[%s12799_s4 + $0x38] sm:$0xff] }
 0xdc5   :  { %v7132_v56 = vadd.f32 %v12676_v57, %v7109_v58  ;;  %v7075_v54 = vadd.f32 %v7074_v25, %v7073_v63  ;;  %v7085_v0 = vadd.f32 %v7084_v26, %v7083_v62  ;;  %v9104_v37 = vpack.c.bf16 %v7465_v36, %v7464_v59  ;;  %v7467_v63 = vld [vmem:[%s12799_s4 + $0x18] sm:$0xff]  ;;  %v7468_v17 = vld [vmem:[%s12799_s4 + $0x20] sm:$0xff]  ;;  %v7470_v31 = vld [vmem:[%s12799_s4 + $0x30] sm:$0xff] }
 0xdc6   :  { %v7203_v21 = vrot.slane %v7163_v34, 5  ;;  %v7081_v29 = vrot.slane %v7080_v49, 1  ;;  %v9107_v62 = vpack.c.bf16 %v7467_v63, %v7466_v46  ;;  %v9110_v45 = vpack.c.bf16 %v7469_v6, %v7468_v17  ;;  %v7472_v25 = vld [vmem:[%s12799_s4 + $0x40] sm:$0xff]  ;;  %v7473_v26 = vld [vmem:[%s12799_s4 + $0x48] sm:$0xff] }
 0xdc7   :  { %v7148_v16 = vadd.f32 %v7132_v56, %v13024_v41  ;;  %v7110_v8 = vmul.f32 %v12671_v7, %v7075_v54  ;;  %v7086_v13 = vrot.slane %v7085_v0, 2  ;;  %v9113_v58 = vpack.c.bf16 %v7471_v61, %v7470_v31 }
 0xdc8   :  { %v7082_v35 = vadd.f32 %v7081_v29, %v7080_v49  ;;  %v7204_v60 = vsel %vm2011_vm8, %v7203_v21, %v7202_v50  ;;  %v9116_v34 = vpack.c.bf16 %v7473_v26, %v7472_v25  ;;  %v7474_v49 = vld [vmem:[%s12799_s4 + $0x50] sm:$0xff]  ;;  %v7475_v50 = vld [vmem:[%s12799_s4 + $0x58] sm:$0xff]  ;;  %v7476_v21 = vld [vmem:[%s12799_s4 + $0x60] sm:$0xff]  ;;  %vm7646_vm8 = vcmask 1024  }
 0xdc9   :  { %v7164_v1 = vmax.f32 %v7148_v16, 0.0  ;;  %v7133_v53 = vadd.f32 %v12676_v57, %v7110_v8  ;;  %v7087_v22 = vadd.f32 %v7086_v13, %v7085_v0  ;;  %v9119_v56 = vpack.c.bf16 %v7475_v50, %v7474_v49  ;;  %v7477_v29 = vld [vmem:[%s12799_s4 + $0x68] sm:$0xff]  ;;  %v7478_v8 = vld [vmem:[%s12799_s4 + $0x70] sm:$0xff]  ;;  %v7479_v13 = vld [vmem:[%s12799_s4 + $0x78] sm:$0xff] }
 0xdca   :  { %v7111_v47 = vmul.f32 %v12671_v7, %v7082_v35  ;;  %v9122_v3 = vpack.c.bf16 %v7477_v29, %v7476_v21  ;;  %v9125_v35 = vpack.c.bf16 %v7479_v13, %v7478_v8 }
 0xdcb   :  { %v7205_v43 = vrot.slane %v7164_v1, 4  ;;  %v7149_v15 = vadd.f32 %v7133_v53, %v13026_v32  ;;  %v7088_v2 = vrot.slane %v7087_v22, 1  ;;  %v7559_v1 = vld [vmem:[%s7683_s7 + $0x8] sm:$0xff] }
 0xdcc   :  { %v7134_v51 = vadd.f32 %v12676_v57, %v7111_v47 }
 0xdcd   :  { %v7165_v27 = vmax.f32 %v7149_v15, 0.0  ;;  %v7089_v39 = vadd.f32 %v7088_v2, %v7087_v22  ;;  %v7206_v9 = vsel %vm2014_vm9, %v7205_v43, %v7204_v60  ;;  %v7558_v60 = vld [vmem:[%s7683_s7] sm:$0xff]  ;;  %v7561_v22 = vld [vmem:[%s7683_s7 + $0x18] sm:$0xff] }
 0xdce   :  { %v7150_v48 = vadd.f32 %v7134_v51, %v13028_v33  ;;  %v9128_v53 = vpack.c.bf16 %v7559_v1, %v7558_v60  ;;  %v7562_v43 = vld [vmem:[%s7683_s7 + $0x20] sm:$0xff]  ;;  %v7565_v33 = vld [vmem:[%s7683_s7 + $0x38] sm:$0xff] }
 0xdcf   :  { %v7207_v18 = vrot.slane %v7165_v27, 3  ;;  %v7112_v40 = vmul.f32 %v12671_v7, %v7089_v39  ;;  %v9134_v32 = vpack.c.bf16 %v7563_v28, %v7562_v43  ;;  %v7831_v2 = vld [vmem:[%s7680_s11] ss:$0 sm:$0xff] }
 0xdd0   :  { %v7166_v52 = vmax.f32 %v7150_v48, 0.0  ;;  %v9137_v48 = vpack.c.bf16 %v7565_v33, %v7564_v10 }
 0xdd1   :  { %v7135_v55 = vadd.f32 %v12676_v57, %v7112_v40  ;;  %v7208_v23 = vsel %vm2017_vm10, %v7207_v18, %v7206_v9  ;;  %v7832_v18 = vld [vmem:[%s7682_s19] ss:$0 sm:$0xff] }
 0xdd2   :  { %v7209_v11 = vrot.slane %v7166_v52, 2 }
 0xdd3   :  { %v7151_v14 = vadd.f32 %v7135_v55, %v13030_v5 }
 0xdd4   :  { %v7210_v38 = vsel %vm2020_vm11, %v7209_v11, %v7208_v23 }
 0xdd5   :  { %v7167_v30 = vmax.f32 %v7151_v14, 0.0 }
 0xdd7   :  { %v7211_v7 = vrot.slane %v7167_v30, 1 }
 0xdd9   :  { %v7212_v57 = vsel %vm2023_vm12, %v7211_v7, %v7210_v38 }
 0xdda   :  { %v9077_v19 = vpack.c.bf16 %v7212_v57, %v12742_v12  ;;  %v7305_v12 = vld [vmem:[%s7655_s28] sm:$0x3] }
 0xddc   :  { %9078 = vmatpush3.bf16.msra.mxu0 %v9077_v19 }
 0xddd   :  { %8742 = vmatprep.subr.mxu0 %v12937_v24 }
 0xddf   :  { %8740 = vmatmul.mubr.msk.f32.vlgmr.msra.gmra.mrb[132].mxu0 %vm7215_vm5, %v7168_v44 }
 0xde0   :  { %8743 = vmatpush3.msk.msra.mxu0 %vm7311_vm6, %v7306_v42  ;;  %8744 = vmatprep.mubr.msk.f32.mxu0 %vm9685_vm3, %v12937_v24 }
 0xde1   :  { %9103 = vmatprep.subr.bf16.mxu0 %v9684_v20 }
 0xde3   :  { %8745 = vmatmul.mubr.msk.f32.vlgmr.msra.gmra.mrb[134].mxu0 %vm7307_vm7, %v7305_v12 }
 0xde4   :  { %8814 = vmatprep.mubr.msk.f32.mxu0 %vm9685_vm3, %v12937_v24  ;;  %9105 = vmatpush3.bf16.msra.mxu0 %v9104_v37 }
 0xde5   :  { %9106 = vmatprep.subr.bf16.mxu0 %v9684_v20 }
 0xde8   :  { %9108 = vmatpush3.bf16.msra.mxu0 %v9107_v62 }
 0xde9   :  { %9109 = vmatprep.subr.bf16.mxu0 %v9684_v20 }
 0xdec   :  { %9111 = vmatpush3.bf16.msra.mxu0 %v9110_v45 }
 0xded   :  { %9112 = vmatprep.subr.bf16.mxu0 %v9684_v20 }
 0xdf0   :  { %9114 = vmatpush3.bf16.msra.mxu0 %v9113_v58 }
 0xdf1   :  { %9115 = vmatprep.subr.bf16.mxu0 %v9684_v20 }
 0xdf4   :  { %9117 = vmatpush3.bf16.msra.mxu0 %v9116_v34 }
 0xdf5   :  { %9118 = vmatprep.subr.bf16.mxu0 %v9684_v20 }
 0xdf8   :  { %9120 = vmatpush3.bf16.msra.mxu0 %v9119_v56 }
 0xdf9   :  { %9121 = vmatprep.subr.bf16.mxu0 %v9684_v20 }
 0xdfc   :  { %9123 = vmatpush3.bf16.msra.mxu0 %v9122_v3 }
 0xdfd   :  { %9124 = vmatprep.subr.bf16.mxu0 %v9684_v20 }
 0xe00   :  { %9126 = vmatpush3.bf16.msra.mxu0 %v9125_v35 }
 0xeb2   :  { %v7285_v54 = vpop.f32.mrb[132].mxu0 }
 0xeb3   :  { %v8741_v0 = vpop.f32.mrb[133].mxu0  ;;  %8780 = vmatmul.mubr.f32.vlgmr.msra.gmra.mrb[142].mxu1 %v7285_v54 }
 0xeb4   :  { %8833 = vmatprep.mubr.msk.f32.mxu1 %vm9685_vm3, %v12937_v24  ;;  %v7560_v24 = vld [vmem:[%s7683_s7 + $0x10] sm:$0xff]  ;;  %9129 = vmatpush3.bf16.msra.mxu1 %v9128_v53 }
 0xeb5   :  { %v9131_v47 = vpack.c.bf16 %v7561_v22, %v7560_v24  ;;  %9130 = vmatprep.subr.bf16.mxu1 %v9684_v20 }
 0xeb6   :  { %v7381_v41 = vpop.f32.mrb[134].mxu0 }
 0xeb7   :  { %v8746_v16 = vpop.f32.mrb[135].mxu0 }
 0xeb8   :  { %9132 = vmatpush3.bf16.msra.mxu1 %v9131_v47 }
 0xeb9   :  { %9133 = vmatprep.subr.bf16.mxu1 %v9684_v20 }
 0xebc   :  { %9135 = vmatpush3.bf16.msra.mxu1 %v9134_v32 }
 0xebd   :  { %9136 = vmatprep.subr.bf16.mxu1 %v9684_v20  ;;  %v74_v20 = vstv %s7684_s15 }
 0xebe   :  { %75 = vst [vmem:[#allocation2] sm:$0x1] %v74_v20 }
 0xec0   :  { %9138 = vmatpush3.bf16.msra.mxu1 %v9137_v48 }
 0xec5   :  { %v7833_v11 = vld [vmem:[#allocation2] ss:$0 sm:$0xff] }
 0xf86   :  { %v7451_v15 = vpop.f32.mrb[142].mxu1 }
 0xf87   :  { %v7452_v51 = vadd.f32 %v7451_v15, %v7381_v41  ;;  %v8781_v27 = vpop.f32.mrb[143].mxu1 }
 0xf89   :  { %v7462_v39 = vadd.f32 %v7831_v2, %v7452_v51 }
 0xf8b   :  { %v7463_v9 = vmax.f32 %v7462_v39, 0.0 }
 0xf8d   :  { %8815 = vmatmul.mubr.f32.vlgmr.msra.gmra.mrb[136].mxu0 %v7463_v9 }
0x1060   :  { %v7553_v40 = vpop.f32.mrb[136].mxu0 }
0x1061   :  { %v7554_v52 = vadd.f32 %v7832_v18, %v7553_v40  ;;  %v8816_v55 = vpop.f32.mrb[137].mxu0 }
0x1063   :  { %v7557_v23 = vmax.f32 %v7554_v52, 0.0 }
0x1065   :  { %8834 = vmatmul.mubr.msk.f32.vlgmr.msra.gmra.mrb[144].mxu1 %vm303_vm2, %v7557_v23 }
0x1138   :  { %v7642_v4 = vpop.f32.mrb[144].mxu1 }
0x1139   :  { %v7643_v5 = vadd.f32 %v7833_v11, %v7642_v4  ;;  %v8835_v14 = vpop.f32.mrb[145].mxu1 }
0x113b   :  { %7647 = vst.msk [vmem:[%s7685_s22] sm:$0x3] %vm7646_vm8, %v7643_v5 }

</bundles_post_ra>
